<compile_context>
chip_gen: v7x
topology: tpu7x:2x2x1
jax: 0.10.0
libtpu: 0.0.40
codegen_flags: <defaults>
</compile_context>

<pallas_src>
import functools
import math

import jax
import jax.numpy as jnp
from jax.experimental import pallas as pl
from jax.experimental.pallas import tpu as pltpu


# ----------------------------------------------------------------------------
# Helpers
# ----------------------------------------------------------------------------
def _round_up(x, m):
    return ((x + m - 1) // m) * m


def _pick_tile(dim):
    """(padded_dim, tile) for an M/N axis.

    Full-dim block when small (no pad, no post-slice); otherwise the largest
    aligned tile that divides the dim, preferring >=2 blocks for mid-sized
    dims so a parallel grid axis can be sharded across v7x's two TensorCores.
    """
    if dim <= 256:
        return dim, dim
    if dim <= 1024:
        for t in (256, 128):
            if dim % t == 0:
                return dim, t
        return _round_up(dim, 128), 128
    for t in (512, 256, 128):
        if dim % t == 0:
            return dim, t
    return _round_up(dim, 512), 512


# ----------------------------------------------------------------------------
# Pallas kernel 1: fused tiled matmul + (optional) bias + activation
# ----------------------------------------------------------------------------
def _mm_bias_act_kernel(*refs, act, has_bias):
    """o = act(x @ w [+ b]); reduction over grid axis 2; bias folded into init."""
    if has_bias:
        x_ref, w_ref, b_ref, o_ref, acc_ref = refs
    else:
        x_ref, w_ref, o_ref, acc_ref = refs
        b_ref = None

    @pl.when(pl.program_id(2) == 0)
    def _():
        if b_ref is None:
            acc_ref[...] = jnp.zeros_like(acc_ref)
        else:
            acc_ref[...] = jnp.broadcast_to(b_ref[...], acc_ref.shape)

    acc_ref[...] += jnp.dot(x_ref[...], w_ref[...],
                            preferred_element_type=jnp.float32)

    @pl.when(pl.program_id(2) == pl.num_programs(2) - 1)
    def _():
        r = acc_ref[...]
        if act == "relu":
            r = jnp.maximum(r, 0.0)
        elif act == "sigmoid":
            r = jax.nn.sigmoid(r)
        o_ref[...] = r.astype(o_ref.dtype)


def matmul_bias_act(x, w, b=None, act="none", bias_axis="row",
                    out_dtype=jnp.float32):
    """y = act(x @ w [+ b]) with bf16 MXU operands and f32 accumulation.

    bias_axis="row": b has length N (broadcast over rows).
    bias_axis="col": b has length M (broadcast over columns).
    """
    M, K = x.shape
    K2, N = w.shape
    assert K == K2

    # Contraction dim: full-dim single step when small (full-dim blocks are
    # legal for any K, so no zero-pad copy of the big cols tensor); 512-chunks
    # otherwise so double-buffered tiles stay well under v5e's 16 MiB default
    # scoped VMEM.
    if K <= 2048:
        Kp, tk = K, K
    else:
        Kp, tk = _round_up(K, 512), 512
    Mp, tm = _pick_tile(M)
    Np, tn = _pick_tile(N)

    # Cast to bf16 BEFORE any padding (halves traffic of every pad copy).
    xb = x.astype(jnp.bfloat16)
    wb = w.astype(jnp.bfloat16)
    if (Mp, Kp) != (M, K):
        xb = jnp.pad(xb, ((0, Mp - M), (0, Kp - K)))
    if (Kp, Np) != (K, N):
        wb = jnp.pad(wb, ((0, Kp - K), (0, Np - N)))

    has_bias = b is not None
    operands = [xb, wb]
    in_specs = [pl.BlockSpec((tm, tk), lambda i, j, k: (i, k)),
                pl.BlockSpec((tk, tn), lambda i, j, k: (k, j))]
    if has_bias:
        if bias_axis == "row":
            bp = b.astype(jnp.float32).reshape(1, N)
            if Np != N:
                bp = jnp.pad(bp, ((0, 0), (0, Np - N)))
            in_specs.append(pl.BlockSpec((1, tn), lambda i, j, k: (0, j)))
        else:
            bp = b.astype(jnp.float32).reshape(M, 1)
            if Mp != M:
                bp = jnp.pad(bp, ((0, Mp - M), (0, 0)))
            in_specs.append(pl.BlockSpec((tm, 1), lambda i, j, k: (i, 0)))
        operands.append(bp)

    out = pl.pallas_call(
        functools.partial(_mm_bias_act_kernel, act=act, has_bias=has_bias),
        out_shape=jax.ShapeDtypeStruct((Mp, Np), out_dtype),
        grid_spec=pltpu.PrefetchScalarGridSpec(
            num_scalar_prefetch=0,
            grid=(Mp // tm, Np // tn, Kp // tk),
            in_specs=in_specs,
            out_specs=pl.BlockSpec((tm, tn), lambda i, j, k: (i, j)),
            scratch_shapes=[pltpu.VMEM((tm, tn), jnp.float32)],
        ),
        compiler_params=pltpu.CompilerParams(
            dimension_semantics=("parallel", "parallel", "arbitrary")),
    )(*operands)

    if (Mp, Np) != (M, N):
        out = out[:M, :N]
    return out


# ----------------------------------------------------------------------------
# Pallas kernel 2: fused latent head (mu+logvar matmul, reparameterize, decode)
# ----------------------------------------------------------------------------
def _latent_kernel(flat_ref, wmv_ref, bmv_ref, wdec_ref, bdec_ref, eps_ref,
                   mu_ref, logvar_ref, dec_ref):
    dimp = mu_ref.shape[-1]
    flat = flat_ref[...]                                      # (B, Fp) bf16
    # mu and log_var share the LHS: one MXU pass over [wmu | wvar].
    mv = (jnp.dot(flat, wmv_ref[...], preferred_element_type=jnp.float32)
          + bmv_ref[...])
    mu = mv[:, :dimp]
    logvar = mv[:, dimp:]
    std = jnp.exp(0.5 * logvar)                               # f32 (EUP)
    z = eps_ref[...] * std + mu                               # f32
    # Padded lanes (dim..dimp): eps=0 and wdec rows are zero -> no leak.
    dec = (jnp.dot(z.astype(wdec_ref.dtype), wdec_ref[...],
                   preferred_element_type=jnp.float32) + bdec_ref[...])
    mu_ref[...] = mu
    logvar_ref[...] = logvar
    dec_ref[...] = dec.astype(dec_ref.dtype)


def latent_head(flat, wmv, bmv, wdec, bdec, eps, dim):
    """Returns (mu, log_var, decode_net(reparameterize(mu, log_var)))."""
    B, F = flat.shape
    Fp = wmv.shape[0]
    dimp = wdec.shape[0]

    flat_p = flat.astype(jnp.bfloat16)
    if Fp != F:
        flat_p = jnp.pad(flat_p, ((0, 0), (0, Fp - F)))
    eps_p = eps.astype(jnp.float32)
    if dimp != dim:
        eps_p = jnp.pad(eps_p, ((0, 0), (0, dimp - dim)))

    mu_p, logvar_p, dec_p = pl.pallas_call(
        _latent_kernel,
        out_shape=(jax.ShapeDtypeStruct((B, dimp), jnp.float32),
                   jax.ShapeDtypeStruct((B, dimp), jnp.float32),
                   jax.ShapeDtypeStruct((B, Fp), jnp.bfloat16)),
    )(flat_p, wmv, bmv, wdec, bdec, eps_p)
    return mu_p[:, :dim], logvar_p[:, :dim], dec_p[:, :F]


# ----------------------------------------------------------------------------
# Conv3d (encoder): CNDHW im2col (no relayouts) + Pallas matmul
# ----------------------------------------------------------------------------
def im2col_cndhw(x, ksize, stride, padding):
    """x: (C, N, D, H, W) -> cols of shape (C*k^3, N*Do*Ho*Wo).

    K rows ordered (C, kd, kh, kw) to match weight.reshape(Cout, C*k^3);
    columns ordered (N, Do, Ho, Wo). No transposes of the amplified tensor.
    """
    C, N, D, H, W = x.shape
    xp = jnp.pad(x, ((0, 0), (0, 0), (padding, padding),
                     (padding, padding), (padding, padding)))
    Do = (D + 2 * padding - ksize) // stride + 1
    Ho = (H + 2 * padding - ksize) // stride + 1
    Wo = (W + 2 * padding - ksize) // stride + 1
    taps = []
    for kd in range(ksize):
        for kh in range(ksize):
            for kw in range(ksize):
                taps.append(xp[:, :,
                               kd:kd + Do * stride:stride,
                               kh:kh + Ho * stride:stride,
                               kw:kw + Wo * stride:stride])
    cols = jnp.stack(taps, axis=1)                 # (C, k^3, N, Do, Ho, Wo)
    return cols.reshape(C * ksize ** 3, N * Do * Ho * Wo), (N, Do, Ho, Wo)


def conv3d_cndhw(x, w2, bias, stride, padding, ksize, act):
    """x: (Cin, N, D, H, W) bf16; w2: (Cout, Cin*k^3) bf16 (pre-reshaped).

    Returns (Cout, N, Do, Ho, Wo) in bf16 (lane-dense output, CNDHW layout).
    """
    Cout = w2.shape[0]
    colsT, (N, Do, Ho, Wo) = im2col_cndhw(x, ksize, stride, padding)
    yT = matmul_bias_act(w2, colsT, bias, act=act, bias_axis="col",
                         out_dtype=jnp.bfloat16)
    return yT.reshape(Cout, N, Do, Ho, Wo)


# ----------------------------------------------------------------------------
# ConvTranspose3d (decoder): lane-dense matmul + parity-group col2im
# ----------------------------------------------------------------------------
def _col2im_s2k4(ycols, padding):
    """col2im for stride=2, k=4 via 8 non-overlapping parity groups.

    One interleave/write pass over the output buffer instead of 64
    read-modify-write strided scatters.
    ycols: (Cout, 4, 4, 4, N, D, H, W) -> (Cout, N, oD, oH, oW) f32.
    """
    Cout, _, _, _, N, D, H, W = ycols.shape
    y = ycols.astype(jnp.float32)
    groups = []
    for rd in (0, 1):
        for rh in (0, 1):
            for rw in (0, 1):
                g = None
                for ad in (0, 1):
                    for ah in (0, 1):
                        for aw in (0, 1):
                            tap = y[:, rd + 2 * ad, rh + 2 * ah, rw + 2 * aw]
                            pads = ((0, 0), (0, 0),
                                    (1, 0) if ad else (0, 1),
                                    (1, 0) if ah else (0, 1),
                                    (1, 0) if aw else (0, 1))
                            t = jnp.pad(tap, pads)
                            g = t if g is None else g + t
                groups.append(g)                  # (Cout, N, D+1, H+1, W+1)
    stk = jnp.stack(groups, axis=-1)              # (..., 8) order (rd, rh, rw)
    stk = stk.reshape(Cout, N, D + 1, H + 1, W + 1, 2, 2, 2)
    buf = stk.transpose(0, 1, 2, 5, 3, 6, 4, 7)
    buf = buf.reshape(Cout, N, 2 * D + 2, 2 * H + 2, 2 * W + 2)
    oD = 2 * D + 2 - 2 * padding
    oH = 2 * H + 2 - 2 * padding
    oW = 2 * W + 2 - 2 * padding
    return buf[:, :, padding:padding + oD, padding:padding + oH,
               padding:padding + oW]


def conv_transpose3d_cndhw(x, w2t, bias, stride, padding, ksize, act,
                           out_dtype=jnp.bfloat16):
    """x: (Cin, N, D, H, W); w2t: (Cout*k^3, Cin) rows ordered (Cout,kd,kh,kw).

    Lane-dense orientation: ycols^T = w2t @ x(Cin, N*D*H*W); the large spatial
    dim sits on the 128-lane side for every layer (incl. the last one).
    Returns (Cout, N, oD, oH, oW).
    """
    assert stride == 2 and ksize == 4
    Cin, N, D, H, W = x.shape
    Cout = w2t.shape[0] // ksize ** 3
    xf = x.reshape(Cin, N * D * H * W)
    ycols = matmul_bias_act(w2t, xf, None, act="none", out_dtype=jnp.bfloat16)
    ycols = ycols.reshape(Cout, ksize, ksize, ksize, N, D, H, W)
    # TODO(synk): fuse col2im + bias + activation into a small Pallas kernel.
    out = _col2im_s2k4(ycols, padding)            # (Cout, N, oD, oH, oW) f32
    out = out + bias.reshape(-1, 1, 1, 1, 1)
    if act == "relu":
        out = jnp.maximum(out, 0.0)
    elif act == "sigmoid":
        out = jax.nn.sigmoid(out)
    return out.astype(out_dtype)


# ----------------------------------------------------------------------------
# Parameters
# ----------------------------------------------------------------------------
def init_params(key, aspect_ratio, dim):
    dbr = math.prod(aspect_ratio)
    flat = 64 * dbr
    specs = {
        "enc0_w": (16, 1, 5, 5, 5), "enc0_b": (16,),
        "enc1_w": (32, 16, 5, 5, 5), "enc1_b": (32,),
        "enc2_w": (64, 32, 5, 5, 5), "enc2_b": (64,),
        "enc3_w": (64, 64, 5, 5, 5), "enc3_b": (64,),
        # ConvTranspose3d weight layout: (Cin, Cout, k, k, k)
        "dec0_w": (64, 64, 4, 4, 4), "dec0_b": (64,),
        "dec1_w": (64, 32, 4, 4, 4), "dec1_b": (32,),
        "dec2_w": (32, 16, 4, 4, 4), "dec2_b": (16,),
        "dec3_w": (16, 1, 4, 4, 4), "dec3_b": (1,),
        "mu_w": (dim, flat), "mu_b": (dim,),
        "var_w": (dim, flat), "var_b": (dim,),
        "dec_lin_w": (flat, dim), "dec_lin_b": (flat,),
    }
    params = {}
    keys = jax.random.split(key, len(specs))
    for (name, shape), k in zip(specs.items(), keys):
        if name.endswith("_b"):
            params[name] = jnp.zeros(shape, jnp.float32)
        else:
            fan_in = math.prod(shape[1:])
            params[name] = (jax.random.normal(k, shape, jnp.float32)
                            * (1.0 / math.sqrt(fan_in)))
    return params


def prepare_params(params, aspect_ratio, dim):
    """One-time weight prep (hoisted out of the per-step forward):
    reshape/transpose conv weights to matmul form and pad/cast the latent-head
    weights, everything already in bf16."""
    p = {}
    for i in range(4):
        w = params[f"enc{i}_w"]                            # (Cout, Cin, 5,5,5)
        p[f"enc{i}_w2"] = w.reshape(w.shape[0], -1).astype(jnp.bfloat16)
        p[f"enc{i}_b"] = params[f"enc{i}_b"].astype(jnp.float32)
    for i in range(4):
        w = params[f"dec{i}_w"]                            # (Cin, Cout, 4,4,4)
        cin, cout, k = w.shape[0], w.shape[1], w.shape[2]
        p[f"dec{i}_w2t"] = (w.transpose(1, 2, 3, 4, 0)
                            .reshape(cout * k ** 3, cin).astype(jnp.bfloat16))
        p[f"dec{i}_b"] = params[f"dec{i}_b"].astype(jnp.float32)

    F = 64 * math.prod(aspect_ratio)
    Fp, dimp = _round_up(F, 128), _round_up(dim, 128)
    wmu = jnp.pad(params["mu_w"].T, ((0, Fp - F), (0, dimp - dim)))
    wvar = jnp.pad(params["var_w"].T, ((0, Fp - F), (0, dimp - dim)))
    p["lat_wmv"] = jnp.concatenate([wmu, wvar], axis=1).astype(jnp.bfloat16)
    bmu = jnp.pad(params["mu_b"], (0, dimp - dim))
    bvar = jnp.pad(params["var_b"], (0, dimp - dim))
    p["lat_bmv"] = (jnp.concatenate([bmu, bvar])
                    .reshape(1, 2 * dimp).astype(jnp.float32))
    p["lat_wdec"] = jnp.pad(params["dec_lin_w"].T,
                            ((0, dimp - dim), (0, Fp - F))).astype(jnp.bfloat16)
    p["lat_bdec"] = (jnp.pad(params["dec_lin_b"], (0, Fp - F))
                     .reshape(1, Fp).astype(jnp.float32))
    return p


# ----------------------------------------------------------------------------
# Forward
# ----------------------------------------------------------------------------
def vae3d_forward(prep, x, eps, aspect_ratio, dim):
    """x: (B, H, W, Dz) — same convention as the PyTorch module input."""
    B = x.shape[0]
    ar = aspect_ratio
    F = 64 * math.prod(ar)

    # x.permute(0,3,1,2); x[:, None] -> NCDHW (B,1,Dz,H,W); we keep CNDHW.
    h = jnp.transpose(x, (0, 3, 1, 2))[None].astype(jnp.bfloat16)  # (1,B,Dz,H,W)

    # Encoder: 4 x (Conv3d k=5 s=2 p=2 + ReLU), activations stay CNDHW bf16.
    for i in range(4):
        h = conv3d_cndhw(h, prep[f"enc{i}_w2"], prep[f"enc{i}_b"],
                         stride=2, padding=2, ksize=5, act="relu")

    # Flatten in PyTorch NCDHW order (tiny tensor).
    flat = h.transpose(1, 0, 2, 3, 4).reshape(B, F)

    # Fused latent head: mu, log_var, reparameterize, decode_net (one kernel).
    mu, logvar, dec = latent_head(flat, prep["lat_wmv"], prep["lat_bmv"],
                                  prep["lat_wdec"], prep["lat_bdec"], eps, dim)

    # decoded.view(-1, 64, ar[-1], ar[0], ar[1]) -> CNDHW (64, B, D, H, W).
    h = dec.reshape(B, 64, ar[-1], ar[0], ar[1]).transpose(1, 0, 2, 3, 4)

    # Decoder: 3 x (ConvT k=4 s=2 p=1 + ReLU) + (ConvT + Sigmoid).
    acts = ("relu", "relu", "relu", "sigmoid")
    for i in range(4):
        h = conv_transpose3d_cndhw(
            h, prep[f"dec{i}_w2t"], prep[f"dec{i}_b"],
            stride=2, padding=1, ksize=4, act=acts[i],
            out_dtype=jnp.float32 if i == 3 else jnp.bfloat16)

    out = jnp.transpose(h[0], (0, 2, 3, 1))      # (B, Dz, H, W) -> (B, H, W, Dz)
    return out, mu, logvar


# ----------------------------------------------------------------------------
# Pure-XLA f32 reference (for a loose numerical check; bf16 MXU path differs)
# ----------------------------------------------------------------------------
def vae3d_reference(params, x, eps, aspect_ratio, dim):
    dn = ("NCDHW", "OIDHW", "NCDHW")
    h = jnp.transpose(x, (0, 3, 1, 2))[:, None]
    for i in range(4):
        h = jax.lax.conv_general_dilated(
            h, params[f"enc{i}_w"], window_strides=(2, 2, 2),
            padding=[(2, 2)] * 3, dimension_numbers=dn)
        h = jnp.maximum(h + params[f"enc{i}_b"].reshape(1, -1, 1, 1, 1), 0.0)
    B = h.shape[0]
    flat = h.reshape(B, -1)
    mu = flat @ params["mu_w"].T + params["mu_b"]
    logvar = flat @ params["var_w"].T + params["var_b"]
    z = eps * jnp.exp(0.5 * logvar) + mu
    dec = z @ params["dec_lin_w"].T + params["dec_lin_b"]
    ar = aspect_ratio
    h = dec.reshape(B, 64, ar[-1], ar[0], ar[1])
    for i in range(4):
        w = params[f"dec{i}_w"]
        wk = jnp.flip(w, axis=(2, 3, 4)).transpose(1, 0, 2, 3, 4)
        h = jax.lax.conv_general_dilated(
            h, wk, window_strides=(1, 1, 1), padding=[(2, 2)] * 3,
            lhs_dilation=(2, 2, 2), dimension_numbers=dn)
        h = h + params[f"dec{i}_b"].reshape(1, -1, 1, 1, 1)
        h = jnp.maximum(h, 0.0) if i < 3 else jax.nn.sigmoid(h)
    out = jnp.transpose(jnp.squeeze(h, 1), (0, 2, 3, 1))
    return out, mu, logvar


# ----------------------------------------------------------------------------
# Main
# ----------------------------------------------------------------------------
if __name__ == "__main__":
    # Small config consistent with the module: aspect_ratio is the
    # post-encoder (H/16, W/16, Dz/16); dim is the latent size.
    aspect_ratio = [2, 2, 1]
    dim = 32
    B = 2
    H = aspect_ratio[0] * 16   # 32
    W = aspect_ratio[1] * 16   # 32
    Dz = aspect_ratio[2] * 16  # 16

    key = jax.random.PRNGKey(0)
    kx, keps, kparam = jax.random.split(key, 3)
    x = jax.random.normal(kx, (B, H, W, Dz), jnp.float32)
    eps = jax.random.normal(keps, (B, dim), jnp.float32)   # reparam noise
    params = init_params(kparam, aspect_ratio, dim)

    prep = prepare_params(params, aspect_ratio, dim)        # one-time prep
    fwd = jax.jit(lambda pr, xin, e: vae3d_forward(pr, xin, e, aspect_ratio, dim))
    decoded, mu, logvar = fwd(prep, x, eps)
    jax.block_until_ready((decoded, mu, logvar))

    assert decoded.shape == (B, H, W, Dz), decoded.shape
    assert mu.shape == (B, dim) and logvar.shape == (B, dim)
    assert bool(jnp.all(jnp.isfinite(decoded)))
    assert bool(jnp.all(decoded >= 0.0)) and bool(jnp.all(decoded <= 1.0))

    # Loose numerical check against the f32 XLA reference (kernel path uses
    # bf16 MXU operands with f32 accumulation).
    ref_dec, ref_mu, ref_lv = jax.jit(
        lambda p, xin, e: vae3d_reference(p, xin, e, aspect_ratio, dim)
    )(params, x, eps)
    jax.block_until_ready((ref_dec, ref_mu, ref_lv))

    def _close(a, b, tol):
        return bool(jnp.max(jnp.abs(a - b)) <= tol * (1.0 + jnp.max(jnp.abs(b))))

    assert _close(decoded, ref_dec, 0.03)
    assert _close(mu, ref_mu, 0.03)
    assert _close(logvar, ref_lv, 0.03)

    print("KERNEL_OK")
</pallas_src>

<mosaic_0001>
module attributes {stable_mosaic.version = 11 : i64} {
  func.func @_mm_bias_act_kernel(%arg0: i32, %arg1: i32, %arg2: i32, %arg3: memref<16x125xbf16, #tpu.memory_space<vmem>>, %arg4: memref<125x512xbf16, #tpu.memory_space<vmem>>, %arg5: memref<16x1xf32, #tpu.memory_space<vmem>>, %arg6: memref<16x512xbf16, #tpu.memory_space<vmem>>, %arg7: memref<16x512xf32, #tpu.memory_space<vmem>>) attributes {dimension_semantics = [#tpu.dimension_semantics<parallel>, #tpu.dimension_semantics<parallel>, #tpu.dimension_semantics<arbitrary>], iteration_bounds = array<i64: 1, 8, 1>, scalar_prefetch = 0 : i64, scratch_operands = 1 : i64, tpu.core_type = #tpu.core_type<tc>, window_params = [{transform_indices = @transform_0, window_bounds = array<i64: 16, 125>}, {transform_indices = @transform_1, window_bounds = array<i64: 125, 512>}, {transform_indices = @transform_2, window_bounds = array<i64: 16, 1>}, {transform_indices = @transform_3, window_bounds = array<i64: 16, 512>}]} {
    %c0_i32 = arith.constant 0 : i32
    %0 = arith.cmpi eq, %arg2, %c0_i32 : i32
    %1 = arith.extui %0 : i1 to i32
    %c0_i32_0 = arith.constant 0 : i32
    %2 = arith.cmpi ne, %1, %c0_i32_0 : i32
    scf.if %2 {
      %c0_10 = arith.constant 0 : index
      %c0_11 = arith.constant 0 : index
      %12 = vector.load %arg5[%c0_10, %c0_11] : memref<16x1xf32, #tpu.memory_space<vmem>>, vector<16x1xf32>
      %13 = vector.shape_cast %12 : vector<16x1xf32> to vector<16x1xf32>
      %14 = vector.broadcast %13 : vector<16x1xf32> to vector<16x512xf32>
      %c0_12 = arith.constant 0 : index
      %c0_13 = arith.constant 0 : index
      %15 = vector.load %arg7[%c0_12, %c0_13] : memref<16x512xf32, #tpu.memory_space<vmem>>, vector<16x512xf32>
      tpu.vector_store %arg7[%c0_12, %c0_13], %14 {strides = array<i32>} : memref<16x512xf32, #tpu.memory_space<vmem>>, vector<16x512xf32>,
    } else {
    }
    %c0 = arith.constant 0 : index
    %c0_1 = arith.constant 0 : index
    %3 = vector.load %arg7[%c0, %c0_1] : memref<16x512xf32, #tpu.memory_space<vmem>>, vector<16x512xf32>
    %c0_2 = arith.constant 0 : index
    %c0_3 = arith.constant 0 : index
    %4 = vector.load %arg3[%c0_2, %c0_3] : memref<16x125xbf16, #tpu.memory_space<vmem>>, vector<16x125xbf16>
    %c0_4 = arith.constant 0 : index
    %c0_5 = arith.constant 0 : index
    %5 = vector.load %arg4[%c0_4, %c0_5] : memref<125x512xbf16, #tpu.memory_space<vmem>>, vector<125x512xbf16>
    %cst = arith.constant dense<0.000000e+00> : vector<16x512xf32>
    %6 = tpu.matmul %4, %5, %cst {dimension_numbers = #tpu.dot_dimension_numbers<[1], [0], [0], [1], [0, 0, 1, 1], [], []>} : vector<16x125xbf16>, vector<125x512xbf16>, vector<16x512xf32> -> vector<16x512xf32>
    %7 = arith.addf %3, %6 : vector<16x512xf32>
    %c0_6 = arith.constant 0 : index
    %c0_7 = arith.constant 0 : index
    %8 = vector.load %arg7[%c0_6, %c0_7] : memref<16x512xf32, #tpu.memory_space<vmem>>, vector<16x512xf32>
    tpu.vector_store %arg7[%c0_6, %c0_7], %7 {strides = array<i32>} : memref<16x512xf32, #tpu.memory_space<vmem>>, vector<16x512xf32>,
    %c0_i32_8 = arith.constant 0 : i32
    %9 = arith.cmpi eq, %arg2, %c0_i32_8 : i32
    %10 = arith.extui %9 : i1 to i32
    %c0_i32_9 = arith.constant 0 : i32
    %11 = arith.cmpi ne, %10, %c0_i32_9 : i32
    scf.if %11 {
      %c0_10 = arith.constant 0 : index
      %c0_11 = arith.constant 0 : index
      %12 = vector.load %arg7[%c0_10, %c0_11] : memref<16x512xf32, #tpu.memory_space<vmem>>, vector<16x512xf32>
      %cst_12 = arith.constant 0.000000e+00 : f32
      %13 = vector.broadcast %cst_12 : f32 to vector<16x512xf32>
      %14 = arith.maximumf %12, %13 : vector<16x512xf32>
      %15 = arith.truncf %14 : vector<16x512xf32> to vector<16x512xbf16>
      %c0_13 = arith.constant 0 : index
      %c0_14 = arith.constant 0 : index
      %16 = vector.load %arg6[%c0_13, %c0_14] : memref<16x512xbf16, #tpu.memory_space<vmem>>, vector<16x512xbf16>
      tpu.vector_store %arg6[%c0_13, %c0_14], %15 {strides = array<i32>} : memref<16x512xbf16, #tpu.memory_space<vmem>>, vector<16x512xbf16>,
    } else {
    }
    return
  }
  func.func @transform_0(%arg0: i32, %arg1: i32, %arg2: i32) -> (i32, i32) {
    %c0_i32 = arith.constant 0 : i32
    return %arg0, %arg2 : i32, i32
  }
  func.func @transform_1(%arg0: i32, %arg1: i32, %arg2: i32) -> (i32, i32) {
    %c0_i32 = arith.constant 0 : i32
    return %arg2, %arg1 : i32, i32
  }
  func.func @transform_2(%arg0: i32, %arg1: i32, %arg2: i32) -> (i32, i32) {
    %c0_i32 = arith.constant 0 : i32
    %c0_i32_0 = arith.constant 0 : i32
    return %arg0, %c0_i32 : i32, i32
  }
  func.func @transform_3(%arg0: i32, %arg1: i32, %arg2: i32) -> (i32, i32) {
    %c0_i32 = arith.constant 0 : i32
    return %arg0, %arg1 : i32, i32
  }
}

module attributes {stable_mosaic.version = 11 : i64} {
  func.func @_mm_bias_act_kernel(%arg0: i32, %arg1: i32, %arg2: i32, %arg3: memref<32x2000xbf16, #tpu.memory_space<vmem>>, %arg4: memref<2000x256xbf16, #tpu.memory_space<vmem>>, %arg5: memref<32x1xf32, #tpu.memory_space<vmem>>, %arg6: memref<32x256xbf16, #tpu.memory_space<vmem>>, %arg7: memref<32x256xf32, #tpu.memory_space<vmem>>) attributes {dimension_semantics = [#tpu.dimension_semantics<parallel>, #tpu.dimension_semantics<parallel>, #tpu.dimension_semantics<arbitrary>], iteration_bounds = array<i64: 1, 2, 1>, scalar_prefetch = 0 : i64, scratch_operands = 1 : i64, tpu.core_type = #tpu.core_type<tc>, window_params = [{transform_indices = @transform_0, window_bounds = array<i64: 32, 2000>}, {transform_indices = @transform_1, window_bounds = array<i64: 2000, 256>}, {transform_indices = @transform_2, window_bounds = array<i64: 32, 1>}, {transform_indices = @transform_3, window_bounds = array<i64: 32, 256>}]} {
    %c0_i32 = arith.constant 0 : i32
    %0 = arith.cmpi eq, %arg2, %c0_i32 : i32
    %1 = arith.extui %0 : i1 to i32
    %c0_i32_0 = arith.constant 0 : i32
    %2 = arith.cmpi ne, %1, %c0_i32_0 : i32
    scf.if %2 {
      %c0_10 = arith.constant 0 : index
      %c0_11 = arith.constant 0 : index
      %12 = vector.load %arg5[%c0_10, %c0_11] : memref<32x1xf32, #tpu.memory_space<vmem>>, vector<32x1xf32>
      %13 = vector.shape_cast %12 : vector<32x1xf32> to vector<32x1xf32>
      %14 = vector.broadcast %13 : vector<32x1xf32> to vector<32x256xf32>
      %c0_12 = arith.constant 0 : index
      %c0_13 = arith.constant 0 : index
      %15 = vector.load %arg7[%c0_12, %c0_13] : memref<32x256xf32, #tpu.memory_space<vmem>>, vector<32x256xf32>
      tpu.vector_store %arg7[%c0_12, %c0_13], %14 {strides = array<i32>} : memref<32x256xf32, #tpu.memory_space<vmem>>, vector<32x256xf32>,
    } else {
    }
    %c0 = arith.constant 0 : index
    %c0_1 = arith.constant 0 : index
    %3 = vector.load %arg7[%c0, %c0_1] : memref<32x256xf32, #tpu.memory_space<vmem>>, vector<32x256xf32>
    %c0_2 = arith.constant 0 : index
    %c0_3 = arith.constant 0 : index
    %4 = vector.load %arg3[%c0_2, %c0_3] : memref<32x2000xbf16, #tpu.memory_space<vmem>>, vector<32x2000xbf16>
    %c0_4 = arith.constant 0 : index
    %c0_5 = arith.constant 0 : index
    %5 = vector.load %arg4[%c0_4, %c0_5] : memref<2000x256xbf16, #tpu.memory_space<vmem>>, vector<2000x256xbf16>
    %cst = arith.constant dense<0.000000e+00> : vector<32x256xf32>
    %6 = tpu.matmul %4, %5, %cst {dimension_numbers = #tpu.dot_dimension_numbers<[1], [0], [0], [1], [0, 0, 1, 1], [], []>} : vector<32x2000xbf16>, vector<2000x256xbf16>, vector<32x256xf32> -> vector<32x256xf32>
    %7 = arith.addf %3, %6 : vector<32x256xf32>
    %c0_6 = arith.constant 0 : index
    %c0_7 = arith.constant 0 : index
    %8 = vector.load %arg7[%c0_6, %c0_7] : memref<32x256xf32, #tpu.memory_space<vmem>>, vector<32x256xf32>
    tpu.vector_store %arg7[%c0_6, %c0_7], %7 {strides = array<i32>} : memref<32x256xf32, #tpu.memory_space<vmem>>, vector<32x256xf32>,
    %c0_i32_8 = arith.constant 0 : i32
    %9 = arith.cmpi eq, %arg2, %c0_i32_8 : i32
    %10 = arith.extui %9 : i1 to i32
    %c0_i32_9 = arith.constant 0 : i32
    %11 = arith.cmpi ne, %10, %c0_i32_9 : i32
    scf.if %11 {
      %c0_10 = arith.constant 0 : index
      %c0_11 = arith.constant 0 : index
      %12 = vector.load %arg7[%c0_10, %c0_11] : memref<32x256xf32, #tpu.memory_space<vmem>>, vector<32x256xf32>
      %cst_12 = arith.constant 0.000000e+00 : f32
      %13 = vector.broadcast %cst_12 : f32 to vector<32x256xf32>
      %14 = arith.maximumf %12, %13 : vector<32x256xf32>
      %15 = arith.truncf %14 : vector<32x256xf32> to vector<32x256xbf16>
      %c0_13 = arith.constant 0 : index
      %c0_14 = arith.constant 0 : index
      %16 = vector.load %arg6[%c0_13, %c0_14] : memref<32x256xbf16, #tpu.memory_space<vmem>>, vector<32x256xbf16>
      tpu.vector_store %arg6[%c0_13, %c0_14], %15 {strides = array<i32>} : memref<32x256xbf16, #tpu.memory_space<vmem>>, vector<32x256xbf16>,
    } else {
    }
    return
  }
  func.func @transform_0(%arg0: i32, %arg1: i32, %arg2: i32) -> (i32, i32) {
    %c0_i32 = arith.constant 0 : i32
    return %arg0, %arg2 : i32, i32
  }
  func.func @transform_1(%arg0: i32, %arg1: i32, %arg2: i32) -> (i32, i32) {
    %c0_i32 = arith.constant 0 : i32
    return %arg2, %arg1 : i32, i32
  }
  func.func @transform_2(%arg0: i32, %arg1: i32, %arg2: i32) -> (i32, i32) {
    %c0_i32 = arith.constant 0 : i32
    %c0_i32_0 = arith.constant 0 : i32
    return %arg0, %c0_i32 : i32, i32
  }
  func.func @transform_3(%arg0: i32, %arg1: i32, %arg2: i32) -> (i32, i32) {
    %c0_i32 = arith.constant 0 : i32
    return %arg0, %arg1 : i32, i32
  }
}

module attributes {stable_mosaic.version = 11 : i64} {
  func.func @_mm_bias_act_kernel(%arg0: i32, %arg1: i32, %arg2: i32, %arg3: memref<64x512xbf16, #tpu.memory_space<vmem>>, %arg4: memref<512x64xbf16, #tpu.memory_space<vmem>>, %arg5: memref<64x1xf32, #tpu.memory_space<vmem>>, %arg6: memref<64x64xbf16, #tpu.memory_space<vmem>>, %arg7: memref<64x64xf32, #tpu.memory_space<vmem>>) attributes {dimension_semantics = [#tpu.dimension_semantics<parallel>, #tpu.dimension_semantics<parallel>, #tpu.dimension_semantics<arbitrary>], iteration_bounds = array<i64: 1, 1, 8>, scalar_prefetch = 0 : i64, scratch_operands = 1 : i64, tpu.core_type = #tpu.core_type<tc>, window_params = [{transform_indices = @transform_0, window_bounds = array<i64: 64, 512>}, {transform_indices = @transform_1, window_bounds = array<i64: 512, 64>}, {transform_indices = @transform_2, window_bounds = array<i64: 64, 1>}, {transform_indices = @transform_3, window_bounds = array<i64: 64, 64>}]} {
    %c0_i32 = arith.constant 0 : i32
    %0 = arith.cmpi eq, %arg2, %c0_i32 : i32
    %1 = arith.extui %0 : i1 to i32
    %c0_i32_0 = arith.constant 0 : i32
    %2 = arith.cmpi ne, %1, %c0_i32_0 : i32
    scf.if %2 {
      %c0_9 = arith.constant 0 : index
      %c0_10 = arith.constant 0 : index
      %12 = vector.load %arg5[%c0_9, %c0_10] : memref<64x1xf32, #tpu.memory_space<vmem>>, vector<64x1xf32>
      %13 = vector.shape_cast %12 : vector<64x1xf32> to vector<64x1xf32>
      %14 = vector.broadcast %13 : vector<64x1xf32> to vector<64x64xf32>
      %c0_11 = arith.constant 0 : index
      %c0_12 = arith.constant 0 : index
      %15 = vector.load %arg7[%c0_11, %c0_12] : memref<64x64xf32, #tpu.memory_space<vmem>>, vector<64x64xf32>
      tpu.vector_store %arg7[%c0_11, %c0_12], %14 {strides = array<i32>} : memref<64x64xf32, #tpu.memory_space<vmem>>, vector<64x64xf32>,
    } else {
    }
    %c0 = arith.constant 0 : index
    %c0_1 = arith.constant 0 : index
    %3 = vector.load %arg7[%c0, %c0_1] : memref<64x64xf32, #tpu.memory_space<vmem>>, vector<64x64xf32>
    %c0_2 = arith.constant 0 : index
    %c0_3 = arith.constant 0 : index
    %4 = vector.load %arg3[%c0_2, %c0_3] : memref<64x512xbf16, #tpu.memory_space<vmem>>, vector<64x512xbf16>
    %c0_4 = arith.constant 0 : index
    %c0_5 = arith.constant 0 : index
    %5 = vector.load %arg4[%c0_4, %c0_5] : memref<512x64xbf16, #tpu.memory_space<vmem>>, vector<512x64xbf16>
    %cst = arith.constant dense<0.000000e+00> : vector<64x64xf32>
    %6 = tpu.matmul %4, %5, %cst {dimension_numbers = #tpu.dot_dimension_numbers<[1], [0], [0], [1], [0, 0, 1, 1], [], []>} : vector<64x512xbf16>, vector<512x64xbf16>, vector<64x64xf32> -> vector<64x64xf32>
    %7 = arith.addf %3, %6 : vector<64x64xf32>
    %c0_6 = arith.constant 0 : index
    %c0_7 = arith.constant 0 : index
    %8 = vector.load %arg7[%c0_6, %c0_7] : memref<64x64xf32, #tpu.memory_space<vmem>>, vector<64x64xf32>
    tpu.vector_store %arg7[%c0_6, %c0_7], %7 {strides = array<i32>} : memref<64x64xf32, #tpu.memory_space<vmem>>, vector<64x64xf32>,
    %c7_i32 = arith.constant 7 : i32
    %9 = arith.cmpi eq, %arg2, %c7_i32 : i32
    %10 = arith.extui %9 : i1 to i32
    %c0_i32_8 = arith.constant 0 : i32
    %11 = arith.cmpi ne, %10, %c0_i32_8 : i32
    scf.if %11 {
      %c0_9 = arith.constant 0 : index
      %c0_10 = arith.constant 0 : index
      %12 = vector.load %arg7[%c0_9, %c0_10] : memref<64x64xf32, #tpu.memory_space<vmem>>, vector<64x64xf32>
      %cst_11 = arith.constant 0.000000e+00 : f32
      %13 = vector.broadcast %cst_11 : f32 to vector<64x64xf32>
      %14 = arith.maximumf %12, %13 : vector<64x64xf32>
      %15 = arith.truncf %14 : vector<64x64xf32> to vector<64x64xbf16>
      %c0_12 = arith.constant 0 : index
      %c0_13 = arith.constant 0 : index
      %16 = vector.load %arg6[%c0_12, %c0_13] : memref<64x64xbf16, #tpu.memory_space<vmem>>, vector<64x64xbf16>
      tpu.vector_store %arg6[%c0_12, %c0_13], %15 {strides = array<i32>} : memref<64x64xbf16, #tpu.memory_space<vmem>>, vector<64x64xbf16>,
    } else {
    }
    return
  }
  func.func @transform_0(%arg0: i32, %arg1: i32, %arg2: i32) -> (i32, i32) {
    %c0_i32 = arith.constant 0 : i32
    return %arg0, %arg2 : i32, i32
  }
  func.func @transform_1(%arg0: i32, %arg1: i32, %arg2: i32) -> (i32, i32) {
    %c0_i32 = arith.constant 0 : i32
    return %arg2, %arg1 : i32, i32
  }
  func.func @transform_2(%arg0: i32, %arg1: i32, %arg2: i32) -> (i32, i32) {
    %c0_i32 = arith.constant 0 : i32
    %c0_i32_0 = arith.constant 0 : i32
    return %arg0, %c0_i32 : i32, i32
  }
  func.func @transform_3(%arg0: i32, %arg1: i32, %arg2: i32) -> (i32, i32) {
    %c0_i32 = arith.constant 0 : i32
    return %arg0, %arg1 : i32, i32
  }
}

module attributes {stable_mosaic.version = 11 : i64} {
  func.func @_mm_bias_act_kernel(%arg0: i32, %arg1: i32, %arg2: i32, %arg3: memref<64x512xbf16, #tpu.memory_space<vmem>>, %arg4: memref<512x8xbf16, #tpu.memory_space<vmem>>, %arg5: memref<64x1xf32, #tpu.memory_space<vmem>>, %arg6: memref<64x8xbf16, #tpu.memory_space<vmem>>, %arg7: memref<64x8xf32, #tpu.memory_space<vmem>>) attributes {dimension_semantics = [#tpu.dimension_semantics<parallel>, #tpu.dimension_semantics<parallel>, #tpu.dimension_semantics<arbitrary>], iteration_bounds = array<i64: 1, 1, 16>, scalar_prefetch = 0 : i64, scratch_operands = 1 : i64, tpu.core_type = #tpu.core_type<tc>, window_params = [{transform_indices = @transform_0, window_bounds = array<i64: 64, 512>}, {transform_indices = @transform_1, window_bounds = array<i64: 512, 8>}, {transform_indices = @transform_2, window_bounds = array<i64: 64, 1>}, {transform_indices = @transform_3, window_bounds = array<i64: 64, 8>}]} {
    %c0_i32 = arith.constant 0 : i32
    %0 = arith.cmpi eq, %arg2, %c0_i32 : i32
    %1 = arith.extui %0 : i1 to i32
    %c0_i32_0 = arith.constant 0 : i32
    %2 = arith.cmpi ne, %1, %c0_i32_0 : i32
    scf.if %2 {
      %c0_9 = arith.constant 0 : index
      %c0_10 = arith.constant 0 : index
      %12 = vector.load %arg5[%c0_9, %c0_10] : memref<64x1xf32, #tpu.memory_space<vmem>>, vector<64x1xf32>
      %13 = vector.shape_cast %12 : vector<64x1xf32> to vector<64x1xf32>
      %14 = vector.broadcast %13 : vector<64x1xf32> to vector<64x8xf32>
      %c0_11 = arith.constant 0 : index
      %c0_12 = arith.constant 0 : index
      %15 = vector.load %arg7[%c0_11, %c0_12] : memref<64x8xf32, #tpu.memory_space<vmem>>, vector<64x8xf32>
      tpu.vector_store %arg7[%c0_11, %c0_12], %14 {strides = array<i32>} : memref<64x8xf32, #tpu.memory_space<vmem>>, vector<64x8xf32>,
    } else {
    }
    %c0 = arith.constant 0 : index
    %c0_1 = arith.constant 0 : index
    %3 = vector.load %arg7[%c0, %c0_1] : memref<64x8xf32, #tpu.memory_space<vmem>>, vector<64x8xf32>
    %c0_2 = arith.constant 0 : index
    %c0_3 = arith.constant 0 : index
    %4 = vector.load %arg3[%c0_2, %c0_3] : memref<64x512xbf16, #tpu.memory_space<vmem>>, vector<64x512xbf16>
    %c0_4 = arith.constant 0 : index
    %c0_5 = arith.constant 0 : index
    %5 = vector.load %arg4[%c0_4, %c0_5] : memref<512x8xbf16, #tpu.memory_space<vmem>>, vector<512x8xbf16>
    %cst = arith.constant dense<0.000000e+00> : vector<64x8xf32>
    %6 = tpu.matmul %4, %5, %cst {dimension_numbers = #tpu.dot_dimension_numbers<[1], [0], [0], [1], [0, 0, 1, 1], [], []>} : vector<64x512xbf16>, vector<512x8xbf16>, vector<64x8xf32> -> vector<64x8xf32>
    %7 = arith.addf %3, %6 : vector<64x8xf32>
    %c0_6 = arith.constant 0 : index
    %c0_7 = arith.constant 0 : index
    %8 = vector.load %arg7[%c0_6, %c0_7] : memref<64x8xf32, #tpu.memory_space<vmem>>, vector<64x8xf32>
    tpu.vector_store %arg7[%c0_6, %c0_7], %7 {strides = array<i32>} : memref<64x8xf32, #tpu.memory_space<vmem>>, vector<64x8xf32>,
    %c15_i32 = arith.constant 15 : i32
    %9 = arith.cmpi eq, %arg2, %c15_i32 : i32
    %10 = arith.extui %9 : i1 to i32
    %c0_i32_8 = arith.constant 0 : i32
    %11 = arith.cmpi ne, %10, %c0_i32_8 : i32
    scf.if %11 {
      %c0_9 = arith.constant 0 : index
      %c0_10 = arith.constant 0 : index
      %12 = vector.load %arg7[%c0_9, %c0_10] : memref<64x8xf32, #tpu.memory_space<vmem>>, vector<64x8xf32>
      %cst_11 = arith.constant 0.000000e+00 : f32
      %13 = vector.broadcast %cst_11 : f32 to vector<64x8xf32>
      %14 = arith.maximumf %12, %13 : vector<64x8xf32>
      %15 = arith.truncf %14 : vector<64x8xf32> to vector<64x8xbf16>
      %c0_12 = arith.constant 0 : index
      %c0_13 = arith.constant 0 : index
      %16 = vector.load %arg6[%c0_12, %c0_13] : memref<64x8xbf16, #tpu.memory_space<vmem>>, vector<64x8xbf16>
      tpu.vector_store %arg6[%c0_12, %c0_13], %15 {strides = array<i32>} : memref<64x8xbf16, #tpu.memory_space<vmem>>, vector<64x8xbf16>,
    } else {
    }
    return
  }
  func.func @transform_0(%arg0: i32, %arg1: i32, %arg2: i32) -> (i32, i32) {
    %c0_i32 = arith.constant 0 : i32
    return %arg0, %arg2 : i32, i32
  }
  func.func @transform_1(%arg0: i32, %arg1: i32, %arg2: i32) -> (i32, i32) {
    %c0_i32 = arith.constant 0 : i32
    return %arg2, %arg1 : i32, i32
  }
  func.func @transform_2(%arg0: i32, %arg1: i32, %arg2: i32) -> (i32, i32) {
    %c0_i32 = arith.constant 0 : i32
    %c0_i32_0 = arith.constant 0 : i32
    return %arg0, %c0_i32 : i32, i32
  }
  func.func @transform_3(%arg0: i32, %arg1: i32, %arg2: i32) -> (i32, i32) {
    %c0_i32 = arith.constant 0 : i32
    return %arg0, %arg1 : i32, i32
  }
}

module attributes {stable_mosaic.version = 11 : i64} {
  func.func @_latent_kernel(%arg0: memref<2x256xbf16, #tpu.memory_space<vmem>>, %arg1: memref<256x256xbf16, #tpu.memory_space<vmem>>, %arg2: memref<1x256xf32, #tpu.memory_space<vmem>>, %arg3: memref<128x256xbf16, #tpu.memory_space<vmem>>, %arg4: memref<1x256xf32, #tpu.memory_space<vmem>>, %arg5: memref<2x128xf32, #tpu.memory_space<vmem>>, %arg6: memref<2x128xf32, #tpu.memory_space<vmem>>, %arg7: memref<2x128xf32, #tpu.memory_space<vmem>>, %arg8: memref<2x256xbf16, #tpu.memory_space<vmem>>) attributes {dimension_semantics = [], scalar_prefetch = 0 : i64, scratch_operands = 0 : i64, tpu.core_type = #tpu.core_type<tc>} {
    %c0 = arith.constant 0 : index
    %c0_0 = arith.constant 0 : index
    %0 = vector.load %arg0[%c0, %c0_0] : memref<2x256xbf16, #tpu.memory_space<vmem>>, vector<2x256xbf16>
    %c0_1 = arith.constant 0 : index
    %c0_2 = arith.constant 0 : index
    %1 = vector.load %arg1[%c0_1, %c0_2] : memref<256x256xbf16, #tpu.memory_space<vmem>>, vector<256x256xbf16>
    %cst = arith.constant dense<0.000000e+00> : vector<2x256xf32>
    %2 = tpu.matmul %0, %1, %cst {dimension_numbers = #tpu.dot_dimension_numbers<[1], [0], [0], [1], [0, 0, 1, 1], [], []>} : vector<2x256xbf16>, vector<256x256xbf16>, vector<2x256xf32> -> vector<2x256xf32>
    %c0_3 = arith.constant 0 : index
    %c0_4 = arith.constant 0 : index
    %3 = vector.load %arg2[%c0_3, %c0_4] : memref<1x256xf32, #tpu.memory_space<vmem>>, vector<1x256xf32>
    %4 = vector.broadcast %3 : vector<1x256xf32> to vector<2x256xf32>
    %5 = arith.addf %2, %4 : vector<2x256xf32>
    %6 = vector.extract_strided_slice %5 {offsets = [0, 0], sizes = [2, 128], strides = [1, 1]} : vector<2x256xf32> to vector<2x128xf32>
    %7 = vector.extract_strided_slice %5 {offsets = [0, 128], sizes = [2, 128], strides = [1, 1]} : vector<2x256xf32> to vector<2x128xf32>
    %cst_5 = arith.constant 5.000000e-01 : f32
    %8 = vector.broadcast %cst_5 : f32 to vector<2x128xf32>
    %9 = arith.mulf %8, %7 : vector<2x128xf32>
    %10 = math.exp %9 : vector<2x128xf32>
    %c0_6 = arith.constant 0 : index
    %c0_7 = arith.constant 0 : index
    %11 = vector.load %arg5[%c0_6, %c0_7] : memref<2x128xf32, #tpu.memory_space<vmem>>, vector<2x128xf32>
    %12 = arith.mulf %11, %10 : vector<2x128xf32>
    %13 = arith.addf %12, %6 : vector<2x128xf32>
    %14 = arith.truncf %13 : vector<2x128xf32> to vector<2x128xbf16>
    %c0_8 = arith.constant 0 : index
    %c0_9 = arith.constant 0 : index
    %15 = vector.load %arg3[%c0_8, %c0_9] : memref<128x256xbf16, #tpu.memory_space<vmem>>, vector<128x256xbf16>
    %cst_10 = arith.constant dense<0.000000e+00> : vector<2x256xf32>
    %16 = tpu.matmul %14, %15, %cst_10 {dimension_numbers = #tpu.dot_dimension_numbers<[1], [0], [0], [1], [0, 0, 1, 1], [], []>} : vector<2x128xbf16>, vector<128x256xbf16>, vector<2x256xf32> -> vector<2x256xf32>
    %c0_11 = arith.constant 0 : index
    %c0_12 = arith.constant 0 : index
    %17 = vector.load %arg4[%c0_11, %c0_12] : memref<1x256xf32, #tpu.memory_space<vmem>>, vector<1x256xf32>
    %18 = vector.broadcast %17 : vector<1x256xf32> to vector<2x256xf32>
    %19 = arith.addf %16, %18 : vector<2x256xf32>
    %c0_13 = arith.constant 0 : index
    %c0_14 = arith.constant 0 : index
    %20 = vector.load %arg6[%c0_13, %c0_14] : memref<2x128xf32, #tpu.memory_space<vmem>>, vector<2x128xf32>
    tpu.vector_store %arg6[%c0_13, %c0_14], %6 {strides = array<i32>} : memref<2x128xf32, #tpu.memory_space<vmem>>, vector<2x128xf32>,
    %c0_15 = arith.constant 0 : index
    %c0_16 = arith.constant 0 : index
    %21 = vector.load %arg7[%c0_15, %c0_16] : memref<2x128xf32, #tpu.memory_space<vmem>>, vector<2x128xf32>
    tpu.vector_store %arg7[%c0_15, %c0_16], %7 {strides = array<i32>} : memref<2x128xf32, #tpu.memory_space<vmem>>, vector<2x128xf32>,
    %22 = arith.truncf %19 : vector<2x256xf32> to vector<2x256xbf16>
    %c0_17 = arith.constant 0 : index
    %c0_18 = arith.constant 0 : index
    %23 = vector.load %arg8[%c0_17, %c0_18] : memref<2x256xbf16, #tpu.memory_space<vmem>>, vector<2x256xbf16>
    tpu.vector_store %arg8[%c0_17, %c0_18], %22 {strides = array<i32>} : memref<2x256xbf16, #tpu.memory_space<vmem>>, vector<2x256xbf16>,
    return
  }
}

module attributes {stable_mosaic.version = 11 : i64} {
  func.func @_mm_bias_act_kernel(%arg0: i32, %arg1: i32, %arg2: i32, %arg3: memref<512x64xbf16, #tpu.memory_space<vmem>>, %arg4: memref<64x8xbf16, #tpu.memory_space<vmem>>, %arg5: memref<512x8xbf16, #tpu.memory_space<vmem>>, %arg6: memref<512x8xf32, #tpu.memory_space<vmem>>) attributes {dimension_semantics = [#tpu.dimension_semantics<parallel>, #tpu.dimension_semantics<parallel>, #tpu.dimension_semantics<arbitrary>], iteration_bounds = array<i64: 8, 1, 1>, scalar_prefetch = 0 : i64, scratch_operands = 1 : i64, tpu.core_type = #tpu.core_type<tc>, window_params = [{transform_indices = @transform_0, window_bounds = array<i64: 512, 64>}, {transform_indices = @transform_1, window_bounds = array<i64: 64, 8>}, {transform_indices = @transform_2, window_bounds = array<i64: 512, 8>}]} {
    %c0_i32 = arith.constant 0 : i32
    %0 = arith.cmpi eq, %arg2, %c0_i32 : i32
    %1 = arith.extui %0 : i1 to i32
    %c0_i32_0 = arith.constant 0 : i32
    %2 = arith.cmpi ne, %1, %c0_i32_0 : i32
    scf.if %2 {
      %cst_10 = arith.constant 0.000000e+00 : f32
      %12 = vector.broadcast %cst_10 : f32 to vector<512x8xf32>
      %c0_11 = arith.constant 0 : index
      %c0_12 = arith.constant 0 : index
      %13 = vector.load %arg6[%c0_11, %c0_12] : memref<512x8xf32, #tpu.memory_space<vmem>>, vector<512x8xf32>
      tpu.vector_store %arg6[%c0_11, %c0_12], %12 {strides = array<i32>} : memref<512x8xf32, #tpu.memory_space<vmem>>, vector<512x8xf32>,
    } else {
    }
    %c0 = arith.constant 0 : index
    %c0_1 = arith.constant 0 : index
    %3 = vector.load %arg6[%c0, %c0_1] : memref<512x8xf32, #tpu.memory_space<vmem>>, vector<512x8xf32>
    %c0_2 = arith.constant 0 : index
    %c0_3 = arith.constant 0 : index
    %4 = vector.load %arg3[%c0_2, %c0_3] : memref<512x64xbf16, #tpu.memory_space<vmem>>, vector<512x64xbf16>
    %c0_4 = arith.constant 0 : index
    %c0_5 = arith.constant 0 : index
    %5 = vector.load %arg4[%c0_4, %c0_5] : memref<64x8xbf16, #tpu.memory_space<vmem>>, vector<64x8xbf16>
    %cst = arith.constant dense<0.000000e+00> : vector<512x8xf32>
    %6 = tpu.matmul %4, %5, %cst {dimension_numbers = #tpu.dot_dimension_numbers<[1], [0], [0], [1], [0, 0, 1, 1], [], []>} : vector<512x64xbf16>, vector<64x8xbf16>, vector<512x8xf32> -> vector<512x8xf32>
    %7 = arith.addf %3, %6 : vector<512x8xf32>
    %c0_6 = arith.constant 0 : index
    %c0_7 = arith.constant 0 : index
    %8 = vector.load %arg6[%c0_6, %c0_7] : memref<512x8xf32, #tpu.memory_space<vmem>>, vector<512x8xf32>
    tpu.vector_store %arg6[%c0_6, %c0_7], %7 {strides = array<i32>} : memref<512x8xf32, #tpu.memory_space<vmem>>, vector<512x8xf32>,
    %c0_i32_8 = arith.constant 0 : i32
    %9 = arith.cmpi eq, %arg2, %c0_i32_8 : i32
    %10 = arith.extui %9 : i1 to i32
    %c0_i32_9 = arith.constant 0 : i32
    %11 = arith.cmpi ne, %10, %c0_i32_9 : i32
    scf.if %11 {
      %c0_10 = arith.constant 0 : index
      %c0_11 = arith.constant 0 : index
      %12 = vector.load %arg6[%c0_10, %c0_11] : memref<512x8xf32, #tpu.memory_space<vmem>>, vector<512x8xf32>
      %13 = arith.truncf %12 : vector<512x8xf32> to vector<512x8xbf16>
      %c0_12 = arith.constant 0 : index
      %c0_13 = arith.constant 0 : index
      %14 = vector.load %arg5[%c0_12, %c0_13] : memref<512x8xbf16, #tpu.memory_space<vmem>>, vector<512x8xbf16>
      tpu.vector_store %arg5[%c0_12, %c0_13], %13 {strides = array<i32>} : memref<512x8xbf16, #tpu.memory_space<vmem>>, vector<512x8xbf16>,
    } else {
    }
    return
  }
  func.func @transform_0(%arg0: i32, %arg1: i32, %arg2: i32) -> (i32, i32) {
    %c0_i32 = arith.constant 0 : i32
    return %arg0, %arg2 : i32, i32
  }
  func.func @transform_1(%arg0: i32, %arg1: i32, %arg2: i32) -> (i32, i32) {
    %c0_i32 = arith.constant 0 : i32
    return %arg2, %arg1 : i32, i32
  }
  func.func @transform_2(%arg0: i32, %arg1: i32, %arg2: i32) -> (i32, i32) {
    %c0_i32 = arith.constant 0 : i32
    return %arg0, %arg1 : i32, i32
  }
}

module attributes {stable_mosaic.version = 11 : i64} {
  func.func @_mm_bias_act_kernel(%arg0: i32, %arg1: i32, %arg2: i32, %arg3: memref<512x64xbf16, #tpu.memory_space<vmem>>, %arg4: memref<64x64xbf16, #tpu.memory_space<vmem>>, %arg5: memref<512x64xbf16, #tpu.memory_space<vmem>>, %arg6: memref<512x64xf32, #tpu.memory_space<vmem>>) attributes {dimension_semantics = [#tpu.dimension_semantics<parallel>, #tpu.dimension_semantics<parallel>, #tpu.dimension_semantics<arbitrary>], iteration_bounds = array<i64: 4, 1, 1>, scalar_prefetch = 0 : i64, scratch_operands = 1 : i64, tpu.core_type = #tpu.core_type<tc>, window_params = [{transform_indices = @transform_0, window_bounds = array<i64: 512, 64>}, {transform_indices = @transform_1, window_bounds = array<i64: 64, 64>}, {transform_indices = @transform_2, window_bounds = array<i64: 512, 64>}]} {
    %c0_i32 = arith.constant 0 : i32
    %0 = arith.cmpi eq, %arg2, %c0_i32 : i32
    %1 = arith.extui %0 : i1 to i32
    %c0_i32_0 = arith.constant 0 : i32
    %2 = arith.cmpi ne, %1, %c0_i32_0 : i32
    scf.if %2 {
      %cst_10 = arith.constant 0.000000e+00 : f32
      %12 = vector.broadcast %cst_10 : f32 to vector<512x64xf32>
      %c0_11 = arith.constant 0 : index
      %c0_12 = arith.constant 0 : index
      %13 = vector.load %arg6[%c0_11, %c0_12] : memref<512x64xf32, #tpu.memory_space<vmem>>, vector<512x64xf32>
      tpu.vector_store %arg6[%c0_11, %c0_12], %12 {strides = array<i32>} : memref<512x64xf32, #tpu.memory_space<vmem>>, vector<512x64xf32>,
    } else {
    }
    %c0 = arith.constant 0 : index
    %c0_1 = arith.constant 0 : index
    %3 = vector.load %arg6[%c0, %c0_1] : memref<512x64xf32, #tpu.memory_space<vmem>>, vector<512x64xf32>
    %c0_2 = arith.constant 0 : index
    %c0_3 = arith.constant 0 : index
    %4 = vector.load %arg3[%c0_2, %c0_3] : memref<512x64xbf16, #tpu.memory_space<vmem>>, vector<512x64xbf16>
    %c0_4 = arith.constant 0 : index
    %c0_5 = arith.constant 0 : index
    %5 = vector.load %arg4[%c0_4, %c0_5] : memref<64x64xbf16, #tpu.memory_space<vmem>>, vector<64x64xbf16>
    %cst = arith.constant dense<0.000000e+00> : vector<512x64xf32>
    %6 = tpu.matmul %4, %5, %cst {dimension_numbers = #tpu.dot_dimension_numbers<[1], [0], [0], [1], [0, 0, 1, 1], [], []>} : vector<512x64xbf16>, vector<64x64xbf16>, vector<512x64xf32> -> vector<512x64xf32>
    %7 = arith.addf %3, %6 : vector<512x64xf32>
    %c0_6 = arith.constant 0 : index
    %c0_7 = arith.constant 0 : index
    %8 = vector.load %arg6[%c0_6, %c0_7] : memref<512x64xf32, #tpu.memory_space<vmem>>, vector<512x64xf32>
    tpu.vector_store %arg6[%c0_6, %c0_7], %7 {strides = array<i32>} : memref<512x64xf32, #tpu.memory_space<vmem>>, vector<512x64xf32>,
    %c0_i32_8 = arith.constant 0 : i32
    %9 = arith.cmpi eq, %arg2, %c0_i32_8 : i32
    %10 = arith.extui %9 : i1 to i32
    %c0_i32_9 = arith.constant 0 : i32
    %11 = arith.cmpi ne, %10, %c0_i32_9 : i32
    scf.if %11 {
      %c0_10 = arith.constant 0 : index
      %c0_11 = arith.constant 0 : index
      %12 = vector.load %arg6[%c0_10, %c0_11] : memref<512x64xf32, #tpu.memory_space<vmem>>, vector<512x64xf32>
      %13 = arith.truncf %12 : vector<512x64xf32> to vector<512x64xbf16>
      %c0_12 = arith.constant 0 : index
      %c0_13 = arith.constant 0 : index
      %14 = vector.load %arg5[%c0_12, %c0_13] : memref<512x64xbf16, #tpu.memory_space<vmem>>, vector<512x64xbf16>
      tpu.vector_store %arg5[%c0_12, %c0_13], %13 {strides = array<i32>} : memref<512x64xbf16, #tpu.memory_space<vmem>>, vector<512x64xbf16>,
    } else {
    }
    return
  }
  func.func @transform_0(%arg0: i32, %arg1: i32, %arg2: i32) -> (i32, i32) {
    %c0_i32 = arith.constant 0 : i32
    return %arg0, %arg2 : i32, i32
  }
  func.func @transform_1(%arg0: i32, %arg1: i32, %arg2: i32) -> (i32, i32) {
    %c0_i32 = arith.constant 0 : i32
    return %arg2, %arg1 : i32, i32
  }
  func.func @transform_2(%arg0: i32, %arg1: i32, %arg2: i32) -> (i32, i32) {
    %c0_i32 = arith.constant 0 : i32
    return %arg0, %arg1 : i32, i32
  }
}

module attributes {stable_mosaic.version = 11 : i64} {
  func.func @_mm_bias_act_kernel(%arg0: i32, %arg1: i32, %arg2: i32, %arg3: memref<256x32xbf16, #tpu.memory_space<vmem>>, %arg4: memref<32x256xbf16, #tpu.memory_space<vmem>>, %arg5: memref<256x256xbf16, #tpu.memory_space<vmem>>, %arg6: memref<256x256xf32, #tpu.memory_space<vmem>>) attributes {dimension_semantics = [#tpu.dimension_semantics<parallel>, #tpu.dimension_semantics<parallel>, #tpu.dimension_semantics<arbitrary>], iteration_bounds = array<i64: 4, 2, 1>, scalar_prefetch = 0 : i64, scratch_operands = 1 : i64, tpu.core_type = #tpu.core_type<tc>, window_params = [{transform_indices = @transform_0, window_bounds = array<i64: 256, 32>}, {transform_indices = @transform_1, window_bounds = array<i64: 32, 256>}, {transform_indices = @transform_2, window_bounds = array<i64: 256, 256>}]} {
    %c0_i32 = arith.constant 0 : i32
    %0 = arith.cmpi eq, %arg2, %c0_i32 : i32
    %1 = arith.extui %0 : i1 to i32
    %c0_i32_0 = arith.constant 0 : i32
    %2 = arith.cmpi ne, %1, %c0_i32_0 : i32
    scf.if %2 {
      %cst_10 = arith.constant 0.000000e+00 : f32
      %12 = vector.broadcast %cst_10 : f32 to vector<256x256xf32>
      %c0_11 = arith.constant 0 : index
      %c0_12 = arith.constant 0 : index
      %13 = vector.load %arg6[%c0_11, %c0_12] : memref<256x256xf32, #tpu.memory_space<vmem>>, vector<256x256xf32>
      tpu.vector_store %arg6[%c0_11, %c0_12], %12 {strides = array<i32>} : memref<256x256xf32, #tpu.memory_space<vmem>>, vector<256x256xf32>,
    } else {
    }
    %c0 = arith.constant 0 : index
    %c0_1 = arith.constant 0 : index
    %3 = vector.load %arg6[%c0, %c0_1] : memref<256x256xf32, #tpu.memory_space<vmem>>, vector<256x256xf32>
    %c0_2 = arith.constant 0 : index
    %c0_3 = arith.constant 0 : index
    %4 = vector.load %arg3[%c0_2, %c0_3] : memref<256x32xbf16, #tpu.memory_space<vmem>>, vector<256x32xbf16>
    %c0_4 = arith.constant 0 : index
    %c0_5 = arith.constant 0 : index
    %5 = vector.load %arg4[%c0_4, %c0_5] : memref<32x256xbf16, #tpu.memory_space<vmem>>, vector<32x256xbf16>
    %cst = arith.constant dense<0.000000e+00> : vector<256x256xf32>
    %6 = tpu.matmul %4, %5, %cst {dimension_numbers = #tpu.dot_dimension_numbers<[1], [0], [0], [1], [0, 0, 1, 1], [], []>} : vector<256x32xbf16>, vector<32x256xbf16>, vector<256x256xf32> -> vector<256x256xf32>
    %7 = arith.addf %3, %6 : vector<256x256xf32>
    %c0_6 = arith.constant 0 : index
    %c0_7 = arith.constant 0 : index
    %8 = vector.load %arg6[%c0_6, %c0_7] : memref<256x256xf32, #tpu.memory_space<vmem>>, vector<256x256xf32>
    tpu.vector_store %arg6[%c0_6, %c0_7], %7 {strides = array<i32>} : memref<256x256xf32, #tpu.memory_space<vmem>>, vector<256x256xf32>,
    %c0_i32_8 = arith.constant 0 : i32
    %9 = arith.cmpi eq, %arg2, %c0_i32_8 : i32
    %10 = arith.extui %9 : i1 to i32
    %c0_i32_9 = arith.constant 0 : i32
    %11 = arith.cmpi ne, %10, %c0_i32_9 : i32
    scf.if %11 {
      %c0_10 = arith.constant 0 : index
      %c0_11 = arith.constant 0 : index
      %12 = vector.load %arg6[%c0_10, %c0_11] : memref<256x256xf32, #tpu.memory_space<vmem>>, vector<256x256xf32>
      %13 = arith.truncf %12 : vector<256x256xf32> to vector<256x256xbf16>
      %c0_12 = arith.constant 0 : index
      %c0_13 = arith.constant 0 : index
      %14 = vector.load %arg5[%c0_12, %c0_13] : memref<256x256xbf16, #tpu.memory_space<vmem>>, vector<256x256xbf16>
      tpu.vector_store %arg5[%c0_12, %c0_13], %13 {strides = array<i32>} : memref<256x256xbf16, #tpu.memory_space<vmem>>, vector<256x256xbf16>,
    } else {
    }
    return
  }
  func.func @transform_0(%arg0: i32, %arg1: i32, %arg2: i32) -> (i32, i32) {
    %c0_i32 = arith.constant 0 : i32
    return %arg0, %arg2 : i32, i32
  }
  func.func @transform_1(%arg0: i32, %arg1: i32, %arg2: i32) -> (i32, i32) {
    %c0_i32 = arith.constant 0 : i32
    return %arg2, %arg1 : i32, i32
  }
  func.func @transform_2(%arg0: i32, %arg1: i32, %arg2: i32) -> (i32, i32) {
    %c0_i32 = arith.constant 0 : i32
    return %arg0, %arg1 : i32, i32
  }
}

module attributes {stable_mosaic.version = 11 : i64} {
  func.func @_mm_bias_act_kernel(%arg0: i32, %arg1: i32, %arg2: i32, %arg3: memref<64x16xbf16, #tpu.memory_space<vmem>>, %arg4: memref<16x512xbf16, #tpu.memory_space<vmem>>, %arg5: memref<64x512xbf16, #tpu.memory_space<vmem>>, %arg6: memref<64x512xf32, #tpu.memory_space<vmem>>) attributes {dimension_semantics = [#tpu.dimension_semantics<parallel>, #tpu.dimension_semantics<parallel>, #tpu.dimension_semantics<arbitrary>], iteration_bounds = array<i64: 1, 8, 1>, scalar_prefetch = 0 : i64, scratch_operands = 1 : i64, tpu.core_type = #tpu.core_type<tc>, window_params = [{transform_indices = @transform_0, window_bounds = array<i64: 64, 16>}, {transform_indices = @transform_1, window_bounds = array<i64: 16, 512>}, {transform_indices = @transform_2, window_bounds = array<i64: 64, 512>}]} {
    %c0_i32 = arith.constant 0 : i32
    %0 = arith.cmpi eq, %arg2, %c0_i32 : i32
    %1 = arith.extui %0 : i1 to i32
    %c0_i32_0 = arith.constant 0 : i32
    %2 = arith.cmpi ne, %1, %c0_i32_0 : i32
    scf.if %2 {
      %cst_10 = arith.constant 0.000000e+00 : f32
      %12 = vector.broadcast %cst_10 : f32 to vector<64x512xf32>
      %c0_11 = arith.constant 0 : index
      %c0_12 = arith.constant 0 : index
      %13 = vector.load %arg6[%c0_11, %c0_12] : memref<64x512xf32, #tpu.memory_space<vmem>>, vector<64x512xf32>
      tpu.vector_store %arg6[%c0_11, %c0_12], %12 {strides = array<i32>} : memref<64x512xf32, #tpu.memory_space<vmem>>, vector<64x512xf32>,
    } else {
    }
    %c0 = arith.constant 0 : index
    %c0_1 = arith.constant 0 : index
    %3 = vector.load %arg6[%c0, %c0_1] : memref<64x512xf32, #tpu.memory_space<vmem>>, vector<64x512xf32>
    %c0_2 = arith.constant 0 : index
    %c0_3 = arith.constant 0 : index
    %4 = vector.load %arg3[%c0_2, %c0_3] : memref<64x16xbf16, #tpu.memory_space<vmem>>, vector<64x16xbf16>
    %c0_4 = arith.constant 0 : index
    %c0_5 = arith.constant 0 : index
    %5 = vector.load %arg4[%c0_4, %c0_5] : memref<16x512xbf16, #tpu.memory_space<vmem>>, vector<16x512xbf16>
    %cst = arith.constant dense<0.000000e+00> : vector<64x512xf32>
    %6 = tpu.matmul %4, %5, %cst {dimension_numbers = #tpu.dot_dimension_numbers<[1], [0], [0], [1], [0, 0, 1, 1], [], []>} : vector<64x16xbf16>, vector<16x512xbf16>, vector<64x512xf32> -> vector<64x512xf32>
    %7 = arith.addf %3, %6 : vector<64x512xf32>
    %c0_6 = arith.constant 0 : index
    %c0_7 = arith.constant 0 : index
    %8 = vector.load %arg6[%c0_6, %c0_7] : memref<64x512xf32, #tpu.memory_space<vmem>>, vector<64x512xf32>
    tpu.vector_store %arg6[%c0_6, %c0_7], %7 {strides = array<i32>} : memref<64x512xf32, #tpu.memory_space<vmem>>, vector<64x512xf32>,
    %c0_i32_8 = arith.constant 0 : i32
    %9 = arith.cmpi eq, %arg2, %c0_i32_8 : i32
    %10 = arith.extui %9 : i1 to i32
    %c0_i32_9 = arith.constant 0 : i32
    %11 = arith.cmpi ne, %10, %c0_i32_9 : i32
    scf.if %11 {
      %c0_10 = arith.constant 0 : index
      %c0_11 = arith.constant 0 : index
      %12 = vector.load %arg6[%c0_10, %c0_11] : memref<64x512xf32, #tpu.memory_space<vmem>>, vector<64x512xf32>
      %13 = arith.truncf %12 : vector<64x512xf32> to vector<64x512xbf16>
      %c0_12 = arith.constant 0 : index
      %c0_13 = arith.constant 0 : index
      %14 = vector.load %arg5[%c0_12, %c0_13] : memref<64x512xbf16, #tpu.memory_space<vmem>>, vector<64x512xbf16>
      tpu.vector_store %arg5[%c0_12, %c0_13], %13 {strides = array<i32>} : memref<64x512xbf16, #tpu.memory_space<vmem>>, vector<64x512xbf16>,
    } else {
    }
    return
  }
  func.func @transform_0(%arg0: i32, %arg1: i32, %arg2: i32) -> (i32, i32) {
    %c0_i32 = arith.constant 0 : i32
    return %arg0, %arg2 : i32, i32
  }
  func.func @transform_1(%arg0: i32, %arg1: i32, %arg2: i32) -> (i32, i32) {
    %c0_i32 = arith.constant 0 : i32
    return %arg2, %arg1 : i32, i32
  }
  func.func @transform_2(%arg0: i32, %arg1: i32, %arg2: i32) -> (i32, i32) {
    %c0_i32 = arith.constant 0 : i32
    return %arg0, %arg1 : i32, i32
  }
}

</mosaic_0001>

<bundles_post_ra>
// kernel: _lambda_.9
= control target key start
LH: loop header
LB: loop body
LE: loop exit
PB: predicated region body
PF: predicated region fallthrough
CT: control target
= control target key end

     0   :  { %s1088_s12 = smov 0   ;;  %s1090_s13 = smov 0   ;;  %s1275_s0 = inlined_call_operand.vmem [shape: bf16[16,125], index: 0, kind: input, shape index: {}]   ;;  %s1276_s1 = inlined_call_operand.vmem [shape: bf16[125,4096], index: 1, kind: input, shape index: {}]   ;;  %s1277_s2 = inlined_call_operand.vmem [shape: f32[16,1], index: 2, kind: input, shape index: {}]   ;;  %s1278_s3 = inlined_call_operand.vmem [shape: bf16[16,4096], index: 3, kind: output, shape index: {}]  }
   0x1   :  { %s1092_s14 = smov 0   ;;  %s1094_s15 = smov 0  }
   0x2   :  { %s1096_s16 = smov 0  }
   0x3 LB: > { %s28_s17 = sadd.s32 1, %s1060_s15  ;;  %s872_s18 = sadd.s32 4294967295, %s1064_s16   ;;  %s1064_s16 = sphi %s1096_s16, %s13_s16   ;;  %s1060_s15 = sphi %s1094_s15, %s1283_s15   ;;  %s1056_s14 = sphi %s1092_s14, %s1282_s14   ;;  %s1052_s13 = sphi %s1090_s13, %s1281_s13   ;;  %s1048_s12 = sphi %s1088_s12, %s1280_s12  }
   0x4   : > { %p30_p0 = scmp.ge.s32.totalorder %s28_s17, 8  ;;  %p76_p1 = scmp.ne.s32.totalorder %s1052_s13, %s1048_s12 }
   0x5   : > { %p77_p2 = scmp.eq.s32.totalorder %s1064_s16, 0  ;;  %p134_p4 = scmp.eq.s32.totalorder %s872_s18, 7 }
   0x6   : > { %s1285_s17 = smov (%p30_p0, %s28_s17), 0  ;;  %s69_s20 = sadd.s32 1, %s1052_s13 }
   0x7   : > { %p78_p3 = por %p77_p2, %p76_p1  ;;  %s65_s19 = ssub.s32 %s1060_s15, %s1285_s17 }
   0x8   : > { %p67_p5 = scmp.eq.s32.totalorder %s65_s19, 0  ;;  %p1123_p6 = por %p134_p4, %p76_p1 }
   0x9   : > { %p877_p7 = scmp.ge.s32.totalorder %s1064_s16, 8 }
   0xa   : > { %s1128_s22 = scalar_select %p67_p5, %s1052_s13, %s69_s20  }
   0xb   : > { %177 = sbr.rel (%p877_p7) target bundleno = 38 (0x26), region = 24 }
  0x12   : > { %180 = sbr.rel (!%p78_p3) target bundleno = 38 (0x26), region = 28  ;;  %s182_s23 = sand.u32 (%p78_p3), 1, %s1052_s13  }
  0x13   : > { %s928_s24 = sshll.u32 (%p78_p3), %s1060_s15, 4  ;;  %s878_s25 = sshll.u32 (%p78_p3), %s182_s23, 8 }
  0x14   : > { %s1136_s28 = scalar_lea.vmem (%p78_p3), %s1276_s1, %s928_s24  ;;  %s1141_s29 = scalar_lea.vmem (%p78_p3), [#allocation3], %s878_s25 }
  0x15   : > { %v203_v0 = vld [vmem:[%s1136_s28] sm:$0xff] (%p78_p3)  ;;  %v205_v1 = vld [vmem:[%s1136_s28 + $0x8] sm:$0xff] (%p78_p3) }
  0x16   : > { %v207_v2 = vld [vmem:[%s1136_s28 + $0x80] sm:$0xff] (%p78_p3)  ;;  %204 = vst [vmem:[%s1141_s29] sm:$0xff] (%p78_p3), %v203_v0  ;;  %206 = vst [vmem:[%s1141_s29 + $0x8] sm:$0xff] (%p78_p3), %v205_v1  ;;  %v209_v3 = vld [vmem:[%s1136_s28 + $0x88] sm:$0xff] (%p78_p3) }
  0x17   : > { %208 = vst [vmem:[%s1141_s29 + $0x10] sm:$0xff] (%p78_p3), %v207_v2  ;;  %v211_v4 = vld [vmem:[%s1136_s28 + $0x100] sm:$0xff] (%p78_p3)  ;;  %v213_v5 = vld [vmem:[%s1136_s28 + $0x108] sm:$0xff] (%p78_p3)  ;;  %210 = vst [vmem:[%s1141_s29 + $0x18] sm:$0xff] (%p78_p3), %v209_v3 }
  0x18   : > { %212 = vst [vmem:[%s1141_s29 + $0x20] sm:$0xff] (%p78_p3), %v211_v4  ;;  %214 = vst [vmem:[%s1141_s29 + $0x28] sm:$0xff] (%p78_p3), %v213_v5  ;;  %v215_v6 = vld [vmem:[%s1136_s28 + $0x180] sm:$0xff] (%p78_p3)  ;;  %v217_v7 = vld [vmem:[%s1136_s28 + $0x188] sm:$0xff] (%p78_p3) }
  0x19   : > { %v219_v8 = vld [vmem:[%s1136_s28 + $0x200] sm:$0xff]  ;;  %216 = vst [vmem:[%s1141_s29 + $0x30] sm:$0xff] %v215_v6  ;;  %218 = vst [vmem:[%s1141_s29 + $0x38] sm:$0xff] %v217_v7  ;;  %v221_v9 = vld [vmem:[%s1136_s28 + $0x208] sm:$0xff] }
  0x1a   : > { %220 = vst [vmem:[%s1141_s29 + $0x40] sm:$0xff] %v219_v8  ;;  %v223_v10 = vld [vmem:[%s1136_s28 + $0x280] sm:$0xff]  ;;  %v225_v11 = vld [vmem:[%s1136_s28 + $0x288] sm:$0xff]  ;;  %222 = vst [vmem:[%s1141_s29 + $0x48] sm:$0xff] %v221_v9 }
  0x1b   : > { %224 = vst [vmem:[%s1141_s29 + $0x50] sm:$0xff] %v223_v10  ;;  %226 = vst [vmem:[%s1141_s29 + $0x58] sm:$0xff] %v225_v11  ;;  %v227_v12 = vld [vmem:[%s1136_s28 + $0x300] sm:$0xff]  ;;  %v229_v13 = vld [vmem:[%s1136_s28 + $0x308] sm:$0xff] }
  0x1c   : > { %v231_v14 = vld [vmem:[%s1136_s28 + $0x380] sm:$0xff]  ;;  %228 = vst [vmem:[%s1141_s29 + $0x60] sm:$0xff] %v227_v12  ;;  %230 = vst [vmem:[%s1141_s29 + $0x68] sm:$0xff] %v229_v13  ;;  %v233_v15 = vld [vmem:[%s1136_s28 + $0x388] sm:$0xff] }
  0x1d   : > { %232 = vst [vmem:[%s1141_s29 + $0x70] sm:$0xff] %v231_v14  ;;  %v235_v16 = vld [vmem:[%s1136_s28 + $0x400] sm:$0xff]  ;;  %v237_v17 = vld [vmem:[%s1136_s28 + $0x408] sm:$0xff]  ;;  %234 = vst [vmem:[%s1141_s29 + $0x78] sm:$0xff] %v233_v15 }
  0x1e   : > { %236 = vst [vmem:[%s1141_s29 + $0x80] sm:$0xff] %v235_v16  ;;  %238 = vst [vmem:[%s1141_s29 + $0x88] sm:$0xff] %v237_v17  ;;  %v239_v18 = vld [vmem:[%s1136_s28 + $0x480] sm:$0xff]  ;;  %v241_v19 = vld [vmem:[%s1136_s28 + $0x488] sm:$0xff] }
  0x1f   : > { %v243_v20 = vld [vmem:[%s1136_s28 + $0x500] sm:$0xff]  ;;  %240 = vst [vmem:[%s1141_s29 + $0x90] sm:$0xff] %v239_v18  ;;  %242 = vst [vmem:[%s1141_s29 + $0x98] sm:$0xff] %v241_v19  ;;  %v245_v21 = vld [vmem:[%s1136_s28 + $0x508] sm:$0xff] }
  0x20   : > { %244 = vst [vmem:[%s1141_s29 + $0xa0] sm:$0xff] %v243_v20  ;;  %v247_v22 = vld [vmem:[%s1136_s28 + $0x580] sm:$0xff]  ;;  %v249_v23 = vld [vmem:[%s1136_s28 + $0x588] sm:$0xff]  ;;  %246 = vst [vmem:[%s1141_s29 + $0xa8] sm:$0xff] %v245_v21 }
  0x21   : > { %248 = vst [vmem:[%s1141_s29 + $0xb0] sm:$0xff] %v247_v22  ;;  %250 = vst [vmem:[%s1141_s29 + $0xb8] sm:$0xff] %v249_v23  ;;  %v251_v24 = vld [vmem:[%s1136_s28 + $0x600] sm:$0xff]  ;;  %v253_v25 = vld [vmem:[%s1136_s28 + $0x608] sm:$0xff] }
  0x22   : > { %v255_v26 = vld [vmem:[%s1136_s28 + $0x680] sm:$0xff]  ;;  %252 = vst [vmem:[%s1141_s29 + $0xc0] sm:$0xff] %v251_v24  ;;  %254 = vst [vmem:[%s1141_s29 + $0xc8] sm:$0xff] %v253_v25  ;;  %v257_v27 = vld [vmem:[%s1136_s28 + $0x688] sm:$0xff] }
  0x23   : > { %256 = vst [vmem:[%s1141_s29 + $0xd0] sm:$0xff] %v255_v26  ;;  %v259_v28 = vld [vmem:[%s1136_s28 + $0x700] sm:$0xff]  ;;  %v261_v29 = vld [vmem:[%s1136_s28 + $0x708] sm:$0xff]  ;;  %258 = vst [vmem:[%s1141_s29 + $0xd8] sm:$0xff] %v257_v27 }
  0x24   : > { %260 = vst [vmem:[%s1141_s29 + $0xe0] sm:$0xff] %v259_v28  ;;  %262 = vst [vmem:[%s1141_s29 + $0xe8] sm:$0xff] %v261_v29  ;;  %v263_v30 = vld [vmem:[%s1136_s28 + $0x780] sm:$0xff]  ;;  %v265_v31 = vld [vmem:[%s1136_s28 + $0x788] sm:$0xff] }
  0x25   : > { %264 = vst [vmem:[%s1141_s29 + $0xf0] sm:$0xff] %v263_v30  ;;  %266 = vst [vmem:[%s1141_s29 + $0xf8] sm:$0xff] %v265_v31 }
  0x26 PF: > { %p881_p8 = scmp.ge.s32.totalorder %s1064_s16, 1  ;;  %p271_p9 = scmp.lt.s32.totalorder %s1064_s16, 9 }
  0x28   : > { %p272_p10 = pnand %p881_p8, %p271_p9 }
  0x29   : > { %s278_s30 = sand.u32 (!%p272_p10), 1, %s1048_s12   ;;  %v1066_v32 = vmov (!%p272_p10), 0   ;;  %v337_v33 = vld [vmem:[%s1277_s2] sm:$0xff] (!%p272_p10)  ;;  %v338_v35 = vld [vmem:[%s1277_s2 + $0x8] sm:$0xff] (!%p272_p10)  ;;  %vm564_vm0 = vcmask (!%p272_p10), 1045504   ;;  %vm565_vm1 = vcmask (!%p272_p10), 1046528  }
  0x2a   : > { %275 = sbr.rel (%p272_p10) target bundleno = 307 (0x133), region = 51  ;;  %s882_s4 = sshll.u32 (!%p272_p10), %s278_s30, 8  ;;  %612 = vmatprep.mubr.bf16.mxu0 (!%p272_p10), %v1066_v32  ;;  %655 = vmatprep.mubr.bf16.mxu1 (!%p272_p10), %v1066_v32  ;;  %v1067_v59 = vmov (!%p272_p10), 65535   ;;  %v1025_v10 = vld [vmem:[%s1275_s0] sm:$0xff] (!%p272_p10)   ;;  %vm560_vm2 = vcmask (!%p272_p10), 1022976  }
  0x2b   : > { %976 = vset.pattern.permute.xlu0 (!%p272_p10), %v1066_v32  ;;  %s1212_s7 = scalar_lea.vmem (!%p272_p10), [#allocation3], %s882_s4  ;;  %v566_v60 = vsel (!%p272_p10), %vm564_vm0, 4294967295, %v1067_v59  ;;  %s883_s18 = sshll.u32 (!%p272_p10), %s278_s30, 5 }
  0x2c   : > { %v977_v34 = vld [vmem:[%s1212_s7 + $0x4] ss:$16 sps:$4 sm:$0xff] (!%p272_p10)   ;;  %341 = vperm.xlu0 (!%p272_p10), %976, %v337_v33   ;;  %v979_v36 = vld [vmem:[%s1212_s7 + $0xc] ss:$16 sps:$4 sm:$0xff] (!%p272_p10)   ;;  %v981_v37 = vld [vmem:[%s1212_s7] ss:$16 sps:$4 sm:$0xff] (!%p272_p10)  }
  0x2d   : > { %580 = vmatprep.subr.bf16.mxu0 (!%p272_p10), %v977_v34  ;;  %v982_v38 = vld [vmem:[%s1212_s7 + $0x8] ss:$16 sps:$4 sm:$0xff] (!%p272_p10)   ;;  %623 = vmatprep.subr.bf16.mxu1 (!%p272_p10), %v979_v36  ;;  %v983_v39 = vld [vmem:[%s1212_s7 + $0x24] ss:$16 sps:$4 sm:$0xff] (!%p272_p10)   ;;  %v985_v40 = vld [vmem:[%s1212_s7 + $0x2c] ss:$16 sps:$4 sm:$0xff] (!%p272_p10)  }
  0x2e   : > { %581 = vmatpush1.bf16.msra.mxu0 (!%p272_p10), %v981_v37  ;;  %624 = vmatpush1.bf16.msra.mxu1 (!%p272_p10), %v982_v38  ;;  %v987_v41 = vld [vmem:[%s1212_s7 + $0x20] ss:$16 sps:$4 sm:$0xff] (!%p272_p10)   ;;  %v988_v42 = vld [vmem:[%s1212_s7 + $0x28] ss:$16 sps:$4 sm:$0xff] (!%p272_p10)   ;;  %v989_v43 = vld [vmem:[%s1212_s7 + $0x44] ss:$16 sps:$4 sm:$0xff] (!%p272_p10)  }
  0x2f   : > { %582 = vmatprep.subr.bf16.mxu0 (!%p272_p10), %v983_v39  ;;  %625 = vmatprep.subr.bf16.mxu1 (!%p272_p10), %v985_v40  ;;  %v991_v44 = vld [vmem:[%s1212_s7 + $0x4c] ss:$16 sps:$4 sm:$0xff] (!%p272_p10)   ;;  %v993_v45 = vld [vmem:[%s1212_s7 + $0x40] ss:$16 sps:$4 sm:$0xff] (!%p272_p10)   ;;  %v994_v46 = vld [vmem:[%s1212_s7 + $0x48] ss:$16 sps:$4 sm:$0xff] (!%p272_p10)  }
  0x30   : > { %346 = vperm.xlu0 (!%p272_p10), %976, %v338_v35   ;;  %v995_v47 = vld [vmem:[%s1212_s7 + $0x64] ss:$16 sps:$4 sm:$0xff] (!%p272_p10)   ;;  %v997_v48 = vld [vmem:[%s1212_s7 + $0x6c] ss:$16 sps:$4 sm:$0xff] (!%p272_p10)   ;;  %v999_v49 = vld [vmem:[%s1212_s7 + $0x60] ss:$16 sps:$4 sm:$0xff] (!%p272_p10)  }
  0x31   : > { %v1000_v50 = vld [vmem:[%s1212_s7 + $0x68] ss:$16 sps:$4 sm:$0xff]   ;;  %v1001_v51 = vld [vmem:[%s1212_s7 + $0x84] ss:$16 sps:$4 sm:$0xff]   ;;  %v1003_v52 = vld [vmem:[%s1212_s7 + $0x8c] ss:$16 sps:$4 sm:$0xff]  }
  0x32   : > { %583 = vmatpush1.bf16.msra.mxu0 %v987_v41  ;;  %626 = vmatpush1.bf16.msra.mxu1 %v988_v42  ;;  %v1005_v53 = vld [vmem:[%s1212_s7 + $0x80] ss:$16 sps:$4 sm:$0xff]   ;;  %v1006_v54 = vld [vmem:[%s1212_s7 + $0x88] ss:$16 sps:$4 sm:$0xff]   ;;  %v1007_v55 = vld [vmem:[%s1212_s7 + $0xa4] ss:$16 sps:$4 sm:$0xff]  }
  0x33   : > { %584 = vmatprep.subr.bf16.mxu0 %v989_v43  ;;  %627 = vmatprep.subr.bf16.mxu1 %v991_v44  ;;  %v1009_v56 = vld [vmem:[%s1212_s7 + $0xac] ss:$16 sps:$4 sm:$0xff]   ;;  %v1011_v57 = vld [vmem:[%s1212_s7 + $0xa0] ss:$16 sps:$4 sm:$0xff]   ;;  %v1012_v58 = vld [vmem:[%s1212_s7 + $0xa8] ss:$16 sps:$4 sm:$0xff]  }
  0x34   : > { %v1013_v61 = vld [vmem:[%s1212_s7 + $0xc4] ss:$16 sps:$4 sm:$0xff]   ;;  %v1015_v62 = vld [vmem:[%s1212_s7 + $0xcc] ss:$16 sps:$4 sm:$0xff]   ;;  %v567_v1 = vsel %vm565_vm1, %v566_v60, 0  ;;  %s312_s12 = scalar_lea.vmem [#allocation4], %s883_s18 }
  0x35   : > { %v1019_v63 = vld [vmem:[%s1212_s7 + $0xe4] ss:$16 sps:$4 sm:$0x7f]   ;;  %v1021_v0 = vld [vmem:[%s1212_s7 + $0xec] ss:$16 sps:$4 sm:$0x7f]  }
  0x36   : > { %585 = vmatpush1.bf16.msra.mxu0 %v993_v45  ;;  %628 = vmatpush1.bf16.msra.mxu1 %v994_v46  ;;  %v1017_v2 = vld [vmem:[%s1212_s7 + $0xc0] ss:$16 sps:$4 sm:$0xff]   ;;  %v1018_v3 = vld [vmem:[%s1212_s7 + $0xc8] ss:$16 sps:$4 sm:$0xff]   ;;  %v572_v6 = vand.u32 %v1019_v63, %v567_v1  ;;  %v578_v7 = vand.u32 %v1021_v0, %v567_v1  ;;  %s933_s19 = sshll.u32 (%p1123_p6), %s1056_s14, 4 }
  0x37   : > { %586 = vmatprep.subr.bf16.mxu0 %v995_v47  ;;  %629 = vmatprep.subr.bf16.mxu1 %v997_v48  ;;  %v1023_v4 = vld [vmem:[%s1212_s7 + $0xe0] ss:$16 sps:$4 sm:$0x7f]   ;;  %v1024_v5 = vld [vmem:[%s1212_s7 + $0xe8] ss:$16 sps:$4 sm:$0x7f]   ;;  %s741_s24 = scalar_lea.vmem (%p1123_p6), %s1278_s3, %s933_s19 }
  0x38   : > { %v569_v8 = vand.u32 %v1023_v4, %v567_v1  ;;  %v575_v9 = vand.u32 %v1024_v5, %v567_v1 }
  0x3a   : > { %587 = vmatpush1.bf16.msra.mxu0 %v999_v49  ;;  %630 = vmatpush1.bf16.msra.mxu1 %v1000_v50 }
  0x3b   : > { %588 = vmatprep.subr.bf16.mxu0 %v1001_v51  ;;  %631 = vmatprep.subr.bf16.mxu1 %v1003_v52 }
  0x3e   : > { %589 = vmatpush1.bf16.msra.mxu0 %v1005_v53  ;;  %632 = vmatpush1.bf16.msra.mxu1 %v1006_v54 }
  0x3f   : > { %590 = vmatprep.subr.bf16.mxu0 %v1007_v55  ;;  %633 = vmatprep.subr.bf16.mxu1 %v1009_v56 }
  0x42   : > { %591 = vmatpush1.bf16.msra.mxu0 %v1011_v57  ;;  %634 = vmatpush1.bf16.msra.mxu1 %v1012_v58 }
  0x43   : > { %592 = vmatprep.subr.bf16.mxu0 %v1013_v61  ;;  %635 = vmatprep.subr.bf16.mxu1 %v1015_v62 }
  0x46   : > { %593 = vmatpush1.bf16.msra.mxu0 %v1017_v2  ;;  %636 = vmatpush1.bf16.msra.mxu1 %v1018_v3 }
  0x47   : > { %594 = vmatprep.subr.bf16.mxu0 %v572_v6  ;;  %637 = vmatprep.subr.bf16.mxu1 %v578_v7 }
  0x4a   : > { %595 = vmatpush1.bf16.msra.mxu0 %v569_v8  ;;  %638 = vmatpush1.bf16.msra.mxu1 %v575_v9 }
  0x4d   : > { %917 = vmatmul.mubr.msk.bf16.vlgmr.msra.gmra.mrb[0].mxu0 %vm560_vm2, %v1025_v10  ;;  %918 = vmatmul.mubr.msk.bf16.vlgmr.msra.gmra.mrb[0].mxu1 %vm560_vm2, %v1025_v10 }
  0xab   : > { %v342_v11 = vpop.permute.xlu0 %341 }
  0xaf   : > { %v347_v12 = vpop.permute.xlu0 %346 }
 0x120   : > { %v614_v13 = vpop.f32.mrb[0].mxu0  ;;  %v657_v14 = vpop.f32.mrb[0].mxu1 }
 0x121   : > { %v666_v15 = vadd.f32 %v614_v13, %v342_v11  ;;  %v668_v16 = vadd.f32 %v657_v14, %v342_v11  ;;  %v616_v17 = vpop.f32.mrb[1].mxu0  ;;  %v659_v18 = vpop.f32.mrb[1].mxu1 }
 0x122   : > { %v667_v19 = vadd.f32 %v616_v17, %v342_v11  ;;  %v669_v20 = vadd.f32 %v659_v18, %v342_v11  ;;  %v618_v21 = vpop.f32.mrb[2].mxu0  ;;  %v661_v22 = vpop.f32.mrb[2].mxu1 }
 0x123   : > { %v693_v23 = vmax.f32 %v666_v15, 0.0  ;;  %v695_v24 = vmax.f32 %v668_v16, 0.0  ;;  %v670_v25 = vadd.f32 %v618_v21, %v347_v12  ;;  %v672_v26 = vadd.f32 %v661_v22, %v347_v12  ;;  %v620_v27 = vpop.f32.mrb[3].mxu0  ;;  %v663_v28 = vpop.f32.mrb[3].mxu1 }
 0x124   : > { %v694_v29 = vmax.f32 %v667_v19, 0.0  ;;  %v696_v30 = vmax.f32 %v669_v20, 0.0  ;;  %v671_v31 = vadd.f32 %v620_v27, %v347_v12  ;;  %v673_v32 = vadd.f32 %v663_v28, %v347_v12  ;;  %735 = sbr.rel (!%p1123_p6) target bundleno = 307 (0x133), region = 67 }
 0x125   : > { %v697_v33 = vmax.f32 %v670_v25, 0.0  ;;  %v699_v34 = vmax.f32 %v672_v26, 0.0 }
 0x126   : > { %v929_v35 = vpack.c.bf16 %v694_v29, %v693_v23  ;;  %v930_v36 = vpack.c.bf16 %v696_v30, %v695_v24  ;;  %v698_v37 = vmax.f32 %v671_v31, 0.0  ;;  %v700_v38 = vmax.f32 %v673_v32, 0.0 }
 0x128   : > { %725 = vst [vmem:[%s312_s12] sm:$0xff] %v929_v35  ;;  %726 = vst [vmem:[%s312_s12 + $0x8] sm:$0xff] %v930_v36  ;;  %v931_v39 = vpack.c.bf16 %v698_v37, %v697_v33  ;;  %v932_v40 = vpack.c.bf16 %v700_v38, %v699_v34 }
 0x12a   : > { %727 = vst [vmem:[%s312_s12 + $0x10] sm:$0xff] %v931_v39  ;;  %728 = vst [vmem:[%s312_s12 + $0x18] sm:$0xff] %v932_v40 }
 0x12f   : > { %v754_v41 = vld [vmem:[%s312_s12] sm:$0xff]  ;;  %v756_v42 = vld [vmem:[%s312_s12 + $0x8] sm:$0xff] }
 0x130   : > { %755 = vst [vmem:[%s741_s24] sm:$0xff] %v754_v41  ;;  %757 = vst [vmem:[%s741_s24 + $0x8] sm:$0xff] %v756_v42 }
 0x131   : > { %v758_v43 = vld [vmem:[%s312_s12 + $0x10] sm:$0xff]  ;;  %v760_v44 = vld [vmem:[%s312_s12 + $0x18] sm:$0xff] }
 0x132   : > { %759 = vst [vmem:[%s741_s24 + $0x80] sm:$0xff] %v758_v43  ;;  %761 = vst [vmem:[%s741_s24 + $0x88] sm:$0xff] %v760_v44 }
 0x133 PF: > { %s13_s16 = sadd.s32 1, %s1064_s16   ;;  %s1280_s12 = smov %s1052_s13 }
 0x134   : > { %p10_p11 = scmp.ge.s32.totalorder %s13_s16, 10   ;;  %s1281_s13 = smov %s1128_s22 }
 0x135   : > { %s1282_s14 = smov %s1060_s15  ;;  %s1283_s15 = smov %s1285_s17 }
 0x136   :  { %12 = sbr.rel (!%p10_p11) target bundleno = 3 (0x3), region = 127 }

// kernel: _lambda_.10
= control target key start
LH: loop header
LB: loop body
LE: loop exit
PB: predicated region body
PF: predicated region fallthrough
CT: control target
= control target key end

     0   :  { %s4531_s12 = smov 0   ;;  %s4533_s13 = smov 0   ;;  %s5543_s0 = inlined_call_operand.vmem [shape: bf16[32,2000], index: 0, kind: input, shape index: {}]   ;;  %s5544_s1 = inlined_call_operand.vmem [shape: bf16[2000,512], index: 1, kind: input, shape index: {}]   ;;  %s5545_s2 = inlined_call_operand.vmem [shape: f32[32,1], index: 2, kind: input, shape index: {}]   ;;  %s5546_s3 = inlined_call_operand.vmem [shape: bf16[32,512], index: 3, kind: output, shape index: {}]  }
   0x1   :  { %s4535_s14 = smov 0   ;;  %s4537_s15 = smov 0  }
   0x2   :  { %s4539_s16 = smov 0  }
   0x3 LB: > { %s28_s17 = sadd.s32 1, %s4504_s15  ;;  %s3685_s18 = sadd.s32 4294967295, %s4508_s16   ;;  %s4508_s16 = sphi %s4539_s16, %s13_s16   ;;  %s4504_s15 = sphi %s4537_s15, %s5551_s15   ;;  %s4500_s14 = sphi %s4535_s14, %s5550_s14   ;;  %s4496_s13 = sphi %s4533_s13, %s5549_s13   ;;  %s4492_s12 = sphi %s4531_s12, %s5548_s12  }
   0x4   : > { %p30_p0 = scmp.ge.s32.totalorder %s28_s17, 2  ;;  %p76_p1 = scmp.ne.s32.totalorder %s4496_s13, %s4492_s12 }
   0x5   : > { %p77_p2 = scmp.eq.s32.totalorder %s4508_s16, 0  ;;  %p134_p4 = scmp.eq.s32.totalorder %s3685_s18, 1 }
   0x6   : > { %s5553_s17 = smov (%p30_p0, %s28_s17), 0  ;;  %s69_s20 = sadd.s32 1, %s4496_s13 }
   0x7   : > { %p78_p3 = por %p77_p2, %p76_p1  ;;  %s65_s19 = ssub.s32 %s4504_s15, %s5553_s17 }
   0x8   : > { %p67_p5 = scmp.eq.s32.totalorder %s65_s19, 0  ;;  %p4566_p6 = por %p134_p4, %p76_p1 }
   0x9   : > { %p3690_p7 = scmp.ge.s32.totalorder %s4508_s16, 2 }
   0xa   : > { %s4571_s22 = scalar_select %p67_p5, %s4496_s13, %s69_s20  }
   0xb   : > { %180 = sbr.rel (%p3690_p7) target bundleno = 147 (0x93), region = 24 }
  0x12   : > { %183 = sbr.rel (!%p78_p3) target bundleno = 147 (0x93), region = 28  ;;  %s185_s23 = sand.u32 (%p78_p3), 1, %s4496_s13  }
  0x13   : > { %s3988_s24 = sshll.u32 (%p78_p3), %s4504_s15, 3  ;;  %s4050_s25 = smul.u32 (%p78_p3), 2000, %s185_s23 }
  0x14   : > { %s4579_s28 = scalar_lea.vmem (%p78_p3), %s5544_s1, %s3988_s24 }
  0x15   : > { %v719_v0 = vld [vmem:[%s4579_s28] sm:$0xff] (%p78_p3)  ;;  %v721_v1 = vld [vmem:[%s4579_s28 + $0x10] sm:$0xff] (%p78_p3)  ;;  %s4587_s29 = scalar_lea.vmem (%p78_p3), [#allocation3], %s4050_s25 }
  0x16   : > { %v723_v2 = vld [vmem:[%s4579_s28 + $0x20] sm:$0xff] (%p78_p3)  ;;  %v725_v3 = vld [vmem:[%s4579_s28 + $0x30] sm:$0xff] (%p78_p3)  ;;  %720 = vst [vmem:[%s4587_s29] sm:$0xff] (%p78_p3), %v719_v0  ;;  %722 = vst [vmem:[%s4587_s29 + $0x8] sm:$0xff] (%p78_p3), %v721_v1 }
  0x17   : > { %v727_v4 = vld [vmem:[%s4579_s28 + $0x40] sm:$0xff] (%p78_p3)  ;;  %v729_v5 = vld [vmem:[%s4579_s28 + $0x50] sm:$0xff] (%p78_p3)  ;;  %724 = vst [vmem:[%s4587_s29 + $0x10] sm:$0xff] (%p78_p3), %v723_v2  ;;  %726 = vst [vmem:[%s4587_s29 + $0x18] sm:$0xff] (%p78_p3), %v725_v3 }
  0x18   : > { %728 = vst [vmem:[%s4587_s29 + $0x20] sm:$0xff] (%p78_p3), %v727_v4  ;;  %730 = vst [vmem:[%s4587_s29 + $0x28] sm:$0xff] (%p78_p3), %v729_v5  ;;  %v731_v6 = vld [vmem:[%s4579_s28 + $0x60] sm:$0xff] (%p78_p3)  ;;  %v733_v7 = vld [vmem:[%s4579_s28 + $0x70] sm:$0xff] (%p78_p3) }
  0x19   : > { %v735_v8 = vld [vmem:[%s4579_s28 + $0x80] sm:$0xff]  ;;  %732 = vst [vmem:[%s4587_s29 + $0x30] sm:$0xff] %v731_v6  ;;  %734 = vst [vmem:[%s4587_s29 + $0x38] sm:$0xff] %v733_v7  ;;  %v737_v9 = vld [vmem:[%s4579_s28 + $0x90] sm:$0xff] }
  0x1a   : > { %736 = vst [vmem:[%s4587_s29 + $0x40] sm:$0xff] %v735_v8  ;;  %v739_v10 = vld [vmem:[%s4579_s28 + $0xa0] sm:$0xff]  ;;  %v741_v11 = vld [vmem:[%s4579_s28 + $0xb0] sm:$0xff]  ;;  %738 = vst [vmem:[%s4587_s29 + $0x48] sm:$0xff] %v737_v9 }
  0x1b   : > { %740 = vst [vmem:[%s4587_s29 + $0x50] sm:$0xff] %v739_v10  ;;  %742 = vst [vmem:[%s4587_s29 + $0x58] sm:$0xff] %v741_v11  ;;  %v743_v12 = vld [vmem:[%s4579_s28 + $0xc0] sm:$0xff]  ;;  %v745_v13 = vld [vmem:[%s4579_s28 + $0xd0] sm:$0xff] }
  0x1c   : > { %v747_v14 = vld [vmem:[%s4579_s28 + $0xe0] sm:$0xff]  ;;  %744 = vst [vmem:[%s4587_s29 + $0x60] sm:$0xff] %v743_v12  ;;  %746 = vst [vmem:[%s4587_s29 + $0x68] sm:$0xff] %v745_v13  ;;  %v749_v15 = vld [vmem:[%s4579_s28 + $0xf0] sm:$0xff] }
  0x1d   : > { %748 = vst [vmem:[%s4587_s29 + $0x70] sm:$0xff] %v747_v14  ;;  %v751_v16 = vld [vmem:[%s4579_s28 + $0x100] sm:$0xff]  ;;  %v753_v17 = vld [vmem:[%s4579_s28 + $0x110] sm:$0xff]  ;;  %750 = vst [vmem:[%s4587_s29 + $0x78] sm:$0xff] %v749_v15 }
  0x1e   : > { %752 = vst [vmem:[%s4587_s29 + $0x80] sm:$0xff] %v751_v16  ;;  %754 = vst [vmem:[%s4587_s29 + $0x88] sm:$0xff] %v753_v17  ;;  %v755_v18 = vld [vmem:[%s4579_s28 + $0x120] sm:$0xff]  ;;  %v757_v19 = vld [vmem:[%s4579_s28 + $0x130] sm:$0xff] }
  0x1f   : > { %v759_v20 = vld [vmem:[%s4579_s28 + $0x140] sm:$0xff]  ;;  %756 = vst [vmem:[%s4587_s29 + $0x90] sm:$0xff] %v755_v18  ;;  %758 = vst [vmem:[%s4587_s29 + $0x98] sm:$0xff] %v757_v19  ;;  %v761_v21 = vld [vmem:[%s4579_s28 + $0x150] sm:$0xff] }
  0x20   : > { %760 = vst [vmem:[%s4587_s29 + $0xa0] sm:$0xff] %v759_v20  ;;  %v763_v22 = vld [vmem:[%s4579_s28 + $0x160] sm:$0xff]  ;;  %v765_v23 = vld [vmem:[%s4579_s28 + $0x170] sm:$0xff]  ;;  %762 = vst [vmem:[%s4587_s29 + $0xa8] sm:$0xff] %v761_v21 }
  0x21   : > { %764 = vst [vmem:[%s4587_s29 + $0xb0] sm:$0xff] %v763_v22  ;;  %766 = vst [vmem:[%s4587_s29 + $0xb8] sm:$0xff] %v765_v23  ;;  %v767_v24 = vld [vmem:[%s4579_s28 + $0x180] sm:$0xff]  ;;  %v769_v25 = vld [vmem:[%s4579_s28 + $0x190] sm:$0xff] }
  0x22   : > { %v771_v26 = vld [vmem:[%s4579_s28 + $0x1a0] sm:$0xff]  ;;  %768 = vst [vmem:[%s4587_s29 + $0xc0] sm:$0xff] %v767_v24  ;;  %770 = vst [vmem:[%s4587_s29 + $0xc8] sm:$0xff] %v769_v25  ;;  %v773_v27 = vld [vmem:[%s4579_s28 + $0x1b0] sm:$0xff] }
  0x23   : > { %772 = vst [vmem:[%s4587_s29 + $0xd0] sm:$0xff] %v771_v26  ;;  %v775_v28 = vld [vmem:[%s4579_s28 + $0x1c0] sm:$0xff]  ;;  %v777_v29 = vld [vmem:[%s4579_s28 + $0x1d0] sm:$0xff]  ;;  %774 = vst [vmem:[%s4587_s29 + $0xd8] sm:$0xff] %v773_v27 }
  0x24   : > { %776 = vst [vmem:[%s4587_s29 + $0xe0] sm:$0xff] %v775_v28  ;;  %778 = vst [vmem:[%s4587_s29 + $0xe8] sm:$0xff] %v777_v29  ;;  %v779_v30 = vld [vmem:[%s4579_s28 + $0x1e0] sm:$0xff]  ;;  %v781_v31 = vld [vmem:[%s4579_s28 + $0x1f0] sm:$0xff] }
  0x25   : > { %v783_v32 = vld [vmem:[%s4579_s28 + $0x200] sm:$0xff]  ;;  %780 = vst [vmem:[%s4587_s29 + $0xf0] sm:$0xff] %v779_v30  ;;  %782 = vst [vmem:[%s4587_s29 + $0xf8] sm:$0xff] %v781_v31  ;;  %v785_v33 = vld [vmem:[%s4579_s28 + $0x210] sm:$0xff] }
  0x26   : > { %784 = vst [vmem:[%s4587_s29 + $0x100] sm:$0xff] %v783_v32  ;;  %v787_v34 = vld [vmem:[%s4579_s28 + $0x220] sm:$0xff]  ;;  %v789_v35 = vld [vmem:[%s4579_s28 + $0x230] sm:$0xff]  ;;  %786 = vst [vmem:[%s4587_s29 + $0x108] sm:$0xff] %v785_v33 }
  0x27   : > { %788 = vst [vmem:[%s4587_s29 + $0x110] sm:$0xff] %v787_v34  ;;  %790 = vst [vmem:[%s4587_s29 + $0x118] sm:$0xff] %v789_v35  ;;  %v791_v36 = vld [vmem:[%s4579_s28 + $0x240] sm:$0xff]  ;;  %v793_v37 = vld [vmem:[%s4579_s28 + $0x250] sm:$0xff] }
  0x28   : > { %v795_v38 = vld [vmem:[%s4579_s28 + $0x260] sm:$0xff]  ;;  %792 = vst [vmem:[%s4587_s29 + $0x120] sm:$0xff] %v791_v36  ;;  %794 = vst [vmem:[%s4587_s29 + $0x128] sm:$0xff] %v793_v37  ;;  %v797_v39 = vld [vmem:[%s4579_s28 + $0x270] sm:$0xff] }
  0x29   : > { %796 = vst [vmem:[%s4587_s29 + $0x130] sm:$0xff] %v795_v38  ;;  %v799_v40 = vld [vmem:[%s4579_s28 + $0x280] sm:$0xff]  ;;  %v801_v41 = vld [vmem:[%s4579_s28 + $0x290] sm:$0xff]  ;;  %798 = vst [vmem:[%s4587_s29 + $0x138] sm:$0xff] %v797_v39 }
  0x2a   : > { %800 = vst [vmem:[%s4587_s29 + $0x140] sm:$0xff] %v799_v40  ;;  %802 = vst [vmem:[%s4587_s29 + $0x148] sm:$0xff] %v801_v41  ;;  %v803_v42 = vld [vmem:[%s4579_s28 + $0x2a0] sm:$0xff]  ;;  %v805_v43 = vld [vmem:[%s4579_s28 + $0x2b0] sm:$0xff] }
  0x2b   : > { %v807_v44 = vld [vmem:[%s4579_s28 + $0x2c0] sm:$0xff]  ;;  %804 = vst [vmem:[%s4587_s29 + $0x150] sm:$0xff] %v803_v42  ;;  %806 = vst [vmem:[%s4587_s29 + $0x158] sm:$0xff] %v805_v43  ;;  %v809_v45 = vld [vmem:[%s4579_s28 + $0x2d0] sm:$0xff] }
  0x2c   : > { %808 = vst [vmem:[%s4587_s29 + $0x160] sm:$0xff] %v807_v44  ;;  %v811_v46 = vld [vmem:[%s4579_s28 + $0x2e0] sm:$0xff]  ;;  %v813_v47 = vld [vmem:[%s4579_s28 + $0x2f0] sm:$0xff]  ;;  %810 = vst [vmem:[%s4587_s29 + $0x168] sm:$0xff] %v809_v45 }
  0x2d   : > { %812 = vst [vmem:[%s4587_s29 + $0x170] sm:$0xff] %v811_v46  ;;  %814 = vst [vmem:[%s4587_s29 + $0x178] sm:$0xff] %v813_v47  ;;  %v815_v48 = vld [vmem:[%s4579_s28 + $0x300] sm:$0xff]  ;;  %v817_v49 = vld [vmem:[%s4579_s28 + $0x310] sm:$0xff] }
  0x2e   : > { %v819_v50 = vld [vmem:[%s4579_s28 + $0x320] sm:$0xff]  ;;  %816 = vst [vmem:[%s4587_s29 + $0x180] sm:$0xff] %v815_v48  ;;  %818 = vst [vmem:[%s4587_s29 + $0x188] sm:$0xff] %v817_v49  ;;  %v821_v51 = vld [vmem:[%s4579_s28 + $0x330] sm:$0xff] }
  0x2f   : > { %820 = vst [vmem:[%s4587_s29 + $0x190] sm:$0xff] %v819_v50  ;;  %v823_v52 = vld [vmem:[%s4579_s28 + $0x340] sm:$0xff]  ;;  %v825_v53 = vld [vmem:[%s4579_s28 + $0x350] sm:$0xff]  ;;  %822 = vst [vmem:[%s4587_s29 + $0x198] sm:$0xff] %v821_v51 }
  0x30   : > { %824 = vst [vmem:[%s4587_s29 + $0x1a0] sm:$0xff] %v823_v52  ;;  %826 = vst [vmem:[%s4587_s29 + $0x1a8] sm:$0xff] %v825_v53  ;;  %v827_v54 = vld [vmem:[%s4579_s28 + $0x360] sm:$0xff]  ;;  %v829_v55 = vld [vmem:[%s4579_s28 + $0x370] sm:$0xff] }
  0x31   : > { %v831_v56 = vld [vmem:[%s4579_s28 + $0x380] sm:$0xff]  ;;  %828 = vst [vmem:[%s4587_s29 + $0x1b0] sm:$0xff] %v827_v54  ;;  %830 = vst [vmem:[%s4587_s29 + $0x1b8] sm:$0xff] %v829_v55  ;;  %v833_v57 = vld [vmem:[%s4579_s28 + $0x390] sm:$0xff] }
  0x32   : > { %832 = vst [vmem:[%s4587_s29 + $0x1c0] sm:$0xff] %v831_v56  ;;  %v835_v58 = vld [vmem:[%s4579_s28 + $0x3a0] sm:$0xff]  ;;  %v837_v59 = vld [vmem:[%s4579_s28 + $0x3b0] sm:$0xff]  ;;  %834 = vst [vmem:[%s4587_s29 + $0x1c8] sm:$0xff] %v833_v57 }
  0x33   : > { %836 = vst [vmem:[%s4587_s29 + $0x1d0] sm:$0xff] %v835_v58  ;;  %838 = vst [vmem:[%s4587_s29 + $0x1d8] sm:$0xff] %v837_v59  ;;  %v839_v60 = vld [vmem:[%s4579_s28 + $0x3c0] sm:$0xff]  ;;  %v841_v61 = vld [vmem:[%s4579_s28 + $0x3d0] sm:$0xff] }
  0x34   : > { %v843_v62 = vld [vmem:[%s4579_s28 + $0x3e0] sm:$0xff]  ;;  %840 = vst [vmem:[%s4587_s29 + $0x1e0] sm:$0xff] %v839_v60  ;;  %842 = vst [vmem:[%s4587_s29 + $0x1e8] sm:$0xff] %v841_v61  ;;  %v845_v63 = vld [vmem:[%s4579_s28 + $0x3f0] sm:$0xff] }
  0x35   : > { %844 = vst [vmem:[%s4587_s29 + $0x1f0] sm:$0xff] %v843_v62  ;;  %v847_v0 = vld [vmem:[%s4579_s28 + $0x400] sm:$0xff]  ;;  %v849_v1 = vld [vmem:[%s4579_s28 + $0x410] sm:$0xff]  ;;  %846 = vst [vmem:[%s4587_s29 + $0x1f8] sm:$0xff] %v845_v63 }
  0x36   : > { %848 = vst [vmem:[%s4587_s29 + $0x200] sm:$0xff] %v847_v0  ;;  %850 = vst [vmem:[%s4587_s29 + $0x208] sm:$0xff] %v849_v1  ;;  %v851_v2 = vld [vmem:[%s4579_s28 + $0x420] sm:$0xff]  ;;  %v853_v3 = vld [vmem:[%s4579_s28 + $0x430] sm:$0xff] }
  0x37   : > { %v855_v4 = vld [vmem:[%s4579_s28 + $0x440] sm:$0xff]  ;;  %852 = vst [vmem:[%s4587_s29 + $0x210] sm:$0xff] %v851_v2  ;;  %854 = vst [vmem:[%s4587_s29 + $0x218] sm:$0xff] %v853_v3  ;;  %v857_v5 = vld [vmem:[%s4579_s28 + $0x450] sm:$0xff] }
  0x38   : > { %856 = vst [vmem:[%s4587_s29 + $0x220] sm:$0xff] %v855_v4  ;;  %v859_v6 = vld [vmem:[%s4579_s28 + $0x460] sm:$0xff]  ;;  %v861_v7 = vld [vmem:[%s4579_s28 + $0x470] sm:$0xff]  ;;  %858 = vst [vmem:[%s4587_s29 + $0x228] sm:$0xff] %v857_v5 }
  0x39   : > { %860 = vst [vmem:[%s4587_s29 + $0x230] sm:$0xff] %v859_v6  ;;  %862 = vst [vmem:[%s4587_s29 + $0x238] sm:$0xff] %v861_v7  ;;  %v863_v8 = vld [vmem:[%s4579_s28 + $0x480] sm:$0xff]  ;;  %v865_v9 = vld [vmem:[%s4579_s28 + $0x490] sm:$0xff] }
  0x3a   : > { %v867_v10 = vld [vmem:[%s4579_s28 + $0x4a0] sm:$0xff]  ;;  %864 = vst [vmem:[%s4587_s29 + $0x240] sm:$0xff] %v863_v8  ;;  %866 = vst [vmem:[%s4587_s29 + $0x248] sm:$0xff] %v865_v9  ;;  %v869_v11 = vld [vmem:[%s4579_s28 + $0x4b0] sm:$0xff] }
  0x3b   : > { %868 = vst [vmem:[%s4587_s29 + $0x250] sm:$0xff] %v867_v10  ;;  %v871_v12 = vld [vmem:[%s4579_s28 + $0x4c0] sm:$0xff]  ;;  %v873_v13 = vld [vmem:[%s4579_s28 + $0x4d0] sm:$0xff]  ;;  %870 = vst [vmem:[%s4587_s29 + $0x258] sm:$0xff] %v869_v11 }
  0x3c   : > { %872 = vst [vmem:[%s4587_s29 + $0x260] sm:$0xff] %v871_v12  ;;  %874 = vst [vmem:[%s4587_s29 + $0x268] sm:$0xff] %v873_v13  ;;  %v875_v14 = vld [vmem:[%s4579_s28 + $0x4e0] sm:$0xff]  ;;  %v877_v15 = vld [vmem:[%s4579_s28 + $0x4f0] sm:$0xff] }
  0x3d   : > { %v879_v16 = vld [vmem:[%s4579_s28 + $0x500] sm:$0xff]  ;;  %876 = vst [vmem:[%s4587_s29 + $0x270] sm:$0xff] %v875_v14  ;;  %878 = vst [vmem:[%s4587_s29 + $0x278] sm:$0xff] %v877_v15  ;;  %v881_v17 = vld [vmem:[%s4579_s28 + $0x510] sm:$0xff] }
  0x3e   : > { %880 = vst [vmem:[%s4587_s29 + $0x280] sm:$0xff] %v879_v16  ;;  %v883_v18 = vld [vmem:[%s4579_s28 + $0x520] sm:$0xff]  ;;  %v885_v19 = vld [vmem:[%s4579_s28 + $0x530] sm:$0xff]  ;;  %882 = vst [vmem:[%s4587_s29 + $0x288] sm:$0xff] %v881_v17 }
  0x3f   : > { %884 = vst [vmem:[%s4587_s29 + $0x290] sm:$0xff] %v883_v18  ;;  %886 = vst [vmem:[%s4587_s29 + $0x298] sm:$0xff] %v885_v19  ;;  %v887_v20 = vld [vmem:[%s4579_s28 + $0x540] sm:$0xff]  ;;  %v889_v21 = vld [vmem:[%s4579_s28 + $0x550] sm:$0xff] }
  0x40   : > { %v891_v22 = vld [vmem:[%s4579_s28 + $0x560] sm:$0xff]  ;;  %888 = vst [vmem:[%s4587_s29 + $0x2a0] sm:$0xff] %v887_v20  ;;  %890 = vst [vmem:[%s4587_s29 + $0x2a8] sm:$0xff] %v889_v21  ;;  %v893_v23 = vld [vmem:[%s4579_s28 + $0x570] sm:$0xff] }
  0x41   : > { %892 = vst [vmem:[%s4587_s29 + $0x2b0] sm:$0xff] %v891_v22  ;;  %v895_v24 = vld [vmem:[%s4579_s28 + $0x580] sm:$0xff]  ;;  %v897_v25 = vld [vmem:[%s4579_s28 + $0x590] sm:$0xff]  ;;  %894 = vst [vmem:[%s4587_s29 + $0x2b8] sm:$0xff] %v893_v23 }
  0x42   : > { %896 = vst [vmem:[%s4587_s29 + $0x2c0] sm:$0xff] %v895_v24  ;;  %898 = vst [vmem:[%s4587_s29 + $0x2c8] sm:$0xff] %v897_v25  ;;  %v899_v26 = vld [vmem:[%s4579_s28 + $0x5a0] sm:$0xff]  ;;  %v901_v27 = vld [vmem:[%s4579_s28 + $0x5b0] sm:$0xff] }
  0x43   : > { %v903_v28 = vld [vmem:[%s4579_s28 + $0x5c0] sm:$0xff]  ;;  %900 = vst [vmem:[%s4587_s29 + $0x2d0] sm:$0xff] %v899_v26  ;;  %902 = vst [vmem:[%s4587_s29 + $0x2d8] sm:$0xff] %v901_v27  ;;  %v905_v29 = vld [vmem:[%s4579_s28 + $0x5d0] sm:$0xff] }
  0x44   : > { %904 = vst [vmem:[%s4587_s29 + $0x2e0] sm:$0xff] %v903_v28  ;;  %v907_v30 = vld [vmem:[%s4579_s28 + $0x5e0] sm:$0xff]  ;;  %v909_v31 = vld [vmem:[%s4579_s28 + $0x5f0] sm:$0xff]  ;;  %906 = vst [vmem:[%s4587_s29 + $0x2e8] sm:$0xff] %v905_v29 }
  0x45   : > { %908 = vst [vmem:[%s4587_s29 + $0x2f0] sm:$0xff] %v907_v30  ;;  %910 = vst [vmem:[%s4587_s29 + $0x2f8] sm:$0xff] %v909_v31  ;;  %v911_v32 = vld [vmem:[%s4579_s28 + $0x600] sm:$0xff]  ;;  %v913_v33 = vld [vmem:[%s4579_s28 + $0x610] sm:$0xff] }
  0x46   : > { %v915_v34 = vld [vmem:[%s4579_s28 + $0x620] sm:$0xff]  ;;  %912 = vst [vmem:[%s4587_s29 + $0x300] sm:$0xff] %v911_v32  ;;  %914 = vst [vmem:[%s4587_s29 + $0x308] sm:$0xff] %v913_v33  ;;  %v917_v35 = vld [vmem:[%s4579_s28 + $0x630] sm:$0xff] }
  0x47   : > { %916 = vst [vmem:[%s4587_s29 + $0x310] sm:$0xff] %v915_v34  ;;  %v919_v36 = vld [vmem:[%s4579_s28 + $0x640] sm:$0xff]  ;;  %v921_v37 = vld [vmem:[%s4579_s28 + $0x650] sm:$0xff]  ;;  %918 = vst [vmem:[%s4587_s29 + $0x318] sm:$0xff] %v917_v35 }
  0x48   : > { %920 = vst [vmem:[%s4587_s29 + $0x320] sm:$0xff] %v919_v36  ;;  %922 = vst [vmem:[%s4587_s29 + $0x328] sm:$0xff] %v921_v37  ;;  %v923_v38 = vld [vmem:[%s4579_s28 + $0x660] sm:$0xff]  ;;  %v925_v39 = vld [vmem:[%s4579_s28 + $0x670] sm:$0xff] }
  0x49   : > { %v927_v40 = vld [vmem:[%s4579_s28 + $0x680] sm:$0xff]  ;;  %924 = vst [vmem:[%s4587_s29 + $0x330] sm:$0xff] %v923_v38  ;;  %926 = vst [vmem:[%s4587_s29 + $0x338] sm:$0xff] %v925_v39  ;;  %v929_v41 = vld [vmem:[%s4579_s28 + $0x690] sm:$0xff] }
  0x4a   : > { %928 = vst [vmem:[%s4587_s29 + $0x340] sm:$0xff] %v927_v40  ;;  %v931_v42 = vld [vmem:[%s4579_s28 + $0x6a0] sm:$0xff]  ;;  %v933_v43 = vld [vmem:[%s4579_s28 + $0x6b0] sm:$0xff]  ;;  %930 = vst [vmem:[%s4587_s29 + $0x348] sm:$0xff] %v929_v41 }
  0x4b   : > { %932 = vst [vmem:[%s4587_s29 + $0x350] sm:$0xff] %v931_v42  ;;  %934 = vst [vmem:[%s4587_s29 + $0x358] sm:$0xff] %v933_v43  ;;  %v935_v44 = vld [vmem:[%s4579_s28 + $0x6c0] sm:$0xff]  ;;  %v937_v45 = vld [vmem:[%s4579_s28 + $0x6d0] sm:$0xff] }
  0x4c   : > { %v939_v46 = vld [vmem:[%s4579_s28 + $0x6e0] sm:$0xff]  ;;  %936 = vst [vmem:[%s4587_s29 + $0x360] sm:$0xff] %v935_v44  ;;  %938 = vst [vmem:[%s4587_s29 + $0x368] sm:$0xff] %v937_v45  ;;  %v941_v47 = vld [vmem:[%s4579_s28 + $0x6f0] sm:$0xff] }
  0x4d   : > { %940 = vst [vmem:[%s4587_s29 + $0x370] sm:$0xff] %v939_v46  ;;  %v943_v48 = vld [vmem:[%s4579_s28 + $0x700] sm:$0xff]  ;;  %v945_v49 = vld [vmem:[%s4579_s28 + $0x710] sm:$0xff]  ;;  %942 = vst [vmem:[%s4587_s29 + $0x378] sm:$0xff] %v941_v47 }
  0x4e   : > { %944 = vst [vmem:[%s4587_s29 + $0x380] sm:$0xff] %v943_v48  ;;  %946 = vst [vmem:[%s4587_s29 + $0x388] sm:$0xff] %v945_v49  ;;  %v947_v50 = vld [vmem:[%s4579_s28 + $0x720] sm:$0xff]  ;;  %v949_v51 = vld [vmem:[%s4579_s28 + $0x730] sm:$0xff] }
  0x4f   : > { %v951_v52 = vld [vmem:[%s4579_s28 + $0x740] sm:$0xff]  ;;  %948 = vst [vmem:[%s4587_s29 + $0x390] sm:$0xff] %v947_v50  ;;  %950 = vst [vmem:[%s4587_s29 + $0x398] sm:$0xff] %v949_v51  ;;  %v953_v53 = vld [vmem:[%s4579_s28 + $0x750] sm:$0xff] }
  0x50   : > { %952 = vst [vmem:[%s4587_s29 + $0x3a0] sm:$0xff] %v951_v52  ;;  %v955_v54 = vld [vmem:[%s4579_s28 + $0x760] sm:$0xff]  ;;  %v957_v55 = vld [vmem:[%s4579_s28 + $0x770] sm:$0xff]  ;;  %954 = vst [vmem:[%s4587_s29 + $0x3a8] sm:$0xff] %v953_v53 }
  0x51   : > { %956 = vst [vmem:[%s4587_s29 + $0x3b0] sm:$0xff] %v955_v54  ;;  %958 = vst [vmem:[%s4587_s29 + $0x3b8] sm:$0xff] %v957_v55  ;;  %v959_v56 = vld [vmem:[%s4579_s28 + $0x780] sm:$0xff]  ;;  %v961_v57 = vld [vmem:[%s4579_s28 + $0x790] sm:$0xff] }
  0x52   : > { %v963_v58 = vld [vmem:[%s4579_s28 + $0x7a0] sm:$0xff]  ;;  %960 = vst [vmem:[%s4587_s29 + $0x3c0] sm:$0xff] %v959_v56  ;;  %962 = vst [vmem:[%s4587_s29 + $0x3c8] sm:$0xff] %v961_v57  ;;  %v965_v59 = vld [vmem:[%s4579_s28 + $0x7b0] sm:$0xff] }
  0x53   : > { %964 = vst [vmem:[%s4587_s29 + $0x3d0] sm:$0xff] %v963_v58  ;;  %v967_v60 = vld [vmem:[%s4579_s28 + $0x7c0] sm:$0xff]  ;;  %v969_v61 = vld [vmem:[%s4579_s28 + $0x7d0] sm:$0xff]  ;;  %966 = vst [vmem:[%s4587_s29 + $0x3d8] sm:$0xff] %v965_v59 }
  0x54   : > { %968 = vst [vmem:[%s4587_s29 + $0x3e0] sm:$0xff] %v967_v60  ;;  %970 = vst [vmem:[%s4587_s29 + $0x3e8] sm:$0xff] %v969_v61  ;;  %v971_v62 = vld [vmem:[%s4579_s28 + $0x7e0] sm:$0xff]  ;;  %v973_v63 = vld [vmem:[%s4579_s28 + $0x7f0] sm:$0xff] }
  0x55   : > { %v975_v0 = vld [vmem:[%s4579_s28 + $0x800] sm:$0xff]  ;;  %972 = vst [vmem:[%s4587_s29 + $0x3f0] sm:$0xff] %v971_v62  ;;  %974 = vst [vmem:[%s4587_s29 + $0x3f8] sm:$0xff] %v973_v63  ;;  %v977_v1 = vld [vmem:[%s4579_s28 + $0x810] sm:$0xff] }
  0x56   : > { %976 = vst [vmem:[%s4587_s29 + $0x400] sm:$0xff] %v975_v0  ;;  %v979_v2 = vld [vmem:[%s4579_s28 + $0x820] sm:$0xff]  ;;  %v981_v3 = vld [vmem:[%s4579_s28 + $0x830] sm:$0xff]  ;;  %978 = vst [vmem:[%s4587_s29 + $0x408] sm:$0xff] %v977_v1 }
  0x57   : > { %980 = vst [vmem:[%s4587_s29 + $0x410] sm:$0xff] %v979_v2  ;;  %982 = vst [vmem:[%s4587_s29 + $0x418] sm:$0xff] %v981_v3  ;;  %v983_v4 = vld [vmem:[%s4579_s28 + $0x840] sm:$0xff]  ;;  %v985_v5 = vld [vmem:[%s4579_s28 + $0x850] sm:$0xff] }
  0x58   : > { %v987_v6 = vld [vmem:[%s4579_s28 + $0x860] sm:$0xff]  ;;  %984 = vst [vmem:[%s4587_s29 + $0x420] sm:$0xff] %v983_v4  ;;  %986 = vst [vmem:[%s4587_s29 + $0x428] sm:$0xff] %v985_v5  ;;  %v989_v7 = vld [vmem:[%s4579_s28 + $0x870] sm:$0xff] }
  0x59   : > { %988 = vst [vmem:[%s4587_s29 + $0x430] sm:$0xff] %v987_v6  ;;  %v991_v8 = vld [vmem:[%s4579_s28 + $0x880] sm:$0xff]  ;;  %v993_v9 = vld [vmem:[%s4579_s28 + $0x890] sm:$0xff]  ;;  %990 = vst [vmem:[%s4587_s29 + $0x438] sm:$0xff] %v989_v7 }
  0x5a   : > { %992 = vst [vmem:[%s4587_s29 + $0x440] sm:$0xff] %v991_v8  ;;  %994 = vst [vmem:[%s4587_s29 + $0x448] sm:$0xff] %v993_v9  ;;  %v995_v10 = vld [vmem:[%s4579_s28 + $0x8a0] sm:$0xff]  ;;  %v997_v11 = vld [vmem:[%s4579_s28 + $0x8b0] sm:$0xff] }
  0x5b   : > { %v999_v12 = vld [vmem:[%s4579_s28 + $0x8c0] sm:$0xff]  ;;  %996 = vst [vmem:[%s4587_s29 + $0x450] sm:$0xff] %v995_v10  ;;  %998 = vst [vmem:[%s4587_s29 + $0x458] sm:$0xff] %v997_v11  ;;  %v1001_v13 = vld [vmem:[%s4579_s28 + $0x8d0] sm:$0xff] }
  0x5c   : > { %1000 = vst [vmem:[%s4587_s29 + $0x460] sm:$0xff] %v999_v12  ;;  %v1003_v14 = vld [vmem:[%s4579_s28 + $0x8e0] sm:$0xff]  ;;  %v1005_v15 = vld [vmem:[%s4579_s28 + $0x8f0] sm:$0xff]  ;;  %1002 = vst [vmem:[%s4587_s29 + $0x468] sm:$0xff] %v1001_v13 }
  0x5d   : > { %1004 = vst [vmem:[%s4587_s29 + $0x470] sm:$0xff] %v1003_v14  ;;  %1006 = vst [vmem:[%s4587_s29 + $0x478] sm:$0xff] %v1005_v15  ;;  %v1007_v16 = vld [vmem:[%s4579_s28 + $0x900] sm:$0xff]  ;;  %v1009_v17 = vld [vmem:[%s4579_s28 + $0x910] sm:$0xff] }
  0x5e   : > { %v1011_v18 = vld [vmem:[%s4579_s28 + $0x920] sm:$0xff]  ;;  %1008 = vst [vmem:[%s4587_s29 + $0x480] sm:$0xff] %v1007_v16  ;;  %1010 = vst [vmem:[%s4587_s29 + $0x488] sm:$0xff] %v1009_v17  ;;  %v1013_v19 = vld [vmem:[%s4579_s28 + $0x930] sm:$0xff] }
  0x5f   : > { %1012 = vst [vmem:[%s4587_s29 + $0x490] sm:$0xff] %v1011_v18  ;;  %v1015_v20 = vld [vmem:[%s4579_s28 + $0x940] sm:$0xff]  ;;  %v1017_v21 = vld [vmem:[%s4579_s28 + $0x950] sm:$0xff]  ;;  %1014 = vst [vmem:[%s4587_s29 + $0x498] sm:$0xff] %v1013_v19 }
  0x60   : > { %1016 = vst [vmem:[%s4587_s29 + $0x4a0] sm:$0xff] %v1015_v20  ;;  %1018 = vst [vmem:[%s4587_s29 + $0x4a8] sm:$0xff] %v1017_v21  ;;  %v1019_v22 = vld [vmem:[%s4579_s28 + $0x960] sm:$0xff]  ;;  %v1021_v23 = vld [vmem:[%s4579_s28 + $0x970] sm:$0xff] }
  0x61   : > { %v1023_v24 = vld [vmem:[%s4579_s28 + $0x980] sm:$0xff]  ;;  %1020 = vst [vmem:[%s4587_s29 + $0x4b0] sm:$0xff] %v1019_v22  ;;  %1022 = vst [vmem:[%s4587_s29 + $0x4b8] sm:$0xff] %v1021_v23  ;;  %v1025_v25 = vld [vmem:[%s4579_s28 + $0x990] sm:$0xff] }
  0x62   : > { %1024 = vst [vmem:[%s4587_s29 + $0x4c0] sm:$0xff] %v1023_v24  ;;  %v1027_v26 = vld [vmem:[%s4579_s28 + $0x9a0] sm:$0xff]  ;;  %v1029_v27 = vld [vmem:[%s4579_s28 + $0x9b0] sm:$0xff]  ;;  %1026 = vst [vmem:[%s4587_s29 + $0x4c8] sm:$0xff] %v1025_v25 }
  0x63   : > { %1028 = vst [vmem:[%s4587_s29 + $0x4d0] sm:$0xff] %v1027_v26  ;;  %1030 = vst [vmem:[%s4587_s29 + $0x4d8] sm:$0xff] %v1029_v27  ;;  %v1031_v28 = vld [vmem:[%s4579_s28 + $0x9c0] sm:$0xff]  ;;  %v1033_v29 = vld [vmem:[%s4579_s28 + $0x9d0] sm:$0xff] }
  0x64   : > { %v1035_v30 = vld [vmem:[%s4579_s28 + $0x9e0] sm:$0xff]  ;;  %1032 = vst [vmem:[%s4587_s29 + $0x4e0] sm:$0xff] %v1031_v28  ;;  %1034 = vst [vmem:[%s4587_s29 + $0x4e8] sm:$0xff] %v1033_v29  ;;  %v1037_v31 = vld [vmem:[%s4579_s28 + $0x9f0] sm:$0xff] }
  0x65   : > { %1036 = vst [vmem:[%s4587_s29 + $0x4f0] sm:$0xff] %v1035_v30  ;;  %v1039_v32 = vld [vmem:[%s4579_s28 + $0xa00] sm:$0xff]  ;;  %v1041_v33 = vld [vmem:[%s4579_s28 + $0xa10] sm:$0xff]  ;;  %1038 = vst [vmem:[%s4587_s29 + $0x4f8] sm:$0xff] %v1037_v31 }
  0x66   : > { %1040 = vst [vmem:[%s4587_s29 + $0x500] sm:$0xff] %v1039_v32  ;;  %1042 = vst [vmem:[%s4587_s29 + $0x508] sm:$0xff] %v1041_v33  ;;  %v1043_v34 = vld [vmem:[%s4579_s28 + $0xa20] sm:$0xff]  ;;  %v1045_v35 = vld [vmem:[%s4579_s28 + $0xa30] sm:$0xff] }
  0x67   : > { %v1047_v36 = vld [vmem:[%s4579_s28 + $0xa40] sm:$0xff]  ;;  %1044 = vst [vmem:[%s4587_s29 + $0x510] sm:$0xff] %v1043_v34  ;;  %1046 = vst [vmem:[%s4587_s29 + $0x518] sm:$0xff] %v1045_v35  ;;  %v1049_v37 = vld [vmem:[%s4579_s28 + $0xa50] sm:$0xff] }
  0x68   : > { %1048 = vst [vmem:[%s4587_s29 + $0x520] sm:$0xff] %v1047_v36  ;;  %v1051_v38 = vld [vmem:[%s4579_s28 + $0xa60] sm:$0xff]  ;;  %v1053_v39 = vld [vmem:[%s4579_s28 + $0xa70] sm:$0xff]  ;;  %1050 = vst [vmem:[%s4587_s29 + $0x528] sm:$0xff] %v1049_v37 }
  0x69   : > { %1052 = vst [vmem:[%s4587_s29 + $0x530] sm:$0xff] %v1051_v38  ;;  %1054 = vst [vmem:[%s4587_s29 + $0x538] sm:$0xff] %v1053_v39  ;;  %v1055_v40 = vld [vmem:[%s4579_s28 + $0xa80] sm:$0xff]  ;;  %v1057_v41 = vld [vmem:[%s4579_s28 + $0xa90] sm:$0xff] }
  0x6a   : > { %v1059_v42 = vld [vmem:[%s4579_s28 + $0xaa0] sm:$0xff]  ;;  %1056 = vst [vmem:[%s4587_s29 + $0x540] sm:$0xff] %v1055_v40  ;;  %1058 = vst [vmem:[%s4587_s29 + $0x548] sm:$0xff] %v1057_v41  ;;  %v1061_v43 = vld [vmem:[%s4579_s28 + $0xab0] sm:$0xff] }
  0x6b   : > { %1060 = vst [vmem:[%s4587_s29 + $0x550] sm:$0xff] %v1059_v42  ;;  %v1063_v44 = vld [vmem:[%s4579_s28 + $0xac0] sm:$0xff]  ;;  %v1065_v45 = vld [vmem:[%s4579_s28 + $0xad0] sm:$0xff]  ;;  %1062 = vst [vmem:[%s4587_s29 + $0x558] sm:$0xff] %v1061_v43 }
  0x6c   : > { %1064 = vst [vmem:[%s4587_s29 + $0x560] sm:$0xff] %v1063_v44  ;;  %1066 = vst [vmem:[%s4587_s29 + $0x568] sm:$0xff] %v1065_v45  ;;  %v1067_v46 = vld [vmem:[%s4579_s28 + $0xae0] sm:$0xff]  ;;  %v1069_v47 = vld [vmem:[%s4579_s28 + $0xaf0] sm:$0xff] }
  0x6d   : > { %v1071_v48 = vld [vmem:[%s4579_s28 + $0xb00] sm:$0xff]  ;;  %1068 = vst [vmem:[%s4587_s29 + $0x570] sm:$0xff] %v1067_v46  ;;  %1070 = vst [vmem:[%s4587_s29 + $0x578] sm:$0xff] %v1069_v47  ;;  %v1073_v49 = vld [vmem:[%s4579_s28 + $0xb10] sm:$0xff] }
  0x6e   : > { %1072 = vst [vmem:[%s4587_s29 + $0x580] sm:$0xff] %v1071_v48  ;;  %v1075_v50 = vld [vmem:[%s4579_s28 + $0xb20] sm:$0xff]  ;;  %v1077_v51 = vld [vmem:[%s4579_s28 + $0xb30] sm:$0xff]  ;;  %1074 = vst [vmem:[%s4587_s29 + $0x588] sm:$0xff] %v1073_v49 }
  0x6f   : > { %1076 = vst [vmem:[%s4587_s29 + $0x590] sm:$0xff] %v1075_v50  ;;  %1078 = vst [vmem:[%s4587_s29 + $0x598] sm:$0xff] %v1077_v51  ;;  %v1079_v52 = vld [vmem:[%s4579_s28 + $0xb40] sm:$0xff]  ;;  %v1081_v53 = vld [vmem:[%s4579_s28 + $0xb50] sm:$0xff] }
  0x70   : > { %v1083_v54 = vld [vmem:[%s4579_s28 + $0xb60] sm:$0xff]  ;;  %1080 = vst [vmem:[%s4587_s29 + $0x5a0] sm:$0xff] %v1079_v52  ;;  %1082 = vst [vmem:[%s4587_s29 + $0x5a8] sm:$0xff] %v1081_v53  ;;  %v1085_v55 = vld [vmem:[%s4579_s28 + $0xb70] sm:$0xff] }
  0x71   : > { %1084 = vst [vmem:[%s4587_s29 + $0x5b0] sm:$0xff] %v1083_v54  ;;  %v1087_v56 = vld [vmem:[%s4579_s28 + $0xb80] sm:$0xff]  ;;  %v1089_v57 = vld [vmem:[%s4579_s28 + $0xb90] sm:$0xff]  ;;  %1086 = vst [vmem:[%s4587_s29 + $0x5b8] sm:$0xff] %v1085_v55 }
  0x72   : > { %1088 = vst [vmem:[%s4587_s29 + $0x5c0] sm:$0xff] %v1087_v56  ;;  %1090 = vst [vmem:[%s4587_s29 + $0x5c8] sm:$0xff] %v1089_v57  ;;  %v1091_v58 = vld [vmem:[%s4579_s28 + $0xba0] sm:$0xff]  ;;  %v1093_v59 = vld [vmem:[%s4579_s28 + $0xbb0] sm:$0xff] }
  0x73   : > { %v1095_v60 = vld [vmem:[%s4579_s28 + $0xbc0] sm:$0xff]  ;;  %1092 = vst [vmem:[%s4587_s29 + $0x5d0] sm:$0xff] %v1091_v58  ;;  %1094 = vst [vmem:[%s4587_s29 + $0x5d8] sm:$0xff] %v1093_v59  ;;  %v1097_v61 = vld [vmem:[%s4579_s28 + $0xbd0] sm:$0xff] }
  0x74   : > { %1096 = vst [vmem:[%s4587_s29 + $0x5e0] sm:$0xff] %v1095_v60  ;;  %v1099_v62 = vld [vmem:[%s4579_s28 + $0xbe0] sm:$0xff]  ;;  %v1101_v63 = vld [vmem:[%s4579_s28 + $0xbf0] sm:$0xff]  ;;  %1098 = vst [vmem:[%s4587_s29 + $0x5e8] sm:$0xff] %v1097_v61 }
  0x75   : > { %1100 = vst [vmem:[%s4587_s29 + $0x5f0] sm:$0xff] %v1099_v62  ;;  %1102 = vst [vmem:[%s4587_s29 + $0x5f8] sm:$0xff] %v1101_v63  ;;  %v1103_v0 = vld [vmem:[%s4579_s28 + $0xc00] sm:$0xff]  ;;  %v1105_v1 = vld [vmem:[%s4579_s28 + $0xc10] sm:$0xff] }
  0x76   : > { %v1107_v2 = vld [vmem:[%s4579_s28 + $0xc20] sm:$0xff]  ;;  %1104 = vst [vmem:[%s4587_s29 + $0x600] sm:$0xff] %v1103_v0  ;;  %1106 = vst [vmem:[%s4587_s29 + $0x608] sm:$0xff] %v1105_v1  ;;  %v1109_v3 = vld [vmem:[%s4579_s28 + $0xc30] sm:$0xff] }
  0x77   : > { %1108 = vst [vmem:[%s4587_s29 + $0x610] sm:$0xff] %v1107_v2  ;;  %v1111_v4 = vld [vmem:[%s4579_s28 + $0xc40] sm:$0xff]  ;;  %v1113_v5 = vld [vmem:[%s4579_s28 + $0xc50] sm:$0xff]  ;;  %1110 = vst [vmem:[%s4587_s29 + $0x618] sm:$0xff] %v1109_v3 }
  0x78   : > { %1112 = vst [vmem:[%s4587_s29 + $0x620] sm:$0xff] %v1111_v4  ;;  %1114 = vst [vmem:[%s4587_s29 + $0x628] sm:$0xff] %v1113_v5  ;;  %v1115_v6 = vld [vmem:[%s4579_s28 + $0xc60] sm:$0xff]  ;;  %v1117_v7 = vld [vmem:[%s4579_s28 + $0xc70] sm:$0xff] }
  0x79   : > { %v1119_v8 = vld [vmem:[%s4579_s28 + $0xc80] sm:$0xff]  ;;  %1116 = vst [vmem:[%s4587_s29 + $0x630] sm:$0xff] %v1115_v6  ;;  %1118 = vst [vmem:[%s4587_s29 + $0x638] sm:$0xff] %v1117_v7  ;;  %v1121_v9 = vld [vmem:[%s4579_s28 + $0xc90] sm:$0xff] }
  0x7a   : > { %1120 = vst [vmem:[%s4587_s29 + $0x640] sm:$0xff] %v1119_v8  ;;  %v1123_v10 = vld [vmem:[%s4579_s28 + $0xca0] sm:$0xff]  ;;  %v1125_v11 = vld [vmem:[%s4579_s28 + $0xcb0] sm:$0xff]  ;;  %1122 = vst [vmem:[%s4587_s29 + $0x648] sm:$0xff] %v1121_v9 }
  0x7b   : > { %1124 = vst [vmem:[%s4587_s29 + $0x650] sm:$0xff] %v1123_v10  ;;  %1126 = vst [vmem:[%s4587_s29 + $0x658] sm:$0xff] %v1125_v11  ;;  %v1127_v12 = vld [vmem:[%s4579_s28 + $0xcc0] sm:$0xff]  ;;  %v1129_v13 = vld [vmem:[%s4579_s28 + $0xcd0] sm:$0xff] }
  0x7c   : > { %v1131_v14 = vld [vmem:[%s4579_s28 + $0xce0] sm:$0xff]  ;;  %1128 = vst [vmem:[%s4587_s29 + $0x660] sm:$0xff] %v1127_v12  ;;  %1130 = vst [vmem:[%s4587_s29 + $0x668] sm:$0xff] %v1129_v13  ;;  %v1133_v15 = vld [vmem:[%s4579_s28 + $0xcf0] sm:$0xff] }
  0x7d   : > { %1132 = vst [vmem:[%s4587_s29 + $0x670] sm:$0xff] %v1131_v14  ;;  %v1135_v16 = vld [vmem:[%s4579_s28 + $0xd00] sm:$0xff]  ;;  %v1137_v17 = vld [vmem:[%s4579_s28 + $0xd10] sm:$0xff]  ;;  %1134 = vst [vmem:[%s4587_s29 + $0x678] sm:$0xff] %v1133_v15 }
  0x7e   : > { %1136 = vst [vmem:[%s4587_s29 + $0x680] sm:$0xff] %v1135_v16  ;;  %1138 = vst [vmem:[%s4587_s29 + $0x688] sm:$0xff] %v1137_v17  ;;  %v1139_v18 = vld [vmem:[%s4579_s28 + $0xd20] sm:$0xff]  ;;  %v1141_v19 = vld [vmem:[%s4579_s28 + $0xd30] sm:$0xff] }
  0x7f   : > { %v1143_v20 = vld [vmem:[%s4579_s28 + $0xd40] sm:$0xff]  ;;  %1140 = vst [vmem:[%s4587_s29 + $0x690] sm:$0xff] %v1139_v18  ;;  %1142 = vst [vmem:[%s4587_s29 + $0x698] sm:$0xff] %v1141_v19  ;;  %v1145_v21 = vld [vmem:[%s4579_s28 + $0xd50] sm:$0xff] }
  0x80   : > { %1144 = vst [vmem:[%s4587_s29 + $0x6a0] sm:$0xff] %v1143_v20  ;;  %v1147_v22 = vld [vmem:[%s4579_s28 + $0xd60] sm:$0xff]  ;;  %v1149_v23 = vld [vmem:[%s4579_s28 + $0xd70] sm:$0xff]  ;;  %1146 = vst [vmem:[%s4587_s29 + $0x6a8] sm:$0xff] %v1145_v21 }
  0x81   : > { %1148 = vst [vmem:[%s4587_s29 + $0x6b0] sm:$0xff] %v1147_v22  ;;  %1150 = vst [vmem:[%s4587_s29 + $0x6b8] sm:$0xff] %v1149_v23  ;;  %v1151_v24 = vld [vmem:[%s4579_s28 + $0xd80] sm:$0xff]  ;;  %v1153_v25 = vld [vmem:[%s4579_s28 + $0xd90] sm:$0xff] }
  0x82   : > { %v1155_v26 = vld [vmem:[%s4579_s28 + $0xda0] sm:$0xff]  ;;  %1152 = vst [vmem:[%s4587_s29 + $0x6c0] sm:$0xff] %v1151_v24  ;;  %1154 = vst [vmem:[%s4587_s29 + $0x6c8] sm:$0xff] %v1153_v25  ;;  %v1157_v27 = vld [vmem:[%s4579_s28 + $0xdb0] sm:$0xff] }
  0x83   : > { %1156 = vst [vmem:[%s4587_s29 + $0x6d0] sm:$0xff] %v1155_v26  ;;  %v1159_v28 = vld [vmem:[%s4579_s28 + $0xdc0] sm:$0xff]  ;;  %v1161_v29 = vld [vmem:[%s4579_s28 + $0xdd0] sm:$0xff]  ;;  %1158 = vst [vmem:[%s4587_s29 + $0x6d8] sm:$0xff] %v1157_v27 }
  0x84   : > { %1160 = vst [vmem:[%s4587_s29 + $0x6e0] sm:$0xff] %v1159_v28  ;;  %1162 = vst [vmem:[%s4587_s29 + $0x6e8] sm:$0xff] %v1161_v29  ;;  %v1163_v30 = vld [vmem:[%s4579_s28 + $0xde0] sm:$0xff]  ;;  %v1165_v31 = vld [vmem:[%s4579_s28 + $0xdf0] sm:$0xff] }
  0x85   : > { %v1167_v32 = vld [vmem:[%s4579_s28 + $0xe00] sm:$0xff]  ;;  %1164 = vst [vmem:[%s4587_s29 + $0x6f0] sm:$0xff] %v1163_v30  ;;  %1166 = vst [vmem:[%s4587_s29 + $0x6f8] sm:$0xff] %v1165_v31  ;;  %v1169_v33 = vld [vmem:[%s4579_s28 + $0xe10] sm:$0xff] }
  0x86   : > { %1168 = vst [vmem:[%s4587_s29 + $0x700] sm:$0xff] %v1167_v32  ;;  %v1171_v34 = vld [vmem:[%s4579_s28 + $0xe20] sm:$0xff]  ;;  %v1173_v35 = vld [vmem:[%s4579_s28 + $0xe30] sm:$0xff]  ;;  %1170 = vst [vmem:[%s4587_s29 + $0x708] sm:$0xff] %v1169_v33 }
  0x87   : > { %1172 = vst [vmem:[%s4587_s29 + $0x710] sm:$0xff] %v1171_v34  ;;  %1174 = vst [vmem:[%s4587_s29 + $0x718] sm:$0xff] %v1173_v35  ;;  %v1175_v36 = vld [vmem:[%s4579_s28 + $0xe40] sm:$0xff]  ;;  %v1177_v37 = vld [vmem:[%s4579_s28 + $0xe50] sm:$0xff] }
  0x88   : > { %v1179_v38 = vld [vmem:[%s4579_s28 + $0xe60] sm:$0xff]  ;;  %1176 = vst [vmem:[%s4587_s29 + $0x720] sm:$0xff] %v1175_v36  ;;  %1178 = vst [vmem:[%s4587_s29 + $0x728] sm:$0xff] %v1177_v37  ;;  %v1181_v39 = vld [vmem:[%s4579_s28 + $0xe70] sm:$0xff] }
  0x89   : > { %1180 = vst [vmem:[%s4587_s29 + $0x730] sm:$0xff] %v1179_v38  ;;  %v1183_v40 = vld [vmem:[%s4579_s28 + $0xe80] sm:$0xff]  ;;  %v1185_v41 = vld [vmem:[%s4579_s28 + $0xe90] sm:$0xff]  ;;  %1182 = vst [vmem:[%s4587_s29 + $0x738] sm:$0xff] %v1181_v39 }
  0x8a   : > { %1184 = vst [vmem:[%s4587_s29 + $0x740] sm:$0xff] %v1183_v40  ;;  %1186 = vst [vmem:[%s4587_s29 + $0x748] sm:$0xff] %v1185_v41  ;;  %v1187_v42 = vld [vmem:[%s4579_s28 + $0xea0] sm:$0xff]  ;;  %v1189_v43 = vld [vmem:[%s4579_s28 + $0xeb0] sm:$0xff] }
  0x8b   : > { %v1191_v44 = vld [vmem:[%s4579_s28 + $0xec0] sm:$0xff]  ;;  %1188 = vst [vmem:[%s4587_s29 + $0x750] sm:$0xff] %v1187_v42  ;;  %1190 = vst [vmem:[%s4587_s29 + $0x758] sm:$0xff] %v1189_v43  ;;  %v1193_v45 = vld [vmem:[%s4579_s28 + $0xed0] sm:$0xff] }
  0x8c   : > { %1192 = vst [vmem:[%s4587_s29 + $0x760] sm:$0xff] %v1191_v44  ;;  %v1195_v46 = vld [vmem:[%s4579_s28 + $0xee0] sm:$0xff]  ;;  %v1197_v47 = vld [vmem:[%s4579_s28 + $0xef0] sm:$0xff]  ;;  %1194 = vst [vmem:[%s4587_s29 + $0x768] sm:$0xff] %v1193_v45 }
  0x8d   : > { %1196 = vst [vmem:[%s4587_s29 + $0x770] sm:$0xff] %v1195_v46  ;;  %1198 = vst [vmem:[%s4587_s29 + $0x778] sm:$0xff] %v1197_v47  ;;  %v1199_v48 = vld [vmem:[%s4579_s28 + $0xf00] sm:$0xff]  ;;  %v1201_v49 = vld [vmem:[%s4579_s28 + $0xf10] sm:$0xff] }
  0x8e   : > { %v1203_v50 = vld [vmem:[%s4579_s28 + $0xf20] sm:$0xff]  ;;  %1200 = vst [vmem:[%s4587_s29 + $0x780] sm:$0xff] %v1199_v48  ;;  %1202 = vst [vmem:[%s4587_s29 + $0x788] sm:$0xff] %v1201_v49  ;;  %v1205_v51 = vld [vmem:[%s4579_s28 + $0xf30] sm:$0xff] }
  0x8f   : > { %1204 = vst [vmem:[%s4587_s29 + $0x790] sm:$0xff] %v1203_v50  ;;  %v1207_v52 = vld [vmem:[%s4579_s28 + $0xf40] sm:$0xff]  ;;  %v1209_v53 = vld [vmem:[%s4579_s28 + $0xf50] sm:$0xff]  ;;  %1206 = vst [vmem:[%s4587_s29 + $0x798] sm:$0xff] %v1205_v51 }
  0x90   : > { %1208 = vst [vmem:[%s4587_s29 + $0x7a0] sm:$0xff] %v1207_v52  ;;  %1210 = vst [vmem:[%s4587_s29 + $0x7a8] sm:$0xff] %v1209_v53  ;;  %v1211_v54 = vld [vmem:[%s4579_s28 + $0xf60] sm:$0xff]  ;;  %v1213_v55 = vld [vmem:[%s4579_s28 + $0xf70] sm:$0xff] }
  0x91   : > { %v1215_v56 = vld [vmem:[%s4579_s28 + $0xf80] sm:$0xff]  ;;  %1212 = vst [vmem:[%s4587_s29 + $0x7b0] sm:$0xff] %v1211_v54  ;;  %1214 = vst [vmem:[%s4587_s29 + $0x7b8] sm:$0xff] %v1213_v55  ;;  %v1217_v57 = vld [vmem:[%s4579_s28 + $0xf90] sm:$0xff] }
  0x92   : > { %1216 = vst [vmem:[%s4587_s29 + $0x7c0] sm:$0xff] %v1215_v56  ;;  %1218 = vst [vmem:[%s4587_s29 + $0x7c8] sm:$0xff] %v1217_v57 }
  0x93 PF: > { %p3693_p8 = scmp.ge.s32.totalorder %s4508_s16, 1  ;;  %p1223_p9 = scmp.lt.s32.totalorder %s4508_s16, 3 }
  0x95   : > { %p1224_p10 = pnand %p3693_p8, %p1223_p9 }
  0x96   : > { %s1230_s30 = sand.u32 (!%p1224_p10), 1, %s4492_s12   ;;  %v5089_v58 = vld [vmem:[%s5543_s0] sm:$0xff] (!%p1224_p10)  ;;  %vm3024_vm0 = vcmask (!%p1224_p10), 654336  }
  0x97   : > { %1227 = sbr.rel (%p1224_p10) target bundleno = 652 (0x28c), region = 66  ;;  %v5094_v59 = vld [vmem:[%s5543_s0 + $0x40] sm:$0xff] (!%p1224_p10) }
  0x98   : > { %v5099_v60 = vld [vmem:[%s5543_s0 + $0x20] sm:$0xff] (!%p1224_p10)  ;;  %s4051_s10 = smul.u32 (!%p1224_p10), 2000, %s1230_s30  ;;  %v3695_v61 = vcombine.low (!%p1224_p10), %v5089_v58, %v5094_v59  ;;  %v3696_v62 = vcombine.high (!%p1224_p10), %v5089_v58, %v5094_v59 }
  0x99   : > { %v5110_v63 = vld [vmem:[%s5543_s0 + $0x60] sm:$0xff] (!%p1224_p10) }
  0x9a   : > { %v3703_v0 = vcombine.low (!%p1224_p10), %v5099_v60, %v5110_v63  ;;  %v3704_v1 = vcombine.high (!%p1224_p10), %v5099_v60, %v5110_v63  ;;  %3063 = vmatprep.mubr.bf16.mxu1 (!%p1224_p10), %v3696_v62  ;;  %s5116_s19 = scalar_lea.vmem (!%p1224_p10), [#allocation3], %s4051_s10 }
  0x9b   : > { %v4095_v2 = vld [vmem:[%s5116_s19 + $0x4] ss:$8 sps:$4 sm:$0xff] (!%p1224_p10)   ;;  %v4099_v4 = vld [vmem:[%s5116_s19] ss:$8 sps:$4 sm:$0xff] (!%p1224_p10)   ;;  %v4101_v6 = vld [vmem:[%s5116_s19 + $0x14] ss:$8 sps:$4 sm:$0xff] (!%p1224_p10)  }
  0x9c   : > { %3275 = vmatprep.mubr.bf16.mxu0 (!%p1224_p10), %v3704_v1  ;;  %v4097_v3 = vld [vmem:[%s5116_s19 + $0x404] ss:$8 sps:$4 sm:$0xff] (!%p1224_p10)   ;;  %3031 = vmatprep.subr.bf16.mxu1 (!%p1224_p10), %v4095_v2  ;;  %v4100_v5 = vld [vmem:[%s5116_s19 + $0x400] ss:$8 sps:$4 sm:$0xff] (!%p1224_p10)   ;;  %v4103_v7 = vld [vmem:[%s5116_s19 + $0x414] ss:$8 sps:$4 sm:$0xff] (!%p1224_p10)  }
  0x9d   : > { %3243 = vmatprep.subr.bf16.mxu0 (!%p1224_p10), %v4097_v3  ;;  %3032 = vmatpush1.bf16.msra.mxu1 (!%p1224_p10), %v4099_v4  ;;  %v4105_v8 = vld [vmem:[%s5116_s19 + $0x10] ss:$8 sps:$4 sm:$0xff] (!%p1224_p10)   ;;  %v4107_v10 = vld [vmem:[%s5116_s19 + $0x24] ss:$8 sps:$4 sm:$0xff] (!%p1224_p10)   ;;  %v4111_v12 = vld [vmem:[%s5116_s19 + $0x20] ss:$8 sps:$4 sm:$0xff] (!%p1224_p10)  }
  0x9e   : > { %3244 = vmatpush1.bf16.msra.mxu0 %v4100_v5  ;;  %3033 = vmatprep.subr.bf16.mxu1 %v4101_v6  ;;  %v4106_v9 = vld [vmem:[%s5116_s19 + $0x410] ss:$8 sps:$4 sm:$0xff]   ;;  %v4109_v11 = vld [vmem:[%s5116_s19 + $0x424] ss:$8 sps:$4 sm:$0xff]   ;;  %v4112_v13 = vld [vmem:[%s5116_s19 + $0x420] ss:$8 sps:$4 sm:$0xff]  }
  0x9f   : > { %3245 = vmatprep.subr.bf16.mxu0 %v4103_v7  ;;  %v4113_v14 = vld [vmem:[%s5116_s19 + $0x34] ss:$8 sps:$4 sm:$0xff]   ;;  %v4117_v16 = vld [vmem:[%s5116_s19 + $0x30] ss:$8 sps:$4 sm:$0xff]   ;;  %v4119_v18 = vld [vmem:[%s5116_s19 + $0x44] ss:$8 sps:$4 sm:$0xff]  }
  0xa0   : > { %v4115_v15 = vld [vmem:[%s5116_s19 + $0x434] ss:$8 sps:$4 sm:$0xff]   ;;  %v4118_v17 = vld [vmem:[%s5116_s19 + $0x430] ss:$8 sps:$4 sm:$0xff]   ;;  %v4121_v19 = vld [vmem:[%s5116_s19 + $0x444] ss:$8 sps:$4 sm:$0xff]  }
  0xa1   : > { %3034 = vmatpush1.bf16.msra.mxu1 %v4105_v8  ;;  %v4123_v20 = vld [vmem:[%s5116_s19 + $0x40] ss:$8 sps:$4 sm:$0xff]   ;;  %v4125_v22 = vld [vmem:[%s5116_s19 + $0x54] ss:$8 sps:$4 sm:$0xff]   ;;  %v4129_v24 = vld [vmem:[%s5116_s19 + $0x50] ss:$8 sps:$4 sm:$0xff]  }
  0xa2   : > { %3246 = vmatpush1.bf16.msra.mxu0 %v4106_v9  ;;  %3035 = vmatprep.subr.bf16.mxu1 %v4107_v10  ;;  %v4124_v21 = vld [vmem:[%s5116_s19 + $0x440] ss:$8 sps:$4 sm:$0xff]   ;;  %v4127_v23 = vld [vmem:[%s5116_s19 + $0x454] ss:$8 sps:$4 sm:$0xff]   ;;  %v4130_v25 = vld [vmem:[%s5116_s19 + $0x450] ss:$8 sps:$4 sm:$0xff]  }
  0xa3   : > { %3247 = vmatprep.subr.bf16.mxu0 %v4109_v11  ;;  %v4131_v26 = vld [vmem:[%s5116_s19 + $0x64] ss:$8 sps:$4 sm:$0xff]   ;;  %v4135_v28 = vld [vmem:[%s5116_s19 + $0x60] ss:$8 sps:$4 sm:$0xff]   ;;  %v4137_v30 = vld [vmem:[%s5116_s19 + $0x74] ss:$8 sps:$4 sm:$0xff]  }
  0xa4   : > { %v4133_v27 = vld [vmem:[%s5116_s19 + $0x464] ss:$8 sps:$4 sm:$0xff]   ;;  %v4136_v29 = vld [vmem:[%s5116_s19 + $0x460] ss:$8 sps:$4 sm:$0xff]   ;;  %v4139_v31 = vld [vmem:[%s5116_s19 + $0x474] ss:$8 sps:$4 sm:$0xff]  }
  0xa5   : > { %3036 = vmatpush1.bf16.msra.mxu1 %v4111_v12  ;;  %v4141_v32 = vld [vmem:[%s5116_s19 + $0x70] ss:$8 sps:$4 sm:$0xff]   ;;  %v4143_v34 = vld [vmem:[%s5116_s19 + $0x84] ss:$8 sps:$4 sm:$0xff]   ;;  %v4147_v36 = vld [vmem:[%s5116_s19 + $0x80] ss:$8 sps:$4 sm:$0xff]  }
  0xa6   : > { %3248 = vmatpush1.bf16.msra.mxu0 %v4112_v13  ;;  %3037 = vmatprep.subr.bf16.mxu1 %v4113_v14  ;;  %v4142_v33 = vld [vmem:[%s5116_s19 + $0x470] ss:$8 sps:$4 sm:$0xff]   ;;  %v4145_v35 = vld [vmem:[%s5116_s19 + $0x484] ss:$8 sps:$4 sm:$0xff]   ;;  %v4148_v37 = vld [vmem:[%s5116_s19 + $0x480] ss:$8 sps:$4 sm:$0xff]  }
  0xa7   : > { %3249 = vmatprep.subr.bf16.mxu0 %v4115_v15  ;;  %v4149_v38 = vld [vmem:[%s5116_s19 + $0x94] ss:$8 sps:$4 sm:$0xff]   ;;  %v4153_v40 = vld [vmem:[%s5116_s19 + $0x90] ss:$8 sps:$4 sm:$0xff]   ;;  %v4155_v42 = vld [vmem:[%s5116_s19 + $0xa4] ss:$8 sps:$4 sm:$0xff]  }
  0xa8   : > { %v4151_v39 = vld [vmem:[%s5116_s19 + $0x494] ss:$8 sps:$4 sm:$0xff]   ;;  %v4154_v41 = vld [vmem:[%s5116_s19 + $0x490] ss:$8 sps:$4 sm:$0xff]   ;;  %v4157_v43 = vld [vmem:[%s5116_s19 + $0x4a4] ss:$8 sps:$4 sm:$0xff]  }
  0xa9   : > { %3038 = vmatpush1.bf16.msra.mxu1 %v4117_v16  ;;  %v4159_v44 = vld [vmem:[%s5116_s19 + $0xa0] ss:$8 sps:$4 sm:$0xff]   ;;  %v4161_v46 = vld [vmem:[%s5116_s19 + $0xb4] ss:$8 sps:$4 sm:$0xff]   ;;  %v4165_v48 = vld [vmem:[%s5116_s19 + $0xb0] ss:$8 sps:$4 sm:$0xff]  }
  0xaa   : > { %3250 = vmatpush1.bf16.msra.mxu0 %v4118_v17  ;;  %3039 = vmatprep.subr.bf16.mxu1 %v4119_v18  ;;  %v4160_v45 = vld [vmem:[%s5116_s19 + $0x4a0] ss:$8 sps:$4 sm:$0xff]   ;;  %v4163_v47 = vld [vmem:[%s5116_s19 + $0x4b4] ss:$8 sps:$4 sm:$0xff]   ;;  %v4166_v49 = vld [vmem:[%s5116_s19 + $0x4b0] ss:$8 sps:$4 sm:$0xff]  }
  0xab   : > { %3251 = vmatprep.subr.bf16.mxu0 %v4121_v19  ;;  %v4167_v50 = vld [vmem:[%s5116_s19 + $0xc4] ss:$8 sps:$4 sm:$0xff]   ;;  %v4171_v52 = vld [vmem:[%s5116_s19 + $0xc0] ss:$8 sps:$4 sm:$0xff]   ;;  %v4173_v54 = vld [vmem:[%s5116_s19 + $0xd4] ss:$8 sps:$4 sm:$0xff]  }
  0xac   : > { %v4169_v51 = vld [vmem:[%s5116_s19 + $0x4c4] ss:$8 sps:$4 sm:$0xff]   ;;  %v4172_v53 = vld [vmem:[%s5116_s19 + $0x4c0] ss:$8 sps:$4 sm:$0xff]   ;;  %v4175_v55 = vld [vmem:[%s5116_s19 + $0x4d4] ss:$8 sps:$4 sm:$0xff]  }
  0xad   : > { %3040 = vmatpush1.bf16.msra.mxu1 %v4123_v20  ;;  %v4177_v56 = vld [vmem:[%s5116_s19 + $0xd0] ss:$8 sps:$4 sm:$0xff]   ;;  %v4179_v62 = vld [vmem:[%s5116_s19 + $0xe4] ss:$8 sps:$4 sm:$0xff]   ;;  %v4183_v2 = vld [vmem:[%s5116_s19 + $0xe0] ss:$8 sps:$4 sm:$0xff]  }
  0xae   : > { %3252 = vmatpush1.bf16.msra.mxu0 %v4124_v21  ;;  %3041 = vmatprep.subr.bf16.mxu1 %v4125_v22  ;;  %v4178_v57 = vld [vmem:[%s5116_s19 + $0x4d0] ss:$8 sps:$4 sm:$0xff]   ;;  %v4181_v1 = vld [vmem:[%s5116_s19 + $0x4e4] ss:$8 sps:$4 sm:$0xff]   ;;  %v4184_v3 = vld [vmem:[%s5116_s19 + $0x4e0] ss:$8 sps:$4 sm:$0xff]  }
  0xaf   : > { %3253 = vmatprep.subr.bf16.mxu0 %v4127_v23  ;;  %v4185_v4 = vld [vmem:[%s5116_s19 + $0xf4] ss:$8 sps:$4 sm:$0xff]   ;;  %v4189_v6 = vld [vmem:[%s5116_s19 + $0xf0] ss:$8 sps:$4 sm:$0xff]   ;;  %v4193_v8 = vld [vmem:[%s5116_s19 + $0x104] ss:$8 sps:$4 sm:$0xff]  }
  0xb0   : > { %v4187_v5 = vld [vmem:[%s5116_s19 + $0x4f4] ss:$8 sps:$4 sm:$0xff]   ;;  %v4190_v7 = vld [vmem:[%s5116_s19 + $0x4f0] ss:$8 sps:$4 sm:$0xff]   ;;  %v4196_v9 = vld [vmem:[%s5116_s19 + $0x504] ss:$8 sps:$4 sm:$0xff]  }
  0xb1   : > { %3042 = vmatpush1.bf16.msra.mxu1 %v4129_v24  ;;  %v1350_v10 = vld [vmem:[%s5543_s0 + $0x80] sm:$0xff]  ;;  %s3993_s12 = sshll.u32 (%p4566_p6), %s4500_s14, 3 }
  0xb2   : > { %3254 = vmatpush1.bf16.msra.mxu0 %v4130_v25  ;;  %3043 = vmatprep.subr.bf16.mxu1 %v4131_v26  ;;  %v1358_v11 = vld [vmem:[%s5543_s0 + $0xc0] sm:$0xff]  ;;  %s3530_s11 = scalar_lea.vmem (%p4566_p6), %s5546_s3, %s3993_s12 }
  0xb3   : > { %3255 = vmatprep.subr.bf16.mxu0 %v4133_v27  ;;  %v1354_v12 = vld [vmem:[%s5543_s0 + $0xa0] sm:$0xff]  ;;  %v3712_v18 = vcombine.high %v1350_v10, %v1358_v11 }
  0xb4   : > { %v1362_v13 = vld [vmem:[%s5543_s0 + $0xe0] sm:$0xff] }
  0xb5   : > { %3044 = vmatpush1.bf16.msra.mxu1 %v4135_v28  ;;  %v4191_v14 = vld [vmem:[%s5116_s19 + $0x100] ss:$8 sps:$4 sm:$0xff]   ;;  %v4199_v16 = vld [vmem:[%s5116_s19 + $0x114] ss:$8 sps:$4 sm:$0xff]   ;;  %v3720_v19 = vcombine.high %v1354_v12, %v1362_v13  ;;  %v4197_v20 = vld [vmem:[%s5116_s19 + $0x110] ss:$8 sps:$4 sm:$0xff]   ;;  %v3719_v60 = vcombine.low %v1354_v12, %v1362_v13 }
  0xb6   : > { %3256 = vmatpush1.bf16.msra.mxu0 %v4136_v29  ;;  %3045 = vmatprep.subr.bf16.mxu1 %v4137_v30  ;;  %v4194_v15 = vld [vmem:[%s5116_s19 + $0x500] ss:$8 sps:$4 sm:$0xff]   ;;  %v4202_v17 = vld [vmem:[%s5116_s19 + $0x514] ss:$8 sps:$4 sm:$0xff]   ;;  %v4200_v21 = vld [vmem:[%s5116_s19 + $0x510] ss:$8 sps:$4 sm:$0xff]  }
  0xb7   : > { %3257 = vmatprep.subr.bf16.mxu0 %v4139_v31  ;;  %v4205_v22 = vld [vmem:[%s5116_s19 + $0x124] ss:$8 sps:$4 sm:$0xff]   ;;  %v4203_v58 = vld [vmem:[%s5116_s19 + $0x120] ss:$8 sps:$4 sm:$0xff]   ;;  %v4211_v63 = vld [vmem:[%s5116_s19 + $0x134] ss:$8 sps:$4 sm:$0xff]  }
  0xb8   : > { %v4208_v23 = vld [vmem:[%s5116_s19 + $0x524] ss:$8 sps:$4 sm:$0xff]   ;;  %v4206_v59 = vld [vmem:[%s5116_s19 + $0x520] ss:$8 sps:$4 sm:$0xff]   ;;  %v4209_v24 = vld [vmem:[%s5116_s19 + $0x130] ss:$8 sps:$4 sm:$0xff]  }
  0xb9   : > { %3046 = vmatpush1.bf16.msra.mxu1 %v4141_v32  ;;  %v4212_v25 = vld [vmem:[%s5116_s19 + $0x530] ss:$8 sps:$4 sm:$0xff]   ;;  %v4217_v26 = vld [vmem:[%s5116_s19 + $0x144] ss:$8 sps:$4 sm:$0xff]   ;;  %v4215_v28 = vld [vmem:[%s5116_s19 + $0x140] ss:$8 sps:$4 sm:$0xff]  }
  0xba   : > { %3258 = vmatpush1.bf16.msra.mxu0 %v4142_v33  ;;  %3047 = vmatprep.subr.bf16.mxu1 %v4143_v34  ;;  %v4220_v27 = vld [vmem:[%s5116_s19 + $0x544] ss:$8 sps:$4 sm:$0xff]   ;;  %v4218_v29 = vld [vmem:[%s5116_s19 + $0x540] ss:$8 sps:$4 sm:$0xff]   ;;  %v4223_v30 = vld [vmem:[%s5116_s19 + $0x154] ss:$8 sps:$4 sm:$0xff]  }
  0xbb   : > { %3259 = vmatprep.subr.bf16.mxu0 %v4145_v35  ;;  %v4226_v31 = vld [vmem:[%s5116_s19 + $0x554] ss:$8 sps:$4 sm:$0xff]   ;;  %v4221_v32 = vld [vmem:[%s5116_s19 + $0x150] ss:$8 sps:$4 sm:$0xff]   ;;  %v4229_v34 = vld [vmem:[%s5116_s19 + $0x164] ss:$8 sps:$4 sm:$0xff]  }
  0xbc   : > { %v4224_v33 = vld [vmem:[%s5116_s19 + $0x550] ss:$8 sps:$4 sm:$0xff]   ;;  %v4232_v35 = vld [vmem:[%s5116_s19 + $0x564] ss:$8 sps:$4 sm:$0xff]  }
  0xbd   : > { %3048 = vmatpush1.bf16.msra.mxu1 %v4147_v36  ;;  %v5229_v36 = vld [vmem:[%s5543_s0 + $0x8] sm:$0xff] }
  0xbe   : > { %3260 = vmatpush1.bf16.msra.mxu0 %v4148_v37  ;;  %3049 = vmatprep.subr.bf16.mxu1 %v4149_v38  ;;  %v5234_v37 = vld [vmem:[%s5543_s0 + $0x48] sm:$0xff] }
  0xbf   : > { %3261 = vmatprep.subr.bf16.mxu0 %v4151_v39  ;;  %v4227_v38 = vld [vmem:[%s5116_s19 + $0x160] ss:$8 sps:$4 sm:$0xff]   ;;  %v3698_v39 = vcombine.high %v5229_v36, %v5234_v37  ;;  %v4269_v12 = vld [vmem:[%s5116_s19 + $0x1d0] ss:$8 sps:$4 sm:$0xff]  }
  0xc0   : > { %v4272_v13 = vld [vmem:[%s5116_s19 + $0x5d0] ss:$8 sps:$4 sm:$0xff]  }
  0xc1   : > { %3050 = vmatpush1.bf16.msra.mxu1 %v4153_v40  ;;  %v4230_v40 = vld [vmem:[%s5116_s19 + $0x560] ss:$8 sps:$4 sm:$0xff]  }
  0xc2   : > { %3262 = vmatpush1.bf16.msra.mxu0 %v4154_v41  ;;  %3051 = vmatprep.subr.bf16.mxu1 %v4155_v42  ;;  %v5243_v41 = vld [vmem:[%s5543_s0 + $0x28] sm:$0xff] }
  0xc3   : > { %3263 = vmatprep.subr.bf16.mxu0 %v4157_v43  ;;  %v5248_v42 = vld [vmem:[%s5543_s0 + $0x68] sm:$0xff] }
  0xc4   : > { %v4235_v43 = vld [vmem:[%s5116_s19 + $0x174] ss:$8 sps:$4 sm:$0xff]  }
  0xc5   : > { %3052 = vmatpush1.bf16.msra.mxu1 %v4159_v44  ;;  %v3706_v44 = vcombine.high %v5243_v41, %v5248_v42 }
  0xc6   : > { %3264 = vmatpush1.bf16.msra.mxu0 %v4160_v45  ;;  %3053 = vmatprep.subr.bf16.mxu1 %v4161_v46  ;;  %v4238_v45 = vld [vmem:[%s5116_s19 + $0x574] ss:$8 sps:$4 sm:$0xff]   ;;  %v4233_v46 = vld [vmem:[%s5116_s19 + $0x170] ss:$8 sps:$4 sm:$0xff]  }
  0xc7   : > { %3265 = vmatprep.subr.bf16.mxu0 %v4163_v47  ;;  %v4236_v47 = vld [vmem:[%s5116_s19 + $0x570] ss:$8 sps:$4 sm:$0xff]  }
  0xc9   : > { %3054 = vmatpush1.bf16.msra.mxu1 %v4165_v48  ;;  %v4241_v48 = vld [vmem:[%s5116_s19 + $0x184] ss:$8 sps:$4 sm:$0xff]  }
  0xca   : > { %3266 = vmatpush1.bf16.msra.mxu0 %v4166_v49  ;;  %3055 = vmatprep.subr.bf16.mxu1 %v4167_v50  ;;  %v4244_v49 = vld [vmem:[%s5116_s19 + $0x584] ss:$8 sps:$4 sm:$0xff]   ;;  %v4239_v50 = vld [vmem:[%s5116_s19 + $0x180] ss:$8 sps:$4 sm:$0xff]  }
  0xcb   : > { %3267 = vmatprep.subr.bf16.mxu0 %v4169_v51  ;;  %v4242_v51 = vld [vmem:[%s5116_s19 + $0x580] ss:$8 sps:$4 sm:$0xff]  }
  0xcd   : > { %3056 = vmatpush1.bf16.msra.mxu1 %v4171_v52  ;;  %v4247_v52 = vld [vmem:[%s5116_s19 + $0x194] ss:$8 sps:$4 sm:$0xff]  }
  0xce   : > { %3268 = vmatpush1.bf16.msra.mxu0 %v4172_v53  ;;  %3057 = vmatprep.subr.bf16.mxu1 %v4173_v54  ;;  %v4250_v53 = vld [vmem:[%s5116_s19 + $0x594] ss:$8 sps:$4 sm:$0xff]   ;;  %v4245_v54 = vld [vmem:[%s5116_s19 + $0x190] ss:$8 sps:$4 sm:$0xff]  }
  0xcf   : > { %3269 = vmatprep.subr.bf16.mxu0 %v4175_v55  ;;  %v4248_v55 = vld [vmem:[%s5116_s19 + $0x590] ss:$8 sps:$4 sm:$0xff]  }
  0xd1   : > { %3058 = vmatpush1.bf16.msra.mxu1 %v4177_v56  ;;  %v4253_v56 = vld [vmem:[%s5116_s19 + $0x1a4] ss:$8 sps:$4 sm:$0xff]  }
  0xd2   : > { %3270 = vmatpush1.bf16.msra.mxu0 %v4178_v57  ;;  %3059 = vmatprep.subr.bf16.mxu1 %v4179_v62  ;;  %v4256_v57 = vld [vmem:[%s5116_s19 + $0x5a4] ss:$8 sps:$4 sm:$0xff]   ;;  %v4251_v62 = vld [vmem:[%s5116_s19 + $0x1a0] ss:$8 sps:$4 sm:$0xff]  }
  0xd3   : > { %3271 = vmatprep.subr.bf16.mxu0 %v4181_v1  ;;  %v4254_v1 = vld [vmem:[%s5116_s19 + $0x5a0] ss:$8 sps:$4 sm:$0xff]  }
  0xd5   : > { %3060 = vmatpush1.bf16.msra.mxu1 %v4183_v2  ;;  %v4259_v2 = vld [vmem:[%s5116_s19 + $0x1b4] ss:$8 sps:$4 sm:$0xff]  }
  0xd6   : > { %3272 = vmatpush1.bf16.msra.mxu0 %v4184_v3  ;;  %3061 = vmatprep.subr.bf16.mxu1 %v4185_v4  ;;  %v4262_v3 = vld [vmem:[%s5116_s19 + $0x5b4] ss:$8 sps:$4 sm:$0xff]   ;;  %v4257_v4 = vld [vmem:[%s5116_s19 + $0x1b0] ss:$8 sps:$4 sm:$0xff]  }
  0xd7   : > { %3273 = vmatprep.subr.bf16.mxu0 %v4187_v5  ;;  %v4260_v5 = vld [vmem:[%s5116_s19 + $0x5b0] ss:$8 sps:$4 sm:$0xff]  }
  0xd9   : > { %3062 = vmatpush1.bf16.msra.mxu1 %v4189_v6  ;;  %v4265_v6 = vld [vmem:[%s5116_s19 + $0x1c4] ss:$8 sps:$4 sm:$0xff]  }
  0xda   : > { %3274 = vmatpush1.bf16.msra.mxu0 %v4190_v7  ;;  %3084 = vmatprep.subr.bf16.mxu1 %v4193_v8  ;;  %v4268_v7 = vld [vmem:[%s5116_s19 + $0x5c4] ss:$8 sps:$4 sm:$0xff]   ;;  %v4263_v8 = vld [vmem:[%s5116_s19 + $0x1c0] ss:$8 sps:$4 sm:$0xff]  }
  0xdb   : > { %3296 = vmatprep.subr.bf16.mxu0 %v4196_v9  ;;  %v4266_v9 = vld [vmem:[%s5116_s19 + $0x5c0] ss:$8 sps:$4 sm:$0xff]  }
  0xdc   : > { %3064 = vmatmul.mubr.bf16.vlgmr.msra.gmra.mrb[0].mxu1 %v3695_v61  ;;  %v3711_v61 = vcombine.low %v1350_v10, %v1358_v11  ;;  %v4271_v10 = vld [vmem:[%s5116_s19 + $0x1d4] ss:$8 sps:$4 sm:$0xff]  }
  0xdd   : > { %3276 = vmatmul.mubr.bf16.vlgmr.msra.gmra.mrb[0].mxu0 %v3703_v0  ;;  %3085 = vmatpush1.bf16.msra.mxu1 %v4191_v14  ;;  %v4214_v0 = vld [vmem:[%s5116_s19 + $0x534] ss:$8 sps:$4 sm:$0xff]   ;;  %v4277_v14 = vld [vmem:[%s5116_s19 + $0x1e4] ss:$8 sps:$4 sm:$0xff]  }
  0xde   : > { %3297 = vmatpush1.bf16.msra.mxu0 %v4194_v15  ;;  %3086 = vmatprep.subr.bf16.mxu1 %v4199_v16  ;;  %v4274_v11 = vld [vmem:[%s5116_s19 + $0x5d4] ss:$8 sps:$4 sm:$0xff]   ;;  %v4280_v15 = vld [vmem:[%s5116_s19 + $0x5e4] ss:$8 sps:$4 sm:$0xff]   ;;  %v4275_v16 = vld [vmem:[%s5116_s19 + $0x1e0] ss:$8 sps:$4 sm:$0xff]  }
  0xdf   : > { %3298 = vmatprep.subr.bf16.mxu0 %v4202_v17  ;;  %3073 = vmatprep.mubr.bf16.mxu1 %v3712_v18  ;;  %v4278_v17 = vld [vmem:[%s5116_s19 + $0x5e0] ss:$8 sps:$4 sm:$0xff]   ;;  %v4283_v18 = vld [vmem:[%s5116_s19 + $0x1f4] ss:$8 sps:$4 sm:$0xff]  }
  0xe0   : > { %3285 = vmatprep.mubr.bf16.mxu0 %v3720_v19  ;;  %v4286_v19 = vld [vmem:[%s5116_s19 + $0x5f4] ss:$8 sps:$4 sm:$0xff]  }
  0xe1   : > { %3087 = vmatpush1.bf16.msra.mxu1 %v4197_v20  ;;  %v4281_v20 = vld [vmem:[%s5116_s19 + $0x1f0] ss:$8 sps:$4 sm:$0xff]  }
  0xe2   : > { %3299 = vmatpush1.bf16.msra.mxu0 %v4200_v21  ;;  %3088 = vmatprep.subr.bf16.mxu1 %v4205_v22  ;;  %v4284_v21 = vld [vmem:[%s5116_s19 + $0x5f0] ss:$8 sps:$4 sm:$0xff]   ;;  %v4289_v22 = vld [vmem:[%s5116_s19 + $0x204] ss:$8 sps:$4 sm:$0xff]  }
  0xe3   : > { %3300 = vmatprep.subr.bf16.mxu0 %v4208_v23  ;;  %v4292_v23 = vld [vmem:[%s5116_s19 + $0x604] ss:$8 sps:$4 sm:$0xff]  }
  0xe4   : > { %3074 = vmatmul.mubr.bf16.gmra.mrb[4].mxu1 %v3711_v61  ;;  %v1351_v61 = vld [vmem:[%s5543_s0 + $0x88] sm:$0xff] }
  0xe5   : > { %3286 = vmatmul.mubr.bf16.gmra.mrb[4].mxu0 %v3719_v60  ;;  %3089 = vmatpush1.bf16.msra.mxu1 %v4203_v58  ;;  %v4287_v58 = vld [vmem:[%s5116_s19 + $0x200] ss:$8 sps:$4 sm:$0xff]  }
  0xe6   : > { %3301 = vmatpush1.bf16.msra.mxu0 %v4206_v59  ;;  %3090 = vmatprep.subr.bf16.mxu1 %v4211_v63  ;;  %v4290_v59 = vld [vmem:[%s5116_s19 + $0x600] ss:$8 sps:$4 sm:$0xff]   ;;  %v3697_v63 = vcombine.low %v5229_v36, %v5234_v37 }
  0xe7   : > { %3302 = vmatprep.subr.bf16.mxu0 %v4214_v0  ;;  %3116 = vmatprep.mubr.bf16.mxu1 %v3698_v39  ;;  %v1359_v60 = vld [vmem:[%s5543_s0 + $0xc8] sm:$0xff]  ;;  %v3705_v0 = vcombine.low %v5243_v41, %v5248_v42  ;;  %v5319_v36 = vld [vmem:[%s5543_s0 + $0x10] sm:$0xff] }
  0xe8   : > { %3328 = vmatprep.mubr.bf16.mxu0 %v3706_v44  ;;  %v5324_v37 = vld [vmem:[%s5543_s0 + $0x50] sm:$0xff] }
  0xe9   : > { %3091 = vmatpush1.bf16.msra.mxu1 %v4209_v24  ;;  %v1355_v24 = vld [vmem:[%s5543_s0 + $0xa8] sm:$0xff]  ;;  %v5334_v41 = vld [vmem:[%s5543_s0 + $0x70] sm:$0xff]  ;;  %v3700_v44 = vcombine.high %v5319_v36, %v5324_v37 }
  0xea   : > { %3303 = vmatpush1.bf16.msra.mxu0 %v4212_v25  ;;  %3092 = vmatprep.subr.bf16.mxu1 %v4217_v26  ;;  %v1363_v25 = vld [vmem:[%s5543_s0 + $0xe8] sm:$0xff] }
  0xeb   : > { %3304 = vmatprep.subr.bf16.mxu0 %v4220_v27  ;;  %v4295_v26 = vld [vmem:[%s5116_s19 + $0x214] ss:$8 sps:$4 sm:$0xff]   ;;  %v3721_v39 = vcombine.low %v1355_v24, %v1363_v25 }
  0xec   : > { %v4298_v27 = vld [vmem:[%s5116_s19 + $0x614] ss:$8 sps:$4 sm:$0xff]  }
  0xed   : > { %3093 = vmatpush1.bf16.msra.mxu1 %v4215_v28  ;;  %v3714_v28 = vcombine.high %v1351_v61, %v1359_v60  ;;  %v4307_v42 = vld [vmem:[%s5116_s19 + $0x234] ss:$8 sps:$4 sm:$0xff]  }
  0xee   : > { %3305 = vmatpush1.bf16.msra.mxu0 %v4218_v29  ;;  %3094 = vmatprep.subr.bf16.mxu1 %v4223_v30  ;;  %v3722_v29 = vcombine.high %v1355_v24, %v1363_v25  ;;  %v4293_v30 = vld [vmem:[%s5116_s19 + $0x210] ss:$8 sps:$4 sm:$0xff]   ;;  %v4367_v24 = vld [vmem:[%s5116_s19 + $0x2d4] ss:$8 sps:$4 sm:$0xff]  }
  0xef   : > { %3306 = vmatprep.subr.bf16.mxu0 %v4226_v31  ;;  %v4296_v31 = vld [vmem:[%s5116_s19 + $0x610] ss:$8 sps:$4 sm:$0xff]   ;;  %v4370_v25 = vld [vmem:[%s5116_s19 + $0x6d4] ss:$8 sps:$4 sm:$0xff]  }
  0xf1   : > { %3095 = vmatpush1.bf16.msra.mxu1 %v4221_v32  ;;  %v4301_v32 = vld [vmem:[%s5116_s19 + $0x224] ss:$8 sps:$4 sm:$0xff]  }
  0xf2   : > { %3307 = vmatpush1.bf16.msra.mxu0 %v4224_v33  ;;  %3096 = vmatprep.subr.bf16.mxu1 %v4229_v34  ;;  %v4304_v33 = vld [vmem:[%s5116_s19 + $0x624] ss:$8 sps:$4 sm:$0xff]   ;;  %v4299_v34 = vld [vmem:[%s5116_s19 + $0x220] ss:$8 sps:$4 sm:$0xff]  }
  0xf3   : > { %3308 = vmatprep.subr.bf16.mxu0 %v4232_v35  ;;  %v4302_v35 = vld [vmem:[%s5116_s19 + $0x620] ss:$8 sps:$4 sm:$0xff]  }
  0xf5   : > { %3097 = vmatpush1.bf16.msra.mxu1 %v4227_v38  ;;  %v3713_v38 = vcombine.low %v1351_v61, %v1359_v60  ;;  %v1296_v61 = vld [vmem:[%s5545_s2 + $0x10] sm:$0xff] }
  0xf6   : > { %3309 = vmatpush1.bf16.msra.mxu0 %v4230_v40  ;;  %3098 = vmatprep.subr.bf16.mxu1 %v4235_v43  ;;  %v5329_v40 = vld [vmem:[%s5543_s0 + $0x30] sm:$0xff] }
  0xf7   : > { %3310 = vmatprep.subr.bf16.mxu0 %v4238_v45  ;;  %v4310_v43 = vld [vmem:[%s5116_s19 + $0x634] ss:$8 sps:$4 sm:$0xff]   ;;  %v3708_v45 = vcombine.high %v5329_v40, %v5334_v41  ;;  %v4359_v60 = vld [vmem:[%s5116_s19 + $0x2c0] ss:$8 sps:$4 sm:$0xff]  }
  0xf9   : > { %3099 = vmatpush1.bf16.msra.mxu1 %v4233_v46  ;;  %v4305_v46 = vld [vmem:[%s5116_s19 + $0x230] ss:$8 sps:$4 sm:$0xff]  }
  0xfa   : > { %3311 = vmatpush1.bf16.msra.mxu0 %v4236_v47  ;;  %3100 = vmatprep.subr.bf16.mxu1 %v4241_v48  ;;  %v4308_v47 = vld [vmem:[%s5116_s19 + $0x630] ss:$8 sps:$4 sm:$0xff]   ;;  %v4313_v48 = vld [vmem:[%s5116_s19 + $0x244] ss:$8 sps:$4 sm:$0xff]  }
  0xfb   : > { %3312 = vmatprep.subr.bf16.mxu0 %v4244_v49  ;;  %v4316_v49 = vld [vmem:[%s5116_s19 + $0x644] ss:$8 sps:$4 sm:$0xff]  }
  0xfd   : > { %3101 = vmatpush1.bf16.msra.mxu1 %v4239_v50  ;;  %v4311_v50 = vld [vmem:[%s5116_s19 + $0x240] ss:$8 sps:$4 sm:$0xff]  }
  0xfe   : > { %3313 = vmatpush1.bf16.msra.mxu0 %v4242_v51  ;;  %3102 = vmatprep.subr.bf16.mxu1 %v4247_v52  ;;  %v4314_v51 = vld [vmem:[%s5116_s19 + $0x640] ss:$8 sps:$4 sm:$0xff]   ;;  %v4510_v52 = vmov 0  }
  0xff   : > { %3314 = vmatprep.subr.bf16.mxu0 %v4250_v53  ;;  %4093 = vset.pattern.permute.xlu0 %v4510_v52  ;;  %v4319_v53 = vld [vmem:[%s5116_s19 + $0x254] ss:$8 sps:$4 sm:$0xff]  }
 0x100   : > { %4094 = vset.pattern.permute.xlu1 %v4510_v52  ;;  %v4392_v52 = vld [vmem:[%s5116_s19 + $0x710] ss:$8 sps:$4 sm:$0xff]  }
 0x101   : > { %3103 = vmatpush1.bf16.msra.mxu1 %v4245_v54  ;;  %v4322_v54 = vld [vmem:[%s5116_s19 + $0x654] ss:$8 sps:$4 sm:$0xff]   ;;  %1310 = vperm.xlu1 %4094, %v1296_v61   ;;  %v4428_v61 = vld [vmem:[%s5116_s19 + $0x770] ss:$8 sps:$4 sm:$0xff]  }
 0x102   : > { %3315 = vmatpush1.bf16.msra.mxu0 %v4248_v55  ;;  %3104 = vmatprep.subr.bf16.mxu1 %v4253_v56  ;;  %v4317_v55 = vld [vmem:[%s5116_s19 + $0x250] ss:$8 sps:$4 sm:$0xff]  }
 0x103   : > { %3316 = vmatprep.subr.bf16.mxu0 %v4256_v57  ;;  %v4320_v56 = vld [vmem:[%s5116_s19 + $0x650] ss:$8 sps:$4 sm:$0xff]   ;;  %v4325_v57 = vld [vmem:[%s5116_s19 + $0x264] ss:$8 sps:$4 sm:$0xff]  }
 0x105   : > { %3105 = vmatpush1.bf16.msra.mxu1 %v4251_v62  ;;  %v4328_v62 = vld [vmem:[%s5116_s19 + $0x664] ss:$8 sps:$4 sm:$0xff]  }
 0x106   : > { %3317 = vmatpush1.bf16.msra.mxu0 %v4254_v1  ;;  %3106 = vmatprep.subr.bf16.mxu1 %v4259_v2  ;;  %v4323_v1 = vld [vmem:[%s5116_s19 + $0x260] ss:$8 sps:$4 sm:$0xff]  }
 0x107   : > { %3318 = vmatprep.subr.bf16.mxu0 %v4262_v3  ;;  %v4326_v2 = vld [vmem:[%s5116_s19 + $0x660] ss:$8 sps:$4 sm:$0xff]   ;;  %v4331_v3 = vld [vmem:[%s5116_s19 + $0x274] ss:$8 sps:$4 sm:$0xff]  }
 0x109   : > { %3107 = vmatpush1.bf16.msra.mxu1 %v4257_v4  ;;  %v4334_v4 = vld [vmem:[%s5116_s19 + $0x674] ss:$8 sps:$4 sm:$0xff]  }
 0x10a   : > { %3319 = vmatpush1.bf16.msra.mxu0 %v4260_v5  ;;  %3108 = vmatprep.subr.bf16.mxu1 %v4265_v6  ;;  %v4329_v5 = vld [vmem:[%s5116_s19 + $0x270] ss:$8 sps:$4 sm:$0xff]  }
 0x10b   : > { %3320 = vmatprep.subr.bf16.mxu0 %v4268_v7  ;;  %v4332_v6 = vld [vmem:[%s5116_s19 + $0x670] ss:$8 sps:$4 sm:$0xff]   ;;  %v4337_v7 = vld [vmem:[%s5116_s19 + $0x284] ss:$8 sps:$4 sm:$0xff]  }
 0x10d   : > { %3109 = vmatpush1.bf16.msra.mxu1 %v4263_v8  ;;  %v4340_v8 = vld [vmem:[%s5116_s19 + $0x684] ss:$8 sps:$4 sm:$0xff]  }
 0x10e   : > { %3321 = vmatpush1.bf16.msra.mxu0 %v4266_v9  ;;  %3110 = vmatprep.subr.bf16.mxu1 %v4271_v10  ;;  %v4335_v9 = vld [vmem:[%s5116_s19 + $0x280] ss:$8 sps:$4 sm:$0xff]  }
 0x10f   : > { %3322 = vmatprep.subr.bf16.mxu0 %v4274_v11  ;;  %v4338_v10 = vld [vmem:[%s5116_s19 + $0x680] ss:$8 sps:$4 sm:$0xff]   ;;  %v4343_v11 = vld [vmem:[%s5116_s19 + $0x294] ss:$8 sps:$4 sm:$0xff]  }
 0x111   : > { %3111 = vmatpush1.bf16.msra.mxu1 %v4269_v12  ;;  %v4346_v12 = vld [vmem:[%s5116_s19 + $0x694] ss:$8 sps:$4 sm:$0xff]  }
 0x112   : > { %3323 = vmatpush1.bf16.msra.mxu0 %v4272_v13  ;;  %3112 = vmatprep.subr.bf16.mxu1 %v4277_v14  ;;  %v4341_v13 = vld [vmem:[%s5116_s19 + $0x290] ss:$8 sps:$4 sm:$0xff]  }
 0x113   : > { %3324 = vmatprep.subr.bf16.mxu0 %v4280_v15  ;;  %v4344_v14 = vld [vmem:[%s5116_s19 + $0x690] ss:$8 sps:$4 sm:$0xff]   ;;  %v4349_v15 = vld [vmem:[%s5116_s19 + $0x2a4] ss:$8 sps:$4 sm:$0xff]  }
 0x115   : > { %3113 = vmatpush1.bf16.msra.mxu1 %v4275_v16  ;;  %v4352_v16 = vld [vmem:[%s5116_s19 + $0x6a4] ss:$8 sps:$4 sm:$0xff]  }
 0x116   : > { %3325 = vmatpush1.bf16.msra.mxu0 %v4278_v17  ;;  %3114 = vmatprep.subr.bf16.mxu1 %v4283_v18  ;;  %v4347_v17 = vld [vmem:[%s5116_s19 + $0x2a0] ss:$8 sps:$4 sm:$0xff]  }
 0x117   : > { %3326 = vmatprep.subr.bf16.mxu0 %v4286_v19  ;;  %v4350_v18 = vld [vmem:[%s5116_s19 + $0x6a0] ss:$8 sps:$4 sm:$0xff]   ;;  %v4355_v19 = vld [vmem:[%s5116_s19 + $0x2b4] ss:$8 sps:$4 sm:$0xff]  }
 0x119   : > { %3115 = vmatpush1.bf16.msra.mxu1 %v4281_v20  ;;  %v4358_v20 = vld [vmem:[%s5116_s19 + $0x6b4] ss:$8 sps:$4 sm:$0xff]  }
 0x11a   : > { %3327 = vmatpush1.bf16.msra.mxu0 %v4284_v21  ;;  %3137 = vmatprep.subr.bf16.mxu1 %v4289_v22  ;;  %v4353_v21 = vld [vmem:[%s5116_s19 + $0x2b0] ss:$8 sps:$4 sm:$0xff]  }
 0x11b   : > { %3349 = vmatprep.subr.bf16.mxu0 %v4292_v23  ;;  %v4356_v22 = vld [vmem:[%s5116_s19 + $0x6b0] ss:$8 sps:$4 sm:$0xff]   ;;  %v4361_v23 = vld [vmem:[%s5116_s19 + $0x2c4] ss:$8 sps:$4 sm:$0xff]  }
 0x11c   : > { %3117 = vmatmul.mubr.bf16.vlgmr.msra.gmra.mrb[0].mxu1 %v3697_v63  ;;  %v4362_v63 = vld [vmem:[%s5116_s19 + $0x6c0] ss:$8 sps:$4 sm:$0xff]  }
 0x11d   : > { %3329 = vmatmul.mubr.bf16.vlgmr.msra.gmra.mrb[0].mxu0 %v3705_v0  ;;  %3138 = vmatpush1.bf16.msra.mxu1 %v4287_v58  ;;  %v4364_v58 = vld [vmem:[%s5116_s19 + $0x6c4] ss:$8 sps:$4 sm:$0xff]  }
 0x11e   : > { %3350 = vmatpush1.bf16.msra.mxu0 %v4290_v59  ;;  %3139 = vmatprep.subr.bf16.mxu1 %v4295_v26  ;;  %v1294_v59 = vld [vmem:[%s5545_s2] sm:$0xff]  ;;  %v1295_v0 = vld [vmem:[%s5545_s2 + $0x8] sm:$0xff]  ;;  %v1297_v26 = vld [vmem:[%s5545_s2 + $0x18] sm:$0xff] }
 0x11f   : > { %3351 = vmatprep.subr.bf16.mxu0 %v4298_v27  ;;  %3126 = vmatprep.mubr.bf16.mxu1 %v3714_v28  ;;  %v4365_v27 = vld [vmem:[%s5116_s19 + $0x2d0] ss:$8 sps:$4 sm:$0xff]  }
 0x120   : > { %3338 = vmatprep.mubr.bf16.mxu0 %v3722_v29  ;;  %1300 = vperm.xlu0 %4093, %v1294_v59   ;;  %v4368_v28 = vld [vmem:[%s5116_s19 + $0x6d0] ss:$8 sps:$4 sm:$0xff]   ;;  %v4373_v29 = vld [vmem:[%s5116_s19 + $0x2e4] ss:$8 sps:$4 sm:$0xff]  }
 0x121   : > { %3140 = vmatpush1.bf16.msra.mxu1 %v4293_v30  ;;  %v4376_v30 = vld [vmem:[%s5116_s19 + $0x6e4] ss:$8 sps:$4 sm:$0xff]   ;;  %1315 = vperm.xlu1 %4094, %v1297_v26   ;;  %v4425_v59 = vld [vmem:[%s5116_s19 + $0x370] ss:$8 sps:$4 sm:$0xff]   ;;  %v4442_v26 = vld [vmem:[%s5116_s19 + $0x794] ss:$8 sps:$4 sm:$0xff]  }
 0x122   : > { %3352 = vmatpush1.bf16.msra.mxu0 %v4296_v31  ;;  %3141 = vmatprep.subr.bf16.mxu1 %v4301_v32  ;;  %v4371_v31 = vld [vmem:[%s5116_s19 + $0x2e0] ss:$8 sps:$4 sm:$0xff]  }
 0x123   : > { %3353 = vmatprep.subr.bf16.mxu0 %v4304_v33  ;;  %v4374_v32 = vld [vmem:[%s5116_s19 + $0x6e0] ss:$8 sps:$4 sm:$0xff]   ;;  %v4379_v33 = vld [vmem:[%s5116_s19 + $0x2f4] ss:$8 sps:$4 sm:$0xff]  }
 0x124   : > { %3127 = vmatmul.mubr.bf16.gmra.mrb[4].mxu1 %v3713_v38  ;;  %1305 = vperm.xlu0 %4093, %v1295_v0   ;;  %v4380_v38 = vld [vmem:[%s5116_s19 + $0x6f0] ss:$8 sps:$4 sm:$0xff]   ;;  %v4431_v0 = vld [vmem:[%s5116_s19 + $0x380] ss:$8 sps:$4 sm:$0xff]  }
 0x125   : > { %3339 = vmatmul.mubr.bf16.gmra.mrb[4].mxu0 %v3721_v39  ;;  %3142 = vmatpush1.bf16.msra.mxu1 %v4299_v34  ;;  %v4382_v34 = vld [vmem:[%s5116_s19 + $0x6f4] ss:$8 sps:$4 sm:$0xff]   ;;  %v4385_v39 = vld [vmem:[%s5116_s19 + $0x304] ss:$8 sps:$4 sm:$0xff]  }
 0x126   : > { %3354 = vmatpush1.bf16.msra.mxu0 %v4302_v35  ;;  %3143 = vmatprep.subr.bf16.mxu1 %v4307_v42  ;;  %v4377_v35 = vld [vmem:[%s5116_s19 + $0x2f0] ss:$8 sps:$4 sm:$0xff]   ;;  %v4388_v42 = vld [vmem:[%s5116_s19 + $0x704] ss:$8 sps:$4 sm:$0xff]  }
 0x127   : > { %3355 = vmatprep.subr.bf16.mxu0 %v4310_v43  ;;  %3169 = vmatprep.mubr.bf16.mxu1 %v3700_v44  ;;  %v1356_v43 = vld [vmem:[%s5543_s0 + $0xb0] sm:$0xff]  ;;  %v3699_v44 = vcombine.low %v5319_v36, %v5324_v37 }
 0x128   : > { %3381 = vmatprep.mubr.bf16.mxu0 %v3708_v45  ;;  %v3707_v45 = vcombine.low %v5329_v40, %v5334_v41  ;;  %v4383_v36 = vld [vmem:[%s5116_s19 + $0x300] ss:$8 sps:$4 sm:$0xff]   ;;  %v4391_v40 = vld [vmem:[%s5116_s19 + $0x314] ss:$8 sps:$4 sm:$0xff]  }
 0x129   : > { %3144 = vmatpush1.bf16.msra.mxu1 %v4305_v46  ;;  %v1364_v46 = vld [vmem:[%s5543_s0 + $0xf0] sm:$0xff] }
 0x12a   : > { %3356 = vmatpush1.bf16.msra.mxu0 %v4308_v47  ;;  %3145 = vmatprep.subr.bf16.mxu1 %v4313_v48  ;;  %v1352_v47 = vld [vmem:[%s5543_s0 + $0x90] sm:$0xff] }
 0x12b   : > { %3357 = vmatprep.subr.bf16.mxu0 %v4316_v49  ;;  %v1360_v48 = vld [vmem:[%s5543_s0 + $0xd0] sm:$0xff]  ;;  %v3724_v49 = vcombine.high %v1356_v43, %v1364_v46 }
 0x12c   : > { %v4386_v37 = vld [vmem:[%s5116_s19 + $0x700] ss:$8 sps:$4 sm:$0xff]   ;;  %v4394_v41 = vld [vmem:[%s5116_s19 + $0x714] ss:$8 sps:$4 sm:$0xff]  }
 0x12d   : > { %3146 = vmatpush1.bf16.msra.mxu1 %v4311_v50  ;;  %v3716_v50 = vcombine.high %v1352_v47, %v1360_v48 }
 0x12e   : > { %3358 = vmatpush1.bf16.msra.mxu0 %v4314_v51  ;;  %3147 = vmatprep.subr.bf16.mxu1 %v4319_v53  ;;  %v4389_v51 = vld [vmem:[%s5116_s19 + $0x310] ss:$8 sps:$4 sm:$0xff]   ;;  %v4397_v53 = vld [vmem:[%s5116_s19 + $0x324] ss:$8 sps:$4 sm:$0xff]  }
 0x12f   : > { %3359 = vmatprep.subr.bf16.mxu0 %v4322_v54  ;;  %v4400_v54 = vld [vmem:[%s5116_s19 + $0x724] ss:$8 sps:$4 sm:$0xff]  }
 0x131   : > { %3148 = vmatpush1.bf16.msra.mxu1 %v4317_v55  ;;  %v5433_v55 = vld [vmem:[%s5543_s0 + $0x38] sm:$0xff] }
 0x132   : > { %3360 = vmatpush1.bf16.msra.mxu0 %v4320_v56  ;;  %3149 = vmatprep.subr.bf16.mxu1 %v4325_v57  ;;  %v3723_v56 = vcombine.low %v1356_v43, %v1364_v46  ;;  %v5438_v57 = vld [vmem:[%s5543_s0 + $0x78] sm:$0xff] }
 0x133   : > { %3361 = vmatprep.subr.bf16.mxu0 %v4328_v62  ;;  %v3715_v62 = vcombine.low %v1352_v47, %v1360_v48  ;;  %v4455_v43 = vld [vmem:[%s5116_s19 + $0x3c0] ss:$8 sps:$4 sm:$0xff]   ;;  %v3709_v48 = vcombine.low %v5433_v55, %v5438_v57 }
 0x134   : > { %v1357_v46 = vld [vmem:[%s5543_s0 + $0xb8] sm:$0xff] }
 0x135   : > { %3150 = vmatpush1.bf16.msra.mxu1 %v4323_v1  ;;  %v5443_v1 = vld [vmem:[%s5543_s0 + $0x18] sm:$0xff] }
 0x136   : > { %3362 = vmatpush1.bf16.msra.mxu0 %v4326_v2  ;;  %3151 = vmatprep.subr.bf16.mxu1 %v4331_v3  ;;  %v5448_v2 = vld [vmem:[%s5543_s0 + $0x58] sm:$0xff] }
 0x137   : > { %3363 = vmatprep.subr.bf16.mxu0 %v4334_v4  ;;  %v4395_v3 = vld [vmem:[%s5116_s19 + $0x320] ss:$8 sps:$4 sm:$0xff]  }
 0x138   : > { %v4398_v4 = vld [vmem:[%s5116_s19 + $0x720] ss:$8 sps:$4 sm:$0xff]  }
 0x139   : > { %3152 = vmatpush1.bf16.msra.mxu1 %v4329_v5  ;;  %v4403_v5 = vld [vmem:[%s5116_s19 + $0x334] ss:$8 sps:$4 sm:$0xff]  }
 0x13a   : > { %3364 = vmatpush1.bf16.msra.mxu0 %v4332_v6  ;;  %3153 = vmatprep.subr.bf16.mxu1 %v4337_v7  ;;  %v4406_v6 = vld [vmem:[%s5116_s19 + $0x734] ss:$8 sps:$4 sm:$0xff]   ;;  %v3710_v7 = vcombine.high %v5433_v55, %v5438_v57 }
 0x13b   : > { %3365 = vmatprep.subr.bf16.mxu0 %v4340_v8  ;;  %v3702_v8 = vcombine.high %v5443_v1, %v5448_v2  ;;  %v1365_v47 = vld [vmem:[%s5543_s0 + $0xf8] sm:$0xff] }
 0x13d   : > { %3154 = vmatpush1.bf16.msra.mxu1 %v4335_v9  ;;  %v4401_v9 = vld [vmem:[%s5116_s19 + $0x330] ss:$8 sps:$4 sm:$0xff]  }
 0x13e   : > { %3366 = vmatpush1.bf16.msra.mxu0 %v4338_v10  ;;  %3155 = vmatprep.subr.bf16.mxu1 %v4343_v11  ;;  %v4404_v10 = vld [vmem:[%s5116_s19 + $0x730] ss:$8 sps:$4 sm:$0xff]   ;;  %v4409_v11 = vld [vmem:[%s5116_s19 + $0x344] ss:$8 sps:$4 sm:$0xff]  }
 0x13f   : > { %3367 = vmatprep.subr.bf16.mxu0 %v4346_v12  ;;  %v4412_v12 = vld [vmem:[%s5116_s19 + $0x744] ss:$8 sps:$4 sm:$0xff]  }
 0x141   : > { %3156 = vmatpush1.bf16.msra.mxu1 %v4341_v13  ;;  %v4407_v13 = vld [vmem:[%s5116_s19 + $0x340] ss:$8 sps:$4 sm:$0xff]  }
 0x142   : > { %3368 = vmatpush1.bf16.msra.mxu0 %v4344_v14  ;;  %3157 = vmatprep.subr.bf16.mxu1 %v4349_v15  ;;  %v4410_v14 = vld [vmem:[%s5116_s19 + $0x740] ss:$8 sps:$4 sm:$0xff]   ;;  %v4415_v15 = vld [vmem:[%s5116_s19 + $0x354] ss:$8 sps:$4 sm:$0xff]  }
 0x143   : > { %3369 = vmatprep.subr.bf16.mxu0 %v4352_v16  ;;  %v4418_v16 = vld [vmem:[%s5116_s19 + $0x754] ss:$8 sps:$4 sm:$0xff]  }
 0x145   : > { %3158 = vmatpush1.bf16.msra.mxu1 %v4347_v17  ;;  %v4413_v17 = vld [vmem:[%s5116_s19 + $0x350] ss:$8 sps:$4 sm:$0xff]  }
 0x146   : > { %3370 = vmatpush1.bf16.msra.mxu0 %v4350_v18  ;;  %3159 = vmatprep.subr.bf16.mxu1 %v4355_v19  ;;  %v4416_v18 = vld [vmem:[%s5116_s19 + $0x750] ss:$8 sps:$4 sm:$0xff]   ;;  %v4421_v19 = vld [vmem:[%s5116_s19 + $0x364] ss:$8 sps:$4 sm:$0xff]  }
 0x147   : > { %3371 = vmatprep.subr.bf16.mxu0 %v4358_v20  ;;  %v4424_v20 = vld [vmem:[%s5116_s19 + $0x764] ss:$8 sps:$4 sm:$0xff]  }
 0x149   : > { %3160 = vmatpush1.bf16.msra.mxu1 %v4353_v21  ;;  %v4419_v21 = vld [vmem:[%s5116_s19 + $0x360] ss:$8 sps:$4 sm:$0xff]  }
 0x14a   : > { %3372 = vmatpush1.bf16.msra.mxu0 %v4356_v22  ;;  %3161 = vmatprep.subr.bf16.mxu1 %v4361_v23  ;;  %v4422_v22 = vld [vmem:[%s5116_s19 + $0x760] ss:$8 sps:$4 sm:$0xff]   ;;  %v4427_v23 = vld [vmem:[%s5116_s19 + $0x374] ss:$8 sps:$4 sm:$0xff]  }
 0x14b   : > { %3373 = vmatprep.subr.bf16.mxu0 %v4364_v58  ;;  %v4430_v58 = vld [vmem:[%s5116_s19 + $0x774] ss:$8 sps:$4 sm:$0xff]  }
 0x14d   : > { %3162 = vmatpush1.bf16.msra.mxu1 %v4359_v60  ;;  %v4433_v60 = vld [vmem:[%s5116_s19 + $0x384] ss:$8 sps:$4 sm:$0xff]  }
 0x14e   : > { %3374 = vmatpush1.bf16.msra.mxu0 %v4362_v63  ;;  %3163 = vmatprep.subr.bf16.mxu1 %v4367_v24  ;;  %v4436_v63 = vld [vmem:[%s5116_s19 + $0x784] ss:$8 sps:$4 sm:$0xff]   ;;  %v4434_v24 = vld [vmem:[%s5116_s19 + $0x780] ss:$8 sps:$4 sm:$0xff]  }
 0x14f   : > { %3375 = vmatprep.subr.bf16.mxu0 %v4370_v25  ;;  %v4439_v25 = vld [vmem:[%s5116_s19 + $0x394] ss:$8 sps:$4 sm:$0xff]  }
 0x151   : > { %3164 = vmatpush1.bf16.msra.mxu1 %v4365_v27  ;;  %v4437_v27 = vld [vmem:[%s5116_s19 + $0x390] ss:$8 sps:$4 sm:$0xff]  }
 0x152   : > { %3376 = vmatpush1.bf16.msra.mxu0 %v4368_v28  ;;  %3165 = vmatprep.subr.bf16.mxu1 %v4373_v29  ;;  %v4440_v28 = vld [vmem:[%s5116_s19 + $0x790] ss:$8 sps:$4 sm:$0xff]   ;;  %v4445_v29 = vld [vmem:[%s5116_s19 + $0x3a4] ss:$8 sps:$4 sm:$0xff]  }
 0x153   : > { %3377 = vmatprep.subr.bf16.mxu0 %v4376_v30  ;;  %v4448_v30 = vld [vmem:[%s5116_s19 + $0x7a4] ss:$8 sps:$4 sm:$0xff]  }
 0x155   : > { %3166 = vmatpush1.bf16.msra.mxu1 %v4371_v31  ;;  %v4443_v31 = vld [vmem:[%s5116_s19 + $0x3a0] ss:$8 sps:$4 sm:$0xff]  }
 0x156   : > { %3378 = vmatpush1.bf16.msra.mxu0 %v4374_v32  ;;  %3167 = vmatprep.subr.bf16.mxu1 %v4379_v33  ;;  %v4446_v32 = vld [vmem:[%s5116_s19 + $0x7a0] ss:$8 sps:$4 sm:$0xff]   ;;  %v4451_v33 = vld [vmem:[%s5116_s19 + $0x3b4] ss:$8 sps:$4 sm:$0xff]  }
 0x157   : > { %3379 = vmatprep.subr.bf16.mxu0 %v4382_v34  ;;  %v4454_v34 = vld [vmem:[%s5116_s19 + $0x7b4] ss:$8 sps:$4 sm:$0xff]  }
 0x159   : > { %3168 = vmatpush1.bf16.msra.mxu1 %v4377_v35  ;;  %v4449_v35 = vld [vmem:[%s5116_s19 + $0x3b0] ss:$8 sps:$4 sm:$0xff]  }
 0x15a   : > { %3380 = vmatpush1.bf16.msra.mxu0 %v4380_v38  ;;  %3190 = vmatprep.subr.bf16.mxu1 %v4385_v39  ;;  %v4452_v38 = vld [vmem:[%s5116_s19 + $0x7b0] ss:$8 sps:$4 sm:$0xff]   ;;  %v4457_v39 = vld [vmem:[%s5116_s19 + $0x3c4] ss:$8 sps:$4 sm:$0xff]  }
 0x15b   : > { %3402 = vmatprep.subr.bf16.mxu0 %v4388_v42  ;;  %v4460_v42 = vld [vmem:[%s5116_s19 + $0x7c4] ss:$8 sps:$4 sm:$0xff]  }
 0x15c   : > { %3170 = vmatmul.mubr.bf16.vlgmr.msra.gmra.mrb[0].mxu1 %v3699_v44  ;;  %v4458_v44 = vld [vmem:[%s5116_s19 + $0x7c0] ss:$8 sps:$4 sm:$0xff]  }
 0x15d   : > { %3382 = vmatmul.mubr.bf16.vlgmr.msra.gmra.mrb[0].mxu0 %v3707_v45  ;;  %3191 = vmatpush1.bf16.msra.mxu1 %v4383_v36  ;;  %v4463_v45 = vld [vmem:[%s5116_s19 + $0x3d4] ss:$8 sps:$4 sm:$0xff]   ;;  %v4461_v36 = vld [vmem:[%s5116_s19 + $0x3d0] ss:$8 sps:$4 sm:$0xff]  }
 0x15e   : > { %3403 = vmatpush1.bf16.msra.mxu0 %v4386_v37  ;;  %3192 = vmatprep.subr.bf16.mxu1 %v4391_v40  ;;  %v3726_v37 = vcombine.high %v1357_v46, %v1365_v47  ;;  %v4466_v40 = vld [vmem:[%s5116_s19 + $0x3e4] ss:$8 sps:$4 sm:$0xff]  }
 0x15f   : > { %3404 = vmatprep.subr.bf16.mxu0 %v4394_v41  ;;  %3391 = vmatprep.mubr.bf16.mxu0 %v3724_v49  ;;  %v4464_v41 = vld [vmem:[%s5116_s19 + $0x3e0] ss:$8 sps:$4 sm:$0xff]   ;;  %v4469_v49 = vld [vmem:[%s5116_s19 + $0x3f4] ss:$8 sps:$4 sm:$0xff]  }
 0x160   : > { %3179 = vmatprep.mubr.bf16.mxu1 %v3716_v50  ;;  %v3725_v50 = vcombine.low %v1357_v46, %v1365_v47 }
 0x161   : > { %3193 = vmatpush1.bf16.msra.mxu1 %v4389_v51  ;;  %v4467_v51 = vld [vmem:[%s5116_s19 + $0x3f0] ss:$8 sps:$4 sm:$0xff]   ;;  %s3694_s19 = sshll.u32 %s1230_s30, 5 }
 0x162   : > { %3405 = vmatpush1.bf16.msra.mxu0 %v4392_v52  ;;  %3194 = vmatprep.subr.bf16.mxu1 %v4397_v53  ;;  %v1353_v52 = vld [vmem:[%s5543_s0 + $0x98] sm:$0xff]  ;;  %s1266_s9 = scalar_lea.vmem [#allocation4], %s3694_s19 }
 0x163   : > { %3406 = vmatprep.subr.bf16.mxu0 %v4400_v54  ;;  %v1361_v53 = vld [vmem:[%s5543_s0 + $0xd8] sm:$0xff]  ;;  %v3701_v54 = vcombine.low %v5443_v1, %v5448_v2 }
 0x164   : > { %3180 = vmatmul.mubr.bf16.gmra.mrb[4].mxu1 %v3715_v62  ;;  %v3718_v55 = vcombine.high %v1353_v52, %v1361_v53 }
 0x165   : > { %3392 = vmatmul.mubr.bf16.gmra.mrb[4].mxu0 %v3723_v56  ;;  %3195 = vmatpush1.bf16.msra.mxu1 %v4395_v3  ;;  %v3717_v56 = vcombine.low %v1353_v52, %v1361_v53 }
 0x166   : > { %3407 = vmatpush1.bf16.msra.mxu0 %v4398_v4  ;;  %3196 = vmatprep.subr.bf16.mxu1 %v4403_v5 }
 0x167   : > { %3408 = vmatprep.subr.bf16.mxu0 %v4406_v6  ;;  %3977 = vmatprep.mubr.msk.bf16.mxu0 %vm3024_vm0, %v3710_v7 }
 0x168   : > { %3222 = vmatprep.mubr.bf16.mxu1 %v3702_v8 }
 0x169   : > { %3197 = vmatpush1.bf16.msra.mxu1 %v4401_v9 }
 0x16a   : > { %3409 = vmatpush1.bf16.msra.mxu0 %v4404_v10  ;;  %3198 = vmatprep.subr.bf16.mxu1 %v4409_v11 }
 0x16b   : > { %3410 = vmatprep.subr.bf16.mxu0 %v4412_v12 }
 0x16d   : > { %3199 = vmatpush1.bf16.msra.mxu1 %v4407_v13 }
 0x16e   : > { %3411 = vmatpush1.bf16.msra.mxu0 %v4410_v14  ;;  %3200 = vmatprep.subr.bf16.mxu1 %v4415_v15 }
 0x16f   : > { %3412 = vmatprep.subr.bf16.mxu0 %v4418_v16 }
 0x171   : > { %3201 = vmatpush1.bf16.msra.mxu1 %v4413_v17 }
 0x172   : > { %3413 = vmatpush1.bf16.msra.mxu0 %v4416_v18  ;;  %3202 = vmatprep.subr.bf16.mxu1 %v4421_v19 }
 0x173   : > { %3414 = vmatprep.subr.bf16.mxu0 %v4424_v20 }
 0x175   : > { %3203 = vmatpush1.bf16.msra.mxu1 %v4419_v21 }
 0x176   : > { %3415 = vmatpush1.bf16.msra.mxu0 %v4422_v22  ;;  %3204 = vmatprep.subr.bf16.mxu1 %v4427_v23 }
 0x177   : > { %3416 = vmatprep.subr.bf16.mxu0 %v4430_v58 }
 0x179   : > { %3205 = vmatpush1.bf16.msra.mxu1 %v4425_v59 }
 0x17a   : > { %3417 = vmatpush1.bf16.msra.mxu0 %v4428_v61  ;;  %3206 = vmatprep.subr.bf16.mxu1 %v4433_v60 }
 0x17b   : > { %3418 = vmatprep.subr.bf16.mxu0 %v4436_v63 }
 0x17d   : > { %3207 = vmatpush1.bf16.msra.mxu1 %v4431_v0 }
 0x17e   : > { %3419 = vmatpush1.bf16.msra.mxu0 %v4434_v24  ;;  %3208 = vmatprep.subr.bf16.mxu1 %v4439_v25 }
 0x17f   : > { %3420 = vmatprep.subr.bf16.mxu0 %v4442_v26 }
 0x180   : > { %v1311_v23 = vpop.permute.xlu1 %1310 }
 0x181   : > { %3209 = vmatpush1.bf16.msra.mxu1 %v4437_v27 }
 0x182   : > { %3421 = vmatpush1.bf16.msra.mxu0 %v4440_v28  ;;  %3210 = vmatprep.subr.bf16.mxu1 %v4445_v29 }
 0x183   : > { %3422 = vmatprep.subr.bf16.mxu0 %v4448_v30 }
 0x185   : > { %3211 = vmatpush1.bf16.msra.mxu1 %v4443_v31 }
 0x186   : > { %3423 = vmatpush1.bf16.msra.mxu0 %v4446_v32  ;;  %3212 = vmatprep.subr.bf16.mxu1 %v4451_v33 }
 0x187   : > { %3424 = vmatprep.subr.bf16.mxu0 %v4454_v34 }
 0x189   : > { %3213 = vmatpush1.bf16.msra.mxu1 %v4449_v35 }
 0x18a   : > { %3425 = vmatpush1.bf16.msra.mxu0 %v4452_v38  ;;  %3214 = vmatprep.subr.bf16.mxu1 %v4457_v39 }
 0x18b   : > { %3426 = vmatprep.subr.bf16.mxu0 %v4460_v42 }
 0x18d   : > { %3215 = vmatpush1.bf16.msra.mxu1 %v4455_v43 }
 0x18e   : > { %3427 = vmatpush1.bf16.msra.mxu0 %v4458_v44  ;;  %3216 = vmatprep.subr.bf16.mxu1 %v4463_v45 }
 0x191   : > { %3435 = vmatmul.mubr.bf16.vlgmr.msra.gmra.mrb[0].mxu0 %v3709_v48  ;;  %3217 = vmatpush1.bf16.msra.mxu1 %v4461_v36 }
 0x192   : > { %3978 = vmatprep.mubr.msk.bf16.mxu0 %vm3024_vm0, %v3726_v37  ;;  %3218 = vmatprep.subr.bf16.mxu1 %v4466_v40 }
 0x195   : > { %3219 = vmatpush1.bf16.msra.mxu1 %v4464_v41 }
 0x196   : > { %3220 = vmatprep.subr.bf16.mxu1 %v4469_v49 }
 0x199   : > { %3445 = vmatmul.mubr.bf16.gmra.mrb[4].mxu0 %v3725_v50  ;;  %3221 = vmatpush1.bf16.msra.mxu1 %v4467_v51 }
 0x19c   : > { %3223 = vmatmul.mubr.bf16.vlgmr.msra.gmra.mrb[0].mxu1 %v3701_v54 }
 0x19d   : > { %3232 = vmatprep.mubr.bf16.mxu1 %v3718_v55 }
 0x19f   : > { %v1301_v6 = vpop.permute.xlu0 %1300 }
 0x1a0   : > { %v1316_v30 = vpop.permute.xlu1 %1315 }
 0x1a3   : > { %v1306_v13 = vpop.permute.xlu0 %1305 }
 0x1a4   : > { %3233 = vmatmul.mubr.bf16.gmra.mrb[4].mxu1 %v3717_v56 }
 0x264   : > { %v3436_v57 = vpop.f32.mrb[0].mxu0 }
 0x265   : > { %v3438_v62 = vpop.f32.mrb[1].mxu0 }
 0x266   : > { %v3440_v3 = vpop.f32.mrb[2].mxu0 }
 0x267   : > { %v3442_v4 = vpop.f32.mrb[3].mxu0 }
 0x26c   : > { %v3446_v5 = vpop.f32.mrb[4].mxu0 }
 0x26d   : > { %v3448_v7 = vpop.f32.mrb[5].mxu0 }
 0x26e   : > { %v3450_v8 = vpop.f32.mrb[6].mxu0 }
 0x26f   : > { %v3452_v9 = vpop.f32.mrb[7].mxu0  ;;  %v3224_v10 = vpop.f32.mrb[0].mxu1 }
 0x270   : > { %v3994_v11 = vadd.f32 %v3436_v57, %v3224_v10  ;;  %v3226_v12 = vpop.f32.mrb[1].mxu1 }
 0x271   : > { %v3995_v1 = vadd.f32 %v3438_v62, %v3226_v12  ;;  %v3228_v2 = vpop.f32.mrb[2].mxu1 }
 0x272   : > { %v3455_v14 = vadd.f32 %v3994_v11, %v1301_v6  ;;  %v3996_v15 = vadd.f32 %v3440_v3, %v3228_v2  ;;  %v3230_v16 = vpop.f32.mrb[3].mxu1 }
 0x273   : > { %v3456_v17 = vadd.f32 %v3995_v1, %v1301_v6  ;;  %v3997_v18 = vadd.f32 %v3442_v4, %v3230_v16 }
 0x274   : > { %v3482_v19 = vmax.f32 %v3455_v14, 0.0  ;;  %v3457_v20 = vadd.f32 %v3996_v15, %v1306_v13 }
 0x275   : > { %v3483_v21 = vmax.f32 %v3456_v17, 0.0  ;;  %v3458_v22 = vadd.f32 %v3997_v18, %v1306_v13 }
 0x276   : > { %v3484_v58 = vmax.f32 %v3457_v20, 0.0 }
 0x277   : > { %v3989_v59 = vpack.c.bf16 %v3483_v21, %v3482_v19  ;;  %v3485_v61 = vmax.f32 %v3458_v22, 0.0  ;;  %v3234_v60 = vpop.f32.mrb[4].mxu1 }
 0x278   : > { %v3998_v63 = vadd.f32 %v3446_v5, %v3234_v60  ;;  %v3236_v0 = vpop.f32.mrb[5].mxu1 }
 0x279   : > { %3514 = vst [vmem:[%s1266_s9] sm:$0xff] %v3989_v59  ;;  %v3990_v24 = vpack.c.bf16 %v3485_v61, %v3484_v58  ;;  %v3999_v25 = vadd.f32 %v3448_v7, %v3236_v0  ;;  %v3238_v26 = vpop.f32.mrb[6].mxu1 }
 0x27a   : > { %v3459_v27 = vadd.f32 %v3998_v63, %v1311_v23  ;;  %v4000_v28 = vadd.f32 %v3450_v8, %v3238_v26  ;;  %v3240_v29 = vpop.f32.mrb[7].mxu1 }
 0x27b   : > { %3515 = vst [vmem:[%s1266_s9 + $0x8] sm:$0xff] %v3990_v24  ;;  %v3460_v31 = vadd.f32 %v3999_v25, %v1311_v23  ;;  %v4001_v32 = vadd.f32 %v3452_v9, %v3240_v29 }
 0x27c   : > { %v3486_v33 = vmax.f32 %v3459_v27, 0.0  ;;  %v3461_v34 = vadd.f32 %v4000_v28, %v1316_v30 }
 0x27d   : > { %v3487_v35 = vmax.f32 %v3460_v31, 0.0  ;;  %v3462_v38 = vadd.f32 %v4001_v32, %v1316_v30  ;;  %3524 = sbr.rel (!%p4566_p6) target bundleno = 652 (0x28c), region = 82 }
 0x27e   : > { %v3488_v39 = vmax.f32 %v3461_v34, 0.0 }
 0x27f   : > { %v3991_v42 = vpack.c.bf16 %v3487_v35, %v3486_v33  ;;  %v3489_v43 = vmax.f32 %v3462_v38, 0.0 }
 0x280   : > { %v3564_v45 = vld [vmem:[%s1266_s9] sm:$0xff] (%p4566_p6) }
 0x281   : > { %3516 = vst [vmem:[%s1266_s9 + $0x10] sm:$0xff] %v3991_v42  ;;  %v3992_v44 = vpack.c.bf16 %v3489_v43, %v3488_v39  ;;  %3565 = vst [vmem:[%s3530_s11] sm:$0xff] (%p4566_p6), %v3564_v45 }
 0x282   : > { %v3566_v46 = vld [vmem:[%s1266_s9 + $0x8] sm:$0xff] (%p4566_p6) }
 0x283   : > { %3517 = vst [vmem:[%s1266_s9 + $0x18] sm:$0xff] %v3992_v44  ;;  %3567 = vst [vmem:[%s3530_s11 + $0x10] sm:$0xff] (%p4566_p6), %v3566_v46 }
 0x288   : > { %v3568_v47 = vld [vmem:[%s1266_s9 + $0x10] sm:$0xff] }
 0x289   : > { %3569 = vst [vmem:[%s3530_s11 + $0x20] sm:$0xff] %v3568_v47 }
 0x28a   : > { %v3570_v48 = vld [vmem:[%s1266_s9 + $0x18] sm:$0xff] }
 0x28b   : > { %3571 = vst [vmem:[%s3530_s11 + $0x30] sm:$0xff] %v3570_v48 }
 0x28c PF: > { %s13_s16 = sadd.s32 1, %s4508_s16   ;;  %s5548_s12 = smov %s4496_s13 }
 0x28d   : > { %p10_p11 = scmp.ge.s32.totalorder %s13_s16, 4   ;;  %s5549_s13 = smov %s4571_s22 }
 0x28e   : > { %s5550_s14 = smov %s4504_s15  ;;  %s5551_s15 = smov %s5553_s17 }
 0x28f   :  { %12 = sbr.rel (!%p10_p11) target bundleno = 3 (0x3), region = 157 }

// kernel: _lambda_.11
= control target key start
LH: loop header
LB: loop body
LE: loop exit
PB: predicated region body
PF: predicated region fallthrough
CT: control target
= control target key end

     0   :  { %s1377_s12 = smov 0   ;;  %s1379_s13 = smov 0   ;;  %s1586_s0 = inlined_call_operand.vmem [shape: bf16[64,4096], index: 0, kind: input, shape index: {}]   ;;  %s1587_s1 = inlined_call_operand.vmem [shape: bf16[4096,64], index: 1, kind: input, shape index: {}]   ;;  %s1588_s2 = inlined_call_operand.vmem [shape: f32[64,1], index: 2, kind: input, shape index: {}]   ;;  %s1589_s3 = inlined_call_operand.vmem [shape: bf16[64,64], index: 3, kind: output, shape index: {}]  }
   0x1   :  { %s1381_s14 = smov 0   ;;  %s1383_s15 = smov 0  }
   0x2   :  { %s1385_s16 = smov 0  }
   0x3 LB: > { %s25_s17 = sadd.s32 1, %s1350_s15  ;;  %p48_p1 = scmp.ne.s32.totalorder %s1342_s13, %s1338_s12  ;;  %s1354_s16 = sphi %s1385_s16, %s13_s16   ;;  %s1350_s15 = sphi %s1383_s15, %s1593_s15   ;;  %s1346_s14 = sphi %s1381_s14, %s1592_s14   ;;  %s1342_s13 = sphi %s1379_s13, %s1591_s13   ;;  %s1338_s12 = sphi %s1377_s12, %s1590_s12  }
   0x4   : > { %p26_p0 = scmp.ge.s32.totalorder %s25_s17, 8  ;;  %p49_p2 = scmp.eq.s32.totalorder %s1354_s16, 0 }
   0x5   : > { %s41_s19 = sadd.s32 1, %s1342_s13  ;;  %p1058_p5 = scmp.ge.s32.totalorder %s1354_s16, 8 }
   0x6   : > { %s1595_s17 = smov (%p26_p0, %s25_s17), 0  ;;  %p50_p3 = por %p49_p2, %p48_p1 }
   0x7   : > { %s37_s18 = ssub.s32 %s1350_s15, %s1595_s17  ;;  %165 = sbr.rel (%p1058_p5) target bundleno = 26 (0x1a), region = 20 }
   0x8   : > { %p39_p4 = scmp.eq.s32.totalorder %s37_s18, 0 }
   0xa   : > { %s1412_s20 = scalar_select %p39_p4, %s1342_s13, %s41_s19  }
   0xe   : > { %168 = sbr.rel (!%p50_p3) target bundleno = 26 (0x1a), region = 24  ;;  %s170_s21 = sand.u32 (%p50_p3), 1, %s1342_s13  }
   0xf   : > { %s1128_s22 = sshll.u32 (%p50_p3), %s1350_s15, 4  ;;  %s1059_s23 = sshll.u32 (%p50_p3), %s170_s21, 7 }
  0x10   : > { %s1420_s26 = scalar_lea.vmem (%p50_p3), %s1586_s0, %s1128_s22  ;;  %s172_s27 = scalar_lea.vmem (%p50_p3), [#allocation3], %s1059_s23 }
  0x11   : > { %v191_v0 = vld [vmem:[%s1420_s26] sm:$0xff] (%p50_p3)  ;;  %v193_v1 = vld [vmem:[%s1420_s26 + $0x8] sm:$0xff] (%p50_p3) }
  0x12   : > { %v195_v2 = vld [vmem:[%s1420_s26 + $0x80] sm:$0xff] (%p50_p3)  ;;  %192 = vst [vmem:[%s172_s27] sm:$0xff] (%p50_p3), %v191_v0  ;;  %194 = vst [vmem:[%s172_s27 + $0x8] sm:$0xff] (%p50_p3), %v193_v1  ;;  %v197_v3 = vld [vmem:[%s1420_s26 + $0x88] sm:$0xff] (%p50_p3) }
  0x13   : > { %196 = vst [vmem:[%s172_s27 + $0x10] sm:$0xff] (%p50_p3), %v195_v2  ;;  %v199_v4 = vld [vmem:[%s1420_s26 + $0x100] sm:$0xff] (%p50_p3)  ;;  %v201_v5 = vld [vmem:[%s1420_s26 + $0x108] sm:$0xff] (%p50_p3)  ;;  %198 = vst [vmem:[%s172_s27 + $0x18] sm:$0xff] (%p50_p3), %v197_v3 }
  0x14   : > { %200 = vst [vmem:[%s172_s27 + $0x20] sm:$0xff] (%p50_p3), %v199_v4  ;;  %202 = vst [vmem:[%s172_s27 + $0x28] sm:$0xff] (%p50_p3), %v201_v5  ;;  %v203_v6 = vld [vmem:[%s1420_s26 + $0x180] sm:$0xff] (%p50_p3)  ;;  %v205_v7 = vld [vmem:[%s1420_s26 + $0x188] sm:$0xff] (%p50_p3) }
  0x15   : > { %v207_v8 = vld [vmem:[%s1420_s26 + $0x200] sm:$0xff]  ;;  %204 = vst [vmem:[%s172_s27 + $0x30] sm:$0xff] %v203_v6  ;;  %206 = vst [vmem:[%s172_s27 + $0x38] sm:$0xff] %v205_v7  ;;  %v209_v9 = vld [vmem:[%s1420_s26 + $0x208] sm:$0xff] }
  0x16   : > { %208 = vst [vmem:[%s172_s27 + $0x40] sm:$0xff] %v207_v8  ;;  %v211_v10 = vld [vmem:[%s1420_s26 + $0x280] sm:$0xff]  ;;  %v213_v11 = vld [vmem:[%s1420_s26 + $0x288] sm:$0xff]  ;;  %210 = vst [vmem:[%s172_s27 + $0x48] sm:$0xff] %v209_v9 }
  0x17   : > { %212 = vst [vmem:[%s172_s27 + $0x50] sm:$0xff] %v211_v10  ;;  %214 = vst [vmem:[%s172_s27 + $0x58] sm:$0xff] %v213_v11  ;;  %v215_v12 = vld [vmem:[%s1420_s26 + $0x300] sm:$0xff]  ;;  %v217_v13 = vld [vmem:[%s1420_s26 + $0x308] sm:$0xff] }
  0x18   : > { %v219_v14 = vld [vmem:[%s1420_s26 + $0x380] sm:$0xff]  ;;  %216 = vst [vmem:[%s172_s27 + $0x60] sm:$0xff] %v215_v12  ;;  %218 = vst [vmem:[%s172_s27 + $0x68] sm:$0xff] %v217_v13  ;;  %v221_v15 = vld [vmem:[%s1420_s26 + $0x388] sm:$0xff] }
  0x19   : > { %220 = vst [vmem:[%s172_s27 + $0x70] sm:$0xff] %v219_v14  ;;  %222 = vst [vmem:[%s172_s27 + $0x78] sm:$0xff] %v221_v15 }
  0x1a PF: > { %p1062_p6 = scmp.ge.s32.totalorder %s1354_s16, 1  ;;  %p239_p7 = scmp.lt.s32.totalorder %s1354_s16, 9 }
  0x1c   : > { %p240_p8 = pnand %p1062_p6, %p239_p7 }
  0x1d   : > { %s246_s28 = sand.u32 (!%p240_p8), 1, %s1338_s12   ;;  %s1064_s29 = sshll.u32 (!%p240_p8), %s1346_s14, 6 }
  0x1e   : > { %243 = sbr.rel (%p240_p8) target bundleno = 474 (0x1da), region = 51  ;;  %s1063_s30 = sshll.u32 (!%p240_p8), %s246_s28, 7 }
  0x1f   : > { %p288_p9 = scmp.lt.s32.totalorder (!%p240_p8), %s1064_s29, 511  ;;  %s1447_s8 = scalar_lea.vmem (!%p240_p8), [#allocation3], %s1063_s30 }
  0x20   : > { %p1066_p10 = scmp.ne.s32.totalorder (!%p240_p8), %s1346_s14, 0 }
  0x25   : > { %s1597_s29 = smov (!%p288_p9, %s1064_s29), 511  ;;  %315 = sbr.rel (%p1066_p10) target bundleno = 181 (0xb5), region = 59 }
  0x26   : > { %s1065_s4 = sshll.u32 %s1597_s29, 2  ;;  %v318_v16 = vld [vmem:[%s1588_s2 + $0x10] sm:$0xff] (!%p1066_p10)  ;;  %v316_v17 = vld [vmem:[%s1588_s2] sm:$0xff] (!%p1066_p10)  ;;  %v1356_v18 = vmov (!%p1066_p10), 0   ;;  %v319_v19 = vld [vmem:[%s1588_s2 + $0x18] sm:$0xff] (!%p1066_p10)  ;;  %vm364_vm0 = vcmask (!%p1066_p10), 523264  }
  0x27   : > { %s1445_s7 = scalar_lea.vmem %s1587_s1, %s1065_s4  ;;  %1259 = vset.pattern.permute.xlu1 (!%p1066_p10), %v1356_v18  ;;  %1258 = vset.pattern.permute.xlu0 (!%p1066_p10), %v1356_v18  ;;  %v317_v20 = vld [vmem:[%s1588_s2 + $0x8] sm:$0xff] (!%p1066_p10)  ;;  %v320_v22 = vld [vmem:[%s1588_s2 + $0x20] sm:$0xff] (!%p1066_p10)  ;;  %v323_v23 = vld [vmem:[%s1588_s2 + $0x38] sm:$0xff] (!%p1066_p10) }
  0x28   : > { %336 = vperm.xlu1 (!%p1066_p10), %1259, %v318_v16   ;;  %326 = vperm.xlu0 (!%p1066_p10), %1258, %v316_v17   ;;  %v321_v21 = vld [vmem:[%s1588_s2 + $0x28] sm:$0xff] (!%p1066_p10)  ;;  %v322_v24 = vld [vmem:[%s1588_s2 + $0x30] sm:$0xff] (!%p1066_p10) }
  0x2c   : > { %341 = vperm.xlu1 %1259, %v319_v19   ;;  %331 = vperm.xlu0 %1258, %v317_v20  }
  0x30   : > { %351 = vperm.xlu1 %1259, %v321_v21   ;;  %346 = vperm.xlu0 %1258, %v320_v22  }
  0x34   : > { %361 = vperm.xlu1 %1259, %v323_v23   ;;  %356 = vperm.xlu0 %1258, %v322_v24  }
  0xa7   : > { %v337_v25 = vpop.permute.xlu1 %336  ;;  %v327_v26 = vpop.permute.xlu0 %326 }
  0xa8   : > { %367 = vst.msk [vmem:[#allocation2 + $0x10] sm:$0xff] %vm364_vm0, %v337_v25  ;;  %365 = vst.msk [vmem:[#allocation2] sm:$0xff] %vm364_vm0, %v327_v26 }
  0xab   : > { %v342_v27 = vpop.permute.xlu1 %341  ;;  %v332_v28 = vpop.permute.xlu0 %331 }
  0xac   : > { %368 = vst.msk [vmem:[#allocation2 + $0x18] sm:$0xff] %vm364_vm0, %v342_v27  ;;  %366 = vst.msk [vmem:[#allocation2 + $0x8] sm:$0xff] %vm364_vm0, %v332_v28 }
  0xaf   : > { %v352_v29 = vpop.permute.xlu1 %351  ;;  %v347_v30 = vpop.permute.xlu0 %346 }
  0xb0   : > { %370 = vst.msk [vmem:[#allocation2 + $0x28] sm:$0xff] %vm364_vm0, %v352_v29  ;;  %369 = vst.msk [vmem:[#allocation2 + $0x20] sm:$0xff] %vm364_vm0, %v347_v30 }
  0xb3   : > { %v362_v31 = vpop.permute.xlu1 %361  ;;  %v357_v32 = vpop.permute.xlu0 %356 }
  0xb4   : > { %372 = vst.msk [vmem:[#allocation2 + $0x38] sm:$0xff] %vm364_vm0, %v362_v31  ;;  %371 = vst.msk [vmem:[#allocation2 + $0x30] sm:$0xff] %vm364_vm0, %v357_v32 }
  0xb5 PF: > { %v1260_v33 = vld [vmem:[%s1445_s7 + $0x40] sm:$0xff]   ;;  %v1264_v37 = vld [vmem:[%s1445_s7 + $0x48] sm:$0xff]   ;;  %v1268_v41 = vld [vmem:[%s1445_s7 + $0x50] sm:$0xff]   ;;  %vm871_vm1 = vcmask 523264   ;;  %p1115_p11 = scmp.ne.s32.totalorder %s1346_s14, 7 }
  0xb6   : > { %v1261_v34 = vld [vmem:[%s1445_s7 + $0xc0] sm:$0xff]   ;;  %1137 = vmatprep.subr.bf16.mxu0 %v1260_v33  ;;  %v1265_v38 = vld [vmem:[%s1445_s7 + $0xc8] sm:$0xff]   ;;  %v1269_v42 = vld [vmem:[%s1445_s7 + $0xd0] sm:$0xff]   ;;  %vm932_vm2 = vcmask (!%p1115_p11), 519168  }
  0xb7   : > { %v1262_v35 = vld [vmem:[%s1445_s7] sm:$0xff]   ;;  %1177 = vmatprep.subr.bf16.mxu1 %v1261_v34  ;;  %v1266_v39 = vld [vmem:[%s1445_s7 + $0x8] sm:$0xff]   ;;  %v1270_v43 = vld [vmem:[%s1445_s7 + $0x10] sm:$0xff]  }
  0xb8   : > { %v1263_v36 = vld [vmem:[%s1445_s7 + $0x80] sm:$0xff]   ;;  %1138 = vmatpush3.bf16.msra.mxu0 %v1262_v35  ;;  %v1267_v40 = vld [vmem:[%s1445_s7 + $0x88] sm:$0xff]   ;;  %v1271_v44 = vld [vmem:[%s1445_s7 + $0x90] sm:$0xff]  }
  0xb9   : > { %1178 = vmatpush3.bf16.msra.mxu1 %v1263_v36  ;;  %1139 = vmatprep.subr.bf16.mxu0 %v1264_v37  ;;  %v1272_v45 = vld [vmem:[%s1445_s7 + $0x58] sm:$0xff]   ;;  %v1276_v49 = vld [vmem:[%s1445_s7 + $0x60] sm:$0xff]   ;;  %v1280_v53 = vld [vmem:[%s1445_s7 + $0x68] sm:$0xff]  }
  0xba   : > { %1179 = vmatprep.subr.bf16.mxu1 %v1265_v38  ;;  %v1273_v46 = vld [vmem:[%s1445_s7 + $0xd8] sm:$0xff]   ;;  %v1277_v50 = vld [vmem:[%s1445_s7 + $0xe0] sm:$0xff]   ;;  %v1281_v54 = vld [vmem:[%s1445_s7 + $0xe8] sm:$0xff]  }
  0xbb   : > { %v1274_v47 = vld [vmem:[%s1445_s7 + $0x18] sm:$0xff]   ;;  %v1278_v51 = vld [vmem:[%s1445_s7 + $0x20] sm:$0xff]   ;;  %v1282_v55 = vld [vmem:[%s1445_s7 + $0x28] sm:$0xff]  }
  0xbc   : > { %1140 = vmatpush3.bf16.msra.mxu0 %v1266_v39  ;;  %v1275_v48 = vld [vmem:[%s1445_s7 + $0x98] sm:$0xff]   ;;  %v1279_v52 = vld [vmem:[%s1445_s7 + $0xa0] sm:$0xff]   ;;  %v1283_v56 = vld [vmem:[%s1445_s7 + $0xa8] sm:$0xff]  }
  0xbd   : > { %1180 = vmatpush3.bf16.msra.mxu1 %v1267_v40  ;;  %1141 = vmatprep.subr.bf16.mxu0 %v1268_v41  ;;  %v1284_v57 = vld [vmem:[%s1445_s7 + $0x70] sm:$0xff]   ;;  %v1288_v61 = vld [vmem:[%s1445_s7 + $0x78] sm:$0xff]   ;;  %v373_v26 = vld [vmem:[#allocation2] sm:$0xff] }
  0xbe   : > { %1181 = vmatprep.subr.bf16.mxu1 %v1269_v42  ;;  %v1285_v58 = vld [vmem:[%s1445_s7 + $0xf0] sm:$0xff]   ;;  %v1289_v62 = vld [vmem:[%s1445_s7 + $0xf8] sm:$0xff]   ;;  %v374_v31 = vld [vmem:[#allocation2 + $0x8] sm:$0xff] }
  0xbf   : > { %v1286_v59 = vld [vmem:[%s1445_s7 + $0x30] sm:$0xff]   ;;  %v1290_v63 = vld [vmem:[%s1445_s7 + $0x38] sm:$0xff]  }
  0xc0   : > { %1142 = vmatpush3.bf16.msra.mxu0 %v1270_v43  ;;  %v1287_v60 = vld [vmem:[%s1445_s7 + $0xb0] sm:$0xff]   ;;  %v1291_v0 = vld [vmem:[%s1445_s7 + $0xb8] sm:$0xff]  }
  0xc1   : > { %1182 = vmatpush3.bf16.msra.mxu1 %v1271_v44  ;;  %1143 = vmatprep.subr.bf16.mxu0 %v1272_v45  ;;  %v1292_v1 = vld [vmem:[%s1447_s8] ss:$16 sps:$4 sm:$0xff]   ;;  %v1294_v2 = vld [vmem:[%s1447_s8 + $0x4] ss:$16 sps:$4 sm:$0xff]   ;;  %v1295_v3 = vld [vmem:[%s1447_s8 + $0x8] ss:$16 sps:$4 sm:$0xff]  }
  0xc2   : > { %1183 = vmatprep.subr.bf16.mxu1 %v1273_v46  ;;  %v1297_v4 = vld [vmem:[%s1447_s8 + $0xc] ss:$16 sps:$4 sm:$0xff]   ;;  %765 = vmatprep.mubr.bf16.mxu0 %v1294_v2  ;;  %v1298_v5 = vld [vmem:[%s1447_s8 + $0x24] ss:$16 sps:$4 sm:$0xff]   ;;  %v1302_v7 = vld [vmem:[%s1447_s8 + $0x20] ss:$16 sps:$4 sm:$0xff]  }
  0xc3   : > { %830 = vmatprep.mubr.bf16.mxu1 %v1297_v4  ;;  %v1300_v6 = vld [vmem:[%s1447_s8 + $0x2c] ss:$16 sps:$4 sm:$0xff]   ;;  %v1303_v8 = vld [vmem:[%s1447_s8 + $0x28] ss:$16 sps:$4 sm:$0xff]   ;;  %v1304_v9 = vld [vmem:[%s1447_s8 + $0x44] ss:$16 sps:$4 sm:$0xff]  }
  0xc4   : > { %1144 = vmatpush3.bf16.msra.mxu0 %v1274_v47  ;;  %v1306_v10 = vld [vmem:[%s1447_s8 + $0x4c] ss:$16 sps:$4 sm:$0xff]   ;;  %v1308_v11 = vld [vmem:[%s1447_s8 + $0x40] ss:$16 sps:$4 sm:$0xff]   ;;  %v1309_v12 = vld [vmem:[%s1447_s8 + $0x48] ss:$16 sps:$4 sm:$0xff]  }
  0xc5   : > { %1184 = vmatpush3.bf16.msra.mxu1 %v1275_v48  ;;  %1145 = vmatprep.subr.bf16.mxu0 %v1276_v49  ;;  %v1310_v13 = vld [vmem:[%s1447_s8 + $0x64] ss:$16 sps:$4 sm:$0xff]   ;;  %v1312_v14 = vld [vmem:[%s1447_s8 + $0x6c] ss:$16 sps:$4 sm:$0xff]   ;;  %v1314_v15 = vld [vmem:[%s1447_s8 + $0x60] ss:$16 sps:$4 sm:$0xff]  }
  0xc6   : > { %1185 = vmatprep.subr.bf16.mxu1 %v1277_v50  ;;  %v1315_v16 = vld [vmem:[%s1447_s8 + $0x68] ss:$16 sps:$4 sm:$0xff]   ;;  %v375_v44 = vld [vmem:[#allocation2 + $0x10] sm:$0xff] }
  0xc7   : > { %v376_v49 = vld [vmem:[#allocation2 + $0x18] sm:$0xff] }
  0xc8   : > { %1146 = vmatpush3.bf16.msra.mxu0 %v1278_v51 }
  0xc9   : > { %1186 = vmatpush3.bf16.msra.mxu1 %v1279_v52  ;;  %1147 = vmatprep.subr.bf16.mxu0 %v1280_v53 }
  0xca   : > { %1187 = vmatprep.subr.bf16.mxu1 %v1281_v54 }
  0xcc   : > { %1148 = vmatpush3.bf16.msra.mxu0 %v1282_v55 }
  0xcd   : > { %1188 = vmatpush3.bf16.msra.mxu1 %v1283_v56  ;;  %1149 = vmatprep.subr.bf16.mxu0 %v1284_v57 }
  0xce   : > { %1189 = vmatprep.subr.bf16.mxu1 %v1285_v58 }
  0xd0   : > { %1150 = vmatpush3.bf16.msra.mxu0 %v1286_v59 }
  0xd1   : > { %1190 = vmatpush3.bf16.msra.mxu1 %v1287_v60  ;;  %1151 = vmatprep.subr.bf16.mxu0 %v1288_v61 }
  0xd2   : > { %1191 = vmatprep.subr.bf16.mxu1 %v1289_v62  ;;  %v377_v62 = vld [vmem:[#allocation2 + $0x20] sm:$0xff] }
  0xd4   : > { %1152 = vmatpush3.bf16.msra.mxu0 %v1290_v63 }
  0xd5   : > { %1192 = vmatpush3.bf16.msra.mxu1 %v1291_v0 }
  0xd7   : > { %766 = vmatmul.mubr.bf16.vlgmr.msra.gmra.mrb[0].mxu0 %v1292_v1 }
  0xd8   : > { %831 = vmatmul.mubr.bf16.vlgmr.msra.gmra.mrb[0].mxu1 %v1295_v3  ;;  %773 = vmatprep.mubr.bf16.mxu0 %v1298_v5  ;;  %v378_v3 = vld [vmem:[#allocation2 + $0x28] sm:$0xff] }
  0xd9   : > { %838 = vmatprep.mubr.bf16.mxu1 %v1300_v6 }
  0xdf   : > { %774 = vmatmul.mubr.bf16.gmra.mrb[4].mxu0 %v1302_v7 }
  0xe0   : > { %839 = vmatmul.mubr.bf16.gmra.mrb[4].mxu1 %v1303_v8  ;;  %781 = vmatprep.mubr.bf16.mxu0 %v1304_v9 }
  0xe1   : > { %846 = vmatprep.mubr.bf16.mxu1 %v1306_v10 }
  0xe7   : > { %782 = vmatmul.mubr.bf16.gmra.mrb[8].mxu0 %v1308_v11 }
  0xe8   : > { %847 = vmatmul.mubr.bf16.gmra.mrb[8].mxu1 %v1309_v12  ;;  %789 = vmatprep.mubr.bf16.mxu0 %v1310_v13 }
  0xe9   : > { %854 = vmatprep.mubr.bf16.mxu1 %v1312_v14 }
  0xef   : > { %790 = vmatmul.mubr.bf16.gmra.mrb[12].mxu0 %v1314_v15 }
  0xf0   : > { %855 = vmatmul.mubr.bf16.gmra.mrb[12].mxu1 %v1315_v16  ;;  %v379_v16 = vld [vmem:[#allocation2 + $0x30] sm:$0xff] }
 0x1aa   : > { %v1153_v17 = vpop.f32.mrb[0].mxu0 }
 0x1ab   : > { %v1193_v18 = vpop.f32.mrb[0].mxu1  ;;  %v1154_v19 = vpop.f32.mrb[1].mxu0 }
 0x1ac   : > { %v1155_v20 = vadd.f32 %v1154_v19, %v1153_v17  ;;  %v1194_v21 = vpop.f32.mrb[1].mxu1  ;;  %v1156_v22 = vpop.f32.mrb[2].mxu0 }
 0x1ad   : > { %v1195_v23 = vadd.f32 %v1194_v21, %v1193_v18  ;;  %v1196_v24 = vpop.f32.mrb[2].mxu1  ;;  %v1157_v25 = vpop.f32.mrb[3].mxu0  ;;  %v380_v21 = vld [vmem:[#allocation2 + $0x38] sm:$0xff] }
 0x1ae   : > { %v1158_v27 = vadd.f32 %v1157_v25, %v1156_v22  ;;  %v1197_v28 = vpop.f32.mrb[3].mxu1 }
 0x1af   : > { %v833_v29 = vadd.f32 %v1195_v23, %v1155_v20  ;;  %v1198_v30 = vadd.f32 %v1197_v28, %v1196_v24 }
 0x1b1   : > { %v863_v32 = vadd.f32 %v833_v29, %v373_v26  ;;  %v836_v33 = vadd.f32 %v1198_v30, %v1158_v27 }
 0x1b2   : > { %v1159_v34 = vpop.f32.mrb[4].mxu0 }
 0x1b3   : > { %872 = vst.msk [vmem:[#allocation2] sm:$0xff] %vm871_vm1, %v863_v32  ;;  %v864_v35 = vadd.f32 %v836_v33, %v374_v31  ;;  %v1199_v36 = vpop.f32.mrb[4].mxu1  ;;  %v1160_v37 = vpop.f32.mrb[5].mxu0 }
 0x1b4   : > { %v1161_v38 = vadd.f32 %v1160_v37, %v1159_v34  ;;  %v1200_v39 = vpop.f32.mrb[5].mxu1  ;;  %v1162_v40 = vpop.f32.mrb[6].mxu0 }
 0x1b5   : > { %873 = vst.msk [vmem:[#allocation2 + $0x8] sm:$0xff] %vm871_vm1, %v864_v35  ;;  %v1201_v41 = vadd.f32 %v1200_v39, %v1199_v36  ;;  %v1202_v42 = vpop.f32.mrb[6].mxu1  ;;  %v1163_v43 = vpop.f32.mrb[7].mxu0 }
 0x1b6   : > { %v1164_v45 = vadd.f32 %v1163_v43, %v1162_v40  ;;  %v1203_v46 = vpop.f32.mrb[7].mxu1 }
 0x1b7   : > { %v841_v47 = vadd.f32 %v1201_v41, %v1161_v38  ;;  %v1204_v48 = vadd.f32 %v1203_v46, %v1202_v42 }
 0x1b9   : > { %v865_v50 = vadd.f32 %v841_v47, %v375_v44  ;;  %v844_v51 = vadd.f32 %v1204_v48, %v1164_v45 }
 0x1ba   : > { %v1165_v52 = vpop.f32.mrb[8].mxu0  ;;  %v884_v25 = vld [vmem:[#allocation2] sm:$0xff] (!%p1115_p11) }
 0x1bb   : > { %874 = vst.msk [vmem:[#allocation2 + $0x10] sm:$0xff] %vm871_vm1, %v865_v50  ;;  %v866_v53 = vadd.f32 %v844_v51, %v376_v49  ;;  %v1205_v54 = vpop.f32.mrb[8].mxu1  ;;  %v1166_v55 = vpop.f32.mrb[9].mxu0  ;;  %v892_v28 = vmax.f32 (!%p1115_p11), %v884_v25, 0.0 }
 0x1bc   : > { %v1167_v56 = vadd.f32 %v1166_v55, %v1165_v52  ;;  %v1206_v57 = vpop.f32.mrb[9].mxu1  ;;  %v1168_v58 = vpop.f32.mrb[10].mxu0  ;;  %v885_v26 = vld [vmem:[#allocation2 + $0x8] sm:$0xff] (!%p1115_p11) }
 0x1bd   : > { %875 = vst.msk [vmem:[#allocation2 + $0x18] sm:$0xff] %vm871_vm1, %v866_v53  ;;  %v1207_v59 = vadd.f32 %v1206_v57, %v1205_v54  ;;  %v1208_v60 = vpop.f32.mrb[10].mxu1  ;;  %v1169_v61 = vpop.f32.mrb[11].mxu0  ;;  %v893_v29 = vmax.f32 (!%p1115_p11), %v885_v26, 0.0  ;;  %v1129_v39 = vpack.c.bf16 (!%p1115_p11), %v892_v28, %v892_v28 }
 0x1be   : > { %v1170_v63 = vadd.f32 %v1169_v61, %v1168_v58  ;;  %v1209_v0 = vpop.f32.mrb[11].mxu1 }
 0x1bf   : > { %v849_v1 = vadd.f32 %v1207_v59, %v1167_v56  ;;  %v1210_v2 = vadd.f32 %v1209_v0, %v1208_v60  ;;  %v1130_v40 = vpack.c.bf16 (!%p1115_p11), %v893_v29, %v893_v29  ;;  %933 = vst.msk [vmem:[%s1589_s3] sm:$0xf] (!%p1115_p11), %vm932_vm2, %v1129_v39 }
 0x1c1   : > { %v867_v4 = vadd.f32 %v849_v1, %v377_v62  ;;  %v852_v5 = vadd.f32 %v1210_v2, %v1170_v63  ;;  %934 = vst.msk [vmem:[%s1589_s3 + $0x4] sm:$0xf] (!%p1115_p11), %vm932_vm2, %v1130_v40 }
 0x1c2   : > { %v1171_v6 = vpop.f32.mrb[12].mxu0  ;;  %v886_v27 = vld [vmem:[#allocation2 + $0x10] sm:$0xff] (!%p1115_p11) }
 0x1c3   : > { %876 = vst.msk [vmem:[#allocation2 + $0x20] sm:$0xff] %vm871_vm1, %v867_v4  ;;  %v868_v7 = vadd.f32 %v852_v5, %v378_v3  ;;  %v1211_v8 = vpop.f32.mrb[12].mxu1  ;;  %v1172_v9 = vpop.f32.mrb[13].mxu0  ;;  %v894_v30 = vmax.f32 (!%p1115_p11), %v886_v27, 0.0 }
 0x1c4   : > { %v1173_v10 = vadd.f32 %v1172_v9, %v1171_v6  ;;  %v1212_v11 = vpop.f32.mrb[13].mxu1  ;;  %v1174_v12 = vpop.f32.mrb[14].mxu0  ;;  %v887_v31 = vld [vmem:[#allocation2 + $0x18] sm:$0xff] (!%p1115_p11) }
 0x1c5   : > { %877 = vst.msk [vmem:[#allocation2 + $0x28] sm:$0xff] %vm871_vm1, %v868_v7  ;;  %v1213_v13 = vadd.f32 %v1212_v11, %v1211_v8  ;;  %v1214_v14 = vpop.f32.mrb[14].mxu1  ;;  %v1175_v15 = vpop.f32.mrb[15].mxu0  ;;  %v895_v34 = vmax.f32 (!%p1115_p11), %v887_v31, 0.0  ;;  %v1131_v41 = vpack.c.bf16 (!%p1115_p11), %v894_v30, %v894_v30 }
 0x1c6   : > { %v1176_v17 = vadd.f32 %v1175_v15, %v1174_v12  ;;  %v1215_v18 = vpop.f32.mrb[15].mxu1 }
 0x1c7   : > { %v857_v19 = vadd.f32 %v1213_v13, %v1173_v10  ;;  %v1216_v20 = vadd.f32 %v1215_v18, %v1214_v14  ;;  %883 = sbr.rel (%p1115_p11) target bundleno = 474 (0x1da), region = 63  ;;  %v1132_v43 = vpack.c.bf16 (!%p1115_p11), %v895_v34, %v895_v34  ;;  %935 = vst.msk [vmem:[%s1589_s3 + $0x8] sm:$0xf] (!%p1115_p11), %vm932_vm2, %v1131_v41 }
 0x1c9   : > { %v869_v22 = vadd.f32 %v857_v19, %v379_v16  ;;  %v860_v23 = vadd.f32 %v1216_v20, %v1176_v17  ;;  %936 = vst.msk [vmem:[%s1589_s3 + $0xc] sm:$0xf] (!%p1115_p11), %vm932_vm2, %v1132_v43 }
 0x1ca   : > { %v888_v32 = vld [vmem:[#allocation2 + $0x20] sm:$0xff] (!%p1115_p11) }
 0x1cb   : > { %878 = vst.msk [vmem:[#allocation2 + $0x30] sm:$0xff] %vm871_vm1, %v869_v22  ;;  %v870_v24 = vadd.f32 %v860_v23, %v380_v21  ;;  %v896_v35 = vmax.f32 (!%p1115_p11), %v888_v32, 0.0 }
 0x1cc   : > { %v889_v33 = vld [vmem:[#allocation2 + $0x28] sm:$0xff] (!%p1115_p11) }
 0x1cd   : > { %879 = vst.msk [vmem:[#allocation2 + $0x38] sm:$0xff] %vm871_vm1, %v870_v24  ;;  %v897_v36 = vmax.f32 (!%p1115_p11), %v889_v33, 0.0  ;;  %v1133_v44 = vpack.c.bf16 (!%p1115_p11), %v896_v35, %v896_v35 }
 0x1cf   : > { %v1134_v45 = vpack.c.bf16 %v897_v36, %v897_v36  ;;  %937 = vst.msk [vmem:[%s1589_s3 + $0x10] sm:$0xf] %vm932_vm2, %v1133_v44 }
 0x1d1   : > { %938 = vst.msk [vmem:[%s1589_s3 + $0x14] sm:$0xf] %vm932_vm2, %v1134_v45 }
 0x1d2   : > { %v890_v37 = vld [vmem:[#allocation2 + $0x30] sm:$0xff] }
 0x1d3   : > { %v898_v42 = vmax.f32 %v890_v37, 0.0 }
 0x1d4   : > { %v891_v38 = vld [vmem:[#allocation2 + $0x38] sm:$0xff] }
 0x1d5   : > { %v899_v46 = vmax.f32 %v891_v38, 0.0  ;;  %v1135_v47 = vpack.c.bf16 %v898_v42, %v898_v42 }
 0x1d7   : > { %v1136_v48 = vpack.c.bf16 %v899_v46, %v899_v46  ;;  %939 = vst.msk [vmem:[%s1589_s3 + $0x18] sm:$0xf] %vm932_vm2, %v1135_v47 }
 0x1d9   : > { %940 = vst.msk [vmem:[%s1589_s3 + $0x1c] sm:$0xf] %vm932_vm2, %v1136_v48 }
 0x1da PF: > { %s13_s16 = sadd.s32 1, %s1354_s16   ;;  %s1590_s12 = smov %s1342_s13 }
 0x1db   : > { %p10_p12 = scmp.ge.s32.totalorder %s13_s16, 10   ;;  %s1591_s13 = smov %s1412_s20 }
 0x1dc   : > { %s1592_s14 = smov %s1350_s15  ;;  %s1593_s15 = smov %s1595_s17 }
 0x1dd   :  { %12 = sbr.rel (!%p10_p12) target bundleno = 3 (0x3), region = 104 }

// kernel: _lambda_.12
= control target key start
LH: loop header
LB: loop body
LE: loop exit
PB: predicated region body
PF: predicated region fallthrough
CT: control target
= control target key end

     0   :  { %s1377_s12 = smov 0   ;;  %s1379_s13 = smov 0   ;;  %s1586_s0 = inlined_call_operand.vmem [shape: bf16[64,8192], index: 0, kind: input, shape index: {}]   ;;  %s1587_s1 = inlined_call_operand.vmem [shape: bf16[8192,8], index: 1, kind: input, shape index: {}]   ;;  %s1588_s2 = inlined_call_operand.vmem [shape: f32[64,1], index: 2, kind: input, shape index: {}]   ;;  %s1589_s3 = inlined_call_operand.vmem [shape: bf16[64,8], index: 3, kind: output, shape index: {}]  }
   0x1   :  { %s1381_s14 = smov 0   ;;  %s1383_s15 = smov 0  }
   0x2   :  { %s1385_s16 = smov 0  }
   0x3 LB: > { %s25_s17 = sadd.s32 1, %s1350_s15  ;;  %p48_p1 = scmp.ne.s32.totalorder %s1342_s13, %s1338_s12  ;;  %s1354_s16 = sphi %s1385_s16, %s13_s16   ;;  %s1350_s15 = sphi %s1383_s15, %s1593_s15   ;;  %s1346_s14 = sphi %s1381_s14, %s1592_s14   ;;  %s1342_s13 = sphi %s1379_s13, %s1591_s13   ;;  %s1338_s12 = sphi %s1377_s12, %s1590_s12  }
   0x4   : > { %p26_p0 = scmp.ge.s32.totalorder %s25_s17, 16  ;;  %p49_p2 = scmp.eq.s32.totalorder %s1354_s16, 0 }
   0x5   : > { %s41_s19 = sadd.s32 1, %s1342_s13  ;;  %p1058_p5 = scmp.ge.s32.totalorder %s1354_s16, 16 }
   0x6   : > { %s1595_s17 = smov (%p26_p0, %s25_s17), 0  ;;  %p50_p3 = por %p49_p2, %p48_p1 }
   0x7   : > { %s37_s18 = ssub.s32 %s1350_s15, %s1595_s17  ;;  %165 = sbr.rel (%p1058_p5) target bundleno = 26 (0x1a), region = 20 }
   0x8   : > { %p39_p4 = scmp.eq.s32.totalorder %s37_s18, 0 }
   0xa   : > { %s1412_s20 = scalar_select %p39_p4, %s1342_s13, %s41_s19  }
   0xe   : > { %168 = sbr.rel (!%p50_p3) target bundleno = 26 (0x1a), region = 24  ;;  %s170_s21 = sand.u32 (%p50_p3), 1, %s1342_s13  }
   0xf   : > { %s1128_s22 = sshll.u32 (%p50_p3), %s1350_s15, 4  ;;  %s1059_s23 = sshll.u32 (%p50_p3), %s170_s21, 7 }
  0x10   : > { %s1420_s26 = scalar_lea.vmem (%p50_p3), %s1586_s0, %s1128_s22  ;;  %s172_s27 = scalar_lea.vmem (%p50_p3), [#allocation3], %s1059_s23 }
  0x11   : > { %v191_v0 = vld [vmem:[%s1420_s26] sm:$0xff] (%p50_p3)  ;;  %v193_v1 = vld [vmem:[%s1420_s26 + $0x8] sm:$0xff] (%p50_p3) }
  0x12   : > { %v195_v2 = vld [vmem:[%s1420_s26 + $0x100] sm:$0xff] (%p50_p3)  ;;  %192 = vst [vmem:[%s172_s27] sm:$0xff] (%p50_p3), %v191_v0  ;;  %194 = vst [vmem:[%s172_s27 + $0x8] sm:$0xff] (%p50_p3), %v193_v1  ;;  %v197_v3 = vld [vmem:[%s1420_s26 + $0x108] sm:$0xff] (%p50_p3) }
  0x13   : > { %196 = vst [vmem:[%s172_s27 + $0x10] sm:$0xff] (%p50_p3), %v195_v2  ;;  %v199_v4 = vld [vmem:[%s1420_s26 + $0x200] sm:$0xff] (%p50_p3)  ;;  %v201_v5 = vld [vmem:[%s1420_s26 + $0x208] sm:$0xff] (%p50_p3)  ;;  %198 = vst [vmem:[%s172_s27 + $0x18] sm:$0xff] (%p50_p3), %v197_v3 }
  0x14   : > { %200 = vst [vmem:[%s172_s27 + $0x20] sm:$0xff] (%p50_p3), %v199_v4  ;;  %202 = vst [vmem:[%s172_s27 + $0x28] sm:$0xff] (%p50_p3), %v201_v5  ;;  %v203_v6 = vld [vmem:[%s1420_s26 + $0x300] sm:$0xff] (%p50_p3)  ;;  %v205_v7 = vld [vmem:[%s1420_s26 + $0x308] sm:$0xff] (%p50_p3) }
  0x15   : > { %v207_v8 = vld [vmem:[%s1420_s26 + $0x400] sm:$0xff]  ;;  %204 = vst [vmem:[%s172_s27 + $0x30] sm:$0xff] %v203_v6  ;;  %206 = vst [vmem:[%s172_s27 + $0x38] sm:$0xff] %v205_v7  ;;  %v209_v9 = vld [vmem:[%s1420_s26 + $0x408] sm:$0xff] }
  0x16   : > { %208 = vst [vmem:[%s172_s27 + $0x40] sm:$0xff] %v207_v8  ;;  %v211_v10 = vld [vmem:[%s1420_s26 + $0x500] sm:$0xff]  ;;  %v213_v11 = vld [vmem:[%s1420_s26 + $0x508] sm:$0xff]  ;;  %210 = vst [vmem:[%s172_s27 + $0x48] sm:$0xff] %v209_v9 }
  0x17   : > { %212 = vst [vmem:[%s172_s27 + $0x50] sm:$0xff] %v211_v10  ;;  %214 = vst [vmem:[%s172_s27 + $0x58] sm:$0xff] %v213_v11  ;;  %v215_v12 = vld [vmem:[%s1420_s26 + $0x600] sm:$0xff]  ;;  %v217_v13 = vld [vmem:[%s1420_s26 + $0x608] sm:$0xff] }
  0x18   : > { %v219_v14 = vld [vmem:[%s1420_s26 + $0x700] sm:$0xff]  ;;  %216 = vst [vmem:[%s172_s27 + $0x60] sm:$0xff] %v215_v12  ;;  %218 = vst [vmem:[%s172_s27 + $0x68] sm:$0xff] %v217_v13  ;;  %v221_v15 = vld [vmem:[%s1420_s26 + $0x708] sm:$0xff] }
  0x19   : > { %220 = vst [vmem:[%s172_s27 + $0x70] sm:$0xff] %v219_v14  ;;  %222 = vst [vmem:[%s172_s27 + $0x78] sm:$0xff] %v221_v15 }
  0x1a PF: > { %p1062_p6 = scmp.ge.s32.totalorder %s1354_s16, 1  ;;  %p239_p7 = scmp.lt.s32.totalorder %s1354_s16, 17 }
  0x1c   : > { %p240_p8 = pnand %p1062_p6, %p239_p7 }
  0x1d   : > { %s246_s28 = sand.u32 (!%p240_p8), 1, %s1338_s12   ;;  %s1064_s29 = sshll.u32 (!%p240_p8), %s1346_s14, 6 }
  0x1e   : > { %243 = sbr.rel (%p240_p8) target bundleno = 474 (0x1da), region = 51  ;;  %s1063_s30 = sshll.u32 (!%p240_p8), %s246_s28, 7 }
  0x1f   : > { %p288_p9 = scmp.lt.s32.totalorder (!%p240_p8), %s1064_s29, 1023  ;;  %s1447_s8 = scalar_lea.vmem (!%p240_p8), [#allocation3], %s1063_s30 }
  0x20   : > { %p1066_p10 = scmp.ne.s32.totalorder (!%p240_p8), %s1346_s14, 0 }
  0x25   : > { %s1597_s29 = smov (!%p288_p9, %s1064_s29), 1023  ;;  %315 = sbr.rel (%p1066_p10) target bundleno = 181 (0xb5), region = 59 }
  0x26   : > { %s1065_s4 = sshll.u32 %s1597_s29, 2  ;;  %v318_v16 = vld [vmem:[%s1588_s2 + $0x10] sm:$0xff] (!%p1066_p10)  ;;  %v316_v17 = vld [vmem:[%s1588_s2] sm:$0xff] (!%p1066_p10)  ;;  %v1356_v18 = vmov (!%p1066_p10), 0   ;;  %v319_v19 = vld [vmem:[%s1588_s2 + $0x18] sm:$0xff] (!%p1066_p10)  ;;  %vm364_vm0 = vcmask (!%p1066_p10), 64512  }
  0x27   : > { %s1445_s7 = scalar_lea.vmem %s1587_s1, %s1065_s4  ;;  %1259 = vset.pattern.permute.xlu1 (!%p1066_p10), %v1356_v18  ;;  %1258 = vset.pattern.permute.xlu0 (!%p1066_p10), %v1356_v18  ;;  %v317_v20 = vld [vmem:[%s1588_s2 + $0x8] sm:$0xff] (!%p1066_p10)  ;;  %v320_v22 = vld [vmem:[%s1588_s2 + $0x20] sm:$0xff] (!%p1066_p10)  ;;  %v323_v23 = vld [vmem:[%s1588_s2 + $0x38] sm:$0xff] (!%p1066_p10) }
  0x28   : > { %336 = vperm.xlu1 (!%p1066_p10), %1259, %v318_v16   ;;  %326 = vperm.xlu0 (!%p1066_p10), %1258, %v316_v17   ;;  %v321_v21 = vld [vmem:[%s1588_s2 + $0x28] sm:$0xff] (!%p1066_p10)  ;;  %v322_v24 = vld [vmem:[%s1588_s2 + $0x30] sm:$0xff] (!%p1066_p10) }
  0x2c   : > { %341 = vperm.xlu1 %1259, %v319_v19   ;;  %331 = vperm.xlu0 %1258, %v317_v20  }
  0x30   : > { %351 = vperm.xlu1 %1259, %v321_v21   ;;  %346 = vperm.xlu0 %1258, %v320_v22  }
  0x34   : > { %361 = vperm.xlu1 %1259, %v323_v23   ;;  %356 = vperm.xlu0 %1258, %v322_v24  }
  0xa7   : > { %v337_v25 = vpop.permute.xlu1 %336  ;;  %v327_v26 = vpop.permute.xlu0 %326 }
  0xa8   : > { %367 = vst.msk [vmem:[#allocation2 + $0x10] sm:$0xff] %vm364_vm0, %v337_v25  ;;  %365 = vst.msk [vmem:[#allocation2] sm:$0xff] %vm364_vm0, %v327_v26 }
  0xab   : > { %v342_v27 = vpop.permute.xlu1 %341  ;;  %v332_v28 = vpop.permute.xlu0 %331 }
  0xac   : > { %368 = vst.msk [vmem:[#allocation2 + $0x18] sm:$0xff] %vm364_vm0, %v342_v27  ;;  %366 = vst.msk [vmem:[#allocation2 + $0x8] sm:$0xff] %vm364_vm0, %v332_v28 }
  0xaf   : > { %v352_v29 = vpop.permute.xlu1 %351  ;;  %v347_v30 = vpop.permute.xlu0 %346 }
  0xb0   : > { %370 = vst.msk [vmem:[#allocation2 + $0x28] sm:$0xff] %vm364_vm0, %v352_v29  ;;  %369 = vst.msk [vmem:[#allocation2 + $0x20] sm:$0xff] %vm364_vm0, %v347_v30 }
  0xb3   : > { %v362_v31 = vpop.permute.xlu1 %361  ;;  %v357_v32 = vpop.permute.xlu0 %356 }
  0xb4   : > { %372 = vst.msk [vmem:[#allocation2 + $0x38] sm:$0xff] %vm364_vm0, %v362_v31  ;;  %371 = vst.msk [vmem:[#allocation2 + $0x30] sm:$0xff] %vm364_vm0, %v357_v32 }
  0xb5 PF: > { %v1260_v33 = vld [vmem:[%s1445_s7 + $0x40] sm:$0xff]   ;;  %v1264_v37 = vld [vmem:[%s1445_s7 + $0x48] sm:$0xff]   ;;  %v1268_v41 = vld [vmem:[%s1445_s7 + $0x50] sm:$0xff]   ;;  %vm871_vm1 = vcmask 64512   ;;  %p1115_p11 = scmp.ne.s32.totalorder %s1346_s14, 15 }
  0xb6   : > { %v1261_v34 = vld [vmem:[%s1445_s7 + $0xc0] sm:$0xff]   ;;  %1137 = vmatprep.subr.bf16.mxu0 %v1260_v33  ;;  %v1265_v38 = vld [vmem:[%s1445_s7 + $0xc8] sm:$0xff]   ;;  %v1269_v42 = vld [vmem:[%s1445_s7 + $0xd0] sm:$0xff]   ;;  %vm932_vm2 = vcmask (!%p1115_p11), 60416  }
  0xb7   : > { %v1262_v35 = vld [vmem:[%s1445_s7] sm:$0xff]   ;;  %1177 = vmatprep.subr.bf16.mxu1 %v1261_v34  ;;  %v1266_v39 = vld [vmem:[%s1445_s7 + $0x8] sm:$0xff]   ;;  %v1270_v43 = vld [vmem:[%s1445_s7 + $0x10] sm:$0xff]  }
  0xb8   : > { %v1263_v36 = vld [vmem:[%s1445_s7 + $0x80] sm:$0xff]   ;;  %1138 = vmatpush3.bf16.msra.mxu0 %v1262_v35  ;;  %v1267_v40 = vld [vmem:[%s1445_s7 + $0x88] sm:$0xff]   ;;  %v1271_v44 = vld [vmem:[%s1445_s7 + $0x90] sm:$0xff]  }
  0xb9   : > { %1178 = vmatpush3.bf16.msra.mxu1 %v1263_v36  ;;  %1139 = vmatprep.subr.bf16.mxu0 %v1264_v37  ;;  %v1272_v45 = vld [vmem:[%s1445_s7 + $0x58] sm:$0xff]   ;;  %v1276_v49 = vld [vmem:[%s1445_s7 + $0x60] sm:$0xff]   ;;  %v1280_v53 = vld [vmem:[%s1445_s7 + $0x68] sm:$0xff]  }
  0xba   : > { %1179 = vmatprep.subr.bf16.mxu1 %v1265_v38  ;;  %v1273_v46 = vld [vmem:[%s1445_s7 + $0xd8] sm:$0xff]   ;;  %v1277_v50 = vld [vmem:[%s1445_s7 + $0xe0] sm:$0xff]   ;;  %v1281_v54 = vld [vmem:[%s1445_s7 + $0xe8] sm:$0xff]  }
  0xbb   : > { %v1274_v47 = vld [vmem:[%s1445_s7 + $0x18] sm:$0xff]   ;;  %v1278_v51 = vld [vmem:[%s1445_s7 + $0x20] sm:$0xff]   ;;  %v1282_v55 = vld [vmem:[%s1445_s7 + $0x28] sm:$0xff]  }
  0xbc   : > { %1140 = vmatpush3.bf16.msra.mxu0 %v1266_v39  ;;  %v1275_v48 = vld [vmem:[%s1445_s7 + $0x98] sm:$0xff]   ;;  %v1279_v52 = vld [vmem:[%s1445_s7 + $0xa0] sm:$0xff]   ;;  %v1283_v56 = vld [vmem:[%s1445_s7 + $0xa8] sm:$0xff]  }
  0xbd   : > { %1180 = vmatpush3.bf16.msra.mxu1 %v1267_v40  ;;  %1141 = vmatprep.subr.bf16.mxu0 %v1268_v41  ;;  %v1284_v57 = vld [vmem:[%s1445_s7 + $0x70] sm:$0xff]   ;;  %v1288_v61 = vld [vmem:[%s1445_s7 + $0x78] sm:$0xff]   ;;  %v373_v26 = vld [vmem:[#allocation2] sm:$0xff] }
  0xbe   : > { %1181 = vmatprep.subr.bf16.mxu1 %v1269_v42  ;;  %v1285_v58 = vld [vmem:[%s1445_s7 + $0xf0] sm:$0xff]   ;;  %v1289_v62 = vld [vmem:[%s1445_s7 + $0xf8] sm:$0xff]   ;;  %v374_v31 = vld [vmem:[#allocation2 + $0x8] sm:$0xff] }
  0xbf   : > { %v1286_v59 = vld [vmem:[%s1445_s7 + $0x30] sm:$0xff]   ;;  %v1290_v63 = vld [vmem:[%s1445_s7 + $0x38] sm:$0xff]  }
  0xc0   : > { %1142 = vmatpush3.bf16.msra.mxu0 %v1270_v43  ;;  %v1287_v60 = vld [vmem:[%s1445_s7 + $0xb0] sm:$0xff]   ;;  %v1291_v0 = vld [vmem:[%s1445_s7 + $0xb8] sm:$0xff]  }
  0xc1   : > { %1182 = vmatpush3.bf16.msra.mxu1 %v1271_v44  ;;  %1143 = vmatprep.subr.bf16.mxu0 %v1272_v45  ;;  %v1292_v1 = vld [vmem:[%s1447_s8] ss:$16 sps:$4 sm:$0xff]   ;;  %v1294_v2 = vld [vmem:[%s1447_s8 + $0x4] ss:$16 sps:$4 sm:$0xff]   ;;  %v1295_v3 = vld [vmem:[%s1447_s8 + $0x8] ss:$16 sps:$4 sm:$0xff]  }
  0xc2   : > { %1183 = vmatprep.subr.bf16.mxu1 %v1273_v46  ;;  %v1297_v4 = vld [vmem:[%s1447_s8 + $0xc] ss:$16 sps:$4 sm:$0xff]   ;;  %765 = vmatprep.mubr.bf16.mxu0 %v1294_v2  ;;  %v1298_v5 = vld [vmem:[%s1447_s8 + $0x24] ss:$16 sps:$4 sm:$0xff]   ;;  %v1302_v7 = vld [vmem:[%s1447_s8 + $0x20] ss:$16 sps:$4 sm:$0xff]  }
  0xc3   : > { %830 = vmatprep.mubr.bf16.mxu1 %v1297_v4  ;;  %v1300_v6 = vld [vmem:[%s1447_s8 + $0x2c] ss:$16 sps:$4 sm:$0xff]   ;;  %v1303_v8 = vld [vmem:[%s1447_s8 + $0x28] ss:$16 sps:$4 sm:$0xff]   ;;  %v1304_v9 = vld [vmem:[%s1447_s8 + $0x44] ss:$16 sps:$4 sm:$0xff]  }
  0xc4   : > { %1144 = vmatpush3.bf16.msra.mxu0 %v1274_v47  ;;  %v1306_v10 = vld [vmem:[%s1447_s8 + $0x4c] ss:$16 sps:$4 sm:$0xff]   ;;  %v1308_v11 = vld [vmem:[%s1447_s8 + $0x40] ss:$16 sps:$4 sm:$0xff]   ;;  %v1309_v12 = vld [vmem:[%s1447_s8 + $0x48] ss:$16 sps:$4 sm:$0xff]  }
  0xc5   : > { %1184 = vmatpush3.bf16.msra.mxu1 %v1275_v48  ;;  %1145 = vmatprep.subr.bf16.mxu0 %v1276_v49  ;;  %v1310_v13 = vld [vmem:[%s1447_s8 + $0x64] ss:$16 sps:$4 sm:$0xff]   ;;  %v1312_v14 = vld [vmem:[%s1447_s8 + $0x6c] ss:$16 sps:$4 sm:$0xff]   ;;  %v1314_v15 = vld [vmem:[%s1447_s8 + $0x60] ss:$16 sps:$4 sm:$0xff]  }
  0xc6   : > { %1185 = vmatprep.subr.bf16.mxu1 %v1277_v50  ;;  %v1315_v16 = vld [vmem:[%s1447_s8 + $0x68] ss:$16 sps:$4 sm:$0xff]   ;;  %v375_v44 = vld [vmem:[#allocation2 + $0x10] sm:$0xff] }
  0xc7   : > { %v376_v49 = vld [vmem:[#allocation2 + $0x18] sm:$0xff] }
  0xc8   : > { %1146 = vmatpush3.bf16.msra.mxu0 %v1278_v51 }
  0xc9   : > { %1186 = vmatpush3.bf16.msra.mxu1 %v1279_v52  ;;  %1147 = vmatprep.subr.bf16.mxu0 %v1280_v53 }
  0xca   : > { %1187 = vmatprep.subr.bf16.mxu1 %v1281_v54 }
  0xcc   : > { %1148 = vmatpush3.bf16.msra.mxu0 %v1282_v55 }
  0xcd   : > { %1188 = vmatpush3.bf16.msra.mxu1 %v1283_v56  ;;  %1149 = vmatprep.subr.bf16.mxu0 %v1284_v57 }
  0xce   : > { %1189 = vmatprep.subr.bf16.mxu1 %v1285_v58 }
  0xd0   : > { %1150 = vmatpush3.bf16.msra.mxu0 %v1286_v59 }
  0xd1   : > { %1190 = vmatpush3.bf16.msra.mxu1 %v1287_v60  ;;  %1151 = vmatprep.subr.bf16.mxu0 %v1288_v61 }
  0xd2   : > { %1191 = vmatprep.subr.bf16.mxu1 %v1289_v62  ;;  %v377_v62 = vld [vmem:[#allocation2 + $0x20] sm:$0xff] }
  0xd4   : > { %1152 = vmatpush3.bf16.msra.mxu0 %v1290_v63 }
  0xd5   : > { %1192 = vmatpush3.bf16.msra.mxu1 %v1291_v0 }
  0xd7   : > { %766 = vmatmul.mubr.bf16.vlgmr.msra.gmra.mrb[0].mxu0 %v1292_v1 }
  0xd8   : > { %831 = vmatmul.mubr.bf16.vlgmr.msra.gmra.mrb[0].mxu1 %v1295_v3  ;;  %773 = vmatprep.mubr.bf16.mxu0 %v1298_v5  ;;  %v378_v3 = vld [vmem:[#allocation2 + $0x28] sm:$0xff] }
  0xd9   : > { %838 = vmatprep.mubr.bf16.mxu1 %v1300_v6 }
  0xdf   : > { %774 = vmatmul.mubr.bf16.gmra.mrb[4].mxu0 %v1302_v7 }
  0xe0   : > { %839 = vmatmul.mubr.bf16.gmra.mrb[4].mxu1 %v1303_v8  ;;  %781 = vmatprep.mubr.bf16.mxu0 %v1304_v9 }
  0xe1   : > { %846 = vmatprep.mubr.bf16.mxu1 %v1306_v10 }
  0xe7   : > { %782 = vmatmul.mubr.bf16.gmra.mrb[8].mxu0 %v1308_v11 }
  0xe8   : > { %847 = vmatmul.mubr.bf16.gmra.mrb[8].mxu1 %v1309_v12  ;;  %789 = vmatprep.mubr.bf16.mxu0 %v1310_v13 }
  0xe9   : > { %854 = vmatprep.mubr.bf16.mxu1 %v1312_v14 }
  0xef   : > { %790 = vmatmul.mubr.bf16.gmra.mrb[12].mxu0 %v1314_v15 }
  0xf0   : > { %855 = vmatmul.mubr.bf16.gmra.mrb[12].mxu1 %v1315_v16  ;;  %v379_v16 = vld [vmem:[#allocation2 + $0x30] sm:$0xff] }
 0x1aa   : > { %v1153_v17 = vpop.f32.mrb[0].mxu0 }
 0x1ab   : > { %v1193_v18 = vpop.f32.mrb[0].mxu1  ;;  %v1154_v19 = vpop.f32.mrb[1].mxu0 }
 0x1ac   : > { %v1155_v20 = vadd.f32 %v1154_v19, %v1153_v17  ;;  %v1194_v21 = vpop.f32.mrb[1].mxu1  ;;  %v1156_v22 = vpop.f32.mrb[2].mxu0 }
 0x1ad   : > { %v1195_v23 = vadd.f32 %v1194_v21, %v1193_v18  ;;  %v1196_v24 = vpop.f32.mrb[2].mxu1  ;;  %v1157_v25 = vpop.f32.mrb[3].mxu0  ;;  %v380_v21 = vld [vmem:[#allocation2 + $0x38] sm:$0xff] }
 0x1ae   : > { %v1158_v27 = vadd.f32 %v1157_v25, %v1156_v22  ;;  %v1197_v28 = vpop.f32.mrb[3].mxu1 }
 0x1af   : > { %v833_v29 = vadd.f32 %v1195_v23, %v1155_v20  ;;  %v1198_v30 = vadd.f32 %v1197_v28, %v1196_v24 }
 0x1b1   : > { %v863_v32 = vadd.f32 %v833_v29, %v373_v26  ;;  %v836_v33 = vadd.f32 %v1198_v30, %v1158_v27 }
 0x1b2   : > { %v1159_v34 = vpop.f32.mrb[4].mxu0 }
 0x1b3   : > { %872 = vst.msk [vmem:[#allocation2] sm:$0xff] %vm871_vm1, %v863_v32  ;;  %v864_v35 = vadd.f32 %v836_v33, %v374_v31  ;;  %v1199_v36 = vpop.f32.mrb[4].mxu1  ;;  %v1160_v37 = vpop.f32.mrb[5].mxu0 }
 0x1b4   : > { %v1161_v38 = vadd.f32 %v1160_v37, %v1159_v34  ;;  %v1200_v39 = vpop.f32.mrb[5].mxu1  ;;  %v1162_v40 = vpop.f32.mrb[6].mxu0 }
 0x1b5   : > { %873 = vst.msk [vmem:[#allocation2 + $0x8] sm:$0xff] %vm871_vm1, %v864_v35  ;;  %v1201_v41 = vadd.f32 %v1200_v39, %v1199_v36  ;;  %v1202_v42 = vpop.f32.mrb[6].mxu1  ;;  %v1163_v43 = vpop.f32.mrb[7].mxu0 }
 0x1b6   : > { %v1164_v45 = vadd.f32 %v1163_v43, %v1162_v40  ;;  %v1203_v46 = vpop.f32.mrb[7].mxu1 }
 0x1b7   : > { %v841_v47 = vadd.f32 %v1201_v41, %v1161_v38  ;;  %v1204_v48 = vadd.f32 %v1203_v46, %v1202_v42 }
 0x1b9   : > { %v865_v50 = vadd.f32 %v841_v47, %v375_v44  ;;  %v844_v51 = vadd.f32 %v1204_v48, %v1164_v45 }
 0x1ba   : > { %v1165_v52 = vpop.f32.mrb[8].mxu0  ;;  %v884_v25 = vld [vmem:[#allocation2] sm:$0xff] (!%p1115_p11) }
 0x1bb   : > { %874 = vst.msk [vmem:[#allocation2 + $0x10] sm:$0xff] %vm871_vm1, %v865_v50  ;;  %v866_v53 = vadd.f32 %v844_v51, %v376_v49  ;;  %v1205_v54 = vpop.f32.mrb[8].mxu1  ;;  %v1166_v55 = vpop.f32.mrb[9].mxu0  ;;  %v892_v28 = vmax.f32 (!%p1115_p11), %v884_v25, 0.0 }
 0x1bc   : > { %v1167_v56 = vadd.f32 %v1166_v55, %v1165_v52  ;;  %v1206_v57 = vpop.f32.mrb[9].mxu1  ;;  %v1168_v58 = vpop.f32.mrb[10].mxu0  ;;  %v885_v26 = vld [vmem:[#allocation2 + $0x8] sm:$0xff] (!%p1115_p11) }
 0x1bd   : > { %875 = vst.msk [vmem:[#allocation2 + $0x18] sm:$0xff] %vm871_vm1, %v866_v53  ;;  %v1207_v59 = vadd.f32 %v1206_v57, %v1205_v54  ;;  %v1208_v60 = vpop.f32.mrb[10].mxu1  ;;  %v1169_v61 = vpop.f32.mrb[11].mxu0  ;;  %v893_v29 = vmax.f32 (!%p1115_p11), %v885_v26, 0.0  ;;  %v1129_v39 = vpack.c.bf16 (!%p1115_p11), %v892_v28, %v892_v28 }
 0x1be   : > { %v1170_v63 = vadd.f32 %v1169_v61, %v1168_v58  ;;  %v1209_v0 = vpop.f32.mrb[11].mxu1 }
 0x1bf   : > { %v849_v1 = vadd.f32 %v1207_v59, %v1167_v56  ;;  %v1210_v2 = vadd.f32 %v1209_v0, %v1208_v60  ;;  %v1130_v40 = vpack.c.bf16 (!%p1115_p11), %v893_v29, %v893_v29  ;;  %933 = vst.msk [vmem:[%s1589_s3] sm:$0xf] (!%p1115_p11), %vm932_vm2, %v1129_v39 }
 0x1c1   : > { %v867_v4 = vadd.f32 %v849_v1, %v377_v62  ;;  %v852_v5 = vadd.f32 %v1210_v2, %v1170_v63  ;;  %934 = vst.msk [vmem:[%s1589_s3 + $0x4] sm:$0xf] (!%p1115_p11), %vm932_vm2, %v1130_v40 }
 0x1c2   : > { %v1171_v6 = vpop.f32.mrb[12].mxu0  ;;  %v886_v27 = vld [vmem:[#allocation2 + $0x10] sm:$0xff] (!%p1115_p11) }
 0x1c3   : > { %876 = vst.msk [vmem:[#allocation2 + $0x20] sm:$0xff] %vm871_vm1, %v867_v4  ;;  %v868_v7 = vadd.f32 %v852_v5, %v378_v3  ;;  %v1211_v8 = vpop.f32.mrb[12].mxu1  ;;  %v1172_v9 = vpop.f32.mrb[13].mxu0  ;;  %v894_v30 = vmax.f32 (!%p1115_p11), %v886_v27, 0.0 }
 0x1c4   : > { %v1173_v10 = vadd.f32 %v1172_v9, %v1171_v6  ;;  %v1212_v11 = vpop.f32.mrb[13].mxu1  ;;  %v1174_v12 = vpop.f32.mrb[14].mxu0  ;;  %v887_v31 = vld [vmem:[#allocation2 + $0x18] sm:$0xff] (!%p1115_p11) }
 0x1c5   : > { %877 = vst.msk [vmem:[#allocation2 + $0x28] sm:$0xff] %vm871_vm1, %v868_v7  ;;  %v1213_v13 = vadd.f32 %v1212_v11, %v1211_v8  ;;  %v1214_v14 = vpop.f32.mrb[14].mxu1  ;;  %v1175_v15 = vpop.f32.mrb[15].mxu0  ;;  %v895_v34 = vmax.f32 (!%p1115_p11), %v887_v31, 0.0  ;;  %v1131_v41 = vpack.c.bf16 (!%p1115_p11), %v894_v30, %v894_v30 }
 0x1c6   : > { %v1176_v17 = vadd.f32 %v1175_v15, %v1174_v12  ;;  %v1215_v18 = vpop.f32.mrb[15].mxu1 }
 0x1c7   : > { %v857_v19 = vadd.f32 %v1213_v13, %v1173_v10  ;;  %v1216_v20 = vadd.f32 %v1215_v18, %v1214_v14  ;;  %883 = sbr.rel (%p1115_p11) target bundleno = 474 (0x1da), region = 63  ;;  %v1132_v43 = vpack.c.bf16 (!%p1115_p11), %v895_v34, %v895_v34  ;;  %935 = vst.msk [vmem:[%s1589_s3 + $0x8] sm:$0xf] (!%p1115_p11), %vm932_vm2, %v1131_v41 }
 0x1c9   : > { %v869_v22 = vadd.f32 %v857_v19, %v379_v16  ;;  %v860_v23 = vadd.f32 %v1216_v20, %v1176_v17  ;;  %936 = vst.msk [vmem:[%s1589_s3 + $0xc] sm:$0xf] (!%p1115_p11), %vm932_vm2, %v1132_v43 }
 0x1ca   : > { %v888_v32 = vld [vmem:[#allocation2 + $0x20] sm:$0xff] (!%p1115_p11) }
 0x1cb   : > { %878 = vst.msk [vmem:[#allocation2 + $0x30] sm:$0xff] %vm871_vm1, %v869_v22  ;;  %v870_v24 = vadd.f32 %v860_v23, %v380_v21  ;;  %v896_v35 = vmax.f32 (!%p1115_p11), %v888_v32, 0.0 }
 0x1cc   : > { %v889_v33 = vld [vmem:[#allocation2 + $0x28] sm:$0xff] (!%p1115_p11) }
 0x1cd   : > { %879 = vst.msk [vmem:[#allocation2 + $0x38] sm:$0xff] %vm871_vm1, %v870_v24  ;;  %v897_v36 = vmax.f32 (!%p1115_p11), %v889_v33, 0.0  ;;  %v1133_v44 = vpack.c.bf16 (!%p1115_p11), %v896_v35, %v896_v35 }
 0x1cf   : > { %v1134_v45 = vpack.c.bf16 %v897_v36, %v897_v36  ;;  %937 = vst.msk [vmem:[%s1589_s3 + $0x10] sm:$0xf] %vm932_vm2, %v1133_v44 }
 0x1d1   : > { %938 = vst.msk [vmem:[%s1589_s3 + $0x14] sm:$0xf] %vm932_vm2, %v1134_v45 }
 0x1d2   : > { %v890_v37 = vld [vmem:[#allocation2 + $0x30] sm:$0xff] }
 0x1d3   : > { %v898_v42 = vmax.f32 %v890_v37, 0.0 }
 0x1d4   : > { %v891_v38 = vld [vmem:[#allocation2 + $0x38] sm:$0xff] }
 0x1d5   : > { %v899_v46 = vmax.f32 %v891_v38, 0.0  ;;  %v1135_v47 = vpack.c.bf16 %v898_v42, %v898_v42 }
 0x1d7   : > { %v1136_v48 = vpack.c.bf16 %v899_v46, %v899_v46  ;;  %939 = vst.msk [vmem:[%s1589_s3 + $0x18] sm:$0xf] %vm932_vm2, %v1135_v47 }
 0x1d9   : > { %940 = vst.msk [vmem:[%s1589_s3 + $0x1c] sm:$0xf] %vm932_vm2, %v1136_v48 }
 0x1da PF: > { %s13_s16 = sadd.s32 1, %s1354_s16   ;;  %s1590_s12 = smov %s1342_s13 }
 0x1db   : > { %p10_p12 = scmp.ge.s32.totalorder %s13_s16, 18   ;;  %s1591_s13 = smov %s1412_s20 }
 0x1dc   : > { %s1592_s14 = smov %s1350_s15  ;;  %s1593_s15 = smov %s1595_s17 }
 0x1dd   :  { %12 = sbr.rel (!%p10_p12) target bundleno = 3 (0x3), region = 104 }

// kernel: _lambda_.13
= control target key start
LH: loop header
LB: loop body
LE: loop exit
PB: predicated region body
PF: predicated region fallthrough
CT: control target
= control target key end

     0   :  { %14 = vsyncpa [#allocation3], 0  ;;  %v64_v9 = vlaneseq  ;;  %v688_v10 = vmov 1966171168   ;;  %s930_s0 = inlined_call_operand.vmem [shape: bf16[2,256], index: 0, kind: input, shape index: {}]   ;;  %s931_s1 = inlined_call_operand.vmem [shape: bf16[256,256], index: 1, kind: input, shape index: {}]   ;;  %s932_s2 = inlined_call_operand.vmem [shape: f32[1,256], index: 2, kind: input, shape index: {}]   ;;  %s933_s3 = inlined_call_operand.vmem [shape: bf16[128,256], index: 3, kind: input, shape index: {}]   ;;  %s934_s4 = inlined_call_operand.vmem [shape: f32[1,256], index: 4, kind: input, shape index: {}]   ;;  %s935_s5 = inlined_call_operand.vmem [shape: f32[2,128], index: 5, kind: input, shape index: {}]   ;;  %s936_s6 = inlined_call_operand.hbm [shape: f32[2,128], index: 6, kind: output, shape index: {0}]   ;;  %s937_s7 = inlined_call_operand.hbm [shape: f32[2,128], index: 7, kind: output, shape index: {1}]   ;;  %s938_s8 = inlined_call_operand.vmem [shape: bf16[2,256], index: 8, kind: output, shape index: {2}]  }
   0x1   :  { %v566_v0 = vld [vmem:[%s931_s1 + $0x4] ss:$8 sps:$4 sm:$0xff]   ;;  %v568_v1 = vld [vmem:[%s931_s1] ss:$8 sps:$4 sm:$0xff]   ;;  %v569_v2 = vld [vmem:[%s931_s1 + $0x14] ss:$8 sps:$4 sm:$0xff]   ;;  %v84_v11 = vunpack.c.l.s4 %v688_v10 }
   0x2   :  { %259 = vmatprep.subr.bf16.mxu0 %v566_v0  ;;  %v571_v3 = vld [vmem:[%s931_s1 + $0x10] ss:$8 sps:$4 sm:$0xff]   ;;  %v572_v4 = vld [vmem:[%s931_s1 + $0x24] ss:$8 sps:$4 sm:$0xff]   ;;  %v574_v5 = vld [vmem:[%s931_s1 + $0x20] ss:$8 sps:$4 sm:$0xff]  }
   0x3   :  { %260 = vmatpush1.bf16.msra.mxu0 %v568_v1  ;;  %v575_v6 = vld [vmem:[%s931_s1 + $0x34] ss:$8 sps:$4 sm:$0xff]   ;;  %v577_v7 = vld [vmem:[%s931_s1 + $0x30] ss:$8 sps:$4 sm:$0xff]   ;;  %v578_v8 = vld [vmem:[%s931_s1 + $0x44] ss:$8 sps:$4 sm:$0xff]   ;;  %v85_v15 = vunpack.c.0.s8 %v84_v11 }
   0x4   :  { %261 = vmatprep.subr.bf16.mxu0 %v569_v2  ;;  %v580_v12 = vld [vmem:[%s931_s1 + $0x40] ss:$8 sps:$4 sm:$0xff]   ;;  %v581_v13 = vld [vmem:[%s931_s1 + $0x54] ss:$8 sps:$4 sm:$0xff]   ;;  %v770_v14 = vshrl.u32 %v64_v9, 7 }
   0x5   :  { %v583_v16 = vld [vmem:[%s931_s1 + $0x50] ss:$8 sps:$4 sm:$0xff]   ;;  %v584_v17 = vld [vmem:[%s931_s1 + $0x64] ss:$8 sps:$4 sm:$0xff]   ;;  %v586_v19 = vld [vmem:[%s931_s1 + $0x60] ss:$8 sps:$4 sm:$0xff]  }
   0x6   :  { %v779_v18 = vsub.s32 %v85_v15, %v770_v14  ;;  %v511_v20 = vld.sshfl [vmem:[%s930_s0] sm:$0x11 pattern:$0x75316420]  ;;  %v614_v22 = vld [vmem:[%s933_s3 + $0x4] ss:$8 sps:$4 sm:$0xff]  }
   0x7   :  { %262 = vmatpush1.bf16.msra.mxu0 %v571_v3  ;;  %v82_v21 = vcombine.high %v511_v20, %v511_v20  ;;  %v616_v23 = vld [vmem:[%s933_s3] ss:$8 sps:$4 sm:$0xff]   ;;  %v587_v24 = vld [vmem:[%s931_s1 + $0x74] ss:$8 sps:$4 sm:$0xff]   ;;  %415 = vmatprep.subr.bf16.mxu1 %v614_v22  ;;  %v619_v27 = vld [vmem:[%s933_s3 + $0x10] ss:$8 sps:$4 sm:$0xff]  }
   0x8   :  { %263 = vmatprep.subr.bf16.mxu0 %v572_v4  ;;  %v617_v26 = vld [vmem:[%s933_s3 + $0x14] ss:$8 sps:$4 sm:$0xff]   ;;  %v589_v28 = vld [vmem:[%s931_s1 + $0x70] ss:$8 sps:$4 sm:$0xff]   ;;  %416 = vmatpush1.bf16.msra.mxu1 %v616_v23  ;;  %v590_v29 = vld [vmem:[%s931_s1 + $0x84] ss:$8 sps:$4 sm:$0xff]  }
   0x9   :  { %v96_v25 = vrot.slane %v82_v21, %v779_v18  ;;  %417 = vmatprep.subr.bf16.mxu1 %v617_v26 }
   0xb   :  { %264 = vmatpush1.bf16.msra.mxu0 %v574_v5  ;;  %291 = vmatprep.mubr.bf16.mxu0 %v96_v25 }
   0xc   :  { %265 = vmatprep.subr.bf16.mxu0 %v575_v6  ;;  %418 = vmatpush1.bf16.msra.mxu1 %v619_v27 }
   0xf   :  { %266 = vmatpush1.bf16.msra.mxu0 %v577_v7 }
  0x10   :  { %267 = vmatprep.subr.bf16.mxu0 %v578_v8 }
  0x13   :  { %268 = vmatpush1.bf16.msra.mxu0 %v580_v12 }
  0x14   :  { %269 = vmatprep.subr.bf16.mxu0 %v581_v13 }
  0x17   :  { %270 = vmatpush1.bf16.msra.mxu0 %v583_v16 }
  0x18   :  { %271 = vmatprep.subr.bf16.mxu0 %v584_v17 }
  0x1b   :  { %272 = vmatpush1.bf16.msra.mxu0 %v586_v19 }
  0x1c   :  { %273 = vmatprep.subr.bf16.mxu0 %v587_v24 }
  0x1d   :  { %15 = vsyncpa [#allocation5], 0  ;;  %v592_v30 = vld [vmem:[%s931_s1 + $0x80] ss:$8 sps:$4 sm:$0xff]   ;;  %v593_v31 = vld [vmem:[%s931_s1 + $0x94] ss:$8 sps:$4 sm:$0xff]   ;;  %v89_v45 = vrot.slane %v511_v20, %v779_v18 }
  0x1e   :  { %v595_v32 = vld [vmem:[%s931_s1 + $0x90] ss:$8 sps:$4 sm:$0xff]   ;;  %v596_v33 = vld [vmem:[%s931_s1 + $0xa4] ss:$8 sps:$4 sm:$0xff]   ;;  %v598_v34 = vld [vmem:[%s931_s1 + $0xa0] ss:$8 sps:$4 sm:$0xff]  }
  0x1f   :  { %274 = vmatpush1.bf16.msra.mxu0 %v589_v28  ;;  %v599_v35 = vld [vmem:[%s931_s1 + $0xb4] ss:$8 sps:$4 sm:$0xff]   ;;  %v601_v36 = vld [vmem:[%s931_s1 + $0xb0] ss:$8 sps:$4 sm:$0xff]   ;;  %v602_v37 = vld [vmem:[%s931_s1 + $0xc4] ss:$8 sps:$4 sm:$0xff]  }
  0x20   :  { %275 = vmatprep.subr.bf16.mxu0 %v590_v29  ;;  %v604_v38 = vld [vmem:[%s931_s1 + $0xc0] ss:$8 sps:$4 sm:$0xff]   ;;  %v605_v39 = vld [vmem:[%s931_s1 + $0xd4] ss:$8 sps:$4 sm:$0xff]   ;;  %v607_v40 = vld [vmem:[%s931_s1 + $0xd0] ss:$8 sps:$4 sm:$0xff]  }
  0x21   :  { %v608_v41 = vld [vmem:[%s931_s1 + $0xe4] ss:$8 sps:$4 sm:$0xff]   ;;  %v610_v42 = vld [vmem:[%s931_s1 + $0xe0] ss:$8 sps:$4 sm:$0xff]   ;;  %v611_v43 = vld [vmem:[%s931_s1 + $0xf4] ss:$8 sps:$4 sm:$0xff]  }
  0x22   :  { %v613_v44 = vld [vmem:[%s931_s1 + $0xf0] ss:$8 sps:$4 sm:$0xff]   ;;  %v620_v46 = vld [vmem:[%s933_s3 + $0x24] ss:$8 sps:$4 sm:$0xff]   ;;  %v622_v47 = vld [vmem:[%s933_s3 + $0x20] ss:$8 sps:$4 sm:$0xff]  }
  0x23   :  { %276 = vmatpush1.bf16.msra.mxu0 %v592_v30  ;;  %419 = vmatprep.subr.bf16.mxu1 %v620_v46  ;;  %v623_v48 = vld [vmem:[%s933_s3 + $0x34] ss:$8 sps:$4 sm:$0xff]   ;;  %v625_v49 = vld [vmem:[%s933_s3 + $0x30] ss:$8 sps:$4 sm:$0xff]   ;;  %v626_v50 = vld [vmem:[%s933_s3 + $0x44] ss:$8 sps:$4 sm:$0xff]  }
  0x24   :  { %277 = vmatprep.subr.bf16.mxu0 %v593_v31  ;;  %420 = vmatpush1.bf16.msra.mxu1 %v622_v47  ;;  %v628_v51 = vld [vmem:[%s933_s3 + $0x40] ss:$8 sps:$4 sm:$0xff]   ;;  %v629_v52 = vld [vmem:[%s933_s3 + $0x54] ss:$8 sps:$4 sm:$0xff]   ;;  %v631_v53 = vld [vmem:[%s933_s3 + $0x50] ss:$8 sps:$4 sm:$0xff]  }
  0x25   :  { %421 = vmatprep.subr.bf16.mxu1 %v623_v48  ;;  %v632_v54 = vld [vmem:[%s933_s3 + $0x64] ss:$8 sps:$4 sm:$0xff]   ;;  %v689_v55 = vmov 0   ;;  %v634_v56 = vld [vmem:[%s933_s3 + $0x60] ss:$8 sps:$4 sm:$0xff]   ;;  %v66_v59 = vsub.s32 0, %v770_v14 }
  0x26   :  { %447 = vmatprep.mubr.bf16.mxu1 %v689_v55  ;;  %v635_v57 = vld [vmem:[%s933_s3 + $0x74] ss:$8 sps:$4 sm:$0xff]   ;;  %v637_v58 = vld [vmem:[%s933_s3 + $0x70] ss:$8 sps:$4 sm:$0xff]   ;;  %v62_v60 = vld [vmem:[%s932_s2] sm:$0x3] }
  0x27   :  { %278 = vmatpush1.bf16.msra.mxu0 %v595_v32  ;;  %v70_v61 = vsub.s32 1, %v770_v14  ;;  %v67_v62 = vrot.slane %v62_v60, %v66_v59  ;;  %v303_v8 = vld [vmem:[%s935_s5] sm:$0x3]  ;;  %s690_s2 = smov [#allocation2]   ;;  %s691_s15 = smov [#allocation4]  }
  0x28   :  { %279 = vmatprep.subr.bf16.mxu0 %v596_v33  ;;  %422 = vmatpush1.bf16.msra.mxu1 %v625_v49  ;;  %s485_s14 = sshll.u32 %s690_s2, 4  ;;  %s495_s16 = sshll.u32 %s691_s15, 4  ;;  %s486_s14 = int_to_ptr.vmem [resolvable:$true] %s485_s14  ;;  %s496_s16 = int_to_ptr.vmem [resolvable:$true] %s495_s16 }
  0x29   :  { %423 = vmatprep.subr.bf16.mxu1 %v626_v50  ;;  %v71_v63 = vrot.slane %v62_v60, %v70_v61  ;;  %s640_s1 = scalar_lea.vmem %s486_s14, 32  ;;  %p645_p1 = scmp.lt.s32.totalorder %s486_s14, %s486_s14 }
  0x2a   :  { %p641_p0 = scmp.ne.s32.totalorder %s486_s14, %s640_s1  ;;  %p646_p2 = scmp.lt.s32.totalorder %s640_s1, %s640_s1 }
  0x2b   :  { %280 = vmatpush1.bf16.msra.mxu0 %v598_v34 }
  0x2c   :  { %281 = vmatprep.subr.bf16.mxu0 %v599_v35  ;;  %424 = vmatpush1.bf16.msra.mxu1 %v628_v51  ;;  %p647_p3 = por %p646_p2, %p645_p1 }
  0x2d   :  { %425 = vmatprep.subr.bf16.mxu1 %v629_v52 }
  0x2e   :  { %p648_p4 = pnand %p647_p3, %p641_p0 }
  0x2f   :  { %282 = vmatpush1.bf16.msra.mxu0 %v601_v36 }
  0x30   :  { %283 = vmatprep.subr.bf16.mxu0 %v602_v37  ;;  %426 = vmatpush1.bf16.msra.mxu1 %v631_v53 }
  0x31   :  { %427 = vmatprep.subr.bf16.mxu1 %v632_v54 }
  0x33   :  { %284 = vmatpush1.bf16.msra.mxu0 %v604_v38 }
  0x34   :  { %285 = vmatprep.subr.bf16.mxu0 %v605_v39  ;;  %428 = vmatpush1.bf16.msra.mxu1 %v634_v56 }
  0x35   :  { %429 = vmatprep.subr.bf16.mxu1 %v635_v57 }
  0x37   :  { %286 = vmatpush1.bf16.msra.mxu0 %v607_v40 }
  0x38   :  { %287 = vmatprep.subr.bf16.mxu0 %v608_v41  ;;  %430 = vmatpush1.bf16.msra.mxu1 %v637_v58 }
  0x3b   :  { %288 = vmatpush1.bf16.msra.mxu0 %v610_v42 }
  0x3c   :  { %289 = vmatprep.subr.bf16.mxu0 %v611_v43 }
  0x3f   :  { %290 = vmatpush1.bf16.msra.mxu0 %v613_v44 }
  0x42   :  { %292 = vmatmul.mubr.bf16.vlgmr.msra.gmra.mrb[0].mxu0 %v89_v45 }
 0x115   :  { %v293_v0 = vpop.f32.mrb[0].mxu0 }
 0x116   :  { %v294_v1 = vadd.f32 %v293_v0, %v67_v62  ;;  %v295_v2 = vpop.f32.mrb[1].mxu0 }
 0x117   :  { %v296_v3 = vadd.f32 %v295_v2, %v71_v63  ;;  %v297_v4 = vpop.f32.mrb[2].mxu0 }
 0x118   :  { %456 = vst [vmem:[#allocation2] sm:$0x3] %v294_v1  ;;  %v298_v5 = vpop.f32.mrb[3].mxu0 }
 0x119   :  { %v300_v6 = vmul.f32 0.5, %v296_v3  ;;  %457 = vst [vmem:[#allocation4] sm:$0x3] %v296_v3 }
 0x11b   :  { %v301_v7 = vmul.f32 1.442695, %v300_v6 }
 0x11d   :  { %638 = vpow2.f32 %v301_v7 }
 0x127   :  { %v639_v9 = vpop.eup %638 }
 0x128   :  { %v304_v10 = vmul.f32 %v639_v9, %v303_v8 }
 0x12a   :  { %v305_v11 = vadd.f32 %v304_v10, %v294_v1 }
 0x12c   :  { %v306_v12 = vpack.c.bf16 %v305_v11, %v305_v11 }
 0x12e   :  { %448 = vmatmul.mubr.bf16.vlgmr.msra.gmra.mrb[0].mxu1 %v306_v12 }
 0x12f   :  { %651 = shalt.err (!%p648_p4)
}
 0x130   :  { %s652_s18 = scalar_lea.hbm %s936_s6, 32 }
 0x131   :  { %p653_p5 = scmp.ne.s32.totalorder %s936_s6, %s652_s18  ;;  %p656_p6 = scmp.lt.u32.totalorder %s652_s18, %s936_s6 }
 0x133   :  { %p658_p7 = pnand %p656_p6, %p653_p5 }
 0x135   :  { %661 = shalt.err (!%p658_p7)
}
 0x136   :  { %488 = dma.vmem_to_hbm [thread:$0]  %s486_s14, 32, %s936_s6, [#allocation3]  }
 0x137   :  { %s662_s24 = scalar_lea.vmem %s496_s16, 32  ;;  %p667_p9 = scmp.lt.s32.totalorder %s496_s16, %s496_s16 }
 0x138   :  { %p663_p8 = scmp.ne.s32.totalorder %s496_s16, %s662_s24  ;;  %p668_p10 = scmp.lt.s32.totalorder %s662_s24, %s662_s24 }
 0x13a   :  { %p669_p11 = por %p668_p10, %p667_p9 }
 0x13c   :  { %p670_p12 = pnand %p669_p11, %p663_p8 }
 0x13e   :  { %673 = shalt.err (!%p670_p12)
}
 0x13f   :  { %s674_s27 = scalar_lea.hbm %s937_s7, 32 }
 0x140   :  { %p675_p13 = scmp.ne.s32.totalorder %s937_s7, %s674_s27  ;;  %p678_p0 = scmp.lt.u32.totalorder %s674_s27, %s937_s7 }
 0x142   :  { %p680_p1 = pnand %p678_p0, %p675_p13 }
 0x144   :  { %683 = shalt.err (!%p680_p1)
}
 0x145   :  { %498 = dma.vmem_to_hbm [thread:$0]  %s496_s16, 32, %s937_s7, [#allocation5]   ;;  %v323_v13 = vld [vmem:[%s934_s4] sm:$0x3] }
 0x146   :  { %v328_v14 = vrot.slane %v323_v13, %v66_v59  ;;  %v332_v15 = vrot.slane %v323_v13, %v70_v61 }
 0x201   :  { %v449_v16 = vpop.f32.mrb[0].mxu1 }
 0x202   :  { %v450_v17 = vadd.f32 %v449_v16, %v328_v14  ;;  %v451_v19 = vpop.f32.mrb[1].mxu1 }
 0x203   :  { %v452_v20 = vadd.f32 %v451_v19, %v332_v15  ;;  %v453_v21 = vpop.f32.mrb[2].mxu1 }
 0x204   :  { %v454_v22 = vpop.f32.mrb[3].mxu1 }
 0x205   :  { %v560_v23 = vpack.c.bf16 %v452_v20, %v450_v17 }
 0x207   :  { %v469_v24 = vrot.slane %v560_v23, %v779_v18 }
 0x209   :  { %561 = vst.sshfl [vmem:[%s938_s8] sm:$0x5 pattern:$0x73625140] %v469_v24 }
 0x20a   :  { %684 = dma.done.wait [#allocation3], 32  }
 0x20b   :  { %685 = vsyncadd [#allocation3], 4294967264 }
 0x20c   :  { %686 = dma.done.wait [#allocation5], 32  }
 0x20d   :  { %687 = vsyncadd [#allocation5], 4294967264 }
 0x20e   :  { %509 = vsyncpa [#allocation3], 1 }
 0x20f   :  { %510 = vsyncpa [#allocation5], 1 }

// kernel: _lambda_.14
= control target key start
LH: loop header
LB: loop body
LE: loop exit
PB: predicated region body
PF: predicated region fallthrough
CT: control target
= control target key end

     0   :  { %s2035_s9 = smov 0   ;;  %s2037_s10 = smov 0   ;;  %s2487_s0 = inlined_call_operand.vmem [shape: bf16[4096,64], index: 0, kind: input, shape index: {}]   ;;  %s2488_s1 = inlined_call_operand.vmem [shape: bf16[64,8], index: 1, kind: input, shape index: {}]   ;;  %s2489_s2 = inlined_call_operand.vmem [shape: bf16[4096,8], index: 2, kind: output, shape index: {}]  }
   0x1   :  { %s2039_s11 = smov 0  }
   0x2 LB: > { %s31_s12 = sadd.s32 1, %s2013_s10  ;;  %p1615_p0 = scmp.ge.s32.totalorder %s2017_s11, 1  ;;  %s2017_s11 = sphi %s2039_s11, %s12_s11   ;;  %s2013_s10 = sphi %s2037_s10, %s2491_s10   ;;  %s2009_s9 = sphi %s2035_s9, %s2490_s9  }
   0x3   : > { %p33_p1 = scmp.ge.s32.totalorder %s31_s12, 8  ;;  %p155_p2 = scmp.lt.s32.totalorder %s2017_s11, 9 }
   0x5   : > { %s2493_s12 = smov (%p33_p1, %s31_s12), 0  ;;  %p156_p3 = pnand %p1615_p0, %p155_p2 }
   0x6   : > { %v1959_v0 = vld [vmem:[%s2488_s1] sm:$0xff] (!%p156_p3)   ;;  %s1616_s15 = sshll.u32 (!%p156_p3), %s2009_s9, 6  ;;  %v2059_v1 = vld [vmem:[%s2488_s1 + $0x8] sm:$0xff] (!%p156_p3)   ;;  %v2068_v2 = vld [vmem:[%s2488_s1 + $0x10] sm:$0xff] (!%p156_p3)   ;;  %vm223_vm0 = vcmask (!%p156_p3), 64512   ;;  %v2019_v3 = vmov (!%p156_p3), 0.0  }
   0x7   : > { %159 = sbr.rel (%p156_p3) target bundleno = 315 (0x13b), region = 28  ;;  %p192_p4 = scmp.lt.s32.totalorder (!%p156_p3), %s1616_s15, 511  ;;  %1854 = vmatprep.subr.bf16.mxu0 (!%p156_p3), %v1959_v0  ;;  %1926 = vmatprep.subr.bf16.mxu1 (!%p156_p3), %v1959_v0  ;;  %226 = vst.msk [vmem:[#allocation2 + $0x10] sm:$0xff] (!%p156_p3), %vm223_vm0, %v2019_v3  ;;  %224 = vst.msk [vmem:[#allocation2] sm:$0xff] (!%p156_p3), %vm223_vm0, %v2019_v3  ;;  %v1962_v4 = vld [vmem:[%s2488_s1 + $0x18] sm:$0xff] (!%p156_p3)   ;;  %vm608_vm1 = vcmask (!%p156_p3), 523264  }
   0x8   : > { %1855 = vmatpush3.bf16.msra.mxu0 (!%p156_p3), %v1959_v0  ;;  %1930 = vmatpush3.bf16.msra.mxu1 (!%p156_p3), %v1959_v0  ;;  %225 = vst.msk [vmem:[#allocation2 + $0x8] sm:$0xff] (!%p156_p3), %vm223_vm0, %v2019_v3  ;;  %227 = vst.msk [vmem:[#allocation2 + $0x18] sm:$0xff] (!%p156_p3), %vm223_vm0, %v2019_v3  ;;  %vm1446_vm2 = vcmask (!%p156_p3), 60416  }
   0x9   : > { %1856 = vmatprep.subr.bf16.mxu0 (!%p156_p3), %v2059_v1  ;;  %1927 = vmatprep.subr.bf16.mxu1 (!%p156_p3), %v2059_v1  ;;  %228 = vst.msk [vmem:[#allocation2 + $0x20] sm:$0xff] (!%p156_p3), %vm223_vm0, %v2019_v3  ;;  %229 = vst.msk [vmem:[#allocation2 + $0x28] sm:$0xff] (!%p156_p3), %vm223_vm0, %v2019_v3 }
   0xa   : > { %230 = vst.msk [vmem:[#allocation2 + $0x30] sm:$0xff] (!%p156_p3), %vm223_vm0, %v2019_v3  ;;  %231 = vst.msk [vmem:[#allocation2 + $0x38] sm:$0xff] (!%p156_p3), %vm223_vm0, %v2019_v3 }
   0xb   : > { %232 = vst.msk [vmem:[#allocation2 + $0x40] sm:$0xff] (!%p156_p3), %vm223_vm0, %v2019_v3  ;;  %233 = vst.msk [vmem:[#allocation2 + $0x48] sm:$0xff] (!%p156_p3), %vm223_vm0, %v2019_v3 }
   0xc   : > { %234 = vst.msk [vmem:[#allocation2 + $0x50] sm:$0xff] (!%p156_p3), %vm223_vm0, %v2019_v3  ;;  %235 = vst.msk [vmem:[#allocation2 + $0x58] sm:$0xff] (!%p156_p3), %vm223_vm0, %v2019_v3  ;;  %1857 = vmatpush3.bf16.msra.mxu0 (!%p156_p3), %v2059_v1  ;;  %1931 = vmatpush3.bf16.msra.mxu1 (!%p156_p3), %v2059_v1 }
   0xd   : > { %236 = vst.msk [vmem:[#allocation2 + $0x60] sm:$0xff] (!%p156_p3), %vm223_vm0, %v2019_v3  ;;  %237 = vst.msk [vmem:[#allocation2 + $0x68] sm:$0xff] (!%p156_p3), %vm223_vm0, %v2019_v3  ;;  %1858 = vmatprep.subr.bf16.mxu0 (!%p156_p3), %v2068_v2  ;;  %1928 = vmatprep.subr.bf16.mxu1 (!%p156_p3), %v2068_v2 }
   0xe   : > { %s2495_s15 = smov (!%p192_p4, %s1616_s15), 511  ;;  %238 = vst.msk [vmem:[#allocation2 + $0x70] sm:$0xff] %vm223_vm0, %v2019_v3  ;;  %239 = vst.msk [vmem:[#allocation2 + $0x78] sm:$0xff] %vm223_vm0, %v2019_v3  ;;  %v290_v37 = vld [vmem:[#allocation2 + $0x10] sm:$0xff]  ;;  %v288_v39 = vld [vmem:[#allocation2] sm:$0xff] }
   0xf   : > { %s1617_s20 = sshll.u32 %s2495_s15, 2  ;;  %240 = vst.msk [vmem:[#allocation2 + $0x80] sm:$0xff] %vm223_vm0, %v2019_v3  ;;  %241 = vst.msk [vmem:[#allocation2 + $0x88] sm:$0xff] %vm223_vm0, %v2019_v3  ;;  %v291_v43 = vld [vmem:[#allocation2 + $0x18] sm:$0xff]  ;;  %v289_v49 = vld [vmem:[#allocation2 + $0x8] sm:$0xff] }
  0x10   : > { %242 = vst.msk [vmem:[#allocation2 + $0x90] sm:$0xff] %vm223_vm0, %v2019_v3  ;;  %243 = vst.msk [vmem:[#allocation2 + $0x98] sm:$0xff] %vm223_vm0, %v2019_v3  ;;  %s2207_s25 = scalar_lea.vmem %s2487_s0, %s1617_s20  ;;  %1859 = vmatpush3.bf16.msra.mxu0 %v2068_v2  ;;  %1932 = vmatpush3.bf16.msra.mxu1 %v2068_v2  ;;  %v292_v63 = vld [vmem:[#allocation2 + $0x20] sm:$0xff]  ;;  %s2292_s28 = scalar_lea.vmem %s2489_s2, %s1617_s20 }
  0x11   : > { %244 = vst.msk [vmem:[#allocation2 + $0xa0] sm:$0xff] %vm223_vm0, %v2019_v3  ;;  %245 = vst.msk [vmem:[#allocation2 + $0xa8] sm:$0xff] %vm223_vm0, %v2019_v3  ;;  %v1963_v5 = vld [vmem:[%s2207_s25] sm:$0xff]   ;;  %1860 = vmatprep.subr.bf16.mxu0 %v1962_v4  ;;  %1929 = vmatprep.subr.bf16.mxu1 %v1962_v4  ;;  %v1965_v7 = vld [vmem:[%s2207_s25 + $0x8] sm:$0xff]  }
  0x12   : > { %246 = vst.msk [vmem:[#allocation2 + $0xb0] sm:$0xff] %vm223_vm0, %v2019_v3  ;;  %247 = vst.msk [vmem:[#allocation2 + $0xb8] sm:$0xff] %vm223_vm0, %v2019_v3  ;;  %v1964_v6 = vld [vmem:[%s2207_s25 + $0x80] sm:$0xff]   ;;  %1862 = vmatprep.mubr.msk.bf16.mxu0 %vm608_vm1, %v1963_v5  ;;  %v1966_v8 = vld [vmem:[%s2207_s25 + $0x88] sm:$0xff]  }
  0x13   : > { %248 = vst.msk [vmem:[#allocation2 + $0xc0] sm:$0xff] %vm223_vm0, %v2019_v3  ;;  %249 = vst.msk [vmem:[#allocation2 + $0xc8] sm:$0xff] %vm223_vm0, %v2019_v3  ;;  %1894 = vmatprep.mubr.msk.bf16.mxu1 %vm608_vm1, %v1964_v6  ;;  %v1967_v9 = vld [vmem:[%s2207_s25 + $0x10] sm:$0xff]   ;;  %v1969_v11 = vld [vmem:[%s2207_s25 + $0x18] sm:$0xff]  }
  0x14   : > { %250 = vst.msk [vmem:[#allocation2 + $0xd0] sm:$0xff] %vm223_vm0, %v2019_v3  ;;  %251 = vst.msk [vmem:[#allocation2 + $0xd8] sm:$0xff] %vm223_vm0, %v2019_v3  ;;  %1861 = vmatpush3.bf16.msra.mxu0 %v1962_v4  ;;  %1933 = vmatpush3.bf16.msra.mxu1 %v1962_v4  ;;  %v1968_v10 = vld [vmem:[%s2207_s25 + $0x90] sm:$0xff]   ;;  %v1970_v12 = vld [vmem:[%s2207_s25 + $0x98] sm:$0xff]  }
  0x15   : > { %252 = vst.msk [vmem:[#allocation2 + $0xe0] sm:$0xff] %vm223_vm0, %v2019_v3  ;;  %253 = vst.msk [vmem:[#allocation2 + $0xe8] sm:$0xff] %vm223_vm0, %v2019_v3  ;;  %v1971_v13 = vld [vmem:[%s2207_s25 + $0x20] sm:$0xff]   ;;  %v1973_v15 = vld [vmem:[%s2207_s25 + $0x28] sm:$0xff]  }
  0x16   : > { %254 = vst.msk [vmem:[#allocation2 + $0xf0] sm:$0xff] %vm223_vm0, %v2019_v3  ;;  %255 = vst.msk [vmem:[#allocation2 + $0xf8] sm:$0xff] %vm223_vm0, %v2019_v3  ;;  %v1972_v14 = vld [vmem:[%s2207_s25 + $0xa0] sm:$0xff]   ;;  %v1974_v16 = vld [vmem:[%s2207_s25 + $0xa8] sm:$0xff]  }
  0x17   : > { %256 = vst.msk [vmem:[#allocation2 + $0x100] sm:$0xff] %vm223_vm0, %v2019_v3  ;;  %257 = vst.msk [vmem:[#allocation2 + $0x108] sm:$0xff] %vm223_vm0, %v2019_v3  ;;  %1863 = vmatmul.mubr.msk.bf16.vlgmr.msra.gmra.mrb[0].mxu0 %vm608_vm1, %v1965_v7  ;;  %1895 = vmatmul.mubr.msk.bf16.vlgmr.msra.gmra.mrb[0].mxu1 %vm608_vm1, %v1966_v8  ;;  %v1975_v17 = vld [vmem:[%s2207_s25 + $0x30] sm:$0xff]   ;;  %v1977_v19 = vld [vmem:[%s2207_s25 + $0x38] sm:$0xff]  }
  0x18   : > { %258 = vst.msk [vmem:[#allocation2 + $0x110] sm:$0xff] %vm223_vm0, %v2019_v3  ;;  %259 = vst.msk [vmem:[#allocation2 + $0x118] sm:$0xff] %vm223_vm0, %v2019_v3  ;;  %1866 = vmatprep.mubr.msk.bf16.mxu0 %vm608_vm1, %v1967_v9  ;;  %1898 = vmatprep.mubr.msk.bf16.mxu1 %vm608_vm1, %v1968_v10  ;;  %v1976_v18 = vld [vmem:[%s2207_s25 + $0xb0] sm:$0xff]   ;;  %v1978_v20 = vld [vmem:[%s2207_s25 + $0xb8] sm:$0xff]  }
  0x19   : > { %260 = vst.msk [vmem:[#allocation2 + $0x120] sm:$0xff] %vm223_vm0, %v2019_v3  ;;  %261 = vst.msk [vmem:[#allocation2 + $0x128] sm:$0xff] %vm223_vm0, %v2019_v3  ;;  %v1979_v21 = vld [vmem:[%s2207_s25 + $0x40] sm:$0xff]   ;;  %v1981_v23 = vld [vmem:[%s2207_s25 + $0x48] sm:$0xff]  }
  0x1a   : > { %262 = vst.msk [vmem:[#allocation2 + $0x130] sm:$0xff] %vm223_vm0, %v2019_v3  ;;  %263 = vst.msk [vmem:[#allocation2 + $0x138] sm:$0xff] %vm223_vm0, %v2019_v3  ;;  %v1980_v22 = vld [vmem:[%s2207_s25 + $0xc0] sm:$0xff]   ;;  %v1982_v24 = vld [vmem:[%s2207_s25 + $0xc8] sm:$0xff]  }
  0x1b   : > { %264 = vst.msk [vmem:[#allocation2 + $0x140] sm:$0xff] %vm223_vm0, %v2019_v3  ;;  %265 = vst.msk [vmem:[#allocation2 + $0x148] sm:$0xff] %vm223_vm0, %v2019_v3  ;;  %v1983_v25 = vld [vmem:[%s2207_s25 + $0x50] sm:$0xff]   ;;  %v1985_v27 = vld [vmem:[%s2207_s25 + $0x58] sm:$0xff]  }
  0x1c   : > { %266 = vst.msk [vmem:[#allocation2 + $0x150] sm:$0xff] %vm223_vm0, %v2019_v3  ;;  %267 = vst.msk [vmem:[#allocation2 + $0x158] sm:$0xff] %vm223_vm0, %v2019_v3  ;;  %v1984_v26 = vld [vmem:[%s2207_s25 + $0xd0] sm:$0xff]   ;;  %v1986_v28 = vld [vmem:[%s2207_s25 + $0xd8] sm:$0xff]  }
  0x1d   : > { %268 = vst.msk [vmem:[#allocation2 + $0x160] sm:$0xff] %vm223_vm0, %v2019_v3  ;;  %269 = vst.msk [vmem:[#allocation2 + $0x168] sm:$0xff] %vm223_vm0, %v2019_v3  ;;  %v1987_v29 = vld [vmem:[%s2207_s25 + $0x60] sm:$0xff]   ;;  %v1989_v31 = vld [vmem:[%s2207_s25 + $0x68] sm:$0xff]  }
  0x1e   : > { %270 = vst.msk [vmem:[#allocation2 + $0x170] sm:$0xff] %vm223_vm0, %v2019_v3  ;;  %271 = vst.msk [vmem:[#allocation2 + $0x178] sm:$0xff] %vm223_vm0, %v2019_v3  ;;  %v1988_v30 = vld [vmem:[%s2207_s25 + $0xe0] sm:$0xff]   ;;  %v1990_v32 = vld [vmem:[%s2207_s25 + $0xe8] sm:$0xff]  }
  0x1f   : > { %272 = vst.msk [vmem:[#allocation2 + $0x180] sm:$0xff] %vm223_vm0, %v2019_v3  ;;  %273 = vst.msk [vmem:[#allocation2 + $0x188] sm:$0xff] %vm223_vm0, %v2019_v3  ;;  %1867 = vmatmul.mubr.msk.bf16.gmra.mrb[4].mxu0 %vm608_vm1, %v1969_v11  ;;  %1899 = vmatmul.mubr.msk.bf16.gmra.mrb[4].mxu1 %vm608_vm1, %v1970_v12  ;;  %v1991_v33 = vld [vmem:[%s2207_s25 + $0x70] sm:$0xff]   ;;  %v1993_v35 = vld [vmem:[%s2207_s25 + $0x78] sm:$0xff]  }
  0x20   : > { %274 = vst.msk [vmem:[#allocation2 + $0x190] sm:$0xff] %vm223_vm0, %v2019_v3  ;;  %275 = vst.msk [vmem:[#allocation2 + $0x198] sm:$0xff] %vm223_vm0, %v2019_v3  ;;  %1870 = vmatprep.mubr.msk.bf16.mxu0 %vm608_vm1, %v1971_v13  ;;  %1902 = vmatprep.mubr.msk.bf16.mxu1 %vm608_vm1, %v1972_v14  ;;  %v1992_v34 = vld [vmem:[%s2207_s25 + $0xf0] sm:$0xff]   ;;  %v1994_v36 = vld [vmem:[%s2207_s25 + $0xf8] sm:$0xff]  }
  0x21   : > { %276 = vst.msk [vmem:[#allocation2 + $0x1a0] sm:$0xff] %vm223_vm0, %v2019_v3  ;;  %277 = vst.msk [vmem:[#allocation2 + $0x1a8] sm:$0xff] %vm223_vm0, %v2019_v3  ;;  %v322_v38 = vld [vmem:[#allocation2 + $0x110] sm:$0xff]  ;;  %v320_v40 = vld [vmem:[#allocation2 + $0x100] sm:$0xff] }
  0x22   : > { %278 = vst.msk [vmem:[#allocation2 + $0x1b0] sm:$0xff] %vm223_vm0, %v2019_v3  ;;  %279 = vst.msk [vmem:[#allocation2 + $0x1b8] sm:$0xff] %vm223_vm0, %v2019_v3  ;;  %v323_v44 = vld [vmem:[#allocation2 + $0x118] sm:$0xff]  ;;  %v321_v50 = vld [vmem:[#allocation2 + $0x108] sm:$0xff] }
  0x23   : > { %280 = vst.msk [vmem:[#allocation2 + $0x1c0] sm:$0xff] %vm223_vm0, %v2019_v3  ;;  %281 = vst.msk [vmem:[#allocation2 + $0x1c8] sm:$0xff] %vm223_vm0, %v2019_v3  ;;  %v294_v61 = vld [vmem:[#allocation2 + $0x30] sm:$0xff]  ;;  %v324_v0 = vld [vmem:[#allocation2 + $0x120] sm:$0xff] }
  0x24   : > { %282 = vst.msk [vmem:[#allocation2 + $0x1d0] sm:$0xff] %vm223_vm0, %v2019_v3  ;;  %283 = vst.msk [vmem:[#allocation2 + $0x1d8] sm:$0xff] %vm223_vm0, %v2019_v3  ;;  %v326_v62 = vld [vmem:[#allocation2 + $0x130] sm:$0xff]  ;;  %v327_v4 = vld [vmem:[#allocation2 + $0x138] sm:$0xff] }
  0x25   : > { %284 = vst.msk [vmem:[#allocation2 + $0x1e0] sm:$0xff] %vm223_vm0, %v2019_v3  ;;  %285 = vst.msk [vmem:[#allocation2 + $0x1e8] sm:$0xff] %vm223_vm0, %v2019_v3  ;;  %v293_v9 = vld [vmem:[#allocation2 + $0x28] sm:$0xff] }
  0x26   : > { %286 = vst.msk [vmem:[#allocation2 + $0x1f0] sm:$0xff] %vm223_vm0, %v2019_v3  ;;  %287 = vst.msk [vmem:[#allocation2 + $0x1f8] sm:$0xff] %vm223_vm0, %v2019_v3  ;;  %v295_v3 = vld [vmem:[#allocation2 + $0x38] sm:$0xff]  ;;  %v325_v10 = vld [vmem:[#allocation2 + $0x128] sm:$0xff] }
  0x27   : > { %1871 = vmatmul.mubr.msk.bf16.gmra.mrb[8].mxu0 %vm608_vm1, %v1973_v15  ;;  %1903 = vmatmul.mubr.msk.bf16.gmra.mrb[8].mxu1 %vm608_vm1, %v1974_v16 }
  0x28   : > { %1874 = vmatprep.mubr.msk.bf16.mxu0 %vm608_vm1, %v1975_v17  ;;  %1906 = vmatprep.mubr.msk.bf16.mxu1 %vm608_vm1, %v1976_v18 }
  0x2f   : > { %1875 = vmatmul.mubr.msk.bf16.gmra.mrb[12].mxu0 %vm608_vm1, %v1977_v19  ;;  %1907 = vmatmul.mubr.msk.bf16.gmra.mrb[12].mxu1 %vm608_vm1, %v1978_v20 }
  0x30   : > { %1878 = vmatprep.mubr.msk.bf16.mxu0 %vm608_vm1, %v1979_v21  ;;  %1910 = vmatprep.mubr.msk.bf16.mxu1 %vm608_vm1, %v1980_v22 }
  0x37   : > { %1879 = vmatmul.mubr.msk.bf16.gmra.mrb[16].mxu0 %vm608_vm1, %v1981_v23  ;;  %1911 = vmatmul.mubr.msk.bf16.gmra.mrb[16].mxu1 %vm608_vm1, %v1982_v24 }
  0x38   : > { %1882 = vmatprep.mubr.msk.bf16.mxu0 %vm608_vm1, %v1983_v25  ;;  %1914 = vmatprep.mubr.msk.bf16.mxu1 %vm608_vm1, %v1984_v26 }
  0x3f   : > { %1883 = vmatmul.mubr.msk.bf16.gmra.mrb[20].mxu0 %vm608_vm1, %v1985_v27  ;;  %1915 = vmatmul.mubr.msk.bf16.gmra.mrb[20].mxu1 %vm608_vm1, %v1986_v28 }
  0x40   : > { %1886 = vmatprep.mubr.msk.bf16.mxu0 %vm608_vm1, %v1987_v29  ;;  %1918 = vmatprep.mubr.msk.bf16.mxu1 %vm608_vm1, %v1988_v30 }
  0x47   : > { %1887 = vmatmul.mubr.msk.bf16.gmra.mrb[24].mxu0 %vm608_vm1, %v1989_v31  ;;  %1919 = vmatmul.mubr.msk.bf16.gmra.mrb[24].mxu1 %vm608_vm1, %v1990_v32 }
  0x48   : > { %1890 = vmatprep.mubr.msk.bf16.mxu0 %vm608_vm1, %v1991_v33  ;;  %1922 = vmatprep.mubr.msk.bf16.mxu1 %vm608_vm1, %v1992_v34 }
  0x4f   : > { %1891 = vmatmul.mubr.msk.bf16.gmra.mrb[28].mxu0 %vm608_vm1, %v1993_v35  ;;  %1923 = vmatmul.mubr.msk.bf16.gmra.mrb[28].mxu1 %vm608_vm1, %v1994_v36 }
  0xea   : > { %v1864_v41 = vpop.f32.mrb[0].mxu0  ;;  %v1896_v42 = vpop.f32.mrb[0].mxu1 }
  0xeb   : > { %v996_v45 = vadd.f32 %v1864_v41, %v290_v37  ;;  %v1028_v46 = vadd.f32 %v1896_v42, %v322_v38  ;;  %v739_v47 = vpop.f32.mrb[1].mxu0  ;;  %v867_v48 = vpop.f32.mrb[1].mxu1  ;;  %v298_v37 = vld [vmem:[#allocation2 + $0x50] sm:$0xff] }
  0xec   : > { %v994_v51 = vadd.f32 %v739_v47, %v288_v39  ;;  %v1026_v52 = vadd.f32 %v867_v48, %v320_v40  ;;  %v1865_v53 = vpop.f32.mrb[2].mxu0  ;;  %v1897_v54 = vpop.f32.mrb[2].mxu1  ;;  %v330_v38 = vld [vmem:[#allocation2 + $0x150] sm:$0xff]  ;;  %v296_v39 = vld [vmem:[#allocation2 + $0x40] sm:$0xff] }
  0xed   : > { %1061 = vst.msk [vmem:[#allocation2 + $0x10] sm:$0xff] %vm223_vm0, %v996_v45  ;;  %1093 = vst.msk [vmem:[#allocation2 + $0x110] sm:$0xff] %vm223_vm0, %v1028_v46  ;;  %v997_v55 = vadd.f32 %v1865_v53, %v291_v43  ;;  %v1029_v56 = vadd.f32 %v1897_v54, %v323_v44  ;;  %v742_v57 = vpop.f32.mrb[3].mxu0  ;;  %v870_v58 = vpop.f32.mrb[3].mxu1  ;;  %v328_v40 = vld [vmem:[#allocation2 + $0x140] sm:$0xff]  ;;  %v299_v43 = vld [vmem:[#allocation2 + $0x58] sm:$0xff] }
  0xee   : > { %1059 = vst.msk [vmem:[#allocation2] sm:$0xff] %vm223_vm0, %v994_v51  ;;  %1091 = vst.msk [vmem:[#allocation2 + $0x100] sm:$0xff] %vm223_vm0, %v1026_v52  ;;  %v995_v59 = vadd.f32 %v742_v57, %v289_v49  ;;  %v1027_v60 = vadd.f32 %v870_v58, %v321_v50  ;;  %v331_v44 = vld [vmem:[#allocation2 + $0x158] sm:$0xff]  ;;  %v297_v49 = vld [vmem:[#allocation2 + $0x48] sm:$0xff] }
  0xef   : > { %1062 = vst.msk [vmem:[#allocation2 + $0x18] sm:$0xff] %vm223_vm0, %v997_v55  ;;  %1094 = vst.msk [vmem:[#allocation2 + $0x118] sm:$0xff] %vm223_vm0, %v1029_v56  ;;  %v329_v50 = vld [vmem:[#allocation2 + $0x148] sm:$0xff] }
  0xf0   : > { %1060 = vst.msk [vmem:[#allocation2 + $0x8] sm:$0xff] %vm223_vm0, %v995_v59  ;;  %1092 = vst.msk [vmem:[#allocation2 + $0x108] sm:$0xff] %vm223_vm0, %v1027_v60 }
  0xf2   : > { %v1868_v1 = vpop.f32.mrb[4].mxu0  ;;  %v1900_v2 = vpop.f32.mrb[4].mxu1 }
  0xf3   : > { %v1000_v5 = vadd.f32 %v1868_v1, %v294_v61  ;;  %v1032_v6 = vadd.f32 %v1900_v2, %v326_v62  ;;  %v755_v7 = vpop.f32.mrb[5].mxu0  ;;  %v883_v8 = vpop.f32.mrb[5].mxu1 }
  0xf4   : > { %v1128_v11 = vld [vmem:[#allocation2 + $0x10] sm:$0xff]  ;;  %v998_v13 = vadd.f32 %v755_v7, %v292_v63  ;;  %v1030_v14 = vadd.f32 %v883_v8, %v324_v0  ;;  %v1869_v15 = vpop.f32.mrb[6].mxu0  ;;  %v1901_v16 = vpop.f32.mrb[6].mxu1 }
  0xf5   : > { %v1160_v12 = vld [vmem:[#allocation2 + $0x110] sm:$0xff]  ;;  %v1756_v17 = vpack.c.bf16 %v1128_v11, %v1128_v11  ;;  %v1126_v19 = vld [vmem:[#allocation2] sm:$0xff]  ;;  %1065 = vst.msk [vmem:[#allocation2 + $0x30] sm:$0xff] %vm223_vm0, %v1000_v5  ;;  %1097 = vst.msk [vmem:[#allocation2 + $0x130] sm:$0xff] %vm223_vm0, %v1032_v6  ;;  %v1001_v21 = vadd.f32 %v1869_v15, %v295_v3  ;;  %v1033_v22 = vadd.f32 %v1901_v16, %v327_v4  ;;  %v758_v23 = vpop.f32.mrb[7].mxu0  ;;  %v886_v24 = vpop.f32.mrb[7].mxu1 }
  0xf6   : > { %v1788_v18 = vpack.c.bf16 %v1160_v12, %v1160_v12  ;;  %v1158_v20 = vld [vmem:[#allocation2 + $0x100] sm:$0xff]  ;;  %v1754_v25 = vpack.c.bf16 %v1126_v19, %v1126_v19  ;;  %v1129_v27 = vld [vmem:[#allocation2 + $0x18] sm:$0xff]  ;;  %1063 = vst.msk [vmem:[#allocation2 + $0x20] sm:$0xff] %vm223_vm0, %v998_v13  ;;  %1095 = vst.msk [vmem:[#allocation2 + $0x120] sm:$0xff] %vm223_vm0, %v1030_v14  ;;  %v999_v29 = vadd.f32 %v758_v23, %v293_v9 }
  0xf7   : > { %v1786_v26 = vpack.c.bf16 %v1158_v20, %v1158_v20  ;;  %v1161_v28 = vld [vmem:[#allocation2 + $0x118] sm:$0xff]  ;;  %v1031_v30 = vadd.f32 %v886_v24, %v325_v10  ;;  %1449 = vst.msk [vmem:[%s2292_s28 + $0x8] sm:$0xf] %vm1446_vm2, %v1756_v17  ;;  %v1757_v31 = vpack.c.bf16 %v1129_v27, %v1129_v27  ;;  %v1127_v33 = vld [vmem:[#allocation2 + $0x8] sm:$0xff]  ;;  %v302_v13 = vld [vmem:[#allocation2 + $0x70] sm:$0xff] }
  0xf8   : > { %1481 = vst.msk [vmem:[%s2292_s28 + $0x88] sm:$0xf] %vm1446_vm2, %v1788_v18  ;;  %v1789_v32 = vpack.c.bf16 %v1161_v28, %v1161_v28  ;;  %v1159_v34 = vld [vmem:[#allocation2 + $0x108] sm:$0xff]  ;;  %1447 = vst.msk [vmem:[%s2292_s28] sm:$0xf] %vm1446_vm2, %v1754_v25  ;;  %v1755_v35 = vpack.c.bf16 %v1127_v33, %v1127_v33  ;;  %v334_v14 = vld [vmem:[#allocation2 + $0x170] sm:$0xff] }
  0xf9   : > { %1066 = vst.msk [vmem:[#allocation2 + $0x38] sm:$0xff] %vm223_vm0, %v1001_v21  ;;  %1098 = vst.msk [vmem:[#allocation2 + $0x138] sm:$0xff] %vm223_vm0, %v1033_v22  ;;  %v1787_v36 = vpack.c.bf16 %v1159_v34, %v1159_v34  ;;  %v300_v15 = vld [vmem:[#allocation2 + $0x60] sm:$0xff]  ;;  %v303_v19 = vld [vmem:[#allocation2 + $0x78] sm:$0xff] }
  0xfa   : > { %1479 = vst.msk [vmem:[%s2292_s28 + $0x80] sm:$0xf] %vm1446_vm2, %v1786_v26  ;;  %1450 = vst.msk [vmem:[%s2292_s28 + $0xc] sm:$0xf] %vm1446_vm2, %v1757_v31  ;;  %v1872_v41 = vpop.f32.mrb[8].mxu0  ;;  %v1904_v42 = vpop.f32.mrb[8].mxu1 }
  0xfb   : > { %1064 = vst.msk [vmem:[#allocation2 + $0x28] sm:$0xff] %vm223_vm0, %v999_v29  ;;  %1096 = vst.msk [vmem:[#allocation2 + $0x128] sm:$0xff] %vm223_vm0, %v1031_v30  ;;  %v1004_v45 = vadd.f32 %v1872_v41, %v298_v37  ;;  %v1036_v46 = vadd.f32 %v1904_v42, %v330_v38  ;;  %v771_v47 = vpop.f32.mrb[9].mxu0  ;;  %v899_v48 = vpop.f32.mrb[9].mxu1  ;;  %v332_v16 = vld [vmem:[#allocation2 + $0x160] sm:$0xff]  ;;  %v335_v20 = vld [vmem:[#allocation2 + $0x178] sm:$0xff] }
  0xfc   : > { %1482 = vst.msk [vmem:[%s2292_s28 + $0x8c] sm:$0xf] %vm1446_vm2, %v1789_v32  ;;  %1448 = vst.msk [vmem:[%s2292_s28 + $0x4] sm:$0xf] %vm1446_vm2, %v1755_v35  ;;  %v1132_v51 = vld [vmem:[#allocation2 + $0x30] sm:$0xff]  ;;  %v1002_v53 = vadd.f32 %v771_v47, %v296_v39  ;;  %v1034_v54 = vadd.f32 %v899_v48, %v328_v40  ;;  %v1873_v55 = vpop.f32.mrb[10].mxu0 }
  0xfd   : > { %1480 = vst.msk [vmem:[%s2292_s28 + $0x84] sm:$0xf] %vm1446_vm2, %v1787_v36  ;;  %v1164_v52 = vld [vmem:[#allocation2 + $0x130] sm:$0xff]  ;;  %v1905_v56 = vpop.f32.mrb[10].mxu1  ;;  %v1760_v57 = vpack.c.bf16 %v1132_v51, %v1132_v51  ;;  %v1130_v59 = vld [vmem:[#allocation2 + $0x20] sm:$0xff]  ;;  %v1005_v61 = vadd.f32 %v1873_v55, %v299_v43  ;;  %v774_v63 = vpop.f32.mrb[11].mxu0 }
  0xfe   : > { %v1792_v58 = vpack.c.bf16 %v1164_v52, %v1164_v52  ;;  %v1162_v60 = vld [vmem:[#allocation2 + $0x120] sm:$0xff]  ;;  %1069 = vst.msk [vmem:[#allocation2 + $0x50] sm:$0xff] %vm223_vm0, %v1004_v45  ;;  %1101 = vst.msk [vmem:[#allocation2 + $0x150] sm:$0xff] %vm223_vm0, %v1036_v46  ;;  %v1037_v62 = vadd.f32 %v1905_v56, %v331_v44  ;;  %v902_v0 = vpop.f32.mrb[11].mxu1  ;;  %v1758_v1 = vpack.c.bf16 %v1130_v59, %v1130_v59  ;;  %v301_v25 = vld [vmem:[#allocation2 + $0x68] sm:$0xff] }
  0xff   : > { %v1790_v2 = vpack.c.bf16 %v1162_v60, %v1162_v60  ;;  %1067 = vst.msk [vmem:[#allocation2 + $0x40] sm:$0xff] %vm223_vm0, %v1002_v53  ;;  %1099 = vst.msk [vmem:[#allocation2 + $0x140] sm:$0xff] %vm223_vm0, %v1034_v54  ;;  %v1003_v5 = vadd.f32 %v774_v63, %v297_v49  ;;  %v1035_v6 = vadd.f32 %v902_v0, %v329_v50  ;;  %v333_v26 = vld [vmem:[#allocation2 + $0x168] sm:$0xff]  ;;  %v306_v53 = vld [vmem:[#allocation2 + $0x90] sm:$0xff] }
 0x100   : > { %v1133_v3 = vld [vmem:[#allocation2 + $0x38] sm:$0xff]  ;;  %1453 = vst.msk [vmem:[%s2292_s28 + $0x18] sm:$0xf] %vm1446_vm2, %v1760_v57  ;;  %1485 = vst.msk [vmem:[%s2292_s28 + $0x98] sm:$0xf] %vm1446_vm2, %v1792_v58  ;;  %v338_v54 = vld [vmem:[#allocation2 + $0x190] sm:$0xff] }
 0x101   : > { %v1165_v4 = vld [vmem:[#allocation2 + $0x138] sm:$0xff]  ;;  %v1761_v7 = vpack.c.bf16 %v1133_v3, %v1133_v3  ;;  %1070 = vst.msk [vmem:[#allocation2 + $0x58] sm:$0xff] %vm223_vm0, %v1005_v61  ;;  %1102 = vst.msk [vmem:[#allocation2 + $0x158] sm:$0xff] %vm223_vm0, %v1037_v62  ;;  %v304_v55 = vld [vmem:[#allocation2 + $0x80] sm:$0xff] }
 0x102   : > { %v1793_v8 = vpack.c.bf16 %v1165_v4, %v1165_v4  ;;  %v1131_v9 = vld [vmem:[#allocation2 + $0x28] sm:$0xff]  ;;  %1451 = vst.msk [vmem:[%s2292_s28 + $0x10] sm:$0xf] %vm1446_vm2, %v1758_v1  ;;  %1483 = vst.msk [vmem:[%s2292_s28 + $0x90] sm:$0xf] %vm1446_vm2, %v1790_v2  ;;  %v1876_v17 = vpop.f32.mrb[12].mxu0 }
 0x103   : > { %v1163_v10 = vld [vmem:[#allocation2 + $0x128] sm:$0xff]  ;;  %v1759_v11 = vpack.c.bf16 %v1131_v9, %v1131_v9  ;;  %1068 = vst.msk [vmem:[#allocation2 + $0x48] sm:$0xff] %vm223_vm0, %v1003_v5  ;;  %1100 = vst.msk [vmem:[#allocation2 + $0x148] sm:$0xff] %vm223_vm0, %v1035_v6  ;;  %v1908_v18 = vpop.f32.mrb[12].mxu1  ;;  %v1008_v21 = vadd.f32 %v1876_v17, %v302_v13  ;;  %v787_v23 = vpop.f32.mrb[13].mxu0  ;;  %v336_v56 = vld [vmem:[#allocation2 + $0x180] sm:$0xff] }
 0x104   : > { %v1791_v12 = vpack.c.bf16 %v1163_v10, %v1163_v10  ;;  %1454 = vst.msk [vmem:[%s2292_s28 + $0x1c] sm:$0xf] %vm1446_vm2, %v1761_v7  ;;  %1486 = vst.msk [vmem:[%s2292_s28 + $0x9c] sm:$0xf] %vm1446_vm2, %v1793_v8  ;;  %v1040_v22 = vadd.f32 %v1908_v18, %v334_v14  ;;  %v915_v24 = vpop.f32.mrb[13].mxu1  ;;  %v1006_v29 = vadd.f32 %v787_v23, %v300_v15  ;;  %v1877_v31 = vpop.f32.mrb[14].mxu0 }
 0x105   : > { %1452 = vst.msk [vmem:[%s2292_s28 + $0x14] sm:$0xf] %vm1446_vm2, %v1759_v11  ;;  %v1136_v27 = vld [vmem:[#allocation2 + $0x50] sm:$0xff]  ;;  %v1038_v30 = vadd.f32 %v915_v24, %v332_v16  ;;  %v1909_v32 = vpop.f32.mrb[14].mxu1  ;;  %v1009_v37 = vadd.f32 %v1877_v31, %v303_v19  ;;  %v790_v39 = vpop.f32.mrb[15].mxu0  ;;  %v307_v59 = vld [vmem:[#allocation2 + $0x98] sm:$0xff] }
 0x106   : > { %1484 = vst.msk [vmem:[%s2292_s28 + $0x94] sm:$0xf] %vm1446_vm2, %v1791_v12  ;;  %v1168_v28 = vld [vmem:[#allocation2 + $0x150] sm:$0xff]  ;;  %v1764_v33 = vpack.c.bf16 %v1136_v27, %v1136_v27  ;;  %v1134_v35 = vld [vmem:[#allocation2 + $0x40] sm:$0xff]  ;;  %v1041_v38 = vadd.f32 %v1909_v32, %v335_v20  ;;  %v918_v40 = vpop.f32.mrb[15].mxu1  ;;  %v1007_v45 = vadd.f32 %v790_v39, %v301_v25  ;;  %v339_v60 = vld [vmem:[#allocation2 + $0x198] sm:$0xff] }
 0x107   : > { %v1796_v34 = vpack.c.bf16 %v1168_v28, %v1168_v28  ;;  %v1166_v36 = vld [vmem:[#allocation2 + $0x140] sm:$0xff]  ;;  %1073 = vst.msk [vmem:[#allocation2 + $0x70] sm:$0xff] %vm223_vm0, %v1008_v21  ;;  %1105 = vst.msk [vmem:[#allocation2 + $0x170] sm:$0xff] %vm223_vm0, %v1040_v22  ;;  %v1762_v41 = vpack.c.bf16 %v1134_v35, %v1134_v35  ;;  %v1039_v46 = vadd.f32 %v918_v40, %v333_v26  ;;  %v305_v1 = vld [vmem:[#allocation2 + $0x88] sm:$0xff] }
 0x108   : > { %v1794_v42 = vpack.c.bf16 %v1166_v36, %v1166_v36  ;;  %v1137_v43 = vld [vmem:[#allocation2 + $0x58] sm:$0xff]  ;;  %1071 = vst.msk [vmem:[#allocation2 + $0x60] sm:$0xff] %vm223_vm0, %v1006_v29  ;;  %1103 = vst.msk [vmem:[#allocation2 + $0x160] sm:$0xff] %vm223_vm0, %v1038_v30  ;;  %v337_v2 = vld [vmem:[#allocation2 + $0x188] sm:$0xff] }
 0x109   : > { %v1169_v44 = vld [vmem:[#allocation2 + $0x158] sm:$0xff]  ;;  %1457 = vst.msk [vmem:[%s2292_s28 + $0x28] sm:$0xf] %vm1446_vm2, %v1764_v33  ;;  %1489 = vst.msk [vmem:[%s2292_s28 + $0xa8] sm:$0xf] %vm1446_vm2, %v1796_v34  ;;  %v1765_v47 = vpack.c.bf16 %v1137_v43, %v1137_v43  ;;  %v310_v29 = vld [vmem:[#allocation2 + $0xb0] sm:$0xff] }
 0x10a   : > { %v1797_v48 = vpack.c.bf16 %v1169_v44, %v1169_v44  ;;  %v1135_v49 = vld [vmem:[#allocation2 + $0x48] sm:$0xff]  ;;  %1074 = vst.msk [vmem:[#allocation2 + $0x78] sm:$0xff] %vm223_vm0, %v1009_v37  ;;  %1106 = vst.msk [vmem:[#allocation2 + $0x178] sm:$0xff] %vm223_vm0, %v1041_v38  ;;  %v1880_v57 = vpop.f32.mrb[16].mxu0  ;;  %v1912_v58 = vpop.f32.mrb[16].mxu1  ;;  %v342_v30 = vld [vmem:[#allocation2 + $0x1b0] sm:$0xff] }
 0x10b   : > { %v1167_v50 = vld [vmem:[#allocation2 + $0x148] sm:$0xff]  ;;  %1455 = vst.msk [vmem:[%s2292_s28 + $0x20] sm:$0xf] %vm1446_vm2, %v1762_v41  ;;  %1487 = vst.msk [vmem:[%s2292_s28 + $0xa0] sm:$0xf] %vm1446_vm2, %v1794_v42  ;;  %v1763_v51 = vpack.c.bf16 %v1135_v49, %v1135_v49  ;;  %v1012_v61 = vadd.f32 %v1880_v57, %v306_v53  ;;  %v1044_v62 = vadd.f32 %v1912_v58, %v338_v54  ;;  %v803_v63 = vpop.f32.mrb[17].mxu0 }
 0x10c   : > { %v1795_v52 = vpack.c.bf16 %v1167_v50, %v1167_v50  ;;  %1072 = vst.msk [vmem:[#allocation2 + $0x68] sm:$0xff] %vm223_vm0, %v1007_v45  ;;  %1104 = vst.msk [vmem:[#allocation2 + $0x168] sm:$0xff] %vm223_vm0, %v1039_v46  ;;  %v931_v0 = vpop.f32.mrb[17].mxu1  ;;  %v1010_v5 = vadd.f32 %v803_v63, %v304_v55  ;;  %v1881_v7 = vpop.f32.mrb[18].mxu0  ;;  %v308_v31 = vld [vmem:[#allocation2 + $0xa0] sm:$0xff]  ;;  %v311_v35 = vld [vmem:[#allocation2 + $0xb8] sm:$0xff] }
 0x10d   : > { %1458 = vst.msk [vmem:[%s2292_s28 + $0x2c] sm:$0xf] %vm1446_vm2, %v1765_v47  ;;  %1490 = vst.msk [vmem:[%s2292_s28 + $0xac] sm:$0xf] %vm1446_vm2, %v1797_v48  ;;  %v1042_v6 = vadd.f32 %v931_v0, %v336_v56  ;;  %v1913_v8 = vpop.f32.mrb[18].mxu1  ;;  %v1013_v13 = vadd.f32 %v1881_v7, %v307_v59  ;;  %v806_v15 = vpop.f32.mrb[19].mxu0 }
 0x10e   : > { %1456 = vst.msk [vmem:[%s2292_s28 + $0x24] sm:$0xf] %vm1446_vm2, %v1763_v51  ;;  %1488 = vst.msk [vmem:[%s2292_s28 + $0xa4] sm:$0xf] %vm1446_vm2, %v1795_v52  ;;  %v1140_v3 = vld [vmem:[#allocation2 + $0x70] sm:$0xff]  ;;  %v1045_v14 = vadd.f32 %v1913_v8, %v339_v60  ;;  %v934_v16 = vpop.f32.mrb[19].mxu1  ;;  %v1011_v21 = vadd.f32 %v806_v15, %v305_v1 }
 0x10f   : > { %v1172_v4 = vld [vmem:[#allocation2 + $0x170] sm:$0xff]  ;;  %v1768_v9 = vpack.c.bf16 %v1140_v3, %v1140_v3  ;;  %v1138_v11 = vld [vmem:[#allocation2 + $0x60] sm:$0xff]  ;;  %1077 = vst.msk [vmem:[#allocation2 + $0x90] sm:$0xff] %vm223_vm0, %v1012_v61  ;;  %1109 = vst.msk [vmem:[#allocation2 + $0x190] sm:$0xff] %vm223_vm0, %v1044_v62  ;;  %v1043_v22 = vadd.f32 %v934_v16, %v337_v2 }
 0x110   : > { %v1800_v10 = vpack.c.bf16 %v1172_v4, %v1172_v4  ;;  %v1170_v12 = vld [vmem:[#allocation2 + $0x160] sm:$0xff]  ;;  %v1766_v17 = vpack.c.bf16 %v1138_v11, %v1138_v11  ;;  %1075 = vst.msk [vmem:[#allocation2 + $0x80] sm:$0xff] %vm223_vm0, %v1010_v5  ;;  %1107 = vst.msk [vmem:[#allocation2 + $0x180] sm:$0xff] %vm223_vm0, %v1042_v6  ;;  %v343_v36 = vld [vmem:[#allocation2 + $0x1b8] sm:$0xff] }
 0x111   : > { %v1798_v18 = vpack.c.bf16 %v1170_v12, %v1170_v12  ;;  %v1141_v19 = vld [vmem:[#allocation2 + $0x78] sm:$0xff]  ;;  %1461 = vst.msk [vmem:[%s2292_s28 + $0x38] sm:$0xf] %vm1446_vm2, %v1768_v9  ;;  %v340_v32 = vld [vmem:[#allocation2 + $0x1a0] sm:$0xff]  ;;  %v309_v41 = vld [vmem:[#allocation2 + $0xa8] sm:$0xff] }
 0x112   : > { %v1173_v20 = vld [vmem:[#allocation2 + $0x178] sm:$0xff]  ;;  %1493 = vst.msk [vmem:[%s2292_s28 + $0xb8] sm:$0xf] %vm1446_vm2, %v1800_v10  ;;  %v1769_v23 = vpack.c.bf16 %v1141_v19, %v1141_v19  ;;  %1459 = vst.msk [vmem:[%s2292_s28 + $0x30] sm:$0xf] %vm1446_vm2, %v1766_v17  ;;  %v1884_v33 = vpop.f32.mrb[20].mxu0 }
 0x113   : > { %v1801_v24 = vpack.c.bf16 %v1173_v20, %v1173_v20  ;;  %v1139_v25 = vld [vmem:[#allocation2 + $0x68] sm:$0xff]  ;;  %1078 = vst.msk [vmem:[#allocation2 + $0x98] sm:$0xff] %vm223_vm0, %v1013_v13  ;;  %1110 = vst.msk [vmem:[#allocation2 + $0x198] sm:$0xff] %vm223_vm0, %v1045_v14  ;;  %v1916_v34 = vpop.f32.mrb[20].mxu1  ;;  %v1016_v37 = vadd.f32 %v1884_v33, %v310_v29  ;;  %v819_v39 = vpop.f32.mrb[21].mxu0  ;;  %v314_v5 = vld [vmem:[#allocation2 + $0xd0] sm:$0xff] }
 0x114   : > { %v1171_v26 = vld [vmem:[#allocation2 + $0x168] sm:$0xff]  ;;  %1491 = vst.msk [vmem:[%s2292_s28 + $0xb0] sm:$0xf] %vm1446_vm2, %v1798_v18  ;;  %v1767_v27 = vpack.c.bf16 %v1139_v25, %v1139_v25  ;;  %1462 = vst.msk [vmem:[%s2292_s28 + $0x3c] sm:$0xf] %vm1446_vm2, %v1769_v23  ;;  %v1048_v38 = vadd.f32 %v1916_v34, %v342_v30  ;;  %v947_v40 = vpop.f32.mrb[21].mxu1  ;;  %v1014_v45 = vadd.f32 %v819_v39, %v308_v31 }
 0x115   : > { %v1799_v28 = vpack.c.bf16 %v1171_v26, %v1171_v26  ;;  %1076 = vst.msk [vmem:[#allocation2 + $0x88] sm:$0xff] %vm223_vm0, %v1011_v21  ;;  %1108 = vst.msk [vmem:[#allocation2 + $0x188] sm:$0xff] %vm223_vm0, %v1043_v22  ;;  %v341_v42 = vld [vmem:[#allocation2 + $0x1a8] sm:$0xff]  ;;  %v1046_v46 = vadd.f32 %v947_v40, %v340_v32  ;;  %v1885_v47 = vpop.f32.mrb[22].mxu0  ;;  %v1917_v48 = vpop.f32.mrb[22].mxu1  ;;  %v346_v6 = vld [vmem:[#allocation2 + $0x1d0] sm:$0xff] }
 0x116   : > { %1494 = vst.msk [vmem:[%s2292_s28 + $0xbc] sm:$0xf] %vm1446_vm2, %v1801_v24  ;;  %1460 = vst.msk [vmem:[%s2292_s28 + $0x34] sm:$0xf] %vm1446_vm2, %v1767_v27  ;;  %v1144_v43 = vld [vmem:[#allocation2 + $0x90] sm:$0xff]  ;;  %v1017_v53 = vadd.f32 %v1885_v47, %v311_v35  ;;  %v1049_v54 = vadd.f32 %v1917_v48, %v343_v36  ;;  %v822_v55 = vpop.f32.mrb[23].mxu0 }
 0x117   : > { %1492 = vst.msk [vmem:[%s2292_s28 + $0xb4] sm:$0xf] %vm1446_vm2, %v1799_v28  ;;  %v1176_v44 = vld [vmem:[#allocation2 + $0x190] sm:$0xff]  ;;  %v1772_v49 = vpack.c.bf16 %v1144_v43, %v1144_v43  ;;  %v1142_v51 = vld [vmem:[#allocation2 + $0x80] sm:$0xff]  ;;  %v950_v56 = vpop.f32.mrb[23].mxu1  ;;  %v1015_v61 = vadd.f32 %v822_v55, %v309_v41  ;;  %v315_v11 = vld [vmem:[#allocation2 + $0xd8] sm:$0xff] }
 0x118   : > { %v1804_v50 = vpack.c.bf16 %v1176_v44, %v1176_v44  ;;  %v1174_v52 = vld [vmem:[#allocation2 + $0x180] sm:$0xff]  ;;  %1081 = vst.msk [vmem:[#allocation2 + $0xb0] sm:$0xff] %vm223_vm0, %v1016_v37  ;;  %1113 = vst.msk [vmem:[#allocation2 + $0x1b0] sm:$0xff] %vm223_vm0, %v1048_v38  ;;  %v1770_v57 = vpack.c.bf16 %v1142_v51, %v1142_v51  ;;  %v1047_v62 = vadd.f32 %v950_v56, %v341_v42  ;;  %v347_v12 = vld [vmem:[#allocation2 + $0x1d8] sm:$0xff] }
 0x119   : > { %v1802_v58 = vpack.c.bf16 %v1174_v52, %v1174_v52  ;;  %1079 = vst.msk [vmem:[#allocation2 + $0xa0] sm:$0xff] %vm223_vm0, %v1014_v45  ;;  %1111 = vst.msk [vmem:[#allocation2 + $0x1a0] sm:$0xff] %vm223_vm0, %v1046_v46  ;;  %v312_v7 = vld [vmem:[#allocation2 + $0xc0] sm:$0xff]  ;;  %v313_v17 = vld [vmem:[#allocation2 + $0xc8] sm:$0xff] }
 0x11a   : > { %v1145_v59 = vld [vmem:[#allocation2 + $0x98] sm:$0xff]  ;;  %1465 = vst.msk [vmem:[%s2292_s28 + $0x48] sm:$0xf] %vm1446_vm2, %v1772_v49  ;;  %1497 = vst.msk [vmem:[%s2292_s28 + $0xc8] sm:$0xf] %vm1446_vm2, %v1804_v50  ;;  %v344_v8 = vld [vmem:[#allocation2 + $0x1c0] sm:$0xff] }
 0x11b   : > { %v1177_v60 = vld [vmem:[#allocation2 + $0x198] sm:$0xff]  ;;  %v1773_v63 = vpack.c.bf16 %v1145_v59, %v1145_v59  ;;  %1082 = vst.msk [vmem:[#allocation2 + $0xb8] sm:$0xff] %vm223_vm0, %v1017_v53  ;;  %1114 = vst.msk [vmem:[#allocation2 + $0x1b8] sm:$0xff] %vm223_vm0, %v1049_v54  ;;  %v1888_v9 = vpop.f32.mrb[24].mxu0  ;;  %v1920_v10 = vpop.f32.mrb[24].mxu1  ;;  %v345_v18 = vld [vmem:[#allocation2 + $0x1c8] sm:$0xff] }
 0x11c   : > { %v1805_v0 = vpack.c.bf16 %v1177_v60, %v1177_v60  ;;  %v1143_v1 = vld [vmem:[#allocation2 + $0x88] sm:$0xff]  ;;  %1463 = vst.msk [vmem:[%s2292_s28 + $0x40] sm:$0xf] %vm1446_vm2, %v1770_v57  ;;  %1495 = vst.msk [vmem:[%s2292_s28 + $0xc0] sm:$0xf] %vm1446_vm2, %v1802_v58  ;;  %v1020_v13 = vadd.f32 %v1888_v9, %v314_v5  ;;  %v1052_v14 = vadd.f32 %v1920_v10, %v346_v6  ;;  %v835_v15 = vpop.f32.mrb[25].mxu0 }
 0x11d   : > { %v1175_v2 = vld [vmem:[#allocation2 + $0x188] sm:$0xff]  ;;  %v1771_v3 = vpack.c.bf16 %v1143_v1, %v1143_v1  ;;  %1080 = vst.msk [vmem:[#allocation2 + $0xa8] sm:$0xff] %vm223_vm0, %v1015_v61  ;;  %1112 = vst.msk [vmem:[#allocation2 + $0x1a8] sm:$0xff] %vm223_vm0, %v1047_v62  ;;  %v963_v16 = vpop.f32.mrb[25].mxu1  ;;  %v1018_v21 = vadd.f32 %v835_v15, %v312_v7  ;;  %v1889_v23 = vpop.f32.mrb[26].mxu0  ;;  %v318_v45 = vld [vmem:[#allocation2 + $0xf0] sm:$0xff] }
 0x11e   : > { %v1803_v4 = vpack.c.bf16 %v1175_v2, %v1175_v2  ;;  %1466 = vst.msk [vmem:[%s2292_s28 + $0x4c] sm:$0xf] %vm1446_vm2, %v1773_v63  ;;  %1498 = vst.msk [vmem:[%s2292_s28 + $0xcc] sm:$0xf] %vm1446_vm2, %v1805_v0  ;;  %v1050_v22 = vadd.f32 %v963_v16, %v344_v8  ;;  %v1921_v24 = vpop.f32.mrb[26].mxu1  ;;  %v1021_v29 = vadd.f32 %v1889_v23, %v315_v11  ;;  %v838_v31 = vpop.f32.mrb[27].mxu0 }
 0x11f   : > { %1464 = vst.msk [vmem:[%s2292_s28 + $0x44] sm:$0xf] %vm1446_vm2, %v1771_v3  ;;  %v1148_v19 = vld [vmem:[#allocation2 + $0xb0] sm:$0xff]  ;;  %v1053_v30 = vadd.f32 %v1921_v24, %v347_v12  ;;  %v966_v32 = vpop.f32.mrb[27].mxu1  ;;  %v1019_v37 = vadd.f32 %v838_v31, %v313_v17  ;;  %v316_v47 = vld [vmem:[#allocation2 + $0xe0] sm:$0xff]  ;;  %v319_v51 = vld [vmem:[#allocation2 + $0xf8] sm:$0xff] }
 0x120   : > { %1496 = vst.msk [vmem:[%s2292_s28 + $0xc4] sm:$0xf] %vm1446_vm2, %v1803_v4  ;;  %v1180_v20 = vld [vmem:[#allocation2 + $0x1b0] sm:$0xff]  ;;  %v1776_v25 = vpack.c.bf16 %v1148_v19, %v1148_v19  ;;  %v1146_v27 = vld [vmem:[#allocation2 + $0xa0] sm:$0xff]  ;;  %v1051_v38 = vadd.f32 %v966_v32, %v345_v18  ;;  %v351_v52 = vld [vmem:[#allocation2 + $0x1f8] sm:$0xff] }
 0x121   : > { %v1808_v26 = vpack.c.bf16 %v1180_v20, %v1180_v20  ;;  %v1178_v28 = vld [vmem:[#allocation2 + $0x1a0] sm:$0xff]  ;;  %1085 = vst.msk [vmem:[#allocation2 + $0xd0] sm:$0xff] %vm223_vm0, %v1020_v13  ;;  %1117 = vst.msk [vmem:[#allocation2 + $0x1d0] sm:$0xff] %vm223_vm0, %v1052_v14  ;;  %v1774_v33 = vpack.c.bf16 %v1146_v27, %v1146_v27  ;;  %v350_v46 = vld [vmem:[#allocation2 + $0x1f0] sm:$0xff] }
 0x122   : > { %v1806_v34 = vpack.c.bf16 %v1178_v28, %v1178_v28  ;;  %v1149_v35 = vld [vmem:[#allocation2 + $0xb8] sm:$0xff]  ;;  %1083 = vst.msk [vmem:[#allocation2 + $0xc0] sm:$0xff] %vm223_vm0, %v1018_v21  ;;  %1115 = vst.msk [vmem:[#allocation2 + $0x1c0] sm:$0xff] %vm223_vm0, %v1050_v22  ;;  %v348_v48 = vld [vmem:[#allocation2 + $0x1e0] sm:$0xff]  ;;  %v1892_v49 = vpop.f32.mrb[28].mxu0  ;;  %v1924_v50 = vpop.f32.mrb[28].mxu1 }
 0x123   : > { %v1181_v36 = vld [vmem:[#allocation2 + $0x1b8] sm:$0xff]  ;;  %1469 = vst.msk [vmem:[%s2292_s28 + $0x58] sm:$0xf] %vm1446_vm2, %v1776_v25  ;;  %1501 = vst.msk [vmem:[%s2292_s28 + $0xd8] sm:$0xf] %vm1446_vm2, %v1808_v26  ;;  %v1777_v39 = vpack.c.bf16 %v1149_v35, %v1149_v35  ;;  %v1024_v53 = vadd.f32 %v1892_v49, %v318_v45  ;;  %v1056_v54 = vadd.f32 %v1924_v50, %v350_v46  ;;  %v851_v55 = vpop.f32.mrb[29].mxu0 }
 0x124   : > { %v1809_v40 = vpack.c.bf16 %v1181_v36, %v1181_v36  ;;  %v1147_v41 = vld [vmem:[#allocation2 + $0xa8] sm:$0xff]  ;;  %1086 = vst.msk [vmem:[#allocation2 + $0xd8] sm:$0xff] %vm223_vm0, %v1021_v29  ;;  %1118 = vst.msk [vmem:[#allocation2 + $0x1d8] sm:$0xff] %vm223_vm0, %v1053_v30  ;;  %v979_v56 = vpop.f32.mrb[29].mxu1  ;;  %v1022_v61 = vadd.f32 %v851_v55, %v316_v47  ;;  %v1893_v63 = vpop.f32.mrb[30].mxu0 }
 0x125   : > { %v1179_v42 = vld [vmem:[#allocation2 + $0x1a8] sm:$0xff]  ;;  %1467 = vst.msk [vmem:[%s2292_s28 + $0x50] sm:$0xf] %vm1446_vm2, %v1774_v33  ;;  %1499 = vst.msk [vmem:[%s2292_s28 + $0xd0] sm:$0xf] %vm1446_vm2, %v1806_v34  ;;  %v1775_v43 = vpack.c.bf16 %v1147_v41, %v1147_v41  ;;  %v1054_v62 = vadd.f32 %v979_v56, %v348_v48  ;;  %v1925_v0 = vpop.f32.mrb[30].mxu1  ;;  %v1025_v5 = vadd.f32 %v1893_v63, %v319_v51 }
 0x126   : > { %v1807_v44 = vpack.c.bf16 %v1179_v42, %v1179_v42  ;;  %1084 = vst.msk [vmem:[#allocation2 + $0xc8] sm:$0xff] %vm223_vm0, %v1019_v37  ;;  %1116 = vst.msk [vmem:[#allocation2 + $0x1c8] sm:$0xff] %vm223_vm0, %v1051_v38  ;;  %v317_v57 = vld [vmem:[#allocation2 + $0xe8] sm:$0xff]  ;;  %v1057_v6 = vadd.f32 %v1925_v0, %v351_v52  ;;  %v854_v7 = vpop.f32.mrb[31].mxu0  ;;  %v982_v8 = vpop.f32.mrb[31].mxu1 }
 0x127   : > { %1470 = vst.msk [vmem:[%s2292_s28 + $0x5c] sm:$0xf] %vm1446_vm2, %v1777_v39  ;;  %1502 = vst.msk [vmem:[%s2292_s28 + $0xdc] sm:$0xf] %vm1446_vm2, %v1809_v40  ;;  %v349_v58 = vld [vmem:[#allocation2 + $0x1e8] sm:$0xff]  ;;  %v1023_v13 = vadd.f32 %v854_v7, %v317_v57 }
 0x128   : > { %1468 = vst.msk [vmem:[%s2292_s28 + $0x54] sm:$0xf] %vm1446_vm2, %v1775_v43  ;;  %1500 = vst.msk [vmem:[%s2292_s28 + $0xd4] sm:$0xf] %vm1446_vm2, %v1807_v44  ;;  %v1152_v59 = vld [vmem:[#allocation2 + $0xd0] sm:$0xff]  ;;  %v1055_v14 = vadd.f32 %v982_v8, %v349_v58 }
 0x129   : > { %v1184_v60 = vld [vmem:[#allocation2 + $0x1d0] sm:$0xff]  ;;  %v1780_v1 = vpack.c.bf16 %v1152_v59, %v1152_v59  ;;  %v1150_v3 = vld [vmem:[#allocation2 + $0xc0] sm:$0xff]  ;;  %1089 = vst.msk [vmem:[#allocation2 + $0xf0] sm:$0xff] %vm223_vm0, %v1024_v53  ;;  %1121 = vst.msk [vmem:[#allocation2 + $0x1f0] sm:$0xff] %vm223_vm0, %v1056_v54 }
 0x12a   : > { %v1812_v2 = vpack.c.bf16 %v1184_v60, %v1184_v60  ;;  %v1182_v4 = vld [vmem:[#allocation2 + $0x1c0] sm:$0xff]  ;;  %v1778_v9 = vpack.c.bf16 %v1150_v3, %v1150_v3  ;;  %1087 = vst.msk [vmem:[#allocation2 + $0xe0] sm:$0xff] %vm223_vm0, %v1022_v61  ;;  %1119 = vst.msk [vmem:[#allocation2 + $0x1e0] sm:$0xff] %vm223_vm0, %v1054_v62 }
 0x12b   : > { %v1810_v10 = vpack.c.bf16 %v1182_v4, %v1182_v4  ;;  %v1153_v11 = vld [vmem:[#allocation2 + $0xd8] sm:$0xff]  ;;  %1473 = vst.msk [vmem:[%s2292_s28 + $0x68] sm:$0xf] %vm1446_vm2, %v1780_v1 }
 0x12c   : > { %v1185_v12 = vld [vmem:[#allocation2 + $0x1d8] sm:$0xff]  ;;  %1505 = vst.msk [vmem:[%s2292_s28 + $0xe8] sm:$0xf] %vm1446_vm2, %v1812_v2  ;;  %v1781_v15 = vpack.c.bf16 %v1153_v11, %v1153_v11  ;;  %1471 = vst.msk [vmem:[%s2292_s28 + $0x60] sm:$0xf] %vm1446_vm2, %v1778_v9 }
 0x12d   : > { %v1813_v16 = vpack.c.bf16 %v1185_v12, %v1185_v12  ;;  %v1151_v17 = vld [vmem:[#allocation2 + $0xc8] sm:$0xff]  ;;  %1090 = vst.msk [vmem:[#allocation2 + $0xf8] sm:$0xff] %vm223_vm0, %v1025_v5  ;;  %1122 = vst.msk [vmem:[#allocation2 + $0x1f8] sm:$0xff] %vm223_vm0, %v1057_v6 }
 0x12e   : > { %v1183_v18 = vld [vmem:[#allocation2 + $0x1c8] sm:$0xff]  ;;  %1503 = vst.msk [vmem:[%s2292_s28 + $0xe0] sm:$0xf] %vm1446_vm2, %v1810_v10  ;;  %v1779_v19 = vpack.c.bf16 %v1151_v17, %v1151_v17  ;;  %1474 = vst.msk [vmem:[%s2292_s28 + $0x6c] sm:$0xf] %vm1446_vm2, %v1781_v15 }
 0x12f   : > { %v1811_v20 = vpack.c.bf16 %v1183_v18, %v1183_v18  ;;  %1088 = vst.msk [vmem:[#allocation2 + $0xe8] sm:$0xff] %vm223_vm0, %v1023_v13  ;;  %1120 = vst.msk [vmem:[#allocation2 + $0x1e8] sm:$0xff] %vm223_vm0, %v1055_v14 }
 0x130   : > { %1506 = vst.msk [vmem:[%s2292_s28 + $0xec] sm:$0xf] %vm1446_vm2, %v1813_v16  ;;  %1472 = vst.msk [vmem:[%s2292_s28 + $0x64] sm:$0xf] %vm1446_vm2, %v1779_v19  ;;  %v1156_v21 = vld [vmem:[#allocation2 + $0xf0] sm:$0xff] }
 0x131   : > { %1504 = vst.msk [vmem:[%s2292_s28 + $0xe4] sm:$0xf] %vm1446_vm2, %v1811_v20  ;;  %v1188_v22 = vld [vmem:[#allocation2 + $0x1f0] sm:$0xff]  ;;  %v1784_v23 = vpack.c.bf16 %v1156_v21, %v1156_v21  ;;  %v1154_v25 = vld [vmem:[#allocation2 + $0xe0] sm:$0xff] }
 0x132   : > { %v1816_v24 = vpack.c.bf16 %v1188_v22, %v1188_v22  ;;  %v1186_v26 = vld [vmem:[#allocation2 + $0x1e0] sm:$0xff]  ;;  %v1782_v27 = vpack.c.bf16 %v1154_v25, %v1154_v25 }
 0x133   : > { %v1814_v28 = vpack.c.bf16 %v1186_v26, %v1186_v26  ;;  %1477 = vst.msk [vmem:[%s2292_s28 + $0x78] sm:$0xf] %vm1446_vm2, %v1784_v23 }
 0x134   : > { %v1157_v29 = vld [vmem:[#allocation2 + $0xf8] sm:$0xff]  ;;  %1509 = vst.msk [vmem:[%s2292_s28 + $0xf8] sm:$0xf] %vm1446_vm2, %v1816_v24  ;;  %1475 = vst.msk [vmem:[%s2292_s28 + $0x70] sm:$0xf] %vm1446_vm2, %v1782_v27 }
 0x135   : > { %v1189_v30 = vld [vmem:[#allocation2 + $0x1f8] sm:$0xff]  ;;  %v1785_v31 = vpack.c.bf16 %v1157_v29, %v1157_v29  ;;  %1507 = vst.msk [vmem:[%s2292_s28 + $0xf0] sm:$0xf] %vm1446_vm2, %v1814_v28 }
 0x136   : > { %v1817_v32 = vpack.c.bf16 %v1189_v30, %v1189_v30  ;;  %v1155_v33 = vld [vmem:[#allocation2 + $0xe8] sm:$0xff] }
 0x137   : > { %v1187_v34 = vld [vmem:[#allocation2 + $0x1e8] sm:$0xff]  ;;  %v1783_v35 = vpack.c.bf16 %v1155_v33, %v1155_v33  ;;  %1478 = vst.msk [vmem:[%s2292_s28 + $0x7c] sm:$0xf] %vm1446_vm2, %v1785_v31 }
 0x138   : > { %v1815_v36 = vpack.c.bf16 %v1187_v34, %v1187_v34  ;;  %1510 = vst.msk [vmem:[%s2292_s28 + $0xfc] sm:$0xf] %vm1446_vm2, %v1817_v32 }
 0x139   : > { %1476 = vst.msk [vmem:[%s2292_s28 + $0x74] sm:$0xf] %vm1446_vm2, %v1783_v35 }
 0x13a   : > { %1508 = vst.msk [vmem:[%s2292_s28 + $0xf4] sm:$0xf] %vm1446_vm2, %v1815_v36 }
 0x13b PF: > { %s12_s11 = sadd.s32 1, %s2017_s11   ;;  %s2490_s9 = smov %s2013_s10 }
 0x13c   : > { %p9_p5 = scmp.ge.s32.totalorder %s12_s11, 10   ;;  %s2491_s10 = smov %s2493_s12 }
 0x13e   :  { %11 = sbr.rel (!%p9_p5) target bundleno = 2 (0x2), region = 69 }

// kernel: _lambda_.15
= control target key start
LH: loop header
LB: loop body
LE: loop exit
PB: predicated region body
PF: predicated region fallthrough
CT: control target
= control target key end

     0   :  { %s2034_s9 = smov 0   ;;  %s2036_s10 = smov 0   ;;  %s2486_s0 = inlined_call_operand.vmem [shape: bf16[2048,64], index: 0, kind: input, shape index: {}]   ;;  %s2487_s1 = inlined_call_operand.vmem [shape: bf16[64,64], index: 1, kind: input, shape index: {}]   ;;  %s2488_s2 = inlined_call_operand.vmem [shape: bf16[2048,64], index: 2, kind: output, shape index: {}]  }
   0x1   :  { %s2038_s11 = smov 0  }
   0x2 LB: > { %s31_s12 = sadd.s32 1, %s2012_s10  ;;  %p1614_p0 = scmp.ge.s32.totalorder %s2016_s11, 1  ;;  %s2016_s11 = sphi %s2038_s11, %s12_s11   ;;  %s2012_s10 = sphi %s2036_s10, %s2490_s10   ;;  %s2008_s9 = sphi %s2034_s9, %s2489_s9  }
   0x3   : > { %p33_p1 = scmp.ge.s32.totalorder %s31_s12, 4  ;;  %p155_p2 = scmp.lt.s32.totalorder %s2016_s11, 5 }
   0x5   : > { %s2492_s12 = smov (%p33_p1, %s31_s12), 0  ;;  %p156_p3 = pnand %p1614_p0, %p155_p2 }
   0x6   : > { %v1958_v0 = vld [vmem:[%s2487_s1] sm:$0xff] (!%p156_p3)   ;;  %s1615_s15 = sshll.u32 (!%p156_p3), %s2008_s9, 6  ;;  %v2058_v1 = vld [vmem:[%s2487_s1 + $0x8] sm:$0xff] (!%p156_p3)   ;;  %v2067_v2 = vld [vmem:[%s2487_s1 + $0x10] sm:$0xff] (!%p156_p3)   ;;  %vm223_vm0 = vcmask (!%p156_p3), 523264   ;;  %v2018_v3 = vmov (!%p156_p3), 0.0  }
   0x7   : > { %159 = sbr.rel (%p156_p3) target bundleno = 315 (0x13b), region = 28  ;;  %p192_p4 = scmp.lt.s32.totalorder (!%p156_p3), %s1615_s15, 255  ;;  %1853 = vmatprep.subr.bf16.mxu0 (!%p156_p3), %v1958_v0  ;;  %1925 = vmatprep.subr.bf16.mxu1 (!%p156_p3), %v1958_v0  ;;  %226 = vst.msk [vmem:[#allocation2 + $0x10] sm:$0xff] (!%p156_p3), %vm223_vm0, %v2018_v3  ;;  %224 = vst.msk [vmem:[#allocation2] sm:$0xff] (!%p156_p3), %vm223_vm0, %v2018_v3  ;;  %v1961_v4 = vld [vmem:[%s2487_s1 + $0x18] sm:$0xff] (!%p156_p3)   ;;  %vm1445_vm1 = vcmask (!%p156_p3), 519168  }
   0x8   : > { %1854 = vmatpush3.bf16.msra.mxu0 (!%p156_p3), %v1958_v0  ;;  %1929 = vmatpush3.bf16.msra.mxu1 (!%p156_p3), %v1958_v0  ;;  %225 = vst.msk [vmem:[#allocation2 + $0x8] sm:$0xff] (!%p156_p3), %vm223_vm0, %v2018_v3  ;;  %227 = vst.msk [vmem:[#allocation2 + $0x18] sm:$0xff] (!%p156_p3), %vm223_vm0, %v2018_v3 }
   0x9   : > { %1855 = vmatprep.subr.bf16.mxu0 (!%p156_p3), %v2058_v1  ;;  %1926 = vmatprep.subr.bf16.mxu1 (!%p156_p3), %v2058_v1  ;;  %228 = vst.msk [vmem:[#allocation2 + $0x20] sm:$0xff] (!%p156_p3), %vm223_vm0, %v2018_v3  ;;  %229 = vst.msk [vmem:[#allocation2 + $0x28] sm:$0xff] (!%p156_p3), %vm223_vm0, %v2018_v3 }
   0xa   : > { %230 = vst.msk [vmem:[#allocation2 + $0x30] sm:$0xff] (!%p156_p3), %vm223_vm0, %v2018_v3  ;;  %231 = vst.msk [vmem:[#allocation2 + $0x38] sm:$0xff] (!%p156_p3), %vm223_vm0, %v2018_v3 }
   0xb   : > { %232 = vst.msk [vmem:[#allocation2 + $0x40] sm:$0xff] (!%p156_p3), %vm223_vm0, %v2018_v3  ;;  %233 = vst.msk [vmem:[#allocation2 + $0x48] sm:$0xff] (!%p156_p3), %vm223_vm0, %v2018_v3 }
   0xc   : > { %234 = vst.msk [vmem:[#allocation2 + $0x50] sm:$0xff] (!%p156_p3), %vm223_vm0, %v2018_v3  ;;  %235 = vst.msk [vmem:[#allocation2 + $0x58] sm:$0xff] (!%p156_p3), %vm223_vm0, %v2018_v3  ;;  %1856 = vmatpush3.bf16.msra.mxu0 (!%p156_p3), %v2058_v1  ;;  %1930 = vmatpush3.bf16.msra.mxu1 (!%p156_p3), %v2058_v1 }
   0xd   : > { %236 = vst.msk [vmem:[#allocation2 + $0x60] sm:$0xff] (!%p156_p3), %vm223_vm0, %v2018_v3  ;;  %237 = vst.msk [vmem:[#allocation2 + $0x68] sm:$0xff] (!%p156_p3), %vm223_vm0, %v2018_v3  ;;  %1857 = vmatprep.subr.bf16.mxu0 (!%p156_p3), %v2067_v2  ;;  %1927 = vmatprep.subr.bf16.mxu1 (!%p156_p3), %v2067_v2 }
   0xe   : > { %s2494_s15 = smov (!%p192_p4, %s1615_s15), 255  ;;  %238 = vst.msk [vmem:[#allocation2 + $0x70] sm:$0xff] %vm223_vm0, %v2018_v3  ;;  %239 = vst.msk [vmem:[#allocation2 + $0x78] sm:$0xff] %vm223_vm0, %v2018_v3  ;;  %v290_v37 = vld [vmem:[#allocation2 + $0x10] sm:$0xff]  ;;  %v288_v39 = vld [vmem:[#allocation2] sm:$0xff] }
   0xf   : > { %s1616_s20 = sshll.u32 %s2494_s15, 2  ;;  %240 = vst.msk [vmem:[#allocation2 + $0x80] sm:$0xff] %vm223_vm0, %v2018_v3  ;;  %241 = vst.msk [vmem:[#allocation2 + $0x88] sm:$0xff] %vm223_vm0, %v2018_v3  ;;  %v291_v43 = vld [vmem:[#allocation2 + $0x18] sm:$0xff]  ;;  %v289_v49 = vld [vmem:[#allocation2 + $0x8] sm:$0xff] }
  0x10   : > { %242 = vst.msk [vmem:[#allocation2 + $0x90] sm:$0xff] %vm223_vm0, %v2018_v3  ;;  %243 = vst.msk [vmem:[#allocation2 + $0x98] sm:$0xff] %vm223_vm0, %v2018_v3  ;;  %s2206_s25 = scalar_lea.vmem %s2486_s0, %s1616_s20  ;;  %1858 = vmatpush3.bf16.msra.mxu0 %v2067_v2  ;;  %1931 = vmatpush3.bf16.msra.mxu1 %v2067_v2  ;;  %v292_v63 = vld [vmem:[#allocation2 + $0x20] sm:$0xff]  ;;  %s2291_s28 = scalar_lea.vmem %s2488_s2, %s1616_s20 }
  0x11   : > { %244 = vst.msk [vmem:[#allocation2 + $0xa0] sm:$0xff] %vm223_vm0, %v2018_v3  ;;  %245 = vst.msk [vmem:[#allocation2 + $0xa8] sm:$0xff] %vm223_vm0, %v2018_v3  ;;  %v1962_v5 = vld [vmem:[%s2206_s25] sm:$0xff]   ;;  %1859 = vmatprep.subr.bf16.mxu0 %v1961_v4  ;;  %1928 = vmatprep.subr.bf16.mxu1 %v1961_v4  ;;  %v1964_v7 = vld [vmem:[%s2206_s25 + $0x8] sm:$0xff]  }
  0x12   : > { %246 = vst.msk [vmem:[#allocation2 + $0xb0] sm:$0xff] %vm223_vm0, %v2018_v3  ;;  %247 = vst.msk [vmem:[#allocation2 + $0xb8] sm:$0xff] %vm223_vm0, %v2018_v3  ;;  %v1963_v6 = vld [vmem:[%s2206_s25 + $0x80] sm:$0xff]   ;;  %1861 = vmatprep.mubr.msk.bf16.mxu0 %vm223_vm0, %v1962_v5  ;;  %v1965_v8 = vld [vmem:[%s2206_s25 + $0x88] sm:$0xff]  }
  0x13   : > { %248 = vst.msk [vmem:[#allocation2 + $0xc0] sm:$0xff] %vm223_vm0, %v2018_v3  ;;  %249 = vst.msk [vmem:[#allocation2 + $0xc8] sm:$0xff] %vm223_vm0, %v2018_v3  ;;  %1893 = vmatprep.mubr.msk.bf16.mxu1 %vm223_vm0, %v1963_v6  ;;  %v1966_v9 = vld [vmem:[%s2206_s25 + $0x10] sm:$0xff]   ;;  %v1968_v11 = vld [vmem:[%s2206_s25 + $0x18] sm:$0xff]  }
  0x14   : > { %250 = vst.msk [vmem:[#allocation2 + $0xd0] sm:$0xff] %vm223_vm0, %v2018_v3  ;;  %251 = vst.msk [vmem:[#allocation2 + $0xd8] sm:$0xff] %vm223_vm0, %v2018_v3  ;;  %1860 = vmatpush3.bf16.msra.mxu0 %v1961_v4  ;;  %1932 = vmatpush3.bf16.msra.mxu1 %v1961_v4  ;;  %v1967_v10 = vld [vmem:[%s2206_s25 + $0x90] sm:$0xff]   ;;  %v1969_v12 = vld [vmem:[%s2206_s25 + $0x98] sm:$0xff]  }
  0x15   : > { %252 = vst.msk [vmem:[#allocation2 + $0xe0] sm:$0xff] %vm223_vm0, %v2018_v3  ;;  %253 = vst.msk [vmem:[#allocation2 + $0xe8] sm:$0xff] %vm223_vm0, %v2018_v3  ;;  %v1970_v13 = vld [vmem:[%s2206_s25 + $0x20] sm:$0xff]   ;;  %v1972_v15 = vld [vmem:[%s2206_s25 + $0x28] sm:$0xff]  }
  0x16   : > { %254 = vst.msk [vmem:[#allocation2 + $0xf0] sm:$0xff] %vm223_vm0, %v2018_v3  ;;  %255 = vst.msk [vmem:[#allocation2 + $0xf8] sm:$0xff] %vm223_vm0, %v2018_v3  ;;  %v1971_v14 = vld [vmem:[%s2206_s25 + $0xa0] sm:$0xff]   ;;  %v1973_v16 = vld [vmem:[%s2206_s25 + $0xa8] sm:$0xff]  }
  0x17   : > { %256 = vst.msk [vmem:[#allocation2 + $0x100] sm:$0xff] %vm223_vm0, %v2018_v3  ;;  %257 = vst.msk [vmem:[#allocation2 + $0x108] sm:$0xff] %vm223_vm0, %v2018_v3  ;;  %1862 = vmatmul.mubr.msk.bf16.vlgmr.msra.gmra.mrb[0].mxu0 %vm223_vm0, %v1964_v7  ;;  %1894 = vmatmul.mubr.msk.bf16.vlgmr.msra.gmra.mrb[0].mxu1 %vm223_vm0, %v1965_v8  ;;  %v1974_v17 = vld [vmem:[%s2206_s25 + $0x30] sm:$0xff]   ;;  %v1976_v19 = vld [vmem:[%s2206_s25 + $0x38] sm:$0xff]  }
  0x18   : > { %258 = vst.msk [vmem:[#allocation2 + $0x110] sm:$0xff] %vm223_vm0, %v2018_v3  ;;  %259 = vst.msk [vmem:[#allocation2 + $0x118] sm:$0xff] %vm223_vm0, %v2018_v3  ;;  %1865 = vmatprep.mubr.msk.bf16.mxu0 %vm223_vm0, %v1966_v9  ;;  %1897 = vmatprep.mubr.msk.bf16.mxu1 %vm223_vm0, %v1967_v10  ;;  %v1975_v18 = vld [vmem:[%s2206_s25 + $0xb0] sm:$0xff]   ;;  %v1977_v20 = vld [vmem:[%s2206_s25 + $0xb8] sm:$0xff]  }
  0x19   : > { %260 = vst.msk [vmem:[#allocation2 + $0x120] sm:$0xff] %vm223_vm0, %v2018_v3  ;;  %261 = vst.msk [vmem:[#allocation2 + $0x128] sm:$0xff] %vm223_vm0, %v2018_v3  ;;  %v1978_v21 = vld [vmem:[%s2206_s25 + $0x40] sm:$0xff]   ;;  %v1980_v23 = vld [vmem:[%s2206_s25 + $0x48] sm:$0xff]  }
  0x1a   : > { %262 = vst.msk [vmem:[#allocation2 + $0x130] sm:$0xff] %vm223_vm0, %v2018_v3  ;;  %263 = vst.msk [vmem:[#allocation2 + $0x138] sm:$0xff] %vm223_vm0, %v2018_v3  ;;  %v1979_v22 = vld [vmem:[%s2206_s25 + $0xc0] sm:$0xff]   ;;  %v1981_v24 = vld [vmem:[%s2206_s25 + $0xc8] sm:$0xff]  }
  0x1b   : > { %264 = vst.msk [vmem:[#allocation2 + $0x140] sm:$0xff] %vm223_vm0, %v2018_v3  ;;  %265 = vst.msk [vmem:[#allocation2 + $0x148] sm:$0xff] %vm223_vm0, %v2018_v3  ;;  %v1982_v25 = vld [vmem:[%s2206_s25 + $0x50] sm:$0xff]   ;;  %v1984_v27 = vld [vmem:[%s2206_s25 + $0x58] sm:$0xff]  }
  0x1c   : > { %266 = vst.msk [vmem:[#allocation2 + $0x150] sm:$0xff] %vm223_vm0, %v2018_v3  ;;  %267 = vst.msk [vmem:[#allocation2 + $0x158] sm:$0xff] %vm223_vm0, %v2018_v3  ;;  %v1983_v26 = vld [vmem:[%s2206_s25 + $0xd0] sm:$0xff]   ;;  %v1985_v28 = vld [vmem:[%s2206_s25 + $0xd8] sm:$0xff]  }
  0x1d   : > { %268 = vst.msk [vmem:[#allocation2 + $0x160] sm:$0xff] %vm223_vm0, %v2018_v3  ;;  %269 = vst.msk [vmem:[#allocation2 + $0x168] sm:$0xff] %vm223_vm0, %v2018_v3  ;;  %v1986_v29 = vld [vmem:[%s2206_s25 + $0x60] sm:$0xff]   ;;  %v1988_v31 = vld [vmem:[%s2206_s25 + $0x68] sm:$0xff]  }
  0x1e   : > { %270 = vst.msk [vmem:[#allocation2 + $0x170] sm:$0xff] %vm223_vm0, %v2018_v3  ;;  %271 = vst.msk [vmem:[#allocation2 + $0x178] sm:$0xff] %vm223_vm0, %v2018_v3  ;;  %v1987_v30 = vld [vmem:[%s2206_s25 + $0xe0] sm:$0xff]   ;;  %v1989_v32 = vld [vmem:[%s2206_s25 + $0xe8] sm:$0xff]  }
  0x1f   : > { %272 = vst.msk [vmem:[#allocation2 + $0x180] sm:$0xff] %vm223_vm0, %v2018_v3  ;;  %273 = vst.msk [vmem:[#allocation2 + $0x188] sm:$0xff] %vm223_vm0, %v2018_v3  ;;  %1866 = vmatmul.mubr.msk.bf16.gmra.mrb[4].mxu0 %vm223_vm0, %v1968_v11  ;;  %1898 = vmatmul.mubr.msk.bf16.gmra.mrb[4].mxu1 %vm223_vm0, %v1969_v12  ;;  %v1990_v33 = vld [vmem:[%s2206_s25 + $0x70] sm:$0xff]   ;;  %v1992_v35 = vld [vmem:[%s2206_s25 + $0x78] sm:$0xff]  }
  0x20   : > { %274 = vst.msk [vmem:[#allocation2 + $0x190] sm:$0xff] %vm223_vm0, %v2018_v3  ;;  %275 = vst.msk [vmem:[#allocation2 + $0x198] sm:$0xff] %vm223_vm0, %v2018_v3  ;;  %1869 = vmatprep.mubr.msk.bf16.mxu0 %vm223_vm0, %v1970_v13  ;;  %1901 = vmatprep.mubr.msk.bf16.mxu1 %vm223_vm0, %v1971_v14  ;;  %v1991_v34 = vld [vmem:[%s2206_s25 + $0xf0] sm:$0xff]   ;;  %v1993_v36 = vld [vmem:[%s2206_s25 + $0xf8] sm:$0xff]  }
  0x21   : > { %276 = vst.msk [vmem:[#allocation2 + $0x1a0] sm:$0xff] %vm223_vm0, %v2018_v3  ;;  %277 = vst.msk [vmem:[#allocation2 + $0x1a8] sm:$0xff] %vm223_vm0, %v2018_v3  ;;  %v322_v38 = vld [vmem:[#allocation2 + $0x110] sm:$0xff]  ;;  %v320_v40 = vld [vmem:[#allocation2 + $0x100] sm:$0xff] }
  0x22   : > { %278 = vst.msk [vmem:[#allocation2 + $0x1b0] sm:$0xff] %vm223_vm0, %v2018_v3  ;;  %279 = vst.msk [vmem:[#allocation2 + $0x1b8] sm:$0xff] %vm223_vm0, %v2018_v3  ;;  %v323_v44 = vld [vmem:[#allocation2 + $0x118] sm:$0xff]  ;;  %v321_v50 = vld [vmem:[#allocation2 + $0x108] sm:$0xff] }
  0x23   : > { %280 = vst.msk [vmem:[#allocation2 + $0x1c0] sm:$0xff] %vm223_vm0, %v2018_v3  ;;  %281 = vst.msk [vmem:[#allocation2 + $0x1c8] sm:$0xff] %vm223_vm0, %v2018_v3  ;;  %v294_v61 = vld [vmem:[#allocation2 + $0x30] sm:$0xff]  ;;  %v324_v0 = vld [vmem:[#allocation2 + $0x120] sm:$0xff] }
  0x24   : > { %282 = vst.msk [vmem:[#allocation2 + $0x1d0] sm:$0xff] %vm223_vm0, %v2018_v3  ;;  %283 = vst.msk [vmem:[#allocation2 + $0x1d8] sm:$0xff] %vm223_vm0, %v2018_v3  ;;  %v326_v62 = vld [vmem:[#allocation2 + $0x130] sm:$0xff]  ;;  %v327_v4 = vld [vmem:[#allocation2 + $0x138] sm:$0xff] }
  0x25   : > { %284 = vst.msk [vmem:[#allocation2 + $0x1e0] sm:$0xff] %vm223_vm0, %v2018_v3  ;;  %285 = vst.msk [vmem:[#allocation2 + $0x1e8] sm:$0xff] %vm223_vm0, %v2018_v3  ;;  %v293_v9 = vld [vmem:[#allocation2 + $0x28] sm:$0xff] }
  0x26   : > { %286 = vst.msk [vmem:[#allocation2 + $0x1f0] sm:$0xff] %vm223_vm0, %v2018_v3  ;;  %287 = vst.msk [vmem:[#allocation2 + $0x1f8] sm:$0xff] %vm223_vm0, %v2018_v3  ;;  %v295_v3 = vld [vmem:[#allocation2 + $0x38] sm:$0xff]  ;;  %v325_v10 = vld [vmem:[#allocation2 + $0x128] sm:$0xff] }
  0x27   : > { %1870 = vmatmul.mubr.msk.bf16.gmra.mrb[8].mxu0 %vm223_vm0, %v1972_v15  ;;  %1902 = vmatmul.mubr.msk.bf16.gmra.mrb[8].mxu1 %vm223_vm0, %v1973_v16 }
  0x28   : > { %1873 = vmatprep.mubr.msk.bf16.mxu0 %vm223_vm0, %v1974_v17  ;;  %1905 = vmatprep.mubr.msk.bf16.mxu1 %vm223_vm0, %v1975_v18 }
  0x2f   : > { %1874 = vmatmul.mubr.msk.bf16.gmra.mrb[12].mxu0 %vm223_vm0, %v1976_v19  ;;  %1906 = vmatmul.mubr.msk.bf16.gmra.mrb[12].mxu1 %vm223_vm0, %v1977_v20 }
  0x30   : > { %1877 = vmatprep.mubr.msk.bf16.mxu0 %vm223_vm0, %v1978_v21  ;;  %1909 = vmatprep.mubr.msk.bf16.mxu1 %vm223_vm0, %v1979_v22 }
  0x37   : > { %1878 = vmatmul.mubr.msk.bf16.gmra.mrb[16].mxu0 %vm223_vm0, %v1980_v23  ;;  %1910 = vmatmul.mubr.msk.bf16.gmra.mrb[16].mxu1 %vm223_vm0, %v1981_v24 }
  0x38   : > { %1881 = vmatprep.mubr.msk.bf16.mxu0 %vm223_vm0, %v1982_v25  ;;  %1913 = vmatprep.mubr.msk.bf16.mxu1 %vm223_vm0, %v1983_v26 }
  0x3f   : > { %1882 = vmatmul.mubr.msk.bf16.gmra.mrb[20].mxu0 %vm223_vm0, %v1984_v27  ;;  %1914 = vmatmul.mubr.msk.bf16.gmra.mrb[20].mxu1 %vm223_vm0, %v1985_v28 }
  0x40   : > { %1885 = vmatprep.mubr.msk.bf16.mxu0 %vm223_vm0, %v1986_v29  ;;  %1917 = vmatprep.mubr.msk.bf16.mxu1 %vm223_vm0, %v1987_v30 }
  0x47   : > { %1886 = vmatmul.mubr.msk.bf16.gmra.mrb[24].mxu0 %vm223_vm0, %v1988_v31  ;;  %1918 = vmatmul.mubr.msk.bf16.gmra.mrb[24].mxu1 %vm223_vm0, %v1989_v32 }
  0x48   : > { %1889 = vmatprep.mubr.msk.bf16.mxu0 %vm223_vm0, %v1990_v33  ;;  %1921 = vmatprep.mubr.msk.bf16.mxu1 %vm223_vm0, %v1991_v34 }
  0x4f   : > { %1890 = vmatmul.mubr.msk.bf16.gmra.mrb[28].mxu0 %vm223_vm0, %v1992_v35  ;;  %1922 = vmatmul.mubr.msk.bf16.gmra.mrb[28].mxu1 %vm223_vm0, %v1993_v36 }
  0xea   : > { %v1863_v41 = vpop.f32.mrb[0].mxu0  ;;  %v1895_v42 = vpop.f32.mrb[0].mxu1 }
  0xeb   : > { %v996_v45 = vadd.f32 %v1863_v41, %v290_v37  ;;  %v1028_v46 = vadd.f32 %v1895_v42, %v322_v38  ;;  %v739_v47 = vpop.f32.mrb[1].mxu0  ;;  %v867_v48 = vpop.f32.mrb[1].mxu1  ;;  %v298_v37 = vld [vmem:[#allocation2 + $0x50] sm:$0xff] }
  0xec   : > { %v994_v51 = vadd.f32 %v739_v47, %v288_v39  ;;  %v1026_v52 = vadd.f32 %v867_v48, %v320_v40  ;;  %v1864_v53 = vpop.f32.mrb[2].mxu0  ;;  %v1896_v54 = vpop.f32.mrb[2].mxu1  ;;  %v330_v38 = vld [vmem:[#allocation2 + $0x150] sm:$0xff]  ;;  %v296_v39 = vld [vmem:[#allocation2 + $0x40] sm:$0xff] }
  0xed   : > { %1060 = vst.msk [vmem:[#allocation2 + $0x10] sm:$0xff] %vm223_vm0, %v996_v45  ;;  %1092 = vst.msk [vmem:[#allocation2 + $0x110] sm:$0xff] %vm223_vm0, %v1028_v46  ;;  %v997_v55 = vadd.f32 %v1864_v53, %v291_v43  ;;  %v1029_v56 = vadd.f32 %v1896_v54, %v323_v44  ;;  %v742_v57 = vpop.f32.mrb[3].mxu0  ;;  %v870_v58 = vpop.f32.mrb[3].mxu1  ;;  %v328_v40 = vld [vmem:[#allocation2 + $0x140] sm:$0xff]  ;;  %v299_v43 = vld [vmem:[#allocation2 + $0x58] sm:$0xff] }
  0xee   : > { %1058 = vst.msk [vmem:[#allocation2] sm:$0xff] %vm223_vm0, %v994_v51  ;;  %1090 = vst.msk [vmem:[#allocation2 + $0x100] sm:$0xff] %vm223_vm0, %v1026_v52  ;;  %v995_v59 = vadd.f32 %v742_v57, %v289_v49  ;;  %v1027_v60 = vadd.f32 %v870_v58, %v321_v50  ;;  %v331_v44 = vld [vmem:[#allocation2 + $0x158] sm:$0xff]  ;;  %v297_v49 = vld [vmem:[#allocation2 + $0x48] sm:$0xff] }
  0xef   : > { %1061 = vst.msk [vmem:[#allocation2 + $0x18] sm:$0xff] %vm223_vm0, %v997_v55  ;;  %1093 = vst.msk [vmem:[#allocation2 + $0x118] sm:$0xff] %vm223_vm0, %v1029_v56  ;;  %v329_v50 = vld [vmem:[#allocation2 + $0x148] sm:$0xff] }
  0xf0   : > { %1059 = vst.msk [vmem:[#allocation2 + $0x8] sm:$0xff] %vm223_vm0, %v995_v59  ;;  %1091 = vst.msk [vmem:[#allocation2 + $0x108] sm:$0xff] %vm223_vm0, %v1027_v60 }
  0xf2   : > { %v1867_v1 = vpop.f32.mrb[4].mxu0  ;;  %v1899_v2 = vpop.f32.mrb[4].mxu1 }
  0xf3   : > { %v1000_v5 = vadd.f32 %v1867_v1, %v294_v61  ;;  %v1032_v6 = vadd.f32 %v1899_v2, %v326_v62  ;;  %v755_v7 = vpop.f32.mrb[5].mxu0  ;;  %v883_v8 = vpop.f32.mrb[5].mxu1 }
  0xf4   : > { %v1127_v11 = vld [vmem:[#allocation2 + $0x10] sm:$0xff]  ;;  %v998_v13 = vadd.f32 %v755_v7, %v292_v63  ;;  %v1030_v14 = vadd.f32 %v883_v8, %v324_v0  ;;  %v1868_v15 = vpop.f32.mrb[6].mxu0  ;;  %v1900_v16 = vpop.f32.mrb[6].mxu1 }
  0xf5   : > { %v1159_v12 = vld [vmem:[#allocation2 + $0x110] sm:$0xff]  ;;  %v1755_v17 = vpack.c.bf16 %v1127_v11, %v1127_v11  ;;  %v1125_v19 = vld [vmem:[#allocation2] sm:$0xff]  ;;  %1064 = vst.msk [vmem:[#allocation2 + $0x30] sm:$0xff] %vm223_vm0, %v1000_v5  ;;  %1096 = vst.msk [vmem:[#allocation2 + $0x130] sm:$0xff] %vm223_vm0, %v1032_v6  ;;  %v1001_v21 = vadd.f32 %v1868_v15, %v295_v3  ;;  %v1033_v22 = vadd.f32 %v1900_v16, %v327_v4  ;;  %v758_v23 = vpop.f32.mrb[7].mxu0  ;;  %v886_v24 = vpop.f32.mrb[7].mxu1 }
  0xf6   : > { %v1787_v18 = vpack.c.bf16 %v1159_v12, %v1159_v12  ;;  %v1157_v20 = vld [vmem:[#allocation2 + $0x100] sm:$0xff]  ;;  %v1753_v25 = vpack.c.bf16 %v1125_v19, %v1125_v19  ;;  %v1128_v27 = vld [vmem:[#allocation2 + $0x18] sm:$0xff]  ;;  %1062 = vst.msk [vmem:[#allocation2 + $0x20] sm:$0xff] %vm223_vm0, %v998_v13  ;;  %1094 = vst.msk [vmem:[#allocation2 + $0x120] sm:$0xff] %vm223_vm0, %v1030_v14  ;;  %v999_v29 = vadd.f32 %v758_v23, %v293_v9 }
  0xf7   : > { %v1785_v26 = vpack.c.bf16 %v1157_v20, %v1157_v20  ;;  %v1160_v28 = vld [vmem:[#allocation2 + $0x118] sm:$0xff]  ;;  %v1031_v30 = vadd.f32 %v886_v24, %v325_v10  ;;  %1448 = vst.msk [vmem:[%s2291_s28 + $0x8] sm:$0xf] %vm1445_vm1, %v1755_v17  ;;  %v1756_v31 = vpack.c.bf16 %v1128_v27, %v1128_v27  ;;  %v1126_v33 = vld [vmem:[#allocation2 + $0x8] sm:$0xff]  ;;  %v302_v13 = vld [vmem:[#allocation2 + $0x70] sm:$0xff] }
  0xf8   : > { %1480 = vst.msk [vmem:[%s2291_s28 + $0x88] sm:$0xf] %vm1445_vm1, %v1787_v18  ;;  %v1788_v32 = vpack.c.bf16 %v1160_v28, %v1160_v28  ;;  %v1158_v34 = vld [vmem:[#allocation2 + $0x108] sm:$0xff]  ;;  %1446 = vst.msk [vmem:[%s2291_s28] sm:$0xf] %vm1445_vm1, %v1753_v25  ;;  %v1754_v35 = vpack.c.bf16 %v1126_v33, %v1126_v33  ;;  %v334_v14 = vld [vmem:[#allocation2 + $0x170] sm:$0xff] }
  0xf9   : > { %1065 = vst.msk [vmem:[#allocation2 + $0x38] sm:$0xff] %vm223_vm0, %v1001_v21  ;;  %1097 = vst.msk [vmem:[#allocation2 + $0x138] sm:$0xff] %vm223_vm0, %v1033_v22  ;;  %v1786_v36 = vpack.c.bf16 %v1158_v34, %v1158_v34  ;;  %v300_v15 = vld [vmem:[#allocation2 + $0x60] sm:$0xff]  ;;  %v303_v19 = vld [vmem:[#allocation2 + $0x78] sm:$0xff] }
  0xfa   : > { %1478 = vst.msk [vmem:[%s2291_s28 + $0x80] sm:$0xf] %vm1445_vm1, %v1785_v26  ;;  %1449 = vst.msk [vmem:[%s2291_s28 + $0xc] sm:$0xf] %vm1445_vm1, %v1756_v31  ;;  %v1871_v41 = vpop.f32.mrb[8].mxu0  ;;  %v1903_v42 = vpop.f32.mrb[8].mxu1 }
  0xfb   : > { %1063 = vst.msk [vmem:[#allocation2 + $0x28] sm:$0xff] %vm223_vm0, %v999_v29  ;;  %1095 = vst.msk [vmem:[#allocation2 + $0x128] sm:$0xff] %vm223_vm0, %v1031_v30  ;;  %v1004_v45 = vadd.f32 %v1871_v41, %v298_v37  ;;  %v1036_v46 = vadd.f32 %v1903_v42, %v330_v38  ;;  %v771_v47 = vpop.f32.mrb[9].mxu0  ;;  %v899_v48 = vpop.f32.mrb[9].mxu1  ;;  %v332_v16 = vld [vmem:[#allocation2 + $0x160] sm:$0xff]  ;;  %v335_v20 = vld [vmem:[#allocation2 + $0x178] sm:$0xff] }
  0xfc   : > { %1481 = vst.msk [vmem:[%s2291_s28 + $0x8c] sm:$0xf] %vm1445_vm1, %v1788_v32  ;;  %1447 = vst.msk [vmem:[%s2291_s28 + $0x4] sm:$0xf] %vm1445_vm1, %v1754_v35  ;;  %v1131_v51 = vld [vmem:[#allocation2 + $0x30] sm:$0xff]  ;;  %v1002_v53 = vadd.f32 %v771_v47, %v296_v39  ;;  %v1034_v54 = vadd.f32 %v899_v48, %v328_v40  ;;  %v1872_v55 = vpop.f32.mrb[10].mxu0 }
  0xfd   : > { %1479 = vst.msk [vmem:[%s2291_s28 + $0x84] sm:$0xf] %vm1445_vm1, %v1786_v36  ;;  %v1163_v52 = vld [vmem:[#allocation2 + $0x130] sm:$0xff]  ;;  %v1904_v56 = vpop.f32.mrb[10].mxu1  ;;  %v1759_v57 = vpack.c.bf16 %v1131_v51, %v1131_v51  ;;  %v1129_v59 = vld [vmem:[#allocation2 + $0x20] sm:$0xff]  ;;  %v1005_v61 = vadd.f32 %v1872_v55, %v299_v43  ;;  %v774_v63 = vpop.f32.mrb[11].mxu0 }
  0xfe   : > { %v1791_v58 = vpack.c.bf16 %v1163_v52, %v1163_v52  ;;  %v1161_v60 = vld [vmem:[#allocation2 + $0x120] sm:$0xff]  ;;  %1068 = vst.msk [vmem:[#allocation2 + $0x50] sm:$0xff] %vm223_vm0, %v1004_v45  ;;  %1100 = vst.msk [vmem:[#allocation2 + $0x150] sm:$0xff] %vm223_vm0, %v1036_v46  ;;  %v1037_v62 = vadd.f32 %v1904_v56, %v331_v44  ;;  %v902_v0 = vpop.f32.mrb[11].mxu1  ;;  %v1757_v1 = vpack.c.bf16 %v1129_v59, %v1129_v59  ;;  %v301_v25 = vld [vmem:[#allocation2 + $0x68] sm:$0xff] }
  0xff   : > { %v1789_v2 = vpack.c.bf16 %v1161_v60, %v1161_v60  ;;  %1066 = vst.msk [vmem:[#allocation2 + $0x40] sm:$0xff] %vm223_vm0, %v1002_v53  ;;  %1098 = vst.msk [vmem:[#allocation2 + $0x140] sm:$0xff] %vm223_vm0, %v1034_v54  ;;  %v1003_v5 = vadd.f32 %v774_v63, %v297_v49  ;;  %v1035_v6 = vadd.f32 %v902_v0, %v329_v50  ;;  %v333_v26 = vld [vmem:[#allocation2 + $0x168] sm:$0xff]  ;;  %v306_v53 = vld [vmem:[#allocation2 + $0x90] sm:$0xff] }
 0x100   : > { %v1132_v3 = vld [vmem:[#allocation2 + $0x38] sm:$0xff]  ;;  %1452 = vst.msk [vmem:[%s2291_s28 + $0x18] sm:$0xf] %vm1445_vm1, %v1759_v57  ;;  %1484 = vst.msk [vmem:[%s2291_s28 + $0x98] sm:$0xf] %vm1445_vm1, %v1791_v58  ;;  %v338_v54 = vld [vmem:[#allocation2 + $0x190] sm:$0xff] }
 0x101   : > { %v1164_v4 = vld [vmem:[#allocation2 + $0x138] sm:$0xff]  ;;  %v1760_v7 = vpack.c.bf16 %v1132_v3, %v1132_v3  ;;  %1069 = vst.msk [vmem:[#allocation2 + $0x58] sm:$0xff] %vm223_vm0, %v1005_v61  ;;  %1101 = vst.msk [vmem:[#allocation2 + $0x158] sm:$0xff] %vm223_vm0, %v1037_v62  ;;  %v304_v55 = vld [vmem:[#allocation2 + $0x80] sm:$0xff] }
 0x102   : > { %v1792_v8 = vpack.c.bf16 %v1164_v4, %v1164_v4  ;;  %v1130_v9 = vld [vmem:[#allocation2 + $0x28] sm:$0xff]  ;;  %1450 = vst.msk [vmem:[%s2291_s28 + $0x10] sm:$0xf] %vm1445_vm1, %v1757_v1  ;;  %1482 = vst.msk [vmem:[%s2291_s28 + $0x90] sm:$0xf] %vm1445_vm1, %v1789_v2  ;;  %v1875_v17 = vpop.f32.mrb[12].mxu0 }
 0x103   : > { %v1162_v10 = vld [vmem:[#allocation2 + $0x128] sm:$0xff]  ;;  %v1758_v11 = vpack.c.bf16 %v1130_v9, %v1130_v9  ;;  %1067 = vst.msk [vmem:[#allocation2 + $0x48] sm:$0xff] %vm223_vm0, %v1003_v5  ;;  %1099 = vst.msk [vmem:[#allocation2 + $0x148] sm:$0xff] %vm223_vm0, %v1035_v6  ;;  %v1907_v18 = vpop.f32.mrb[12].mxu1  ;;  %v1008_v21 = vadd.f32 %v1875_v17, %v302_v13  ;;  %v787_v23 = vpop.f32.mrb[13].mxu0  ;;  %v336_v56 = vld [vmem:[#allocation2 + $0x180] sm:$0xff] }
 0x104   : > { %v1790_v12 = vpack.c.bf16 %v1162_v10, %v1162_v10  ;;  %1453 = vst.msk [vmem:[%s2291_s28 + $0x1c] sm:$0xf] %vm1445_vm1, %v1760_v7  ;;  %1485 = vst.msk [vmem:[%s2291_s28 + $0x9c] sm:$0xf] %vm1445_vm1, %v1792_v8  ;;  %v1040_v22 = vadd.f32 %v1907_v18, %v334_v14  ;;  %v915_v24 = vpop.f32.mrb[13].mxu1  ;;  %v1006_v29 = vadd.f32 %v787_v23, %v300_v15  ;;  %v1876_v31 = vpop.f32.mrb[14].mxu0 }
 0x105   : > { %1451 = vst.msk [vmem:[%s2291_s28 + $0x14] sm:$0xf] %vm1445_vm1, %v1758_v11  ;;  %v1135_v27 = vld [vmem:[#allocation2 + $0x50] sm:$0xff]  ;;  %v1038_v30 = vadd.f32 %v915_v24, %v332_v16  ;;  %v1908_v32 = vpop.f32.mrb[14].mxu1  ;;  %v1009_v37 = vadd.f32 %v1876_v31, %v303_v19  ;;  %v790_v39 = vpop.f32.mrb[15].mxu0  ;;  %v307_v59 = vld [vmem:[#allocation2 + $0x98] sm:$0xff] }
 0x106   : > { %1483 = vst.msk [vmem:[%s2291_s28 + $0x94] sm:$0xf] %vm1445_vm1, %v1790_v12  ;;  %v1167_v28 = vld [vmem:[#allocation2 + $0x150] sm:$0xff]  ;;  %v1763_v33 = vpack.c.bf16 %v1135_v27, %v1135_v27  ;;  %v1133_v35 = vld [vmem:[#allocation2 + $0x40] sm:$0xff]  ;;  %v1041_v38 = vadd.f32 %v1908_v32, %v335_v20  ;;  %v918_v40 = vpop.f32.mrb[15].mxu1  ;;  %v1007_v45 = vadd.f32 %v790_v39, %v301_v25  ;;  %v339_v60 = vld [vmem:[#allocation2 + $0x198] sm:$0xff] }
 0x107   : > { %v1795_v34 = vpack.c.bf16 %v1167_v28, %v1167_v28  ;;  %v1165_v36 = vld [vmem:[#allocation2 + $0x140] sm:$0xff]  ;;  %1072 = vst.msk [vmem:[#allocation2 + $0x70] sm:$0xff] %vm223_vm0, %v1008_v21  ;;  %1104 = vst.msk [vmem:[#allocation2 + $0x170] sm:$0xff] %vm223_vm0, %v1040_v22  ;;  %v1761_v41 = vpack.c.bf16 %v1133_v35, %v1133_v35  ;;  %v1039_v46 = vadd.f32 %v918_v40, %v333_v26  ;;  %v305_v1 = vld [vmem:[#allocation2 + $0x88] sm:$0xff] }
 0x108   : > { %v1793_v42 = vpack.c.bf16 %v1165_v36, %v1165_v36  ;;  %v1136_v43 = vld [vmem:[#allocation2 + $0x58] sm:$0xff]  ;;  %1070 = vst.msk [vmem:[#allocation2 + $0x60] sm:$0xff] %vm223_vm0, %v1006_v29  ;;  %1102 = vst.msk [vmem:[#allocation2 + $0x160] sm:$0xff] %vm223_vm0, %v1038_v30  ;;  %v337_v2 = vld [vmem:[#allocation2 + $0x188] sm:$0xff] }
 0x109   : > { %v1168_v44 = vld [vmem:[#allocation2 + $0x158] sm:$0xff]  ;;  %1456 = vst.msk [vmem:[%s2291_s28 + $0x28] sm:$0xf] %vm1445_vm1, %v1763_v33  ;;  %1488 = vst.msk [vmem:[%s2291_s28 + $0xa8] sm:$0xf] %vm1445_vm1, %v1795_v34  ;;  %v1764_v47 = vpack.c.bf16 %v1136_v43, %v1136_v43  ;;  %v310_v29 = vld [vmem:[#allocation2 + $0xb0] sm:$0xff] }
 0x10a   : > { %v1796_v48 = vpack.c.bf16 %v1168_v44, %v1168_v44  ;;  %v1134_v49 = vld [vmem:[#allocation2 + $0x48] sm:$0xff]  ;;  %1073 = vst.msk [vmem:[#allocation2 + $0x78] sm:$0xff] %vm223_vm0, %v1009_v37  ;;  %1105 = vst.msk [vmem:[#allocation2 + $0x178] sm:$0xff] %vm223_vm0, %v1041_v38  ;;  %v1879_v57 = vpop.f32.mrb[16].mxu0  ;;  %v1911_v58 = vpop.f32.mrb[16].mxu1  ;;  %v342_v30 = vld [vmem:[#allocation2 + $0x1b0] sm:$0xff] }
 0x10b   : > { %v1166_v50 = vld [vmem:[#allocation2 + $0x148] sm:$0xff]  ;;  %1454 = vst.msk [vmem:[%s2291_s28 + $0x20] sm:$0xf] %vm1445_vm1, %v1761_v41  ;;  %1486 = vst.msk [vmem:[%s2291_s28 + $0xa0] sm:$0xf] %vm1445_vm1, %v1793_v42  ;;  %v1762_v51 = vpack.c.bf16 %v1134_v49, %v1134_v49  ;;  %v1012_v61 = vadd.f32 %v1879_v57, %v306_v53  ;;  %v1044_v62 = vadd.f32 %v1911_v58, %v338_v54  ;;  %v803_v63 = vpop.f32.mrb[17].mxu0 }
 0x10c   : > { %v1794_v52 = vpack.c.bf16 %v1166_v50, %v1166_v50  ;;  %1071 = vst.msk [vmem:[#allocation2 + $0x68] sm:$0xff] %vm223_vm0, %v1007_v45  ;;  %1103 = vst.msk [vmem:[#allocation2 + $0x168] sm:$0xff] %vm223_vm0, %v1039_v46  ;;  %v931_v0 = vpop.f32.mrb[17].mxu1  ;;  %v1010_v5 = vadd.f32 %v803_v63, %v304_v55  ;;  %v1880_v7 = vpop.f32.mrb[18].mxu0  ;;  %v308_v31 = vld [vmem:[#allocation2 + $0xa0] sm:$0xff]  ;;  %v311_v35 = vld [vmem:[#allocation2 + $0xb8] sm:$0xff] }
 0x10d   : > { %1457 = vst.msk [vmem:[%s2291_s28 + $0x2c] sm:$0xf] %vm1445_vm1, %v1764_v47  ;;  %1489 = vst.msk [vmem:[%s2291_s28 + $0xac] sm:$0xf] %vm1445_vm1, %v1796_v48  ;;  %v1042_v6 = vadd.f32 %v931_v0, %v336_v56  ;;  %v1912_v8 = vpop.f32.mrb[18].mxu1  ;;  %v1013_v13 = vadd.f32 %v1880_v7, %v307_v59  ;;  %v806_v15 = vpop.f32.mrb[19].mxu0 }
 0x10e   : > { %1455 = vst.msk [vmem:[%s2291_s28 + $0x24] sm:$0xf] %vm1445_vm1, %v1762_v51  ;;  %1487 = vst.msk [vmem:[%s2291_s28 + $0xa4] sm:$0xf] %vm1445_vm1, %v1794_v52  ;;  %v1139_v3 = vld [vmem:[#allocation2 + $0x70] sm:$0xff]  ;;  %v1045_v14 = vadd.f32 %v1912_v8, %v339_v60  ;;  %v934_v16 = vpop.f32.mrb[19].mxu1  ;;  %v1011_v21 = vadd.f32 %v806_v15, %v305_v1 }
 0x10f   : > { %v1171_v4 = vld [vmem:[#allocation2 + $0x170] sm:$0xff]  ;;  %v1767_v9 = vpack.c.bf16 %v1139_v3, %v1139_v3  ;;  %v1137_v11 = vld [vmem:[#allocation2 + $0x60] sm:$0xff]  ;;  %1076 = vst.msk [vmem:[#allocation2 + $0x90] sm:$0xff] %vm223_vm0, %v1012_v61  ;;  %1108 = vst.msk [vmem:[#allocation2 + $0x190] sm:$0xff] %vm223_vm0, %v1044_v62  ;;  %v1043_v22 = vadd.f32 %v934_v16, %v337_v2 }
 0x110   : > { %v1799_v10 = vpack.c.bf16 %v1171_v4, %v1171_v4  ;;  %v1169_v12 = vld [vmem:[#allocation2 + $0x160] sm:$0xff]  ;;  %v1765_v17 = vpack.c.bf16 %v1137_v11, %v1137_v11  ;;  %1074 = vst.msk [vmem:[#allocation2 + $0x80] sm:$0xff] %vm223_vm0, %v1010_v5  ;;  %1106 = vst.msk [vmem:[#allocation2 + $0x180] sm:$0xff] %vm223_vm0, %v1042_v6  ;;  %v343_v36 = vld [vmem:[#allocation2 + $0x1b8] sm:$0xff] }
 0x111   : > { %v1797_v18 = vpack.c.bf16 %v1169_v12, %v1169_v12  ;;  %v1140_v19 = vld [vmem:[#allocation2 + $0x78] sm:$0xff]  ;;  %1460 = vst.msk [vmem:[%s2291_s28 + $0x38] sm:$0xf] %vm1445_vm1, %v1767_v9  ;;  %v340_v32 = vld [vmem:[#allocation2 + $0x1a0] sm:$0xff]  ;;  %v309_v41 = vld [vmem:[#allocation2 + $0xa8] sm:$0xff] }
 0x112   : > { %v1172_v20 = vld [vmem:[#allocation2 + $0x178] sm:$0xff]  ;;  %1492 = vst.msk [vmem:[%s2291_s28 + $0xb8] sm:$0xf] %vm1445_vm1, %v1799_v10  ;;  %v1768_v23 = vpack.c.bf16 %v1140_v19, %v1140_v19  ;;  %1458 = vst.msk [vmem:[%s2291_s28 + $0x30] sm:$0xf] %vm1445_vm1, %v1765_v17  ;;  %v1883_v33 = vpop.f32.mrb[20].mxu0 }
 0x113   : > { %v1800_v24 = vpack.c.bf16 %v1172_v20, %v1172_v20  ;;  %v1138_v25 = vld [vmem:[#allocation2 + $0x68] sm:$0xff]  ;;  %1077 = vst.msk [vmem:[#allocation2 + $0x98] sm:$0xff] %vm223_vm0, %v1013_v13  ;;  %1109 = vst.msk [vmem:[#allocation2 + $0x198] sm:$0xff] %vm223_vm0, %v1045_v14  ;;  %v1915_v34 = vpop.f32.mrb[20].mxu1  ;;  %v1016_v37 = vadd.f32 %v1883_v33, %v310_v29  ;;  %v819_v39 = vpop.f32.mrb[21].mxu0  ;;  %v314_v5 = vld [vmem:[#allocation2 + $0xd0] sm:$0xff] }
 0x114   : > { %v1170_v26 = vld [vmem:[#allocation2 + $0x168] sm:$0xff]  ;;  %1490 = vst.msk [vmem:[%s2291_s28 + $0xb0] sm:$0xf] %vm1445_vm1, %v1797_v18  ;;  %v1766_v27 = vpack.c.bf16 %v1138_v25, %v1138_v25  ;;  %1461 = vst.msk [vmem:[%s2291_s28 + $0x3c] sm:$0xf] %vm1445_vm1, %v1768_v23  ;;  %v1048_v38 = vadd.f32 %v1915_v34, %v342_v30  ;;  %v947_v40 = vpop.f32.mrb[21].mxu1  ;;  %v1014_v45 = vadd.f32 %v819_v39, %v308_v31 }
 0x115   : > { %v1798_v28 = vpack.c.bf16 %v1170_v26, %v1170_v26  ;;  %1075 = vst.msk [vmem:[#allocation2 + $0x88] sm:$0xff] %vm223_vm0, %v1011_v21  ;;  %1107 = vst.msk [vmem:[#allocation2 + $0x188] sm:$0xff] %vm223_vm0, %v1043_v22  ;;  %v341_v42 = vld [vmem:[#allocation2 + $0x1a8] sm:$0xff]  ;;  %v1046_v46 = vadd.f32 %v947_v40, %v340_v32  ;;  %v1884_v47 = vpop.f32.mrb[22].mxu0  ;;  %v1916_v48 = vpop.f32.mrb[22].mxu1  ;;  %v346_v6 = vld [vmem:[#allocation2 + $0x1d0] sm:$0xff] }
 0x116   : > { %1493 = vst.msk [vmem:[%s2291_s28 + $0xbc] sm:$0xf] %vm1445_vm1, %v1800_v24  ;;  %1459 = vst.msk [vmem:[%s2291_s28 + $0x34] sm:$0xf] %vm1445_vm1, %v1766_v27  ;;  %v1143_v43 = vld [vmem:[#allocation2 + $0x90] sm:$0xff]  ;;  %v1017_v53 = vadd.f32 %v1884_v47, %v311_v35  ;;  %v1049_v54 = vadd.f32 %v1916_v48, %v343_v36  ;;  %v822_v55 = vpop.f32.mrb[23].mxu0 }
 0x117   : > { %1491 = vst.msk [vmem:[%s2291_s28 + $0xb4] sm:$0xf] %vm1445_vm1, %v1798_v28  ;;  %v1175_v44 = vld [vmem:[#allocation2 + $0x190] sm:$0xff]  ;;  %v1771_v49 = vpack.c.bf16 %v1143_v43, %v1143_v43  ;;  %v1141_v51 = vld [vmem:[#allocation2 + $0x80] sm:$0xff]  ;;  %v950_v56 = vpop.f32.mrb[23].mxu1  ;;  %v1015_v61 = vadd.f32 %v822_v55, %v309_v41  ;;  %v315_v11 = vld [vmem:[#allocation2 + $0xd8] sm:$0xff] }
 0x118   : > { %v1803_v50 = vpack.c.bf16 %v1175_v44, %v1175_v44  ;;  %v1173_v52 = vld [vmem:[#allocation2 + $0x180] sm:$0xff]  ;;  %1080 = vst.msk [vmem:[#allocation2 + $0xb0] sm:$0xff] %vm223_vm0, %v1016_v37  ;;  %1112 = vst.msk [vmem:[#allocation2 + $0x1b0] sm:$0xff] %vm223_vm0, %v1048_v38  ;;  %v1769_v57 = vpack.c.bf16 %v1141_v51, %v1141_v51  ;;  %v1047_v62 = vadd.f32 %v950_v56, %v341_v42  ;;  %v347_v12 = vld [vmem:[#allocation2 + $0x1d8] sm:$0xff] }
 0x119   : > { %v1801_v58 = vpack.c.bf16 %v1173_v52, %v1173_v52  ;;  %1078 = vst.msk [vmem:[#allocation2 + $0xa0] sm:$0xff] %vm223_vm0, %v1014_v45  ;;  %1110 = vst.msk [vmem:[#allocation2 + $0x1a0] sm:$0xff] %vm223_vm0, %v1046_v46  ;;  %v312_v7 = vld [vmem:[#allocation2 + $0xc0] sm:$0xff]  ;;  %v313_v17 = vld [vmem:[#allocation2 + $0xc8] sm:$0xff] }
 0x11a   : > { %v1144_v59 = vld [vmem:[#allocation2 + $0x98] sm:$0xff]  ;;  %1464 = vst.msk [vmem:[%s2291_s28 + $0x48] sm:$0xf] %vm1445_vm1, %v1771_v49  ;;  %1496 = vst.msk [vmem:[%s2291_s28 + $0xc8] sm:$0xf] %vm1445_vm1, %v1803_v50  ;;  %v344_v8 = vld [vmem:[#allocation2 + $0x1c0] sm:$0xff] }
 0x11b   : > { %v1176_v60 = vld [vmem:[#allocation2 + $0x198] sm:$0xff]  ;;  %v1772_v63 = vpack.c.bf16 %v1144_v59, %v1144_v59  ;;  %1081 = vst.msk [vmem:[#allocation2 + $0xb8] sm:$0xff] %vm223_vm0, %v1017_v53  ;;  %1113 = vst.msk [vmem:[#allocation2 + $0x1b8] sm:$0xff] %vm223_vm0, %v1049_v54  ;;  %v1887_v9 = vpop.f32.mrb[24].mxu0  ;;  %v1919_v10 = vpop.f32.mrb[24].mxu1  ;;  %v345_v18 = vld [vmem:[#allocation2 + $0x1c8] sm:$0xff] }
 0x11c   : > { %v1804_v0 = vpack.c.bf16 %v1176_v60, %v1176_v60  ;;  %v1142_v1 = vld [vmem:[#allocation2 + $0x88] sm:$0xff]  ;;  %1462 = vst.msk [vmem:[%s2291_s28 + $0x40] sm:$0xf] %vm1445_vm1, %v1769_v57  ;;  %1494 = vst.msk [vmem:[%s2291_s28 + $0xc0] sm:$0xf] %vm1445_vm1, %v1801_v58  ;;  %v1020_v13 = vadd.f32 %v1887_v9, %v314_v5  ;;  %v1052_v14 = vadd.f32 %v1919_v10, %v346_v6  ;;  %v835_v15 = vpop.f32.mrb[25].mxu0 }
 0x11d   : > { %v1174_v2 = vld [vmem:[#allocation2 + $0x188] sm:$0xff]  ;;  %v1770_v3 = vpack.c.bf16 %v1142_v1, %v1142_v1  ;;  %1079 = vst.msk [vmem:[#allocation2 + $0xa8] sm:$0xff] %vm223_vm0, %v1015_v61  ;;  %1111 = vst.msk [vmem:[#allocation2 + $0x1a8] sm:$0xff] %vm223_vm0, %v1047_v62  ;;  %v963_v16 = vpop.f32.mrb[25].mxu1  ;;  %v1018_v21 = vadd.f32 %v835_v15, %v312_v7  ;;  %v1888_v23 = vpop.f32.mrb[26].mxu0  ;;  %v318_v45 = vld [vmem:[#allocation2 + $0xf0] sm:$0xff] }
 0x11e   : > { %v1802_v4 = vpack.c.bf16 %v1174_v2, %v1174_v2  ;;  %1465 = vst.msk [vmem:[%s2291_s28 + $0x4c] sm:$0xf] %vm1445_vm1, %v1772_v63  ;;  %1497 = vst.msk [vmem:[%s2291_s28 + $0xcc] sm:$0xf] %vm1445_vm1, %v1804_v0  ;;  %v1050_v22 = vadd.f32 %v963_v16, %v344_v8  ;;  %v1920_v24 = vpop.f32.mrb[26].mxu1  ;;  %v1021_v29 = vadd.f32 %v1888_v23, %v315_v11  ;;  %v838_v31 = vpop.f32.mrb[27].mxu0 }
 0x11f   : > { %1463 = vst.msk [vmem:[%s2291_s28 + $0x44] sm:$0xf] %vm1445_vm1, %v1770_v3  ;;  %v1147_v19 = vld [vmem:[#allocation2 + $0xb0] sm:$0xff]  ;;  %v1053_v30 = vadd.f32 %v1920_v24, %v347_v12  ;;  %v966_v32 = vpop.f32.mrb[27].mxu1  ;;  %v1019_v37 = vadd.f32 %v838_v31, %v313_v17  ;;  %v316_v47 = vld [vmem:[#allocation2 + $0xe0] sm:$0xff]  ;;  %v319_v51 = vld [vmem:[#allocation2 + $0xf8] sm:$0xff] }
 0x120   : > { %1495 = vst.msk [vmem:[%s2291_s28 + $0xc4] sm:$0xf] %vm1445_vm1, %v1802_v4  ;;  %v1179_v20 = vld [vmem:[#allocation2 + $0x1b0] sm:$0xff]  ;;  %v1775_v25 = vpack.c.bf16 %v1147_v19, %v1147_v19  ;;  %v1145_v27 = vld [vmem:[#allocation2 + $0xa0] sm:$0xff]  ;;  %v1051_v38 = vadd.f32 %v966_v32, %v345_v18  ;;  %v351_v52 = vld [vmem:[#allocation2 + $0x1f8] sm:$0xff] }
 0x121   : > { %v1807_v26 = vpack.c.bf16 %v1179_v20, %v1179_v20  ;;  %v1177_v28 = vld [vmem:[#allocation2 + $0x1a0] sm:$0xff]  ;;  %1084 = vst.msk [vmem:[#allocation2 + $0xd0] sm:$0xff] %vm223_vm0, %v1020_v13  ;;  %1116 = vst.msk [vmem:[#allocation2 + $0x1d0] sm:$0xff] %vm223_vm0, %v1052_v14  ;;  %v1773_v33 = vpack.c.bf16 %v1145_v27, %v1145_v27  ;;  %v350_v46 = vld [vmem:[#allocation2 + $0x1f0] sm:$0xff] }
 0x122   : > { %v1805_v34 = vpack.c.bf16 %v1177_v28, %v1177_v28  ;;  %v1148_v35 = vld [vmem:[#allocation2 + $0xb8] sm:$0xff]  ;;  %1082 = vst.msk [vmem:[#allocation2 + $0xc0] sm:$0xff] %vm223_vm0, %v1018_v21  ;;  %1114 = vst.msk [vmem:[#allocation2 + $0x1c0] sm:$0xff] %vm223_vm0, %v1050_v22  ;;  %v348_v48 = vld [vmem:[#allocation2 + $0x1e0] sm:$0xff]  ;;  %v1891_v49 = vpop.f32.mrb[28].mxu0  ;;  %v1923_v50 = vpop.f32.mrb[28].mxu1 }
 0x123   : > { %v1180_v36 = vld [vmem:[#allocation2 + $0x1b8] sm:$0xff]  ;;  %1468 = vst.msk [vmem:[%s2291_s28 + $0x58] sm:$0xf] %vm1445_vm1, %v1775_v25  ;;  %1500 = vst.msk [vmem:[%s2291_s28 + $0xd8] sm:$0xf] %vm1445_vm1, %v1807_v26  ;;  %v1776_v39 = vpack.c.bf16 %v1148_v35, %v1148_v35  ;;  %v1024_v53 = vadd.f32 %v1891_v49, %v318_v45  ;;  %v1056_v54 = vadd.f32 %v1923_v50, %v350_v46  ;;  %v851_v55 = vpop.f32.mrb[29].mxu0 }
 0x124   : > { %v1808_v40 = vpack.c.bf16 %v1180_v36, %v1180_v36  ;;  %v1146_v41 = vld [vmem:[#allocation2 + $0xa8] sm:$0xff]  ;;  %1085 = vst.msk [vmem:[#allocation2 + $0xd8] sm:$0xff] %vm223_vm0, %v1021_v29  ;;  %1117 = vst.msk [vmem:[#allocation2 + $0x1d8] sm:$0xff] %vm223_vm0, %v1053_v30  ;;  %v979_v56 = vpop.f32.mrb[29].mxu1  ;;  %v1022_v61 = vadd.f32 %v851_v55, %v316_v47  ;;  %v1892_v63 = vpop.f32.mrb[30].mxu0 }
 0x125   : > { %v1178_v42 = vld [vmem:[#allocation2 + $0x1a8] sm:$0xff]  ;;  %1466 = vst.msk [vmem:[%s2291_s28 + $0x50] sm:$0xf] %vm1445_vm1, %v1773_v33  ;;  %1498 = vst.msk [vmem:[%s2291_s28 + $0xd0] sm:$0xf] %vm1445_vm1, %v1805_v34  ;;  %v1774_v43 = vpack.c.bf16 %v1146_v41, %v1146_v41  ;;  %v1054_v62 = vadd.f32 %v979_v56, %v348_v48  ;;  %v1924_v0 = vpop.f32.mrb[30].mxu1  ;;  %v1025_v5 = vadd.f32 %v1892_v63, %v319_v51 }
 0x126   : > { %v1806_v44 = vpack.c.bf16 %v1178_v42, %v1178_v42  ;;  %1083 = vst.msk [vmem:[#allocation2 + $0xc8] sm:$0xff] %vm223_vm0, %v1019_v37  ;;  %1115 = vst.msk [vmem:[#allocation2 + $0x1c8] sm:$0xff] %vm223_vm0, %v1051_v38  ;;  %v317_v57 = vld [vmem:[#allocation2 + $0xe8] sm:$0xff]  ;;  %v1057_v6 = vadd.f32 %v1924_v0, %v351_v52  ;;  %v854_v7 = vpop.f32.mrb[31].mxu0  ;;  %v982_v8 = vpop.f32.mrb[31].mxu1 }
 0x127   : > { %1469 = vst.msk [vmem:[%s2291_s28 + $0x5c] sm:$0xf] %vm1445_vm1, %v1776_v39  ;;  %1501 = vst.msk [vmem:[%s2291_s28 + $0xdc] sm:$0xf] %vm1445_vm1, %v1808_v40  ;;  %v349_v58 = vld [vmem:[#allocation2 + $0x1e8] sm:$0xff]  ;;  %v1023_v13 = vadd.f32 %v854_v7, %v317_v57 }
 0x128   : > { %1467 = vst.msk [vmem:[%s2291_s28 + $0x54] sm:$0xf] %vm1445_vm1, %v1774_v43  ;;  %1499 = vst.msk [vmem:[%s2291_s28 + $0xd4] sm:$0xf] %vm1445_vm1, %v1806_v44  ;;  %v1151_v59 = vld [vmem:[#allocation2 + $0xd0] sm:$0xff]  ;;  %v1055_v14 = vadd.f32 %v982_v8, %v349_v58 }
 0x129   : > { %v1183_v60 = vld [vmem:[#allocation2 + $0x1d0] sm:$0xff]  ;;  %v1779_v1 = vpack.c.bf16 %v1151_v59, %v1151_v59  ;;  %v1149_v3 = vld [vmem:[#allocation2 + $0xc0] sm:$0xff]  ;;  %1088 = vst.msk [vmem:[#allocation2 + $0xf0] sm:$0xff] %vm223_vm0, %v1024_v53  ;;  %1120 = vst.msk [vmem:[#allocation2 + $0x1f0] sm:$0xff] %vm223_vm0, %v1056_v54 }
 0x12a   : > { %v1811_v2 = vpack.c.bf16 %v1183_v60, %v1183_v60  ;;  %v1181_v4 = vld [vmem:[#allocation2 + $0x1c0] sm:$0xff]  ;;  %v1777_v9 = vpack.c.bf16 %v1149_v3, %v1149_v3  ;;  %1086 = vst.msk [vmem:[#allocation2 + $0xe0] sm:$0xff] %vm223_vm0, %v1022_v61  ;;  %1118 = vst.msk [vmem:[#allocation2 + $0x1e0] sm:$0xff] %vm223_vm0, %v1054_v62 }
 0x12b   : > { %v1809_v10 = vpack.c.bf16 %v1181_v4, %v1181_v4  ;;  %v1152_v11 = vld [vmem:[#allocation2 + $0xd8] sm:$0xff]  ;;  %1472 = vst.msk [vmem:[%s2291_s28 + $0x68] sm:$0xf] %vm1445_vm1, %v1779_v1 }
 0x12c   : > { %v1184_v12 = vld [vmem:[#allocation2 + $0x1d8] sm:$0xff]  ;;  %1504 = vst.msk [vmem:[%s2291_s28 + $0xe8] sm:$0xf] %vm1445_vm1, %v1811_v2  ;;  %v1780_v15 = vpack.c.bf16 %v1152_v11, %v1152_v11  ;;  %1470 = vst.msk [vmem:[%s2291_s28 + $0x60] sm:$0xf] %vm1445_vm1, %v1777_v9 }
 0x12d   : > { %v1812_v16 = vpack.c.bf16 %v1184_v12, %v1184_v12  ;;  %v1150_v17 = vld [vmem:[#allocation2 + $0xc8] sm:$0xff]  ;;  %1089 = vst.msk [vmem:[#allocation2 + $0xf8] sm:$0xff] %vm223_vm0, %v1025_v5  ;;  %1121 = vst.msk [vmem:[#allocation2 + $0x1f8] sm:$0xff] %vm223_vm0, %v1057_v6 }
 0x12e   : > { %v1182_v18 = vld [vmem:[#allocation2 + $0x1c8] sm:$0xff]  ;;  %1502 = vst.msk [vmem:[%s2291_s28 + $0xe0] sm:$0xf] %vm1445_vm1, %v1809_v10  ;;  %v1778_v19 = vpack.c.bf16 %v1150_v17, %v1150_v17  ;;  %1473 = vst.msk [vmem:[%s2291_s28 + $0x6c] sm:$0xf] %vm1445_vm1, %v1780_v15 }
 0x12f   : > { %v1810_v20 = vpack.c.bf16 %v1182_v18, %v1182_v18  ;;  %1087 = vst.msk [vmem:[#allocation2 + $0xe8] sm:$0xff] %vm223_vm0, %v1023_v13  ;;  %1119 = vst.msk [vmem:[#allocation2 + $0x1e8] sm:$0xff] %vm223_vm0, %v1055_v14 }
 0x130   : > { %1505 = vst.msk [vmem:[%s2291_s28 + $0xec] sm:$0xf] %vm1445_vm1, %v1812_v16  ;;  %1471 = vst.msk [vmem:[%s2291_s28 + $0x64] sm:$0xf] %vm1445_vm1, %v1778_v19  ;;  %v1155_v21 = vld [vmem:[#allocation2 + $0xf0] sm:$0xff] }
 0x131   : > { %1503 = vst.msk [vmem:[%s2291_s28 + $0xe4] sm:$0xf] %vm1445_vm1, %v1810_v20  ;;  %v1187_v22 = vld [vmem:[#allocation2 + $0x1f0] sm:$0xff]  ;;  %v1783_v23 = vpack.c.bf16 %v1155_v21, %v1155_v21  ;;  %v1153_v25 = vld [vmem:[#allocation2 + $0xe0] sm:$0xff] }
 0x132   : > { %v1815_v24 = vpack.c.bf16 %v1187_v22, %v1187_v22  ;;  %v1185_v26 = vld [vmem:[#allocation2 + $0x1e0] sm:$0xff]  ;;  %v1781_v27 = vpack.c.bf16 %v1153_v25, %v1153_v25 }
 0x133   : > { %v1813_v28 = vpack.c.bf16 %v1185_v26, %v1185_v26  ;;  %1476 = vst.msk [vmem:[%s2291_s28 + $0x78] sm:$0xf] %vm1445_vm1, %v1783_v23 }
 0x134   : > { %v1156_v29 = vld [vmem:[#allocation2 + $0xf8] sm:$0xff]  ;;  %1508 = vst.msk [vmem:[%s2291_s28 + $0xf8] sm:$0xf] %vm1445_vm1, %v1815_v24  ;;  %1474 = vst.msk [vmem:[%s2291_s28 + $0x70] sm:$0xf] %vm1445_vm1, %v1781_v27 }
 0x135   : > { %v1188_v30 = vld [vmem:[#allocation2 + $0x1f8] sm:$0xff]  ;;  %v1784_v31 = vpack.c.bf16 %v1156_v29, %v1156_v29  ;;  %1506 = vst.msk [vmem:[%s2291_s28 + $0xf0] sm:$0xf] %vm1445_vm1, %v1813_v28 }
 0x136   : > { %v1816_v32 = vpack.c.bf16 %v1188_v30, %v1188_v30  ;;  %v1154_v33 = vld [vmem:[#allocation2 + $0xe8] sm:$0xff] }
 0x137   : > { %v1186_v34 = vld [vmem:[#allocation2 + $0x1e8] sm:$0xff]  ;;  %v1782_v35 = vpack.c.bf16 %v1154_v33, %v1154_v33  ;;  %1477 = vst.msk [vmem:[%s2291_s28 + $0x7c] sm:$0xf] %vm1445_vm1, %v1784_v31 }
 0x138   : > { %v1814_v36 = vpack.c.bf16 %v1186_v34, %v1186_v34  ;;  %1509 = vst.msk [vmem:[%s2291_s28 + $0xfc] sm:$0xf] %vm1445_vm1, %v1816_v32 }
 0x139   : > { %1475 = vst.msk [vmem:[%s2291_s28 + $0x74] sm:$0xf] %vm1445_vm1, %v1782_v35 }
 0x13a   : > { %1507 = vst.msk [vmem:[%s2291_s28 + $0xf4] sm:$0xf] %vm1445_vm1, %v1814_v36 }
 0x13b PF: > { %s12_s11 = sadd.s32 1, %s2016_s11   ;;  %s2489_s9 = smov %s2012_s10 }
 0x13c   : > { %p9_p5 = scmp.ge.s32.totalorder %s12_s11, 6   ;;  %s2490_s10 = smov %s2492_s12 }
 0x13e   :  { %11 = sbr.rel (!%p9_p5) target bundleno = 2 (0x2), region = 69 }

// kernel: _lambda_.16
= control target key start
LH: loop header
LB: loop body
LE: loop exit
PB: predicated region body
PF: predicated region fallthrough
CT: control target
= control target key end

     0   :  { %7 = vsyncpa [#allocation5], 0  ;;  %s1918_s0 = inlined_call_operand.vmem [shape: bf16[1024,32], index: 0, kind: input, shape index: {}]   ;;  %s1919_s1 = inlined_call_operand.vmem [shape: bf16[32,512], index: 1, kind: input, shape index: {}]   ;;  %s1920_s2 = inlined_call_operand.hbm [shape: bf16[1024,512], index: 2, kind: output, shape index: {}]  }
   0x1   :  { %9 = vsyncpa [#allocation5 + $0x1], 0  ;;  %s1672_s9 = smov 0   ;;  %s1674_s10 = smov 0  }
   0x2   :  { %s1676_s11 = smov 0   ;;  %s1678_s12 = smov 0  }
   0x3   :  { %s1680_s13 = smov 0   ;;  %s1682_s14 = smov 0  }
   0x4   :  { %s1684_s15 = smov 0   ;;  %s1686_s16 = smov 0  }
   0x5   :  { %s1688_s17 = smov 0   ;;  %s1690_s18 = smov 0  }
   0x6 LB: > { %s1302_s19 = sadd.s32 4294967295, %s1650_s18   ;;  %s1303_s20 = sadd.s32 4294967294, %s1650_s18   ;;  %s1650_s18 = sphi %s1690_s18, %s15_s18   ;;  %s1646_s17 = sphi %s1688_s17, %s1932_s17   ;;  %s1642_s16 = sphi %s1686_s16, %s1931_s16   ;;  %s1638_s15 = sphi %s1684_s15, %s1930_s15   ;;  %s1634_s14 = sphi %s1682_s14, %s1929_s14   ;;  %s1630_s13 = sphi %s1680_s13, %s1928_s13   ;;  %s1626_s12 = sphi %s1678_s12, %s1927_s12   ;;  %s1622_s11 = sphi %s1676_s11, %s1926_s11   ;;  %s1618_s10 = sphi %s1674_s10, %s1925_s10   ;;  %s1614_s9 = sphi %s1672_s9, %s1924_s9  }
   0x7   : > { %s30_s21 = sadd.s32 1, %s1642_s16  ;;  %s34_s22 = sadd.s32 1, %s1646_s17 }
   0x8   : > { %p32_p0 = scmp.ge.s32.totalorder %s30_s21, 2  ;;  %s71_s23 = sadd.s32 1, %s1630_s13 }
   0x9   : > { %p78_p1 = scmp.ne.s32.totalorder %s1630_s13, %s1626_s12  ;;  %p79_p2 = scmp.eq.s32.totalorder %s1650_s18, 0 }
   0xa   : > { %s1934_s21 = smov (%p32_p0, %s30_s21), 0  ;;  %s1936_s22 = smov (!%p32_p0, %s34_s22), %s1646_s17 }
   0xb   : > { %s67_s24 = ssub.s32 %s1642_s16, %s1934_s21  ;;  %p1735_p3 = por %p79_p2, %p78_p1 }
   0xc   : > { %p36_p4 = scmp.ge.s32.totalorder %s1936_s22, 4  ;;  %p69_p5 = scmp.eq.s32.totalorder %s67_s24, 0 }
   0xd   : > { %s99_s26 = sadd.s32 1, %s1622_s11  ;;  %p109_p6 = scmp.ne.s32.totalorder %s1622_s11, %s1618_s10 }
   0xe   : > { %s1938_s22 = smov (%p36_p4, %s1936_s22), 0  ;;  %p110_p7 = scmp.eq.s32.totalorder %s1302_s19, 7 }
   0xf   : > { %s1745_s27 = scalar_select %p69_p5, %s1630_s13, %s71_s23  }
  0x10   : > { %s94_s28 = ssub.s32 %s1646_s17, %s1938_s22  ;;  %p115_p8 = scmp.ne.s32.totalorder %s1618_s10, %s1614_s9 }
  0x11   : > { %s96_s29 = sor.u32 %s94_s28, %s67_s24  ;;  %p1751_p10 = por %p110_p7, %p109_p6 }
  0x12   : > { %p97_p9 = scmp.eq.s32.totalorder %s96_s29, 0  ;;  %p116_p11 = scmp.eq.s32.totalorder %s1303_s20, 7 }
  0x13   : > { %p1305_p13 = scmp.ge.s32.totalorder %s1650_s18, 8 }
  0x14   : > { %s1756_s3 = scalar_select %p97_p9, %s1622_s11, %s99_s26  }
  0x15   : > { %p1758_p12 = por %p116_p11, %p115_p8  ;;  %132 = sbr.rel (%p1305_p13) target bundleno = 35 (0x23), region = 16 }
  0x1c   : > { %147 = sbr.rel (!%p1735_p3) target bundleno = 35 (0x23), region = 24  ;;  %s149_s5 = sand.u32 (%p1735_p3), 1, %s1630_s13  }
  0x1d   : > { %s1389_s6 = sshll.u32 (%p1735_p3), %s1642_s16, 3  ;;  %s1306_s7 = sshll.u32 (%p1735_p3), %s149_s5, 5 }
  0x1e   : > { %s157_s20 = scalar_lea.vmem (%p1735_p3), %s1919_s1, %s1389_s6  ;;  %s151_s23 = scalar_lea.vmem (%p1735_p3), [#allocation3], %s1306_s7 }
  0x1f   : > { %v191_v0 = vld [vmem:[%s157_s20] sm:$0xff] (%p1735_p3)  ;;  %v193_v1 = vld [vmem:[%s157_s20 + $0x10] sm:$0xff] (%p1735_p3) }
  0x20   : > { %v195_v2 = vld [vmem:[%s157_s20 + $0x20] sm:$0xff] (%p1735_p3)  ;;  %192 = vst [vmem:[%s151_s23] sm:$0xff] (%p1735_p3), %v191_v0  ;;  %194 = vst [vmem:[%s151_s23 + $0x8] sm:$0xff] (%p1735_p3), %v193_v1  ;;  %v197_v3 = vld [vmem:[%s157_s20 + $0x30] sm:$0xff] (%p1735_p3) }
  0x21   : > { %196 = vst [vmem:[%s151_s23 + $0x10] sm:$0xff] (%p1735_p3), %v195_v2  ;;  %198 = vst [vmem:[%s151_s23 + $0x18] sm:$0xff] (%p1735_p3), %v197_v3 }
  0x23 PF: > { %p1309_p0 = scmp.ge.s32.totalorder %s1650_s18, 1  ;;  %p203_p1 = scmp.lt.s32.totalorder %s1650_s18, 9 }
  0x25   : > { %p204_p2 = pnand %p1309_p0, %p203_p1 }
  0x26   : > { %s210_s24 = sand.u32 (!%p204_p2), 1, %s1626_s12   ;;  %s1312_s25 = sshll.u32 (!%p204_p2), %s1638_s15, 5  ;;  %v1652_v4 = vmov (!%p204_p2), 0   ;;  %vm521_vm0 = vcmask (!%p204_p2), 261120  }
  0x27   : > { %207 = sbr.rel (%p204_p2) target bundleno = 340 (0x154), region = 62  ;;  %s1310_s26 = sshll.u32 (!%p204_p2), %s210_s24, 5  ;;  %602 = vmatprep.mubr.bf16.mxu0 (!%p204_p2), %v1652_v4  ;;  %682 = vmatprep.mubr.bf16.mxu1 (!%p204_p2), %v1652_v4 }
  0x28   : > { %p240_p3 = scmp.lt.s32.totalorder (!%p204_p2), %s1312_s25, 127  ;;  %s212_s28 = scalar_lea.vmem (!%p204_p2), [#allocation3], %s1310_s26 }
  0x29   : > { %v1518_v5 = vld [vmem:[%s212_s28 + $0x4] ss:$8 sps:$4 sm:$0xff] (!%p204_p2)   ;;  %v1520_v6 = vld [vmem:[%s212_s28] ss:$8 sps:$4 sm:$0xff] (!%p204_p2)   ;;  %v1521_v7 = vld [vmem:[%s212_s28 + $0x14] ss:$8 sps:$4 sm:$0xff] (!%p204_p2)  }
  0x2a   : > { %570 = vmatprep.subr.bf16.mxu0 (!%p204_p2), %v1518_v5  ;;  %1423 = vmatprep.subr.bf16.mxu1 (!%p204_p2), %v1518_v5  ;;  %v1523_v8 = vld [vmem:[%s212_s28 + $0x10] ss:$8 sps:$4 sm:$0xff] (!%p204_p2)   ;;  %s236_s7 = sand.u32 (!%p204_p2), 1, %s1618_s10   ;;  %s1384_s20 = sshll.u32 (!%p204_p2), %s1634_s14, 1 }
  0x2b   : > { %571 = vmatpush1.bf16.msra.mxu0 (!%p204_p2), %v1520_v6  ;;  %1425 = vmatpush1.bf16.msra.mxu1 (!%p204_p2), %v1520_v6  ;;  %s1311_s8 = sshll.u32 (!%p204_p2), %s236_s7, 8  ;;  %s1422_s23 = sshll.u32 (!%p204_p2), %s1638_s15, 7 }
  0x2c   : > { %572 = vmatprep.subr.bf16.mxu0 (!%p204_p2), %v1521_v7  ;;  %1424 = vmatprep.subr.bf16.mxu1 (!%p204_p2), %v1521_v7  ;;  %s1814_s19 = scalar_lea.vmem (!%p204_p2), [#allocation4], %s1311_s8  ;;  %s1196_s24 = sadd.s32 (!%p204_p2), %s1422_s23, %s1384_s20 }
  0x2d   : > { %s1199_s14 = sshll.u32 (!%p204_p2), %s1814_s19, 4  ;;  %s1653_s6 = smov (!%p204_p2), [#allocation4]   ;;  %s1852_s14 = int_to_ptr.vmem [resolvable:$true] %s1199_s14 }
  0x2e   : > { %s1940_s25 = smov (!%p240_p3, %s1312_s25), 127  ;;  %s1540_s5 = scalar_lea.vmem %s1852_s14, 4096 }
  0x2f   : > { %s1313_s29 = sshll.u32 %s1940_s25, 2  ;;  %573 = vmatpush1.bf16.msra.mxu0 %v1523_v8  ;;  %1426 = vmatpush1.bf16.msra.mxu1 %v1523_v8  ;;  %s1386_s25 = sshll.u32 %s1196_s24, 6 }
  0x30   : > { %s1777_s12 = scalar_lea.vmem %s1918_s0, %s1313_s29  ;;  %s1850_s28 = scalar_lea.hbm %s1920_s2, %s1386_s25 }
  0x31   : > { %v1524_v9 = vld [vmem:[%s1777_s12] sm:$0xff]   ;;  %v1526_v11 = vld [vmem:[%s1777_s12 + $0x8] sm:$0xff]   ;;  %v1528_v13 = vld [vmem:[%s1777_s12 + $0x10] sm:$0xff]   ;;  %s1860_s29 = scalar_lea.sflag [#allocation5], %s236_s7  ;;  %p1541_p4 = scmp.ne.s32.totalorder %s1852_s14, %s1540_s5 }
  0x32   : > { %v1525_v10 = vld [vmem:[%s1777_s12 + $0x40] sm:$0xff]   ;;  %1334 = vmatmul.mubr.msk.bf16.vlgmr.msra.gmra.mrb[0].mxu0 %vm521_vm0, %v1524_v9  ;;  %v1527_v12 = vld [vmem:[%s1777_s12 + $0x48] sm:$0xff]   ;;  %v1529_v14 = vld [vmem:[%s1777_s12 + $0x50] sm:$0xff]  }
  0x33   : > { %1342 = vmatmul.mubr.msk.bf16.vlgmr.msra.gmra.mrb[0].mxu1 %vm521_vm0, %v1525_v10  ;;  %612 = vmatprep.mubr.bf16.mxu0 %v1652_v4  ;;  %v1530_v15 = vld [vmem:[%s1777_s12 + $0x18] sm:$0xff]   ;;  %v1532_v17 = vld [vmem:[%s1777_s12 + $0x20] sm:$0xff]   ;;  %v1534_v19 = vld [vmem:[%s1777_s12 + $0x28] sm:$0xff]   ;;  %p1542_p5 = pnand %p1541_p4, %p1751_p10 }
  0x34   : > { %692 = vmatprep.mubr.bf16.mxu1 %v1652_v4  ;;  %v1531_v16 = vld [vmem:[%s1777_s12 + $0x58] sm:$0xff]   ;;  %v1533_v18 = vld [vmem:[%s1777_s12 + $0x60] sm:$0xff]   ;;  %v1535_v20 = vld [vmem:[%s1777_s12 + $0x68] sm:$0xff]  }
  0x35   : > { %v1536_v21 = vld [vmem:[%s1777_s12 + $0x30] sm:$0xff]   ;;  %v1538_v23 = vld [vmem:[%s1777_s12 + $0x38] sm:$0xff]   ;;  %p1543_p6 = pneg %p1542_p5 }
  0x36   : > { %v1537_v22 = vld [vmem:[%s1777_s12 + $0x70] sm:$0xff]   ;;  %v1539_v24 = vld [vmem:[%s1777_s12 + $0x78] sm:$0xff]   ;;  %s1544_s12 = sshll.u32 %s1653_s6, 4  ;;  %s1545_s12 = int_to_ptr.vmem [resolvable:$false] %s1544_s12 }
  0x37   : > { %s1546_s8 = scalar_lea.vmem %s1545_s12, 8192  ;;  %p1547_p7 = scmp.lt.s32.totalorder %s1852_s14, %s1545_s12 }
  0x38   : > { %p1548_p8 = scmp.lt.s32.totalorder %s1546_s8, %s1540_s5 }
  0x3a   : > { %1335 = vmatmul.mubr.msk.bf16.gmra.mrb[4].mxu0 %vm521_vm0, %v1526_v11  ;;  %p1549_p9 = por %p1548_p8, %p1547_p7 }
  0x3b   : > { %1343 = vmatmul.mubr.msk.bf16.gmra.mrb[4].mxu1 %vm521_vm0, %v1527_v12  ;;  %622 = vmatprep.mubr.bf16.mxu0 %v1652_v4 }
  0x3c   : > { %702 = vmatprep.mubr.bf16.mxu1 %v1652_v4  ;;  %p1550_p11 = pnand %p1549_p9, %p1543_p6 }
  0x42   : > { %1336 = vmatmul.mubr.msk.bf16.gmra.mrb[8].mxu0 %vm521_vm0, %v1528_v13 }
  0x43   : > { %1344 = vmatmul.mubr.msk.bf16.gmra.mrb[8].mxu1 %vm521_vm0, %v1529_v14  ;;  %632 = vmatprep.mubr.bf16.mxu0 %v1652_v4 }
  0x44   : > { %712 = vmatprep.mubr.bf16.mxu1 %v1652_v4 }
  0x4a   : > { %1337 = vmatmul.mubr.msk.bf16.gmra.mrb[12].mxu0 %vm521_vm0, %v1530_v15 }
  0x4b   : > { %1345 = vmatmul.mubr.msk.bf16.gmra.mrb[12].mxu1 %vm521_vm0, %v1531_v16  ;;  %642 = vmatprep.mubr.bf16.mxu0 %v1652_v4 }
  0x4c   : > { %722 = vmatprep.mubr.bf16.mxu1 %v1652_v4 }
  0x52   : > { %1338 = vmatmul.mubr.msk.bf16.gmra.mrb[16].mxu0 %vm521_vm0, %v1532_v17 }
  0x53   : > { %1346 = vmatmul.mubr.msk.bf16.gmra.mrb[16].mxu1 %vm521_vm0, %v1533_v18  ;;  %652 = vmatprep.mubr.bf16.mxu0 %v1652_v4 }
  0x54   : > { %732 = vmatprep.mubr.bf16.mxu1 %v1652_v4 }
  0x5a   : > { %1339 = vmatmul.mubr.msk.bf16.gmra.mrb[20].mxu0 %vm521_vm0, %v1534_v19 }
  0x5b   : > { %1347 = vmatmul.mubr.msk.bf16.gmra.mrb[20].mxu1 %vm521_vm0, %v1535_v20  ;;  %662 = vmatprep.mubr.bf16.mxu0 %v1652_v4 }
  0x5c   : > { %742 = vmatprep.mubr.bf16.mxu1 %v1652_v4 }
  0x62   : > { %1340 = vmatmul.mubr.msk.bf16.gmra.mrb[24].mxu0 %vm521_vm0, %v1536_v21 }
  0x63   : > { %1348 = vmatmul.mubr.msk.bf16.gmra.mrb[24].mxu1 %vm521_vm0, %v1537_v22  ;;  %672 = vmatprep.mubr.bf16.mxu0 %v1652_v4 }
  0x64   : > { %752 = vmatprep.mubr.bf16.mxu1 %v1652_v4 }
  0x6a   : > { %1341 = vmatmul.mubr.msk.bf16.gmra.mrb[28].mxu0 %vm521_vm0, %v1538_v23 }
  0x6b   : > { %1349 = vmatmul.mubr.msk.bf16.gmra.mrb[28].mxu1 %vm521_vm0, %v1539_v24 }
 0x105   : > { %v604_v25 = vpop.f32.mrb[0].mxu0 }
 0x106   : > { %v684_v26 = vpop.f32.mrb[0].mxu1  ;;  %v606_v27 = vpop.f32.mrb[1].mxu0 }
 0x107   : > { %v686_v28 = vpop.f32.mrb[1].mxu1  ;;  %v1390_v29 = vpack.c.bf16 %v606_v27, %v604_v25  ;;  %v608_v31 = vpop.f32.mrb[2].mxu0 }
 0x108   : > { %v1406_v30 = vpack.c.bf16 %v686_v28, %v684_v26  ;;  %v688_v32 = vpop.f32.mrb[2].mxu1  ;;  %v610_v33 = vpop.f32.mrb[3].mxu0 }
 0x109   : > { %v690_v34 = vpop.f32.mrb[3].mxu1  ;;  %1150 = vst [vmem:[%s1814_s19] sm:$0xff] %v1390_v29  ;;  %v1391_v35 = vpack.c.bf16 %v610_v33, %v608_v31 }
 0x10a   : > { %1166 = vst [vmem:[%s1814_s19 + $0x80] sm:$0xff] %v1406_v30  ;;  %v1407_v36 = vpack.c.bf16 %v690_v34, %v688_v32 }
 0x10b   : > { %1151 = vst [vmem:[%s1814_s19 + $0x8] sm:$0xff] %v1391_v35 }
 0x10c   : > { %1167 = vst [vmem:[%s1814_s19 + $0x88] sm:$0xff] %v1407_v36 }
 0x10d   : > { %v614_v37 = vpop.f32.mrb[4].mxu0 }
 0x10e   : > { %v694_v38 = vpop.f32.mrb[4].mxu1  ;;  %v616_v39 = vpop.f32.mrb[5].mxu0 }
 0x10f   : > { %v696_v40 = vpop.f32.mrb[5].mxu1  ;;  %v1392_v41 = vpack.c.bf16 %v616_v39, %v614_v37  ;;  %v618_v43 = vpop.f32.mrb[6].mxu0 }
 0x110   : > { %v1408_v42 = vpack.c.bf16 %v696_v40, %v694_v38  ;;  %v698_v44 = vpop.f32.mrb[6].mxu1  ;;  %v620_v45 = vpop.f32.mrb[7].mxu0 }
 0x111   : > { %v700_v46 = vpop.f32.mrb[7].mxu1  ;;  %1152 = vst [vmem:[%s1814_s19 + $0x10] sm:$0xff] %v1392_v41  ;;  %v1393_v47 = vpack.c.bf16 %v620_v45, %v618_v43 }
 0x112   : > { %1168 = vst [vmem:[%s1814_s19 + $0x90] sm:$0xff] %v1408_v42  ;;  %v1409_v48 = vpack.c.bf16 %v700_v46, %v698_v44 }
 0x113   : > { %1153 = vst [vmem:[%s1814_s19 + $0x18] sm:$0xff] %v1393_v47 }
 0x114   : > { %1169 = vst [vmem:[%s1814_s19 + $0x98] sm:$0xff] %v1409_v48 }
 0x115   : > { %v624_v49 = vpop.f32.mrb[8].mxu0 }
 0x116   : > { %v704_v50 = vpop.f32.mrb[8].mxu1  ;;  %v626_v51 = vpop.f32.mrb[9].mxu0 }
 0x117   : > { %v706_v52 = vpop.f32.mrb[9].mxu1  ;;  %v1394_v53 = vpack.c.bf16 %v626_v51, %v624_v49  ;;  %v628_v55 = vpop.f32.mrb[10].mxu0 }
 0x118   : > { %v1410_v54 = vpack.c.bf16 %v706_v52, %v704_v50  ;;  %v708_v56 = vpop.f32.mrb[10].mxu1  ;;  %v630_v57 = vpop.f32.mrb[11].mxu0 }
 0x119   : > { %v710_v58 = vpop.f32.mrb[11].mxu1  ;;  %1154 = vst [vmem:[%s1814_s19 + $0x20] sm:$0xff] %v1394_v53  ;;  %v1395_v59 = vpack.c.bf16 %v630_v57, %v628_v55 }
 0x11a   : > { %1170 = vst [vmem:[%s1814_s19 + $0xa0] sm:$0xff] %v1410_v54  ;;  %v1411_v60 = vpack.c.bf16 %v710_v58, %v708_v56 }
 0x11b   : > { %1155 = vst [vmem:[%s1814_s19 + $0x28] sm:$0xff] %v1395_v59 }
 0x11c   : > { %1171 = vst [vmem:[%s1814_s19 + $0xa8] sm:$0xff] %v1411_v60 }
 0x11d   : > { %v634_v61 = vpop.f32.mrb[12].mxu0 }
 0x11e   : > { %v714_v62 = vpop.f32.mrb[12].mxu1  ;;  %v636_v63 = vpop.f32.mrb[13].mxu0 }
 0x11f   : > { %v716_v0 = vpop.f32.mrb[13].mxu1  ;;  %v1396_v1 = vpack.c.bf16 %v636_v63, %v634_v61  ;;  %v638_v3 = vpop.f32.mrb[14].mxu0 }
 0x120   : > { %v1412_v2 = vpack.c.bf16 %v716_v0, %v714_v62  ;;  %v718_v4 = vpop.f32.mrb[14].mxu1  ;;  %v640_v5 = vpop.f32.mrb[15].mxu0 }
 0x121   : > { %v720_v6 = vpop.f32.mrb[15].mxu1  ;;  %1156 = vst [vmem:[%s1814_s19 + $0x30] sm:$0xff] %v1396_v1  ;;  %v1397_v7 = vpack.c.bf16 %v640_v5, %v638_v3 }
 0x122   : > { %1172 = vst [vmem:[%s1814_s19 + $0xb0] sm:$0xff] %v1412_v2  ;;  %v1413_v8 = vpack.c.bf16 %v720_v6, %v718_v4 }
 0x123   : > { %1157 = vst [vmem:[%s1814_s19 + $0x38] sm:$0xff] %v1397_v7 }
 0x124   : > { %1173 = vst [vmem:[%s1814_s19 + $0xb8] sm:$0xff] %v1413_v8 }
 0x125   : > { %v644_v9 = vpop.f32.mrb[16].mxu0 }
 0x126   : > { %v724_v10 = vpop.f32.mrb[16].mxu1  ;;  %v646_v11 = vpop.f32.mrb[17].mxu0 }
 0x127   : > { %v726_v12 = vpop.f32.mrb[17].mxu1  ;;  %v1398_v13 = vpack.c.bf16 %v646_v11, %v644_v9  ;;  %v648_v15 = vpop.f32.mrb[18].mxu0 }
 0x128   : > { %v1414_v14 = vpack.c.bf16 %v726_v12, %v724_v10  ;;  %v728_v16 = vpop.f32.mrb[18].mxu1  ;;  %v650_v17 = vpop.f32.mrb[19].mxu0 }
 0x129   : > { %v730_v18 = vpop.f32.mrb[19].mxu1  ;;  %1158 = vst [vmem:[%s1814_s19 + $0x40] sm:$0xff] %v1398_v13  ;;  %v1399_v19 = vpack.c.bf16 %v650_v17, %v648_v15 }
 0x12a   : > { %1174 = vst [vmem:[%s1814_s19 + $0xc0] sm:$0xff] %v1414_v14  ;;  %v1415_v20 = vpack.c.bf16 %v730_v18, %v728_v16 }
 0x12b   : > { %1159 = vst [vmem:[%s1814_s19 + $0x48] sm:$0xff] %v1399_v19 }
 0x12c   : > { %1175 = vst [vmem:[%s1814_s19 + $0xc8] sm:$0xff] %v1415_v20 }
 0x12d   : > { %v654_v21 = vpop.f32.mrb[20].mxu0 }
 0x12e   : > { %v734_v22 = vpop.f32.mrb[20].mxu1  ;;  %v656_v23 = vpop.f32.mrb[21].mxu0 }
 0x12f   : > { %v736_v24 = vpop.f32.mrb[21].mxu1  ;;  %v1400_v25 = vpack.c.bf16 %v656_v23, %v654_v21  ;;  %v658_v27 = vpop.f32.mrb[22].mxu0 }
 0x130   : > { %v1416_v26 = vpack.c.bf16 %v736_v24, %v734_v22  ;;  %v738_v28 = vpop.f32.mrb[22].mxu1  ;;  %v660_v29 = vpop.f32.mrb[23].mxu0 }
 0x131   : > { %v740_v30 = vpop.f32.mrb[23].mxu1  ;;  %1160 = vst [vmem:[%s1814_s19 + $0x50] sm:$0xff] %v1400_v25  ;;  %v1401_v31 = vpack.c.bf16 %v660_v29, %v658_v27 }
 0x132   : > { %1176 = vst [vmem:[%s1814_s19 + $0xd0] sm:$0xff] %v1416_v26  ;;  %v1417_v32 = vpack.c.bf16 %v740_v30, %v738_v28 }
 0x133   : > { %1161 = vst [vmem:[%s1814_s19 + $0x58] sm:$0xff] %v1401_v31 }
 0x134   : > { %1177 = vst [vmem:[%s1814_s19 + $0xd8] sm:$0xff] %v1417_v32 }
 0x135   : > { %v664_v33 = vpop.f32.mrb[24].mxu0 }
 0x136   : > { %v744_v34 = vpop.f32.mrb[24].mxu1  ;;  %v666_v35 = vpop.f32.mrb[25].mxu0 }
 0x137   : > { %v746_v36 = vpop.f32.mrb[25].mxu1  ;;  %v1402_v37 = vpack.c.bf16 %v666_v35, %v664_v33  ;;  %v668_v39 = vpop.f32.mrb[26].mxu0 }
 0x138   : > { %v1418_v38 = vpack.c.bf16 %v746_v36, %v744_v34  ;;  %v748_v40 = vpop.f32.mrb[26].mxu1  ;;  %v670_v41 = vpop.f32.mrb[27].mxu0 }
 0x139   : > { %v750_v42 = vpop.f32.mrb[27].mxu1  ;;  %1162 = vst [vmem:[%s1814_s19 + $0x60] sm:$0xff] %v1402_v37  ;;  %v1403_v43 = vpack.c.bf16 %v670_v41, %v668_v39 }
 0x13a   : > { %1178 = vst [vmem:[%s1814_s19 + $0xe0] sm:$0xff] %v1418_v38  ;;  %v1419_v44 = vpack.c.bf16 %v750_v42, %v748_v40 }
 0x13b   : > { %1163 = vst [vmem:[%s1814_s19 + $0x68] sm:$0xff] %v1403_v43 }
 0x13c   : > { %1179 = vst [vmem:[%s1814_s19 + $0xe8] sm:$0xff] %v1419_v44 }
 0x13d   : > { %v674_v45 = vpop.f32.mrb[28].mxu0 }
 0x13e   : > { %v754_v46 = vpop.f32.mrb[28].mxu1  ;;  %v676_v47 = vpop.f32.mrb[29].mxu0 }
 0x13f   : > { %v756_v48 = vpop.f32.mrb[29].mxu1  ;;  %v1404_v49 = vpack.c.bf16 %v676_v47, %v674_v45  ;;  %v678_v51 = vpop.f32.mrb[30].mxu0 }
 0x140   : > { %v1420_v50 = vpack.c.bf16 %v756_v48, %v754_v46  ;;  %v758_v52 = vpop.f32.mrb[30].mxu1  ;;  %v680_v53 = vpop.f32.mrb[31].mxu0 }
 0x141   : > { %v760_v54 = vpop.f32.mrb[31].mxu1  ;;  %1164 = vst [vmem:[%s1814_s19 + $0x70] sm:$0xff] %v1404_v49  ;;  %v1405_v55 = vpack.c.bf16 %v680_v53, %v678_v51 }
 0x142   : > { %1180 = vst [vmem:[%s1814_s19 + $0xf0] sm:$0xff] %v1420_v50  ;;  %v1421_v56 = vpack.c.bf16 %v760_v54, %v758_v52 }
 0x143   : > { %1165 = vst [vmem:[%s1814_s19 + $0x78] sm:$0xff] %v1405_v55 }
 0x144   : > { %1181 = vst [vmem:[%s1814_s19 + $0xf8] sm:$0xff] %v1421_v56 }
 0x145   : > { %1553 = shalt.err (!%p1550_p11)
}
 0x146   : > { %s1554_s7 = scalar_lea.hbm %s1850_s28, 4096  ;;  %s1558_s23 = scalar_lea.hbm %s1920_s2, 32768 }
 0x147   : > { %p1555_p13 = scmp.ne.s32.totalorder %s1850_s28, %s1554_s7  ;;  %p1559_p2 = scmp.lt.u32.totalorder %s1850_s28, %s1920_s2 }
 0x148   : > { %p1560_p3 = scmp.lt.u32.totalorder %s1558_s23, %s1554_s7  ;;  %p1562_p5 = scmp.lt.u32.totalorder %s1554_s7, %s1850_s28 }
 0x149   : > { %p1556_p0 = pnand %p1555_p13, %p1751_p10 }
 0x14a   : > { %p1561_p4 = por %p1560_p3, %p1559_p2 }
 0x14b   : > { %p1557_p1 = pneg %p1556_p0 }
 0x14c   : > { %p1563_p6 = por %p1562_p5, %p1561_p4 }
 0x14e   : > { %p1564_p7 = pnand %p1563_p6, %p1557_p1 }
 0x150   : > { %1567 = shalt.err (!%p1564_p7)
}
 0x151   : > { %s1654_s15 = smov 128   ;;  %s1655_s26 = smov 256  }
 0x152   : > { %s1656_s5 = smov 8  }
 0x153   : > { %1427 = dma.vmem_to_hbm [thread:$0]  (%p1751_p10), %s1852_s14, 4096, %s1850_s28, %s1860_s29, %s1654_s15, %s1655_s26, %s1656_s5  }
 0x154 PF: > { %p1433_p8 = scmp.ge.s32.totalorder %s1650_s18, 2  ;;  %s1214_s6 = sand.u32 1, %s1614_s9  }
 0x155   : > { %s1215_s12 = scalar_lea.sflag [#allocation5], %s1214_s6 }
 0x156   : > { %p1430_p9 = pnand %p1433_p8, %p1758_p12 }
 0x158   : > { %1609 = dma.done.wait (!%p1430_p9), %s1215_s12, 4096  }
 0x159   : > { %1611 = vsyncadd (!%p1430_p9), %s1215_s12, 4294963200  ;;  %s15_s18 = sadd.s32 1, %s1650_s18   ;;  %s1924_s9 = smov %s1618_s10 }
 0x15a   : > { %p12_p11 = scmp.ge.s32.totalorder %s15_s18, 10   ;;  %s1925_s10 = smov %s1622_s11 }
 0x15b   : > { %s1926_s11 = smov %s1756_s3  ;;  %s1927_s12 = smov %s1630_s13 }
 0x15c   : > { %s1928_s13 = smov %s1745_s27  ;;  %s1929_s14 = smov %s1642_s16 }
 0x15d   : > { %s1930_s15 = smov %s1646_s17  ;;  %s1931_s16 = smov %s1934_s21 }
 0x15e   : > { %s1932_s17 = smov %s1938_s22  ;;  %14 = sbr.rel (!%p12_p11) target bundleno = 6 (0x6), region = 117 }
 0x165   :  { %1220 = vsyncpa [#allocation5], 1 }
 0x166   :  { %1222 = vsyncpa [#allocation5 + $0x1], 1 }

// kernel: _lambda_.17
= control target key start
LH: loop header
LB: loop body
LE: loop exit
PB: predicated region body
PF: predicated region fallthrough
CT: control target
= control target key end

     0   :  { %s1043_s9 = smov 0   ;;  %s1045_s10 = smov 0   ;;  %s1173_s0 = inlined_call_operand.vmem [shape: bf16[64,16], index: 0, kind: input, shape index: {}]   ;;  %s1174_s1 = inlined_call_operand.vmem [shape: bf16[16,4096], index: 1, kind: input, shape index: {}]   ;;  %s1175_s2 = inlined_call_operand.vmem [shape: bf16[64,4096], index: 2, kind: output, shape index: {}]  }
   0x1   :  { %s1047_s11 = smov 0   ;;  %s1049_s12 = smov 0  }
   0x2   :  { %s1051_s13 = smov 0  }
   0x3 LB: > { %s27_s14 = sadd.s32 1, %s1021_s12  ;;  %s870_s15 = sadd.s32 4294967295, %s1025_s13   ;;  %s1025_s13 = sphi %s1051_s13, %s12_s13   ;;  %s1021_s12 = sphi %s1049_s12, %s1180_s12   ;;  %s1017_s11 = sphi %s1047_s11, %s1179_s11   ;;  %s1013_s10 = sphi %s1045_s10, %s1178_s10   ;;  %s1009_s9 = sphi %s1043_s9, %s1177_s9  }
   0x4   : > { %p29_p0 = scmp.ge.s32.totalorder %s27_s14, 8  ;;  %p75_p1 = scmp.ne.s32.totalorder %s1013_s10, %s1009_s9 }
   0x5   : > { %p76_p2 = scmp.eq.s32.totalorder %s1025_s13, 0  ;;  %p107_p4 = scmp.eq.s32.totalorder %s870_s15, 7 }
   0x6   : > { %s1182_s14 = smov (%p29_p0, %s27_s14), 0  ;;  %s68_s17 = sadd.s32 1, %s1013_s10 }
   0x7   : > { %p77_p3 = por %p76_p2, %p75_p1  ;;  %s64_s16 = ssub.s32 %s1021_s12, %s1182_s14 }
   0x8   : > { %p66_p5 = scmp.eq.s32.totalorder %s64_s16, 0  ;;  %p1078_p6 = por %p107_p4, %p75_p1 }
   0x9   : > { %p874_p7 = scmp.ge.s32.totalorder %s1025_s13, 8 }
   0xa   : > { %s1083_s19 = scalar_select %p66_p5, %s1013_s10, %s68_s17  }
   0xb   : > { %141 = sbr.rel (%p874_p7) target bundleno = 25 (0x19), region = 20 }
  0x12   : > { %144 = sbr.rel (!%p77_p3) target bundleno = 25 (0x19), region = 24  ;;  %s146_s20 = sand.u32 (%p77_p3), 1, %s1013_s10  }
  0x13   : > { %s918_s21 = sshll.u32 (%p77_p3), %s1021_s12, 4  ;;  %s875_s22 = sshll.u32 (%p77_p3), %s146_s20, 5 }
  0x14   : > { %s154_s25 = scalar_lea.vmem (%p77_p3), %s1174_s1, %s918_s21  ;;  %s148_s26 = scalar_lea.vmem (%p77_p3), [#allocation3], %s875_s22 }
  0x15   : > { %v167_v0 = vld [vmem:[%s154_s25] sm:$0xff] (%p77_p3)  ;;  %v169_v1 = vld [vmem:[%s154_s25 + $0x8] sm:$0xff] (%p77_p3) }
  0x16   : > { %v171_v2 = vld [vmem:[%s154_s25 + $0x80] sm:$0xff] (%p77_p3)  ;;  %168 = vst [vmem:[%s148_s26] sm:$0xff] (%p77_p3), %v167_v0  ;;  %170 = vst [vmem:[%s148_s26 + $0x8] sm:$0xff] (%p77_p3), %v169_v1  ;;  %v173_v3 = vld [vmem:[%s154_s25 + $0x88] sm:$0xff] (%p77_p3) }
  0x17   : > { %172 = vst [vmem:[%s148_s26 + $0x10] sm:$0xff] (%p77_p3), %v171_v2  ;;  %174 = vst [vmem:[%s148_s26 + $0x18] sm:$0xff] (%p77_p3), %v173_v3 }
  0x19 PF: > { %p878_p8 = scmp.ge.s32.totalorder %s1025_s13, 1  ;;  %p179_p9 = scmp.lt.s32.totalorder %s1025_s13, 9 }
  0x1b   : > { %p180_p10 = pnand %p878_p8, %p179_p9 }
  0x1c   : > { %s186_s27 = sand.u32 (!%p180_p10), 1, %s1009_s9   ;;  %v1027_v4 = vmov (!%p180_p10), 0   ;;  %v983_v7 = vld [vmem:[%s1173_s0] sm:$0xff] (!%p180_p10)   ;;  %vm348_vm0 = vcmask (!%p180_p10), 130048   ;;  %v984_v10 = vld [vmem:[%s1173_s0 + $0x8] sm:$0xff] (!%p180_p10)   ;;  %v985_v11 = vld [vmem:[%s1173_s0 + $0x10] sm:$0xff] (!%p180_p10)  }
  0x1d   : > { %183 = sbr.rel (%p180_p10) target bundleno = 286 (0x11e), region = 47  ;;  %s879_s28 = sshll.u32 (!%p180_p10), %s186_s27, 5  ;;  %393 = vmatprep.mubr.bf16.mxu0 (!%p180_p10), %v1027_v4  ;;  %466 = vmatprep.mubr.bf16.mxu1 (!%p180_p10), %v1027_v4  ;;  %v986_v12 = vld [vmem:[%s1173_s0 + $0x18] sm:$0xff] (!%p180_p10)  }
  0x1e   : > { %s188_s29 = scalar_lea.vmem (!%p180_p10), [#allocation3], %s879_s28  ;;  %s880_s16 = sshll.u32 (!%p180_p10), %s186_s27, 7 }
  0x1f   : > { %v977_v5 = vld [vmem:[%s188_s29 + $0x4] ss:$16 sps:$4 sm:$0xff] (!%p180_p10)   ;;  %v979_v6 = vld [vmem:[%s188_s29 + $0xc] ss:$16 sps:$4 sm:$0xff] (!%p180_p10)   ;;  %v981_v8 = vld [vmem:[%s188_s29] ss:$16 sps:$4 sm:$0xff] (!%p180_p10)  }
  0x20   : > { %361 = vmatprep.subr.bf16.mxu0 (!%p180_p10), %v977_v5  ;;  %v982_v9 = vld [vmem:[%s188_s29 + $0x8] ss:$16 sps:$4 sm:$0xff] (!%p180_p10)   ;;  %434 = vmatprep.subr.bf16.mxu1 (!%p180_p10), %v979_v6  ;;  %s1118_s17 = scalar_lea.vmem (!%p180_p10), [#allocation4], %s880_s16 }
  0x21   : > { %362 = vmatpush1.bf16.msra.mxu0 (!%p180_p10), %v981_v8  ;;  %435 = vmatpush1.bf16.msra.mxu1 (!%p180_p10), %v982_v9 }
  0x24   : > { %889 = vmatmul.mubr.msk.bf16.vlgmr.msra.gmra.mrb[0].mxu0 %vm348_vm0, %v983_v7  ;;  %893 = vmatmul.mubr.msk.bf16.vlgmr.msra.gmra.mrb[0].mxu1 %vm348_vm0, %v983_v7  ;;  %s935_s9 = sshll.u32 (%p1078_p6), %s1017_s11, 4 }
  0x25   : > { %403 = vmatprep.mubr.bf16.mxu0 %v1027_v4  ;;  %476 = vmatprep.mubr.bf16.mxu1 %v1027_v4  ;;  %s730_s22 = scalar_lea.vmem (%p1078_p6), %s1175_s2, %s935_s9 }
  0x2c   : > { %890 = vmatmul.mubr.msk.bf16.gmra.mrb[4].mxu0 %vm348_vm0, %v984_v10  ;;  %894 = vmatmul.mubr.msk.bf16.gmra.mrb[4].mxu1 %vm348_vm0, %v984_v10 }
  0x2d   : > { %413 = vmatprep.mubr.bf16.mxu0 %v1027_v4  ;;  %486 = vmatprep.mubr.bf16.mxu1 %v1027_v4 }
  0x34   : > { %891 = vmatmul.mubr.msk.bf16.gmra.mrb[8].mxu0 %vm348_vm0, %v985_v11  ;;  %895 = vmatmul.mubr.msk.bf16.gmra.mrb[8].mxu1 %vm348_vm0, %v985_v11 }
  0x35   : > { %423 = vmatprep.mubr.bf16.mxu0 %v1027_v4  ;;  %496 = vmatprep.mubr.bf16.mxu1 %v1027_v4 }
  0x3c   : > { %892 = vmatmul.mubr.msk.bf16.gmra.mrb[12].mxu0 %vm348_vm0, %v986_v12  ;;  %896 = vmatmul.mubr.msk.bf16.gmra.mrb[12].mxu1 %vm348_vm0, %v986_v12 }
  0xf7   : > { %v395_v13 = vpop.f32.mrb[0].mxu0  ;;  %v468_v14 = vpop.f32.mrb[0].mxu1 }
  0xf8   : > { %v397_v15 = vpop.f32.mrb[1].mxu0  ;;  %v470_v16 = vpop.f32.mrb[1].mxu1 }
  0xf9   : > { %v919_v17 = vpack.c.bf16 %v397_v15, %v395_v13  ;;  %v920_v18 = vpack.c.bf16 %v470_v16, %v468_v14  ;;  %v399_v19 = vpop.f32.mrb[2].mxu0  ;;  %v472_v20 = vpop.f32.mrb[2].mxu1 }
  0xfa   : > { %v401_v21 = vpop.f32.mrb[3].mxu0  ;;  %v474_v22 = vpop.f32.mrb[3].mxu1 }
  0xfb   : > { %702 = vst [vmem:[%s1118_s17] sm:$0xff] %v919_v17  ;;  %703 = vst [vmem:[%s1118_s17 + $0x8] sm:$0xff] %v920_v18  ;;  %v921_v23 = vpack.c.bf16 %v401_v21, %v399_v19  ;;  %v922_v24 = vpack.c.bf16 %v474_v22, %v472_v20 }
  0xfd   : > { %704 = vst [vmem:[%s1118_s17 + $0x10] sm:$0xff] %v921_v23  ;;  %705 = vst [vmem:[%s1118_s17 + $0x18] sm:$0xff] %v922_v24 }
  0xff   : > { %v405_v25 = vpop.f32.mrb[4].mxu0  ;;  %v478_v26 = vpop.f32.mrb[4].mxu1 }
 0x100   : > { %v407_v27 = vpop.f32.mrb[5].mxu0  ;;  %v480_v28 = vpop.f32.mrb[5].mxu1 }
 0x101   : > { %v923_v29 = vpack.c.bf16 %v407_v27, %v405_v25  ;;  %v924_v30 = vpack.c.bf16 %v480_v28, %v478_v26  ;;  %v409_v31 = vpop.f32.mrb[6].mxu0  ;;  %v482_v32 = vpop.f32.mrb[6].mxu1 }
 0x102   : > { %v411_v33 = vpop.f32.mrb[7].mxu0  ;;  %v484_v34 = vpop.f32.mrb[7].mxu1  ;;  %v743_v61 = vld [vmem:[%s1118_s17] sm:$0xff] (%p1078_p6)  ;;  %v745_v62 = vld [vmem:[%s1118_s17 + $0x8] sm:$0xff] (%p1078_p6) }
 0x103   : > { %706 = vst [vmem:[%s1118_s17 + $0x20] sm:$0xff] %v923_v29  ;;  %707 = vst [vmem:[%s1118_s17 + $0x28] sm:$0xff] %v924_v30  ;;  %v925_v35 = vpack.c.bf16 %v411_v33, %v409_v31  ;;  %v926_v36 = vpack.c.bf16 %v484_v34, %v482_v32 }
 0x104   : > { %v747_v63 = vld [vmem:[%s1118_s17 + $0x10] sm:$0xff] (%p1078_p6)  ;;  %v749_v0 = vld [vmem:[%s1118_s17 + $0x18] sm:$0xff] (%p1078_p6)  ;;  %744 = vst [vmem:[%s730_s22] sm:$0xff] (%p1078_p6), %v743_v61  ;;  %746 = vst [vmem:[%s730_s22 + $0x8] sm:$0xff] (%p1078_p6), %v745_v62 }
 0x105   : > { %708 = vst [vmem:[%s1118_s17 + $0x30] sm:$0xff] %v925_v35  ;;  %709 = vst [vmem:[%s1118_s17 + $0x38] sm:$0xff] %v926_v36 }
 0x106   : > { %748 = vst [vmem:[%s730_s22 + $0x80] sm:$0xff] (%p1078_p6), %v747_v63  ;;  %750 = vst [vmem:[%s730_s22 + $0x88] sm:$0xff] (%p1078_p6), %v749_v0 }
 0x107   : > { %v415_v37 = vpop.f32.mrb[8].mxu0  ;;  %v488_v38 = vpop.f32.mrb[8].mxu1 }
 0x108   : > { %v417_v39 = vpop.f32.mrb[9].mxu0  ;;  %v490_v40 = vpop.f32.mrb[9].mxu1 }
 0x109   : > { %v927_v41 = vpack.c.bf16 %v417_v39, %v415_v37  ;;  %v928_v42 = vpack.c.bf16 %v490_v40, %v488_v38  ;;  %v419_v43 = vpop.f32.mrb[10].mxu0  ;;  %v492_v44 = vpop.f32.mrb[10].mxu1 }
 0x10a   : > { %v421_v45 = vpop.f32.mrb[11].mxu0  ;;  %v494_v46 = vpop.f32.mrb[11].mxu1  ;;  %v751_v1 = vld [vmem:[%s1118_s17 + $0x20] sm:$0xff] (%p1078_p6)  ;;  %v753_v2 = vld [vmem:[%s1118_s17 + $0x28] sm:$0xff] (%p1078_p6) }
 0x10b   : > { %710 = vst [vmem:[%s1118_s17 + $0x40] sm:$0xff] %v927_v41  ;;  %711 = vst [vmem:[%s1118_s17 + $0x48] sm:$0xff] %v928_v42  ;;  %v929_v47 = vpack.c.bf16 %v421_v45, %v419_v43  ;;  %v930_v48 = vpack.c.bf16 %v494_v46, %v492_v44 }
 0x10c   : > { %752 = vst [vmem:[%s730_s22 + $0x100] sm:$0xff] (%p1078_p6), %v751_v1  ;;  %754 = vst [vmem:[%s730_s22 + $0x108] sm:$0xff] (%p1078_p6), %v753_v2  ;;  %v755_v3 = vld [vmem:[%s1118_s17 + $0x30] sm:$0xff] (%p1078_p6)  ;;  %v757_v4 = vld [vmem:[%s1118_s17 + $0x38] sm:$0xff] (%p1078_p6) }
 0x10d   : > { %712 = vst [vmem:[%s1118_s17 + $0x50] sm:$0xff] %v929_v47  ;;  %713 = vst [vmem:[%s1118_s17 + $0x58] sm:$0xff] %v930_v48 }
 0x10e   : > { %756 = vst [vmem:[%s730_s22 + $0x180] sm:$0xff] (%p1078_p6), %v755_v3  ;;  %758 = vst [vmem:[%s730_s22 + $0x188] sm:$0xff] (%p1078_p6), %v757_v4 }
 0x10f   : > { %v425_v49 = vpop.f32.mrb[12].mxu0  ;;  %v498_v50 = vpop.f32.mrb[12].mxu1  ;;  %724 = sbr.rel (!%p1078_p6) target bundleno = 286 (0x11e), region = 63 }
 0x110   : > { %v427_v51 = vpop.f32.mrb[13].mxu0  ;;  %v500_v52 = vpop.f32.mrb[13].mxu1 }
 0x111   : > { %v931_v53 = vpack.c.bf16 %v427_v51, %v425_v49  ;;  %v932_v54 = vpack.c.bf16 %v500_v52, %v498_v50  ;;  %v429_v55 = vpop.f32.mrb[14].mxu0  ;;  %v502_v56 = vpop.f32.mrb[14].mxu1 }
 0x112   : > { %v431_v57 = vpop.f32.mrb[15].mxu0  ;;  %v504_v58 = vpop.f32.mrb[15].mxu1  ;;  %v759_v5 = vld [vmem:[%s1118_s17 + $0x40] sm:$0xff] (%p1078_p6)  ;;  %v761_v6 = vld [vmem:[%s1118_s17 + $0x48] sm:$0xff] (%p1078_p6) }
 0x113   : > { %714 = vst [vmem:[%s1118_s17 + $0x60] sm:$0xff] %v931_v53  ;;  %715 = vst [vmem:[%s1118_s17 + $0x68] sm:$0xff] %v932_v54  ;;  %v933_v59 = vpack.c.bf16 %v431_v57, %v429_v55  ;;  %v934_v60 = vpack.c.bf16 %v504_v58, %v502_v56 }
 0x114   : > { %760 = vst [vmem:[%s730_s22 + $0x200] sm:$0xff] (%p1078_p6), %v759_v5  ;;  %v763_v7 = vld [vmem:[%s1118_s17 + $0x50] sm:$0xff] (%p1078_p6)  ;;  %v765_v8 = vld [vmem:[%s1118_s17 + $0x58] sm:$0xff] (%p1078_p6)  ;;  %762 = vst [vmem:[%s730_s22 + $0x208] sm:$0xff] (%p1078_p6), %v761_v6 }
 0x115   : > { %716 = vst [vmem:[%s1118_s17 + $0x70] sm:$0xff] %v933_v59  ;;  %717 = vst [vmem:[%s1118_s17 + $0x78] sm:$0xff] %v934_v60 }
 0x116   : > { %764 = vst [vmem:[%s730_s22 + $0x280] sm:$0xff] %v763_v7  ;;  %766 = vst [vmem:[%s730_s22 + $0x288] sm:$0xff] %v765_v8 }
 0x11a   : > { %v767_v9 = vld [vmem:[%s1118_s17 + $0x60] sm:$0xff]  ;;  %v769_v10 = vld [vmem:[%s1118_s17 + $0x68] sm:$0xff] }
 0x11b   : > { %768 = vst [vmem:[%s730_s22 + $0x300] sm:$0xff] %v767_v9  ;;  %770 = vst [vmem:[%s730_s22 + $0x308] sm:$0xff] %v769_v10 }
 0x11c   : > { %v771_v11 = vld [vmem:[%s1118_s17 + $0x70] sm:$0xff]  ;;  %v773_v12 = vld [vmem:[%s1118_s17 + $0x78] sm:$0xff] }
 0x11d   : > { %772 = vst [vmem:[%s730_s22 + $0x380] sm:$0xff] %v771_v11  ;;  %774 = vst [vmem:[%s730_s22 + $0x388] sm:$0xff] %v773_v12 }
 0x11e PF: > { %s12_s13 = sadd.s32 1, %s1025_s13   ;;  %s1177_s9 = smov %s1013_s10 }
 0x11f   : > { %p9_p11 = scmp.ge.s32.totalorder %s12_s13, 10   ;;  %s1178_s10 = smov %s1083_s19 }
 0x120   : > { %s1179_s11 = smov %s1021_s12  ;;  %s1180_s12 = smov %s1182_s14 }
 0x121   :  { %11 = sbr.rel (!%p9_p11) target bundleno = 3 (0x3), region = 120 }

</bundles_post_ra>
